<compile_context>
chip_gen: v7x
topology: tpu7x:2x2x1
jax: 0.10.0
libtpu: 0.0.40
codegen_flags: <defaults>
</compile_context>

<pallas_src>
import math
from functools import partial

import jax
import jax.numpy as jnp
from jax.experimental import pallas as pl
from jax.experimental.pallas import tpu as pltpu

HIDDEN_DIM = 512            # hard-coded in the PyTorch module
NUM_HEADS = 8               # TransMIL's TransLayer uses heads=8, dim_head=dim//8
HEAD_DIM = HIDDEN_DIM // NUM_HEADS           # 64
HEADS_PER_BLOCK = 2                          # 2 * 64 = 128 lanes per attention block
LANE = 128
assert HEADS_PER_BLOCK * HEAD_DIM == LANE

_VMEM = pl.BlockSpec(memory_space=pltpu.MemorySpace.VMEM)


def _vmem_limit():
    # generation-aware scoped-VMEM limit: ~48 MiB on 128 MiB parts (v5e/v6e),
    # ~38 MiB on v7x (64 MiB physical per TC).
    cap = 128 * 1024 * 1024
    try:
        info = pltpu.get_tpu_info()
        cap = int(getattr(info, "vmem_capacity_bytes", cap))
    except Exception:
        pass
    return min(48 * 1024 * 1024, (cap * 3) // 5)


_VMEM_LIMIT = _vmem_limit()


def _cparams(*sems):
    if sems:
        return pltpu.CompilerParams(dimension_semantics=sems,
                                    vmem_limit_bytes=_VMEM_LIMIT)
    return pltpu.CompilerParams(vmem_limit_bytes=_VMEM_LIMIT)


def _row_tile(m, desired=512):
    # full array if small (allowed), otherwise a large tile; Pallas handles the
    # partial last block.
    return m if m <= desired else desired


# ----------------------------- Pallas kernels ------------------------------

def _linear_kernel(x_ref, w_ref, b_ref, o_ref, *, activation):
    x = x_ref[...].astype(jnp.bfloat16)
    y = jnp.dot(x, w_ref[...], preferred_element_type=jnp.float32) + b_ref[...]
    if activation == "relu":
        y = jnp.maximum(y, 0.0)
    elif activation == "leaky_relu":
        y = jnp.where(y > 0, y, 0.01 * y)
    o_ref[...] = y.astype(o_ref.dtype)


def linear(x, w, b, activation=None, out_dtype=jnp.float32, tm=512):
    """y = act(x @ w + b); w is pre-cast bf16, b pre-shaped (1, n) f32."""
    m, k = x.shape
    n = w.shape[1]
    tm = _row_tile(m, tm)
    return pl.pallas_call(
        partial(_linear_kernel, activation=activation),
        out_shape=jax.ShapeDtypeStruct((m, n), out_dtype),
        grid=(pl.cdiv(m, tm),),
        in_specs=[
            pl.BlockSpec((tm, k), lambda i: (i, 0)),
            pl.BlockSpec((k, n), lambda i: (0, 0)),
            pl.BlockSpec((1, n), lambda i: (0, 0)),
        ],
        out_specs=pl.BlockSpec((tm, n), lambda i: (i, 0)),
        compiler_params=_cparams("parallel"),
    )(x, w, b)


def _ln_matmul_kernel(x_ref, g_ref, b_ref, w_ref, wb_ref, o_ref):
    x = x_ref[...].astype(jnp.float32)
    mu = jnp.mean(x, axis=-1, keepdims=True)
    var = jnp.mean(jnp.square(x - mu), axis=-1, keepdims=True)
    xn = (x - mu) * jax.lax.rsqrt(var + 1e-5) * g_ref[...] + b_ref[...]
    y = jnp.dot(xn.astype(jnp.bfloat16), w_ref[...],
                preferred_element_type=jnp.float32)
    o_ref[...] = (y + wb_ref[...]).astype(o_ref.dtype)


def layernorm_matmul(x, gamma, beta, w, b, out_dtype=jnp.bfloat16, tm=512):
    """Fused LayerNorm(x) @ w + b, tiled over rows (w pre-cast bf16)."""
    m, d = x.shape
    n = w.shape[1]
    tm = _row_tile(m, tm)
    return pl.pallas_call(
        _ln_matmul_kernel,
        out_shape=jax.ShapeDtypeStruct((m, n), out_dtype),
        grid=(pl.cdiv(m, tm),),
        in_specs=[
            pl.BlockSpec((tm, d), lambda i: (i, 0)),
            pl.BlockSpec((1, d), lambda i: (0, 0)),
            pl.BlockSpec((1, d), lambda i: (0, 0)),
            pl.BlockSpec((d, n), lambda i: (0, 0)),
            pl.BlockSpec((1, n), lambda i: (0, 0)),
        ],
        out_specs=pl.BlockSpec((tm, n), lambda i: (i, 0)),
        compiler_params=_cparams("parallel"),
    )(x, gamma, beta, w, b)


def _proj_residual_kernel(a_ref, r_ref, w_ref, b_ref, o_ref):
    y = jnp.dot(a_ref[...].astype(jnp.bfloat16), w_ref[...],
                preferred_element_type=jnp.float32)
    o_ref[...] = (y + b_ref[...] + r_ref[...]).astype(o_ref.dtype)


def proj_residual(attn, resid, w, b, tm=512):
    """out-projection + residual add, fused and row-tiled."""
    m, d = attn.shape
    n = w.shape[1]
    tm = _row_tile(m, tm)
    return pl.pallas_call(
        _proj_residual_kernel,
        out_shape=jax.ShapeDtypeStruct((m, n), jnp.float32),
        grid=(pl.cdiv(m, tm),),
        in_specs=[
            pl.BlockSpec((tm, d), lambda i: (i, 0)),
            pl.BlockSpec((tm, n), lambda i: (i, 0)),
            pl.BlockSpec((d, n), lambda i: (0, 0)),
            pl.BlockSpec((1, n), lambda i: (0, 0)),
        ],
        out_specs=pl.BlockSpec((tm, n), lambda i: (i, 0)),
        compiler_params=_cparams("parallel"),
    )(attn, resid, w, b)


# ---- attention ----
# qkv layout (after prepare_params):
#   lanes [0, 512)                : q, heads 0..7 (scaled by 1/sqrt(head_dim))
#   lanes [512 + hp*256, +256)    : [k pair hp (128) | v pair hp (128)]
# so each head-pair needs one 128-lane q block and one 256-lane kv block.

def _attn_single_kernel(q_ref, kv_ref, o_ref):
    # Fast path: whole sequence fits in one kv block -> plain softmax.
    qb = q_ref[0]                       # (tq, 128) bf16
    kvb = kv_ref[0]                     # (S, 256) bf16
    kb = kvb[:, :LANE]
    vb = kvb[:, LANE:]
    halves = []
    for hh in range(HEADS_PER_BLOCK):
        lo, hi = hh * HEAD_DIM, (hh + 1) * HEAD_DIM
        s = jax.lax.dot_general(qb[:, lo:hi], kb[:, lo:hi],
                                (((1,), (1,)), ((), ())),
                                preferred_element_type=jnp.float32)
        m = jnp.max(s, axis=-1, keepdims=True)
        p = jnp.exp(s - m)
        l = jnp.sum(p, axis=-1, keepdims=True)
        o = jnp.dot(p.astype(jnp.bfloat16), vb[:, lo:hi],
                    preferred_element_type=jnp.float32)
        halves.append(o * pl.reciprocal(l, approx=True))
    o_ref[0] = jnp.concatenate(halves, axis=-1).astype(o_ref.dtype)


def _flash_attn_kernel(q_ref, kv_ref, o_ref, m_scr, l_scr, acc_scr, *,
                       seq_len, tk, need_mask):
    ki = pl.program_id(3)

    @pl.when(ki == 0)
    def _():
        m_scr[...] = jnp.full_like(m_scr, -1e30)
        l_scr[...] = jnp.zeros_like(l_scr)
        acc_scr[...] = jnp.zeros_like(acc_scr)

    qb = q_ref[0]                       # (tq, 128) bf16
    kvb = kv_ref[0]                     # (tk, 256) bf16
    kb = kvb[:, :LANE]
    vb = kvb[:, LANE:]

    if need_mask:  # built once per kv step, shared by both heads of the block
        kv_pos = ki * tk + jax.lax.broadcasted_iota(jnp.int32, (1, tk), 1)
        valid = kv_pos < seq_len

    for hh in range(HEADS_PER_BLOCK):
        lo, hi = hh * HEAD_DIM, (hh + 1) * HEAD_DIM
        s = jax.lax.dot_general(qb[:, lo:hi], kb[:, lo:hi],
                                (((1,), (1,)), ((), ())),
                                preferred_element_type=jnp.float32)
        if need_mask:
            s = jnp.where(valid, s, -1e30)
        m_prev = m_scr[hh]
        m_new = jnp.maximum(m_prev, jnp.max(s, axis=-1, keepdims=True))
        alpha = jnp.exp(m_prev - m_new)
        p = jnp.exp(s - m_new)
        l_scr[hh] = alpha * l_scr[hh] + jnp.sum(p, axis=-1, keepdims=True)
        acc_scr[hh] = alpha * acc_scr[hh] + jnp.dot(
            p.astype(jnp.bfloat16), vb[:, lo:hi],
            preferred_element_type=jnp.float32)
        m_scr[hh] = m_new

    @pl.when(ki == pl.num_programs(3) - 1)
    def _():
        halves = [acc_scr[hh] * pl.reciprocal(l_scr[hh], approx=True)
                  for hh in range(HEADS_PER_BLOCK)]
        o_ref[0] = jnp.concatenate(halves, axis=-1).astype(o_ref.dtype)


def flash_mhsa(qkv):
    """qkv: (B, S, 3*D) bf16 with prepared layout (see above).

    Output: (B, S, D) bf16 in concat-head order (h0..h7), no HBM transposes.
    """
    B, S, threeD = qkv.shape
    D = threeD // 3
    hp_count = NUM_HEADS // HEADS_PER_BLOCK      # 4 head-pairs
    kv_base = D // (2 * LANE)                    # q spans this many 256-lane blocks
    tq = min(S, 256)
    tk = min(S, 512)
    nq = pl.cdiv(S, tq)
    nk = pl.cdiv(S, tk)

    out_shape = jax.ShapeDtypeStruct((B, S, D), jnp.bfloat16)

    if nk == 1:
        # whole sequence fits one kv block: skip online-softmax machinery.
        return pl.pallas_call(
            _attn_single_kernel,
            out_shape=out_shape,
            grid=(B, hp_count, nq),
            in_specs=[
                pl.BlockSpec((1, tq, LANE), lambda b, hp, qi: (b, qi, hp)),
                pl.BlockSpec((1, tk, 2 * LANE),
                             lambda b, hp, qi: (b, 0, kv_base + hp)),
            ],
            out_specs=pl.BlockSpec((1, tq, LANE), lambda b, hp, qi: (b, qi, hp)),
            compiler_params=_cparams("parallel", "parallel", "parallel"),
        )(qkv, qkv)

    need_mask = (S % tk) != 0
    return pl.pallas_call(
        partial(_flash_attn_kernel, seq_len=S, tk=tk, need_mask=need_mask),
        out_shape=out_shape,
        grid=(B, hp_count, nq, nk),
        in_specs=[
            pl.BlockSpec((1, tq, LANE), lambda b, hp, qi, ki: (b, qi, hp)),
            pl.BlockSpec((1, tk, 2 * LANE),
                         lambda b, hp, qi, ki: (b, ki, kv_base + hp)),
        ],
        out_specs=pl.BlockSpec((1, tq, LANE), lambda b, hp, qi, ki: (b, qi, hp)),
        scratch_shapes=[
            pltpu.VMEM((HEADS_PER_BLOCK, tq, 1), jnp.float32),         # m
            pltpu.VMEM((HEADS_PER_BLOCK, tq, 1), jnp.float32),         # l
            pltpu.VMEM((HEADS_PER_BLOCK, tq, HEAD_DIM), jnp.float32),  # acc
        ],
        compiler_params=_cparams("parallel", "parallel", "parallel", "arbitrary"),
    )(qkv, qkv)


# ---- PPEG (identity + merged 7x7 depthwise conv, "same" padding) ----

def _ppeg_kernel(x_ref, w_ref, b_ref, o_ref, *, H, W):
    C = x_ref.shape[-1]
    x = x_ref[0]                                  # (H, W, C) f32
    acc = x + b_ref[0]                            # identity + combined bias
    pad = 3
    zrow = jnp.zeros((pad, W, C), jnp.float32)
    xp = jnp.concatenate([zrow, x, zrow], axis=0)  # (H+6, W, C), H-padding only
    for dj in range(7):
        sj = dj - pad                             # out[:, j] uses in[:, j + sj]
        if abs(sj) >= W:                          # fully out of range -> zero tap
            continue
        if sj == 0:
            sp = xp
        elif sj > 0:
            zc = jnp.zeros((H + 2 * pad, sj, C), jnp.float32)
            sp = jnp.concatenate([xp[:, sj:, :], zc], axis=1)
        else:
            zc = jnp.zeros((H + 2 * pad, -sj, C), jnp.float32)
            sp = jnp.concatenate([zc, xp[:, :W + sj, :]], axis=1)
        for di in range(7):                       # H shifts are cheap leading-dim slices
            if abs(di - pad) >= H:
                continue
            acc = acc + w_ref[di, dj, :] * sp[di:di + H, :, :]
    o_ref[0] = acc                                # single dense store


def ppeg(feat, w_comb, b_comb, tc=128):
    # feat: (B, H, W, C) channels-last; depthwise -> channel tiling needs no halo.
    # TODO(synk): for very large slides also tile over H rows (with a 3-row halo)
    # to keep per-step VMEM small on v7x.
    B, H, W, C = feat.shape
    tc = min(tc, C)
    return pl.pallas_call(
        partial(_ppeg_kernel, H=H, W=W),
        out_shape=jax.ShapeDtypeStruct((B, H, W, C), jnp.float32),
        grid=(B, C // tc),
        in_specs=[
            pl.BlockSpec((1, H, W, tc), lambda b, c: (b, 0, 0, c)),
            pl.BlockSpec((7, 7, tc), lambda b, c: (0, 0, c)),
            pl.BlockSpec((1, tc), lambda b, c: (0, c)),
        ],
        out_specs=pl.BlockSpec((1, H, W, tc), lambda b, c: (b, 0, 0, c)),
        compiler_params=_cparams("parallel", "parallel"),
    )(feat, w_comb, b_comb)


# ---- classifier head & graph branch ----

def _cls_head_kernel(x_ref, g_ref, b_ref, w_ref, wb_ref, emb_ref, logit_ref):
    x = x_ref[...]
    mu = jnp.mean(x, axis=-1, keepdims=True)
    var = jnp.mean(jnp.square(x - mu), axis=-1, keepdims=True)
    emb = (x - mu) * jax.lax.rsqrt(var + 1e-5) * g_ref[...] + b_ref[...]
    emb_ref[...] = emb
    logit_ref[...] = jnp.dot(emb.astype(jnp.bfloat16), w_ref[...],
                             preferred_element_type=jnp.float32) + wb_ref[...]


def cls_head(h_cls, gamma, beta, fc2_w_pad, fc2_b_pad):
    """Fused LayerNorm(cls token) + _fc2 (weights pre-padded to 128 lanes)."""
    B, D = h_cls.shape
    n_pad = fc2_w_pad.shape[1]
    return pl.pallas_call(
        _cls_head_kernel,
        out_shape=(jax.ShapeDtypeStruct((B, D), jnp.float32),
                   jax.ShapeDtypeStruct((B, n_pad), jnp.float32)),
        in_specs=[_VMEM, _VMEM, _VMEM, _VMEM, _VMEM],
        out_specs=(_VMEM, _VMEM),
        compiler_params=_cparams(),
    )(h_cls, gamma, beta, fc2_w_pad, fc2_b_pad)


def _graph_sim_kernel(x_ref, w_ref, b_ref, sim_ref):
    e = jnp.dot(x_ref[...].astype(jnp.bfloat16), w_ref[...],
                preferred_element_type=jnp.float32) + b_ref[...]
    e = jnp.where(e > 0, e, 0.01 * e)                       # LeakyReLU
    n = e * jax.lax.rsqrt(jnp.sum(e * e, axis=-1, keepdims=True) + 1e-12)
    sim_ref[...] = jax.lax.dot_general(n, n, (((1,), (1,)), ((), ())),
                                       preferred_element_type=jnp.float32)


def graph_similarity(x, w, b):
    # TODO(synk): exact AdaptiveGraphGenerator internals are not given in the
    # source; implemented as Linear+LeakyReLU embedding -> cosine similarity.
    # TODO(synk): add M-tiling if buffer_size grows to thousands of nodes.
    n = x.shape[0]
    return pl.pallas_call(
        _graph_sim_kernel,
        out_shape=jax.ShapeDtypeStruct((n, n), jnp.float32),
        in_specs=[_VMEM, _VMEM, _VMEM],
        out_specs=_VMEM,
        compiler_params=_cparams(),
    )(x, w, b)


def _gcn_kernel(a_ref, x_ref, w1_ref, b1_ref, w2_ref, b2_ref, o_ref):
    a = a_ref[...]
    h = jnp.dot(x_ref[...].astype(jnp.bfloat16), w1_ref[...],
                preferred_element_type=jnp.float32)
    h = jnp.dot(a, h, preferred_element_type=jnp.float32) + b1_ref[...]
    h = jnp.maximum(h, 0.0)
    g = jnp.dot(h.astype(jnp.bfloat16), w2_ref[...],
                preferred_element_type=jnp.float32)
    o_ref[...] = jnp.dot(a, g, preferred_element_type=jnp.float32) + b2_ref[...]


def gcn_fused(a_norm, x, w1, b1, w2_pad, b2_pad):
    # TODO(synk): reference SlideGCN layer widths / message-passing variant are
    # not given; implemented as a 2-layer dense GCN (A @ X @ W) fused into one
    # kernel (second layer output pre-padded to 128 lanes at prep time).
    m = x.shape[0]
    n_pad = w2_pad.shape[1]
    return pl.pallas_call(
        _gcn_kernel,
        out_shape=jax.ShapeDtypeStruct((m, n_pad), jnp.float32),
        in_specs=[_VMEM, _VMEM, _VMEM, _VMEM, _VMEM, _VMEM],
        out_specs=_VMEM,
        compiler_params=_cparams(),
    )(a_norm, x, w1, b1, w2_pad, b2_pad)


# ------------------------------ model glue ---------------------------------

def trans_layer(p, x):
    # x = x + out_proj(MHSA(LayerNorm(x)))
    # TODO(synk): reference TransLayer uses NystromAttention (landmark
    # approximation + depthwise-conv value residual); exact softmax MHSA used here.
    B, S, D = x.shape
    M = B * S
    x2 = x.reshape(M, D)
    qkv = layernorm_matmul(x2, p["ln_g"], p["ln_b"], p["qkv_w"], p["qkv_b"])
    attn = flash_mhsa(qkv.reshape(B, S, 3 * D))            # (B, S, D) bf16
    out = proj_residual(attn.reshape(M, D), x2, p["out_w"], p["out_b"])
    return out.reshape(B, S, D)


def init_params(key, feat_dim, num_classes, buffer_size):
    keys = iter(jax.random.split(key, 64))
    D = HIDDEN_DIM

    def nrm(shape, scale=0.02):
        return scale * jax.random.normal(next(keys), shape, dtype=jnp.float32)

    def translayer():
        return dict(
            ln_g=jnp.ones((D,), jnp.float32), ln_b=jnp.zeros((D,), jnp.float32),
            qkv_w=nrm((D, 3 * D)), qkv_b=jnp.zeros((3 * D,), jnp.float32),
            out_w=nrm((D, D)), out_b=jnp.zeros((D,), jnp.float32),
        )

    return dict(
        fc1_w=nrm((feat_dim, D)), fc1_b=jnp.zeros((D,), jnp.float32),
        cls_token=nrm((1, 1, D), 1.0),
        layer1=translayer(), layer2=translayer(),
        ppeg_w7=nrm((7, 7, D)), ppeg_b7=nrm((D,)),
        ppeg_w5=nrm((5, 5, D)), ppeg_b5=nrm((D,)),
        ppeg_w3=nrm((3, 3, D)), ppeg_b3=nrm((D,)),
        norm_g=jnp.ones((D,), jnp.float32), norm_b=jnp.zeros((D,), jnp.float32),
        fc2_w=nrm((D, num_classes)), fc2_b=jnp.zeros((num_classes,), jnp.float32),
        rehearsal=jax.random.uniform(next(keys), (buffer_size, D), dtype=jnp.float32),
        agg_w=nrm((D, D)), agg_b=jnp.zeros((D,), jnp.float32),
        gcn_w1=nrm((D, 256)), gcn_b1=jnp.zeros((256,), jnp.float32),
        gcn_w2=nrm((256, num_classes)), gcn_b2=jnp.zeros((num_classes,), jnp.float32),
    )


def prepare_params(raw, num_classes):
    """One-time host-side weight prep: bf16 casts, bias reshapes, attention
    scale folding + K/V lane-adjacency, PPEG kernel merge, class padding."""
    D = HIDDEN_DIM
    scale = 1.0 / math.sqrt(HEAD_DIM)

    def prep_layer(lp):
        w, b = lp["qkv_w"], lp["qkv_b"]
        wq, wk, wv = w[:, :D] * scale, w[:, D:2 * D], w[:, 2 * D:]
        bq, bk, bv = b[:D] * scale, b[D:2 * D], b[2 * D:]
        cols, bcols = [wq], [bq]
        for hp in range(NUM_HEADS // HEADS_PER_BLOCK):
            lo, hi = hp * LANE, (hp + 1) * LANE
            cols += [wk[:, lo:hi], wv[:, lo:hi]]        # K|V lane-adjacent per pair
            bcols += [bk[lo:hi], bv[lo:hi]]
        return dict(
            ln_g=lp["ln_g"].reshape(1, D), ln_b=lp["ln_b"].reshape(1, D),
            qkv_w=jnp.concatenate(cols, axis=1).astype(jnp.bfloat16),
            qkv_b=jnp.concatenate(bcols).reshape(1, 3 * D).astype(jnp.float32),
            out_w=lp["out_w"].astype(jnp.bfloat16),
            out_b=lp["out_b"].reshape(1, D).astype(jnp.float32),
        )

    def pad_cols(w, b, n_pad):
        wpad = jnp.zeros((w.shape[0], n_pad), jnp.float32).at[:, :w.shape[1]].set(w)
        bpad = jnp.zeros((1, n_pad), jnp.float32).at[0, :b.shape[0]].set(b)
        return wpad, bpad

    n_pad = ((num_classes + LANE - 1) // LANE) * LANE

    # merge depthwise 7x7 + 5x5 + 3x3 ("same" padding) into one 7x7 tap set
    ppeg_w = (raw["ppeg_w7"]
              + jnp.pad(raw["ppeg_w5"], ((1, 1), (1, 1), (0, 0)))
              + jnp.pad(raw["ppeg_w3"], ((2, 2), (2, 2), (0, 0))))
    ppeg_b = (raw["ppeg_b7"] + raw["ppeg_b5"] + raw["ppeg_b3"]).reshape(1, D)

    fc2_w_pad, fc2_b_pad = pad_cols(raw["fc2_w"], raw["fc2_b"], n_pad)
    gcn_w2_pad, gcn_b2_pad = pad_cols(raw["gcn_w2"], raw["gcn_b2"], n_pad)

    return dict(
        fc1_w=raw["fc1_w"].astype(jnp.bfloat16),
        fc1_b=raw["fc1_b"].reshape(1, D).astype(jnp.float32),
        cls_token=raw["cls_token"],
        layer1=prep_layer(raw["layer1"]), layer2=prep_layer(raw["layer2"]),
        ppeg_w=ppeg_w, ppeg_b=ppeg_b,
        norm_g=raw["norm_g"].reshape(1, D), norm_b=raw["norm_b"].reshape(1, D),
        fc2_w_pad=fc2_w_pad.astype(jnp.bfloat16), fc2_b_pad=fc2_b_pad,
        rehearsal=raw["rehearsal"],
        agg_w=raw["agg_w"].astype(jnp.bfloat16),
        agg_b=raw["agg_b"].reshape(1, D).astype(jnp.float32),
        gcn_w1=raw["gcn_w1"].astype(jnp.bfloat16),
        gcn_b1=raw["gcn_b1"].reshape(1, 256).astype(jnp.float32),
        gcn_w2_pad=gcn_w2_pad.astype(jnp.bfloat16), gcn_b2_pad=gcn_b2_pad,
    )


def forward(params, x, *, num_classes, k, buffer_size, batch_size):
    B, n_patches, feat_dim = x.shape
    D = HIDDEN_DIM

    # _fc1: Linear + ReLU (f32 input read once; bf16 cast happens in-kernel)
    h = linear(x.reshape(B * n_patches, feat_dim),
               params["fc1_w"], params["fc1_b"], activation="relu")
    h = h.reshape(B, n_patches, D)

    _H = _W = int(math.ceil(math.sqrt(n_patches)))
    add_length = _H * _W - n_patches
    h = jnp.concatenate([h, h[:, :add_length, :]], axis=1)
    cls = jnp.broadcast_to(params["cls_token"], (B, 1, D))
    h = jnp.concatenate([cls, h], axis=1)                   # (B, 1 + _H*_W, D)

    h = trans_layer(params["layer1"], h)

    # PPEG positional encoding (depthwise convs on the spatial tokens)
    cls_tok, feat_tok = h[:, :1, :], h[:, 1:, :]
    feat = feat_tok.reshape(B, _H, _W, D)
    feat = ppeg(feat, params["ppeg_w"], params["ppeg_b"])
    h = jnp.concatenate([cls_tok, feat.reshape(B, _H * _W, D)], axis=1)

    h = trans_layer(params["layer2"], h)

    # LayerNorm is per-token, so norm(h)[:, 0] == norm(h[:, 0]); only the cls
    # row is normalized, fused with the _fc2 classifier.
    slide_emb, logits_pad = cls_head(h[:, 0, :], params["norm_g"], params["norm_b"],
                                     params["fc2_w_pad"], params["fc2_b_pad"])
    logits_mlp = logits_pad[:, :num_classes]

    # ---- graph branch ----
    x_concat = jnp.concatenate([slide_emb, params["rehearsal"]], axis=0)
    n_nodes = x_concat.shape[0]
    max_length = batch_size + buffer_size

    sim = graph_similarity(x_concat, params["agg_w"], params["agg_b"])
    vals, idx = jax.lax.top_k(sim, k)
    attr = jax.nn.softmax(vals, axis=-1)
    # TODO(synk): kNN includes the self-edge (diag=1) and A_hat adds identity
    # again; kept as-is since the reference AdaptiveGraphGenerator is not given.
    adj = jnp.zeros((n_nodes, n_nodes), jnp.float32).at[
        jnp.arange(n_nodes)[:, None], idx].set(attr)

    padded_x = jnp.zeros((max_length, D), jnp.float32).at[:n_nodes].set(x_concat)
    padded_a = jnp.zeros((max_length, max_length), jnp.float32).at[
        :n_nodes, :n_nodes].set(adj)
    a_hat = padded_a + jnp.eye(max_length, dtype=jnp.float32)
    a_norm = a_hat / jnp.sum(a_hat, axis=-1, keepdims=True)

    logits_graph_full = gcn_fused(a_norm, padded_x, params["gcn_w1"],
                                  params["gcn_b1"], params["gcn_w2_pad"],
                                  params["gcn_b2_pad"])
    logits_graph = logits_graph_full[:B, :num_classes]

    # TODO(synk): training-mode FIFO rehearsal-buffer update is stateful and
    # omitted (inference forward only).
    return logits_mlp, logits_graph


if __name__ == "__main__":
    feat_dim, num_classes, k, buffer_size, batch_size = 64, 3, 3, 6, 2
    n_patches = 8

    key = jax.random.PRNGKey(0)
    pkey, xkey = jax.random.split(key)
    raw_params = init_params(pkey, feat_dim, num_classes, buffer_size)
    params = prepare_params(raw_params, num_classes)          # one-time, outside jit
    x = jax.random.normal(xkey, (batch_size, n_patches, feat_dim), dtype=jnp.float32)

    fwd = jax.jit(partial(forward, num_classes=num_classes, k=k,
                          buffer_size=buffer_size, batch_size=batch_size))
    logits_mlp, logits_graph = fwd(params, x)
    jax.block_until_ready((logits_mlp, logits_graph))

    assert logits_mlp.shape == (batch_size, num_classes)
    assert logits_graph.shape == (batch_size, num_classes)
    assert bool(jnp.all(jnp.isfinite(logits_mlp))) and bool(jnp.all(jnp.isfinite(logits_graph)))
    print("KERNEL_OK")
</pallas_src>

<mosaic_0001>
module attributes {stable_mosaic.version = 11 : i64} {
  func.func @_linear_kernel(%arg0: i32, %arg1: memref<16x64xf32, #tpu.memory_space<vmem>>, %arg2: memref<64x512xbf16, #tpu.memory_space<vmem>>, %arg3: memref<1x512xf32, #tpu.memory_space<vmem>>, %arg4: memref<16x512xf32, #tpu.memory_space<vmem>>) attributes {dimension_semantics = [#tpu.dimension_semantics<parallel>], iteration_bounds = array<i64: 1>, scalar_prefetch = 0 : i64, scratch_operands = 0 : i64, tpu.core_type = #tpu.core_type<tc>, window_params = [{transform_indices = @transform_0, window_bounds = array<i64: 16, 64>}, {pipeline_mode = #tpu.pipeline_mode<synchronous>, transform_indices = @transform_1, window_bounds = array<i64: 64, 512>}, {pipeline_mode = #tpu.pipeline_mode<synchronous>, transform_indices = @transform_2, window_bounds = array<i64: 1, 512>}, {transform_indices = @transform_3, window_bounds = array<i64: 16, 512>}]} {
    %c0 = arith.constant 0 : index
    %c0_0 = arith.constant 0 : index
    %0 = vector.load %arg1[%c0, %c0_0] : memref<16x64xf32, #tpu.memory_space<vmem>>, vector<16x64xf32>
    %1 = arith.truncf %0 : vector<16x64xf32> to vector<16x64xbf16>
    %c0_1 = arith.constant 0 : index
    %c0_2 = arith.constant 0 : index
    %2 = vector.load %arg2[%c0_1, %c0_2] : memref<64x512xbf16, #tpu.memory_space<vmem>>, vector<64x512xbf16>
    %cst = arith.constant dense<0.000000e+00> : vector<16x512xf32>
    %3 = tpu.matmul %1, %2, %cst {dimension_numbers = #tpu.dot_dimension_numbers<[1], [0], [0], [1], [0, 0, 1, 1], [], []>} : vector<16x64xbf16>, vector<64x512xbf16>, vector<16x512xf32> -> vector<16x512xf32>
    %c0_3 = arith.constant 0 : index
    %c0_4 = arith.constant 0 : index
    %4 = vector.load %arg3[%c0_3, %c0_4] : memref<1x512xf32, #tpu.memory_space<vmem>>, vector<1x512xf32>
    %5 = vector.broadcast %4 : vector<1x512xf32> to vector<16x512xf32>
    %6 = arith.addf %3, %5 : vector<16x512xf32>
    %cst_5 = arith.constant 0.000000e+00 : f32
    %7 = vector.broadcast %cst_5 : f32 to vector<16x512xf32>
    %8 = arith.maximumf %6, %7 : vector<16x512xf32>
    %c0_6 = arith.constant 0 : index
    %c0_7 = arith.constant 0 : index
    %9 = vector.load %arg4[%c0_6, %c0_7] : memref<16x512xf32, #tpu.memory_space<vmem>>, vector<16x512xf32>
    tpu.vector_store %arg4[%c0_6, %c0_7], %8 {strides = array<i32>} : memref<16x512xf32, #tpu.memory_space<vmem>>, vector<16x512xf32>,
    return
  }
  func.func @transform_0(%arg0: i32) -> (i32, i32) {
    %c0_i32 = arith.constant 0 : i32
    %c0_i32_0 = arith.constant 0 : i32
    return %arg0, %c0_i32 : i32, i32
  }
  func.func @transform_1(%arg0: i32) -> (i32, i32) {
    %c0_i32 = arith.constant 0 : i32
    %c0_i32_0 = arith.constant 0 : i32
    %c0_i32_1 = arith.constant 0 : i32
    return %c0_i32, %c0_i32_0 : i32, i32
  }
  func.func @transform_2(%arg0: i32) -> (i32, i32) {
    %c0_i32 = arith.constant 0 : i32
    %c0_i32_0 = arith.constant 0 : i32
    %c0_i32_1 = arith.constant 0 : i32
    return %c0_i32, %c0_i32_0 : i32, i32
  }
  func.func @transform_3(%arg0: i32) -> (i32, i32) {
    %c0_i32 = arith.constant 0 : i32
    %c0_i32_0 = arith.constant 0 : i32
    return %arg0, %c0_i32 : i32, i32
  }
}

module attributes {stable_mosaic.version = 11 : i64} {
  func.func @_ln_matmul_kernel(%arg0: i32, %arg1: memref<20x512xf32, #tpu.memory_space<vmem>>, %arg2: memref<1x512xf32, #tpu.memory_space<vmem>>, %arg3: memref<1x512xf32, #tpu.memory_space<vmem>>, %arg4: memref<512x1536xbf16, #tpu.memory_space<vmem>>, %arg5: memref<1x1536xf32, #tpu.memory_space<vmem>>, %arg6: memref<20x1536xbf16, #tpu.memory_space<vmem>>) attributes {dimension_semantics = [#tpu.dimension_semantics<parallel>], iteration_bounds = array<i64: 1>, scalar_prefetch = 0 : i64, scratch_operands = 0 : i64, tpu.core_type = #tpu.core_type<tc>, window_params = [{transform_indices = @transform_0, window_bounds = array<i64: 20, 512>}, {pipeline_mode = #tpu.pipeline_mode<synchronous>, transform_indices = @transform_1, window_bounds = array<i64: 1, 512>}, {pipeline_mode = #tpu.pipeline_mode<synchronous>, transform_indices = @transform_2, window_bounds = array<i64: 1, 512>}, {pipeline_mode = #tpu.pipeline_mode<synchronous>, transform_indices = @transform_3, window_bounds = array<i64: 512, 1536>}, {pipeline_mode = #tpu.pipeline_mode<synchronous>, transform_indices = @transform_4, window_bounds = array<i64: 1, 1536>}, {transform_indices = @transform_5, window_bounds = array<i64: 20, 1536>}]} {
    %c0 = arith.constant 0 : index
    %c0_0 = arith.constant 0 : index
    %0 = vector.load %arg1[%c0, %c0_0] : memref<20x512xf32, #tpu.memory_space<vmem>>, vector<20x512xf32>
    %cst = arith.constant dense<0.000000e+00> : vector<20xf32>
    %1 = vector.multi_reduction <add>, %0, %cst [1] : vector<20x512xf32> to vector<20xf32>
    %2 = vector.shape_cast %1 : vector<20xf32> to vector<20x1xf32>
    %cst_1 = arith.constant 5.120000e+02 : f32
    %3 = vector.broadcast %cst_1 : f32 to vector<20x1xf32>
    %4 = arith.divf %2, %3 : vector<20x1xf32>
    %5 = vector.broadcast %4 : vector<20x1xf32> to vector<20x512xf32>
    %6 = arith.subf %0, %5 : vector<20x512xf32>
    %7 = arith.mulf %6, %6 : vector<20x512xf32>
    %cst_2 = arith.constant dense<0.000000e+00> : vector<20xf32>
    %8 = vector.multi_reduction <add>, %7, %cst_2 [1] : vector<20x512xf32> to vector<20xf32>
    %9 = vector.shape_cast %8 : vector<20xf32> to vector<20x1xf32>
    %cst_3 = arith.constant 5.120000e+02 : f32
    %10 = vector.broadcast %cst_3 : f32 to vector<20x1xf32>
    %11 = arith.divf %9, %10 : vector<20x1xf32>
    %12 = vector.broadcast %4 : vector<20x1xf32> to vector<20x512xf32>
    %13 = arith.subf %0, %12 : vector<20x512xf32>
    %cst_4 = arith.constant 9.99999974E-6 : f32
    %14 = vector.broadcast %cst_4 : f32 to vector<20x1xf32>
    %15 = arith.addf %11, %14 : vector<20x1xf32>
    %16 = math.rsqrt %15 : vector<20x1xf32>
    %17 = vector.broadcast %16 : vector<20x1xf32> to vector<20x512xf32>
    %18 = arith.mulf %13, %17 : vector<20x512xf32>
    %c0_5 = arith.constant 0 : index
    %c0_6 = arith.constant 0 : index
    %19 = vector.load %arg2[%c0_5, %c0_6] : memref<1x512xf32, #tpu.memory_space<vmem>>, vector<1x512xf32>
    %20 = vector.broadcast %19 : vector<1x512xf32> to vector<20x512xf32>
    %21 = arith.mulf %18, %20 : vector<20x512xf32>
    %c0_7 = arith.constant 0 : index
    %c0_8 = arith.constant 0 : index
    %22 = vector.load %arg3[%c0_7, %c0_8] : memref<1x512xf32, #tpu.memory_space<vmem>>, vector<1x512xf32>
    %23 = vector.broadcast %22 : vector<1x512xf32> to vector<20x512xf32>
    %24 = arith.addf %21, %23 : vector<20x512xf32>
    %25 = arith.truncf %24 : vector<20x512xf32> to vector<20x512xbf16>
    %c0_9 = arith.constant 0 : index
    %c0_10 = arith.constant 0 : index
    %26 = vector.load %arg4[%c0_9, %c0_10] : memref<512x1536xbf16, #tpu.memory_space<vmem>>, vector<512x1536xbf16>
    %cst_11 = arith.constant dense<0.000000e+00> : vector<20x1536xf32>
    %27 = tpu.matmul %25, %26, %cst_11 {dimension_numbers = #tpu.dot_dimension_numbers<[1], [0], [0], [1], [0, 0, 1, 1], [], []>} : vector<20x512xbf16>, vector<512x1536xbf16>, vector<20x1536xf32> -> vector<20x1536xf32>
    %c0_12 = arith.constant 0 : index
    %c0_13 = arith.constant 0 : index
    %28 = vector.load %arg5[%c0_12, %c0_13] : memref<1x1536xf32, #tpu.memory_space<vmem>>, vector<1x1536xf32>
    %29 = vector.broadcast %28 : vector<1x1536xf32> to vector<20x1536xf32>
    %30 = arith.addf %27, %29 : vector<20x1536xf32>
    %31 = arith.truncf %30 : vector<20x1536xf32> to vector<20x1536xbf16>
    %c0_14 = arith.constant 0 : index
    %c0_15 = arith.constant 0 : index
    %32 = vector.load %arg6[%c0_14, %c0_15] : memref<20x1536xbf16, #tpu.memory_space<vmem>>, vector<20x1536xbf16>
    tpu.vector_store %arg6[%c0_14, %c0_15], %31 {strides = array<i32>} : memref<20x1536xbf16, #tpu.memory_space<vmem>>, vector<20x1536xbf16>,
    return
  }
  func.func @transform_0(%arg0: i32) -> (i32, i32) {
    %c0_i32 = arith.constant 0 : i32
    %c0_i32_0 = arith.constant 0 : i32
    return %arg0, %c0_i32 : i32, i32
  }
  func.func @transform_1(%arg0: i32) -> (i32, i32) {
    %c0_i32 = arith.constant 0 : i32
    %c0_i32_0 = arith.constant 0 : i32
    %c0_i32_1 = arith.constant 0 : i32
    return %c0_i32, %c0_i32_0 : i32, i32
  }
  func.func @transform_2(%arg0: i32) -> (i32, i32) {
    %c0_i32 = arith.constant 0 : i32
    %c0_i32_0 = arith.constant 0 : i32
    %c0_i32_1 = arith.constant 0 : i32
    return %c0_i32, %c0_i32_0 : i32, i32
  }
  func.func @transform_3(%arg0: i32) -> (i32, i32) {
    %c0_i32 = arith.constant 0 : i32
    %c0_i32_0 = arith.constant 0 : i32
    %c0_i32_1 = arith.constant 0 : i32
    return %c0_i32, %c0_i32_0 : i32, i32
  }
  func.func @transform_4(%arg0: i32) -> (i32, i32) {
    %c0_i32 = arith.constant 0 : i32
    %c0_i32_0 = arith.constant 0 : i32
    %c0_i32_1 = arith.constant 0 : i32
    return %c0_i32, %c0_i32_0 : i32, i32
  }
  func.func @transform_5(%arg0: i32) -> (i32, i32) {
    %c0_i32 = arith.constant 0 : i32
    %c0_i32_0 = arith.constant 0 : i32
    return %arg0, %c0_i32 : i32, i32
  }
}

module attributes {stable_mosaic.version = 11 : i64} {
  func.func @_attn_single_kernel(%arg0: i32, %arg1: i32, %arg2: i32, %arg3: memref<1x10x128xbf16, #tpu.memory_space<vmem>>, %arg4: memref<1x10x256xbf16, #tpu.memory_space<vmem>>, %arg5: memref<1x10x128xbf16, #tpu.memory_space<vmem>>) attributes {dimension_semantics = [#tpu.dimension_semantics<parallel>, #tpu.dimension_semantics<parallel>, #tpu.dimension_semantics<parallel>], iteration_bounds = array<i64: 2, 4, 1>, scalar_prefetch = 0 : i64, scratch_operands = 0 : i64, tpu.core_type = #tpu.core_type<tc>, window_params = [{transform_indices = @transform_0, window_bounds = array<i64: 1, 10, 128>}, {transform_indices = @transform_1, window_bounds = array<i64: 1, 10, 256>}, {transform_indices = @transform_2, window_bounds = array<i64: 1, 10, 128>}]} {
    %c0 = arith.constant 0 : index
    %c0_0 = arith.constant 0 : index
    %c0_1 = arith.constant 0 : index
    %0 = vector.load %arg3[%c0, %c0_0, %c0_1] : memref<1x10x128xbf16, #tpu.memory_space<vmem>>, vector<1x10x128xbf16>
    %1 = vector.shape_cast %0 : vector<1x10x128xbf16> to vector<10x128xbf16>
    %c0_2 = arith.constant 0 : index
    %c0_3 = arith.constant 0 : index
    %c0_4 = arith.constant 0 : index
    %2 = vector.load %arg4[%c0_2, %c0_3, %c0_4] : memref<1x10x256xbf16, #tpu.memory_space<vmem>>, vector<1x10x256xbf16>
    %3 = vector.shape_cast %2 : vector<1x10x256xbf16> to vector<10x256xbf16>
    %4 = vector.extract_strided_slice %3 {offsets = [0, 0], sizes = [10, 128], strides = [1, 1]} : vector<10x256xbf16> to vector<10x128xbf16>
    %5 = vector.extract_strided_slice %3 {offsets = [0, 128], sizes = [10, 128], strides = [1, 1]} : vector<10x256xbf16> to vector<10x128xbf16>
    %6 = vector.extract_strided_slice %1 {offsets = [0, 0], sizes = [10, 64], strides = [1, 1]} : vector<10x128xbf16> to vector<10x64xbf16>
    %7 = vector.extract_strided_slice %4 {offsets = [0, 0], sizes = [10, 64], strides = [1, 1]} : vector<10x128xbf16> to vector<10x64xbf16>
    %cst = arith.constant dense<0.000000e+00> : vector<10x10xf32>
    %8 = tpu.matmul %6, %7, %cst {dimension_numbers = #tpu.dot_dimension_numbers<[1], [1], [0], [0], [0, 0, 1, 0], [], []>} : vector<10x64xbf16>, vector<10x64xbf16>, vector<10x10xf32> -> vector<10x10xf32>
    %cst_5 = arith.constant dense<0xFF800000> : vector<10xf32>
    %9 = vector.multi_reduction <maximumf>, %8, %cst_5 [1] : vector<10x10xf32> to vector<10xf32>
    %10 = vector.shape_cast %9 : vector<10xf32> to vector<10x1xf32>
    %11 = vector.broadcast %10 : vector<10x1xf32> to vector<10x10xf32>
    %12 = arith.subf %8, %11 : vector<10x10xf32>
    %13 = math.exp %12 : vector<10x10xf32>
    %cst_6 = arith.constant dense<0.000000e+00> : vector<10xf32>
    %14 = vector.multi_reduction <add>, %13, %cst_6 [1] : vector<10x10xf32> to vector<10xf32>
    %15 = vector.shape_cast %14 : vector<10xf32> to vector<10x1xf32>
    %16 = arith.truncf %13 : vector<10x10xf32> to vector<10x10xbf16>
    %17 = vector.extract_strided_slice %5 {offsets = [0, 0], sizes = [10, 64], strides = [1, 1]} : vector<10x128xbf16> to vector<10x64xbf16>
    %cst_7 = arith.constant dense<0.000000e+00> : vector<10x64xf32>
    %18 = tpu.matmul %16, %17, %cst_7 {dimension_numbers = #tpu.dot_dimension_numbers<[1], [0], [0], [1], [0, 0, 1, 1], [], []>} : vector<10x10xbf16>, vector<10x64xbf16>, vector<10x64xf32> -> vector<10x64xf32>
    %19 = tpu.reciprocal %15 {approx = true} : vector<10x1xf32> -> vector<10x1xf32>
    %20 = vector.broadcast %19 : vector<10x1xf32> to vector<10x64xf32>
    %21 = arith.mulf %18, %20 : vector<10x64xf32>
    %22 = vector.extract_strided_slice %1 {offsets = [0, 64], sizes = [10, 64], strides = [1, 1]} : vector<10x128xbf16> to vector<10x64xbf16>
    %23 = vector.extract_strided_slice %4 {offsets = [0, 64], sizes = [10, 64], strides = [1, 1]} : vector<10x128xbf16> to vector<10x64xbf16>
    %cst_8 = arith.constant dense<0.000000e+00> : vector<10x10xf32>
    %24 = tpu.matmul %22, %23, %cst_8 {dimension_numbers = #tpu.dot_dimension_numbers<[1], [1], [0], [0], [0, 0, 1, 0], [], []>} : vector<10x64xbf16>, vector<10x64xbf16>, vector<10x10xf32> -> vector<10x10xf32>
    %cst_9 = arith.constant dense<0xFF800000> : vector<10xf32>
    %25 = vector.multi_reduction <maximumf>, %24, %cst_9 [1] : vector<10x10xf32> to vector<10xf32>
    %26 = vector.shape_cast %25 : vector<10xf32> to vector<10x1xf32>
    %27 = vector.broadcast %26 : vector<10x1xf32> to vector<10x10xf32>
    %28 = arith.subf %24, %27 : vector<10x10xf32>
    %29 = math.exp %28 : vector<10x10xf32>
    %cst_10 = arith.constant dense<0.000000e+00> : vector<10xf32>
    %30 = vector.multi_reduction <add>, %29, %cst_10 [1] : vector<10x10xf32> to vector<10xf32>
    %31 = vector.shape_cast %30 : vector<10xf32> to vector<10x1xf32>
    %32 = arith.truncf %29 : vector<10x10xf32> to vector<10x10xbf16>
    %33 = vector.extract_strided_slice %5 {offsets = [0, 64], sizes = [10, 64], strides = [1, 1]} : vector<10x128xbf16> to vector<10x64xbf16>
    %cst_11 = arith.constant dense<0.000000e+00> : vector<10x64xf32>
    %34 = tpu.matmul %32, %33, %cst_11 {dimension_numbers = #tpu.dot_dimension_numbers<[1], [0], [0], [1], [0, 0, 1, 1], [], []>} : vector<10x10xbf16>, vector<10x64xbf16>, vector<10x64xf32> -> vector<10x64xf32>
    %35 = tpu.reciprocal %31 {approx = true} : vector<10x1xf32> -> vector<10x1xf32>
    %36 = vector.broadcast %35 : vector<10x1xf32> to vector<10x64xf32>
    %37 = arith.mulf %34, %36 : vector<10x64xf32>
    %38 = tpu.concatenate %21, %37 in 1 : vector<10x64xf32>, vector<10x64xf32> -> vector<10x128xf32>
    %39 = arith.truncf %38 : vector<10x128xf32> to vector<10x128xbf16>
    %c0_12 = arith.constant 0 : index
    %c0_13 = arith.constant 0 : index
    %c0_14 = arith.constant 0 : index
    %40 = vector.load %arg5[%c0_12, %c0_13, %c0_14] : memref<1x10x128xbf16, #tpu.memory_space<vmem>>, vector<1x10x128xbf16>
    %41 = vector.shape_cast %40 : vector<1x10x128xbf16> to vector<10x128xbf16>
    %42 = vector.shape_cast %39 : vector<10x128xbf16> to vector<1x10x128xbf16>
    tpu.vector_store %arg5[%c0_12, %c0_13, %c0_14], %42 {strides = array<i32>} : memref<1x10x128xbf16, #tpu.memory_space<vmem>>, vector<1x10x128xbf16>,
    return
  }
  func.func @transform_0(%arg0: i32, %arg1: i32, %arg2: i32) -> (i32, i32, i32) {
    %c0_i32 = arith.constant 0 : i32
    return %arg0, %arg2, %arg1 : i32, i32, i32
  }
  func.func @transform_1(%arg0: i32, %arg1: i32, %arg2: i32) -> (i32, i32, i32) {
    %c2_i32 = arith.constant 2 : i32
    %0 = arith.addi %c2_i32, %arg1 : i32
    %c0_i32 = arith.constant 0 : i32
    %c0_i32_0 = arith.constant 0 : i32
    return %arg0, %c0_i32, %0 : i32, i32, i32
  }
  func.func @transform_2(%arg0: i32, %arg1: i32, %arg2: i32) -> (i32, i32, i32) {
    %c0_i32 = arith.constant 0 : i32
    return %arg0, %arg2, %arg1 : i32, i32, i32
  }
}

module attributes {stable_mosaic.version = 11 : i64} {
  func.func @_proj_residual_kernel(%arg0: i32, %arg1: memref<20x512xbf16, #tpu.memory_space<vmem>>, %arg2: memref<20x512xf32, #tpu.memory_space<vmem>>, %arg3: memref<512x512xbf16, #tpu.memory_space<vmem>>, %arg4: memref<1x512xf32, #tpu.memory_space<vmem>>, %arg5: memref<20x512xf32, #tpu.memory_space<vmem>>) attributes {dimension_semantics = [#tpu.dimension_semantics<parallel>], iteration_bounds = array<i64: 1>, scalar_prefetch = 0 : i64, scratch_operands = 0 : i64, tpu.core_type = #tpu.core_type<tc>, window_params = [{transform_indices = @transform_0, window_bounds = array<i64: 20, 512>}, {transform_indices = @transform_1, window_bounds = array<i64: 20, 512>}, {pipeline_mode = #tpu.pipeline_mode<synchronous>, transform_indices = @transform_2, window_bounds = array<i64: 512, 512>}, {pipeline_mode = #tpu.pipeline_mode<synchronous>, transform_indices = @transform_3, window_bounds = array<i64: 1, 512>}, {transform_indices = @transform_4, window_bounds = array<i64: 20, 512>}]} {
    %c0 = arith.constant 0 : index
    %c0_0 = arith.constant 0 : index
    %0 = vector.load %arg1[%c0, %c0_0] : memref<20x512xbf16, #tpu.memory_space<vmem>>, vector<20x512xbf16>
    %c0_1 = arith.constant 0 : index
    %c0_2 = arith.constant 0 : index
    %1 = vector.load %arg3[%c0_1, %c0_2] : memref<512x512xbf16, #tpu.memory_space<vmem>>, vector<512x512xbf16>
    %cst = arith.constant dense<0.000000e+00> : vector<20x512xf32>
    %2 = tpu.matmul %0, %1, %cst {dimension_numbers = #tpu.dot_dimension_numbers<[1], [0], [0], [1], [0, 0, 1, 1], [], []>} : vector<20x512xbf16>, vector<512x512xbf16>, vector<20x512xf32> -> vector<20x512xf32>
    %c0_3 = arith.constant 0 : index
    %c0_4 = arith.constant 0 : index
    %3 = vector.load %arg4[%c0_3, %c0_4] : memref<1x512xf32, #tpu.memory_space<vmem>>, vector<1x512xf32>
    %4 = vector.broadcast %3 : vector<1x512xf32> to vector<20x512xf32>
    %5 = arith.addf %2, %4 : vector<20x512xf32>
    %c0_5 = arith.constant 0 : index
    %c0_6 = arith.constant 0 : index
    %6 = vector.load %arg2[%c0_5, %c0_6] : memref<20x512xf32, #tpu.memory_space<vmem>>, vector<20x512xf32>
    %7 = arith.addf %5, %6 : vector<20x512xf32>
    %c0_7 = arith.constant 0 : index
    %c0_8 = arith.constant 0 : index
    %8 = vector.load %arg5[%c0_7, %c0_8] : memref<20x512xf32, #tpu.memory_space<vmem>>, vector<20x512xf32>
    tpu.vector_store %arg5[%c0_7, %c0_8], %7 {strides = array<i32>} : memref<20x512xf32, #tpu.memory_space<vmem>>, vector<20x512xf32>,
    return
  }
  func.func @transform_0(%arg0: i32) -> (i32, i32) {
    %c0_i32 = arith.constant 0 : i32
    %c0_i32_0 = arith.constant 0 : i32
    return %arg0, %c0_i32 : i32, i32
  }
  func.func @transform_1(%arg0: i32) -> (i32, i32) {
    %c0_i32 = arith.constant 0 : i32
    %c0_i32_0 = arith.constant 0 : i32
    return %arg0, %c0_i32 : i32, i32
  }
  func.func @transform_2(%arg0: i32) -> (i32, i32) {
    %c0_i32 = arith.constant 0 : i32
    %c0_i32_0 = arith.constant 0 : i32
    %c0_i32_1 = arith.constant 0 : i32
    return %c0_i32, %c0_i32_0 : i32, i32
  }
  func.func @transform_3(%arg0: i32) -> (i32, i32) {
    %c0_i32 = arith.constant 0 : i32
    %c0_i32_0 = arith.constant 0 : i32
    %c0_i32_1 = arith.constant 0 : i32
    return %c0_i32, %c0_i32_0 : i32, i32
  }
  func.func @transform_4(%arg0: i32) -> (i32, i32) {
    %c0_i32 = arith.constant 0 : i32
    %c0_i32_0 = arith.constant 0 : i32
    return %arg0, %c0_i32 : i32, i32
  }
}

module attributes {stable_mosaic.version = 11 : i64} {
  func.func @_ppeg_kernel(%arg0: i32, %arg1: i32, %arg2: memref<1x3x3x128xf32, #tpu.memory_space<vmem>>, %arg3: memref<7x7x128xf32, #tpu.memory_space<vmem>>, %arg4: memref<1x128xf32, #tpu.memory_space<vmem>>, %arg5: memref<1x3x3x128xf32, #tpu.memory_space<vmem>>) attributes {dimension_semantics = [#tpu.dimension_semantics<parallel>, #tpu.dimension_semantics<parallel>], iteration_bounds = array<i64: 2, 4>, scalar_prefetch = 0 : i64, scratch_operands = 0 : i64, tpu.core_type = #tpu.core_type<tc>, window_params = [{transform_indices = @transform_0, window_bounds = array<i64: 1, 3, 3, 128>}, {transform_indices = @transform_1, window_bounds = array<i64: 7, 7, 128>}, {transform_indices = @transform_2, window_bounds = array<i64: 1, 128>}, {transform_indices = @transform_3, window_bounds = array<i64: 1, 3, 3, 128>}]} {
    %c0 = arith.constant 0 : index
    %c0_0 = arith.constant 0 : index
    %c0_1 = arith.constant 0 : index
    %c0_2 = arith.constant 0 : index
    %0 = vector.load %arg2[%c0, %c0_0, %c0_1, %c0_2] : memref<1x3x3x128xf32, #tpu.memory_space<vmem>>, vector<1x3x3x128xf32>
    %1 = vector.shape_cast %0 : vector<1x3x3x128xf32> to vector<3x3x128xf32>
    %c0_3 = arith.constant 0 : index
    %c0_4 = arith.constant 0 : index
    %2 = vector.load %arg4[%c0_3, %c0_4] : memref<1x128xf32, #tpu.memory_space<vmem>>, vector<1x128xf32>
    %3 = vector.shape_cast %2 : vector<1x128xf32> to vector<128xf32>
    %4 = vector.shape_cast %3 : vector<128xf32> to vector<1x1x128xf32>
    %5 = vector.broadcast %4 : vector<1x1x128xf32> to vector<3x3x128xf32>
    %6 = arith.addf %1, %5 : vector<3x3x128xf32>
    %cst = arith.constant 0.000000e+00 : f32
    %7 = vector.broadcast %cst : f32 to vector<3x3x128xf32>
    %8 = tpu.concatenate %7, %1, %7 in 0 : vector<3x3x128xf32>, vector<3x3x128xf32>, vector<3x3x128xf32> -> vector<9x3x128xf32>
    %cst_5 = arith.constant 0.000000e+00 : f32
    %9 = vector.broadcast %cst_5 : f32 to vector<9x2x128xf32>
    %10 = vector.extract_strided_slice %8 {offsets = [0, 0, 0], sizes = [9, 1, 128], strides = [1, 1, 1]} : vector<9x3x128xf32> to vector<9x1x128xf32>
    %11 = tpu.concatenate %9, %10 in 1 : vector<9x2x128xf32>, vector<9x1x128xf32> -> vector<9x3x128xf32>
    %c1 = arith.constant 1 : index
    %c1_6 = arith.constant 1 : index
    %c0_7 = arith.constant 0 : index
    %12 = vector.load %arg3[%c1, %c1_6, %c0_7] : memref<7x7x128xf32, #tpu.memory_space<vmem>>, vector<1x1x128xf32>
    %13 = vector.shape_cast %12 : vector<1x1x128xf32> to vector<128xf32>
    %14 = vector.extract_strided_slice %11 {offsets = [1, 0, 0], sizes = [3, 3, 128], strides = [1, 1, 1]} : vector<9x3x128xf32> to vector<3x3x128xf32>
    %15 = vector.shape_cast %13 : vector<128xf32> to vector<1x1x128xf32>
    %16 = vector.broadcast %15 : vector<1x1x128xf32> to vector<3x3x128xf32>
    %17 = arith.mulf %16, %14 : vector<3x3x128xf32>
    %18 = arith.addf %6, %17 : vector<3x3x128xf32>
    %c2 = arith.constant 2 : index
    %c1_8 = arith.constant 1 : index
    %c0_9 = arith.constant 0 : index
    %19 = vector.load %arg3[%c2, %c1_8, %c0_9] : memref<7x7x128xf32, #tpu.memory_space<vmem>>, vector<1x1x128xf32>
    %20 = vector.shape_cast %19 : vector<1x1x128xf32> to vector<128xf32>
    %21 = vector.extract_strided_slice %11 {offsets = [2, 0, 0], sizes = [3, 3, 128], strides = [1, 1, 1]} : vector<9x3x128xf32> to vector<3x3x128xf32>
    %22 = vector.shape_cast %20 : vector<128xf32> to vector<1x1x128xf32>
    %23 = vector.broadcast %22 : vector<1x1x128xf32> to vector<3x3x128xf32>
    %24 = arith.mulf %23, %21 : vector<3x3x128xf32>
    %25 = arith.addf %18, %24 : vector<3x3x128xf32>
    %c3 = arith.constant 3 : index
    %c1_10 = arith.constant 1 : index
    %c0_11 = arith.constant 0 : index
    %26 = vector.load %arg3[%c3, %c1_10, %c0_11] : memref<7x7x128xf32, #tpu.memory_space<vmem>>, vector<1x1x128xf32>
    %27 = vector.shape_cast %26 : vector<1x1x128xf32> to vector<128xf32>
    %28 = vector.extract_strided_slice %11 {offsets = [3, 0, 0], sizes = [3, 3, 128], strides = [1, 1, 1]} : vector<9x3x128xf32> to vector<3x3x128xf32>
    %29 = vector.shape_cast %27 : vector<128xf32> to vector<1x1x128xf32>
    %30 = vector.broadcast %29 : vector<1x1x128xf32> to vector<3x3x128xf32>
    %31 = arith.mulf %30, %28 : vector<3x3x128xf32>
    %32 = arith.addf %25, %31 : vector<3x3x128xf32>
    %c4 = arith.constant 4 : index
    %c1_12 = arith.constant 1 : index
    %c0_13 = arith.constant 0 : index
    %33 = vector.load %arg3[%c4, %c1_12, %c0_13] : memref<7x7x128xf32, #tpu.memory_space<vmem>>, vector<1x1x128xf32>
    %34 = vector.shape_cast %33 : vector<1x1x128xf32> to vector<128xf32>
    %35 = vector.extract_strided_slice %11 {offsets = [4, 0, 0], sizes = [3, 3, 128], strides = [1, 1, 1]} : vector<9x3x128xf32> to vector<3x3x128xf32>
    %36 = vector.shape_cast %34 : vector<128xf32> to vector<1x1x128xf32>
    %37 = vector.broadcast %36 : vector<1x1x128xf32> to vector<3x3x128xf32>
    %38 = arith.mulf %37, %35 : vector<3x3x128xf32>
    %39 = arith.addf %32, %38 : vector<3x3x128xf32>
    %c5 = arith.constant 5 : index
    %c1_14 = arith.constant 1 : index
    %c0_15 = arith.constant 0 : index
    %40 = vector.load %arg3[%c5, %c1_14, %c0_15] : memref<7x7x128xf32, #tpu.memory_space<vmem>>, vector<1x1x128xf32>
    %41 = vector.shape_cast %40 : vector<1x1x128xf32> to vector<128xf32>
    %42 = vector.extract_strided_slice %11 {offsets = [5, 0, 0], sizes = [3, 3, 128], strides = [1, 1, 1]} : vector<9x3x128xf32> to vector<3x3x128xf32>
    %43 = vector.shape_cast %41 : vector<128xf32> to vector<1x1x128xf32>
    %44 = vector.broadcast %43 : vector<1x1x128xf32> to vector<3x3x128xf32>
    %45 = arith.mulf %44, %42 : vector<3x3x128xf32>
    %46 = arith.addf %39, %45 : vector<3x3x128xf32>
    %cst_16 = arith.constant 0.000000e+00 : f32
    %47 = vector.broadcast %cst_16 : f32 to vector<9x1x128xf32>
    %48 = vector.extract_strided_slice %8 {offsets = [0, 0, 0], sizes = [9, 2, 128], strides = [1, 1, 1]} : vector<9x3x128xf32> to vector<9x2x128xf32>
    %49 = tpu.concatenate %47, %48 in 1 : vector<9x1x128xf32>, vector<9x2x128xf32> -> vector<9x3x128xf32>
    %c1_17 = arith.constant 1 : index
    %c2_18 = arith.constant 2 : index
    %c0_19 = arith.constant 0 : index
    %50 = vector.load %arg3[%c1_17, %c2_18, %c0_19] : memref<7x7x128xf32, #tpu.memory_space<vmem>>, vector<1x1x128xf32>
    %51 = vector.shape_cast %50 : vector<1x1x128xf32> to vector<128xf32>
    %52 = vector.extract_strided_slice %49 {offsets = [1, 0, 0], sizes = [3, 3, 128], strides = [1, 1, 1]} : vector<9x3x128xf32> to vector<3x3x128xf32>
    %53 = vector.shape_cast %51 : vector<128xf32> to vector<1x1x128xf32>
    %54 = vector.broadcast %53 : vector<1x1x128xf32> to vector<3x3x128xf32>
    %55 = arith.mulf %54, %52 : vector<3x3x128xf32>
    %56 = arith.addf %46, %55 : vector<3x3x128xf32>
    %c2_20 = arith.constant 2 : index
    %c2_21 = arith.constant 2 : index
    %c0_22 = arith.constant 0 : index
    %57 = vector.load %arg3[%c2_20, %c2_21, %c0_22] : memref<7x7x128xf32, #tpu.memory_space<vmem>>, vector<1x1x128xf32>
    %58 = vector.shape_cast %57 : vector<1x1x128xf32> to vector<128xf32>
    %59 = vector.extract_strided_slice %49 {offsets = [2, 0, 0], sizes = [3, 3, 128], strides = [1, 1, 1]} : vector<9x3x128xf32> to vector<3x3x128xf32>
    %60 = vector.shape_cast %58 : vector<128xf32> to vector<1x1x128xf32>
    %61 = vector.broadcast %60 : vector<1x1x128xf32> to vector<3x3x128xf32>
    %62 = arith.mulf %61, %59 : vector<3x3x128xf32>
    %63 = arith.addf %56, %62 : vector<3x3x128xf32>
    %c3_23 = arith.constant 3 : index
    %c2_24 = arith.constant 2 : index
    %c0_25 = arith.constant 0 : index
    %64 = vector.load %arg3[%c3_23, %c2_24, %c0_25] : memref<7x7x128xf32, #tpu.memory_space<vmem>>, vector<1x1x128xf32>
    %65 = vector.shape_cast %64 : vector<1x1x128xf32> to vector<128xf32>
    %66 = vector.extract_strided_slice %49 {offsets = [3, 0, 0], sizes = [3, 3, 128], strides = [1, 1, 1]} : vector<9x3x128xf32> to vector<3x3x128xf32>
    %67 = vector.shape_cast %65 : vector<128xf32> to vector<1x1x128xf32>
    %68 = vector.broadcast %67 : vector<1x1x128xf32> to vector<3x3x128xf32>
    %69 = arith.mulf %68, %66 : vector<3x3x128xf32>
    %70 = arith.addf %63, %69 : vector<3x3x128xf32>
    %c4_26 = arith.constant 4 : index
    %c2_27 = arith.constant 2 : index
    %c0_28 = arith.constant 0 : index
    %71 = vector.load %arg3[%c4_26, %c2_27, %c0_28] : memref<7x7x128xf32, #tpu.memory_space<vmem>>, vector<1x1x128xf32>
    %72 = vector.shape_cast %71 : vector<1x1x128xf32> to vector<128xf32>
    %73 = vector.extract_strided_slice %49 {offsets = [4, 0, 0], sizes = [3, 3, 128], strides = [1, 1, 1]} : vector<9x3x128xf32> to vector<3x3x128xf32>
    %74 = vector.shape_cast %72 : vector<128xf32> to vector<1x1x128xf32>
    %75 = vector.broadcast %74 : vector<1x1x128xf32> to vector<3x3x128xf32>
    %76 = arith.mulf %75, %73 : vector<3x3x128xf32>
    %77 = arith.addf %70, %76 : vector<3x3x128xf32>
    %c5_29 = arith.constant 5 : index
    %c2_30 = arith.constant 2 : index
    %c0_31 = arith.constant 0 : index
    %78 = vector.load %arg3[%c5_29, %c2_30, %c0_31] : memref<7x7x128xf32, #tpu.memory_space<vmem>>, vector<1x1x128xf32>
    %79 = vector.shape_cast %78 : vector<1x1x128xf32> to vector<128xf32>
    %80 = vector.extract_strided_slice %49 {offsets = [5, 0, 0], sizes = [3, 3, 128], strides = [1, 1, 1]} : vector<9x3x128xf32> to vector<3x3x128xf32>
    %81 = vector.shape_cast %79 : vector<128xf32> to vector<1x1x128xf32>
    %82 = vector.broadcast %81 : vector<1x1x128xf32> to vector<3x3x128xf32>
    %83 = arith.mulf %82, %80 : vector<3x3x128xf32>
    %84 = arith.addf %77, %83 : vector<3x3x128xf32>
    %c1_32 = arith.constant 1 : index
    %c3_33 = arith.constant 3 : index
    %c0_34 = arith.constant 0 : index
    %85 = vector.load %arg3[%c1_32, %c3_33, %c0_34] : memref<7x7x128xf32, #tpu.memory_space<vmem>>, vector<1x1x128xf32>
    %86 = vector.shape_cast %85 : vector<1x1x128xf32> to vector<128xf32>
    %87 = vector.extract_strided_slice %8 {offsets = [1, 0, 0], sizes = [3, 3, 128], strides = [1, 1, 1]} : vector<9x3x128xf32> to vector<3x3x128xf32>
    %88 = vector.shape_cast %86 : vector<128xf32> to vector<1x1x128xf32>
    %89 = vector.broadcast %88 : vector<1x1x128xf32> to vector<3x3x128xf32>
    %90 = arith.mulf %89, %87 : vector<3x3x128xf32>
    %91 = arith.addf %84, %90 : vector<3x3x128xf32>
    %c2_35 = arith.constant 2 : index
    %c3_36 = arith.constant 3 : index
    %c0_37 = arith.constant 0 : index
    %92 = vector.load %arg3[%c2_35, %c3_36, %c0_37] : memref<7x7x128xf32, #tpu.memory_space<vmem>>, vector<1x1x128xf32>
    %93 = vector.shape_cast %92 : vector<1x1x128xf32> to vector<128xf32>
    %94 = vector.extract_strided_slice %8 {offsets = [2, 0, 0], sizes = [3, 3, 128], strides = [1, 1, 1]} : vector<9x3x128xf32> to vector<3x3x128xf32>
    %95 = vector.shape_cast %93 : vector<128xf32> to vector<1x1x128xf32>
    %96 = vector.broadcast %95 : vector<1x1x128xf32> to vector<3x3x128xf32>
    %97 = arith.mulf %96, %94 : vector<3x3x128xf32>
    %98 = arith.addf %91, %97 : vector<3x3x128xf32>
    %c3_38 = arith.constant 3 : index
    %c3_39 = arith.constant 3 : index
    %c0_40 = arith.constant 0 : index
    %99 = vector.load %arg3[%c3_38, %c3_39, %c0_40] : memref<7x7x128xf32, #tpu.memory_space<vmem>>, vector<1x1x128xf32>
    %100 = vector.shape_cast %99 : vector<1x1x128xf32> to vector<128xf32>
    %101 = vector.extract_strided_slice %8 {offsets = [3, 0, 0], sizes = [3, 3, 128], strides = [1, 1, 1]} : vector<9x3x128xf32> to vector<3x3x128xf32>
    %102 = vector.shape_cast %100 : vector<128xf32> to vector<1x1x128xf32>
    %103 = vector.broadcast %102 : vector<1x1x128xf32> to vector<3x3x128xf32>
    %104 = arith.mulf %103, %101 : vector<3x3x128xf32>
    %105 = arith.addf %98, %104 : vector<3x3x128xf32>
    %c4_41 = arith.constant 4 : index
    %c3_42 = arith.constant 3 : index
    %c0_43 = arith.constant 0 : index
    %106 = vector.load %arg3[%c4_41, %c3_42, %c0_43] : memref<7x7x128xf32, #tpu.memory_space<vmem>>, vector<1x1x128xf32>
    %107 = vector.shape_cast %106 : vector<1x1x128xf32> to vector<128xf32>
    %108 = vector.extract_strided_slice %8 {offsets = [4, 0, 0], sizes = [3, 3, 128], strides = [1, 1, 1]} : vector<9x3x128xf32> to vector<3x3x128xf32>
    %109 = vector.shape_cast %107 : vector<128xf32> to vector<1x1x128xf32>
    %110 = vector.broadcast %109 : vector<1x1x128xf32> to vector<3x3x128xf32>
    %111 = arith.mulf %110, %108 : vector<3x3x128xf32>
    %112 = arith.addf %105, %111 : vector<3x3x128xf32>
    %c5_44 = arith.constant 5 : index
    %c3_45 = arith.constant 3 : index
    %c0_46 = arith.constant 0 : index
    %113 = vector.load %arg3[%c5_44, %c3_45, %c0_46] : memref<7x7x128xf32, #tpu.memory_space<vmem>>, vector<1x1x128xf32>
    %114 = vector.shape_cast %113 : vector<1x1x128xf32> to vector<128xf32>
    %115 = vector.extract_strided_slice %8 {offsets = [5, 0, 0], sizes = [3, 3, 128], strides = [1, 1, 1]} : vector<9x3x128xf32> to vector<3x3x128xf32>
    %116 = vector.shape_cast %114 : vector<128xf32> to vector<1x1x128xf32>
    %117 = vector.broadcast %116 : vector<1x1x128xf32> to vector<3x3x128xf32>
    %118 = arith.mulf %117, %115 : vector<3x3x128xf32>
    %119 = arith.addf %112, %118 : vector<3x3x128xf32>
    %cst_47 = arith.constant 0.000000e+00 : f32
    %120 = vector.broadcast %cst_47 : f32 to vector<9x1x128xf32>
    %121 = vector.extract_strided_slice %8 {offsets = [0, 1, 0], sizes = [9, 2, 128], strides = [1, 1, 1]} : vector<9x3x128xf32> to vector<9x2x128xf32>
    %122 = tpu.concatenate %121, %120 in 1 : vector<9x2x128xf32>, vector<9x1x128xf32> -> vector<9x3x128xf32>
    %c1_48 = arith.constant 1 : index
    %c4_49 = arith.constant 4 : index
    %c0_50 = arith.constant 0 : index
    %123 = vector.load %arg3[%c1_48, %c4_49, %c0_50] : memref<7x7x128xf32, #tpu.memory_space<vmem>>, vector<1x1x128xf32>
    %124 = vector.shape_cast %123 : vector<1x1x128xf32> to vector<128xf32>
    %125 = vector.extract_strided_slice %122 {offsets = [1, 0, 0], sizes = [3, 3, 128], strides = [1, 1, 1]} : vector<9x3x128xf32> to vector<3x3x128xf32>
    %126 = vector.shape_cast %124 : vector<128xf32> to vector<1x1x128xf32>
    %127 = vector.broadcast %126 : vector<1x1x128xf32> to vector<3x3x128xf32>
    %128 = arith.mulf %127, %125 : vector<3x3x128xf32>
    %129 = arith.addf %119, %128 : vector<3x3x128xf32>
    %c2_51 = arith.constant 2 : index
    %c4_52 = arith.constant 4 : index
    %c0_53 = arith.constant 0 : index
    %130 = vector.load %arg3[%c2_51, %c4_52, %c0_53] : memref<7x7x128xf32, #tpu.memory_space<vmem>>, vector<1x1x128xf32>
    %131 = vector.shape_cast %130 : vector<1x1x128xf32> to vector<128xf32>
    %132 = vector.extract_strided_slice %122 {offsets = [2, 0, 0], sizes = [3, 3, 128], strides = [1, 1, 1]} : vector<9x3x128xf32> to vector<3x3x128xf32>
    %133 = vector.shape_cast %131 : vector<128xf32> to vector<1x1x128xf32>
    %134 = vector.broadcast %133 : vector<1x1x128xf32> to vector<3x3x128xf32>
    %135 = arith.mulf %134, %132 : vector<3x3x128xf32>
    %136 = arith.addf %129, %135 : vector<3x3x128xf32>
    %c3_54 = arith.constant 3 : index
    %c4_55 = arith.constant 4 : index
    %c0_56 = arith.constant 0 : index
    %137 = vector.load %arg3[%c3_54, %c4_55, %c0_56] : memref<7x7x128xf32, #tpu.memory_space<vmem>>, vector<1x1x128xf32>
    %138 = vector.shape_cast %137 : vector<1x1x128xf32> to vector<128xf32>
    %139 = vector.extract_strided_slice %122 {offsets = [3, 0, 0], sizes = [3, 3, 128], strides = [1, 1, 1]} : vector<9x3x128xf32> to vector<3x3x128xf32>
    %140 = vector.shape_cast %138 : vector<128xf32> to vector<1x1x128xf32>
    %141 = vector.broadcast %140 : vector<1x1x128xf32> to vector<3x3x128xf32>
    %142 = arith.mulf %141, %139 : vector<3x3x128xf32>
    %143 = arith.addf %136, %142 : vector<3x3x128xf32>
    %c4_57 = arith.constant 4 : index
    %c4_58 = arith.constant 4 : index
    %c0_59 = arith.constant 0 : index
    %144 = vector.load %arg3[%c4_57, %c4_58, %c0_59] : memref<7x7x128xf32, #tpu.memory_space<vmem>>, vector<1x1x128xf32>
    %145 = vector.shape_cast %144 : vector<1x1x128xf32> to vector<128xf32>
    %146 = vector.extract_strided_slice %122 {offsets = [4, 0, 0], sizes = [3, 3, 128], strides = [1, 1, 1]} : vector<9x3x128xf32> to vector<3x3x128xf32>
    %147 = vector.shape_cast %145 : vector<128xf32> to vector<1x1x128xf32>
    %148 = vector.broadcast %147 : vector<1x1x128xf32> to vector<3x3x128xf32>
    %149 = arith.mulf %148, %146 : vector<3x3x128xf32>
    %150 = arith.addf %143, %149 : vector<3x3x128xf32>
    %c5_60 = arith.constant 5 : index
    %c4_61 = arith.constant 4 : index
    %c0_62 = arith.constant 0 : index
    %151 = vector.load %arg3[%c5_60, %c4_61, %c0_62] : memref<7x7x128xf32, #tpu.memory_space<vmem>>, vector<1x1x128xf32>
    %152 = vector.shape_cast %151 : vector<1x1x128xf32> to vector<128xf32>
    %153 = vector.extract_strided_slice %122 {offsets = [5, 0, 0], sizes = [3, 3, 128], strides = [1, 1, 1]} : vector<9x3x128xf32> to vector<3x3x128xf32>
    %154 = vector.shape_cast %152 : vector<128xf32> to vector<1x1x128xf32>
    %155 = vector.broadcast %154 : vector<1x1x128xf32> to vector<3x3x128xf32>
    %156 = arith.mulf %155, %153 : vector<3x3x128xf32>
    %157 = arith.addf %150, %156 : vector<3x3x128xf32>
    %cst_63 = arith.constant 0.000000e+00 : f32
    %158 = vector.broadcast %cst_63 : f32 to vector<9x2x128xf32>
    %159 = vector.extract_strided_slice %8 {offsets = [0, 2, 0], sizes = [9, 1, 128], strides = [1, 1, 1]} : vector<9x3x128xf32> to vector<9x1x128xf32>
    %160 = tpu.concatenate %159, %158 in 1 : vector<9x1x128xf32>, vector<9x2x128xf32> -> vector<9x3x128xf32>
    %c1_64 = arith.constant 1 : index
    %c5_65 = arith.constant 5 : index
    %c0_66 = arith.constant 0 : index
    %161 = vector.load %arg3[%c1_64, %c5_65, %c0_66] : memref<7x7x128xf32, #tpu.memory_space<vmem>>, vector<1x1x128xf32>
    %162 = vector.shape_cast %161 : vector<1x1x128xf32> to vector<128xf32>
    %163 = vector.extract_strided_slice %160 {offsets = [1, 0, 0], sizes = [3, 3, 128], strides = [1, 1, 1]} : vector<9x3x128xf32> to vector<3x3x128xf32>
    %164 = vector.shape_cast %162 : vector<128xf32> to vector<1x1x128xf32>
    %165 = vector.broadcast %164 : vector<1x1x128xf32> to vector<3x3x128xf32>
    %166 = arith.mulf %165, %163 : vector<3x3x128xf32>
    %167 = arith.addf %157, %166 : vector<3x3x128xf32>
    %c2_67 = arith.constant 2 : index
    %c5_68 = arith.constant 5 : index
    %c0_69 = arith.constant 0 : index
    %168 = vector.load %arg3[%c2_67, %c5_68, %c0_69] : memref<7x7x128xf32, #tpu.memory_space<vmem>>, vector<1x1x128xf32>
    %169 = vector.shape_cast %168 : vector<1x1x128xf32> to vector<128xf32>
    %170 = vector.extract_strided_slice %160 {offsets = [2, 0, 0], sizes = [3, 3, 128], strides = [1, 1, 1]} : vector<9x3x128xf32> to vector<3x3x128xf32>
    %171 = vector.shape_cast %169 : vector<128xf32> to vector<1x1x128xf32>
    %172 = vector.broadcast %171 : vector<1x1x128xf32> to vector<3x3x128xf32>
    %173 = arith.mulf %172, %170 : vector<3x3x128xf32>
    %174 = arith.addf %167, %173 : vector<3x3x128xf32>
    %c3_70 = arith.constant 3 : index
    %c5_71 = arith.constant 5 : index
    %c0_72 = arith.constant 0 : index
    %175 = vector.load %arg3[%c3_70, %c5_71, %c0_72] : memref<7x7x128xf32, #tpu.memory_space<vmem>>, vector<1x1x128xf32>
    %176 = vector.shape_cast %175 : vector<1x1x128xf32> to vector<128xf32>
    %177 = vector.extract_strided_slice %160 {offsets = [3, 0, 0], sizes = [3, 3, 128], strides = [1, 1, 1]} : vector<9x3x128xf32> to vector<3x3x128xf32>
    %178 = vector.shape_cast %176 : vector<128xf32> to vector<1x1x128xf32>
    %179 = vector.broadcast %178 : vector<1x1x128xf32> to vector<3x3x128xf32>
    %180 = arith.mulf %179, %177 : vector<3x3x128xf32>
    %181 = arith.addf %174, %180 : vector<3x3x128xf32>
    %c4_73 = arith.constant 4 : index
    %c5_74 = arith.constant 5 : index
    %c0_75 = arith.constant 0 : index
    %182 = vector.load %arg3[%c4_73, %c5_74, %c0_75] : memref<7x7x128xf32, #tpu.memory_space<vmem>>, vector<1x1x128xf32>
    %183 = vector.shape_cast %182 : vector<1x1x128xf32> to vector<128xf32>
    %184 = vector.extract_strided_slice %160 {offsets = [4, 0, 0], sizes = [3, 3, 128], strides = [1, 1, 1]} : vector<9x3x128xf32> to vector<3x3x128xf32>
    %185 = vector.shape_cast %183 : vector<128xf32> to vector<1x1x128xf32>
    %186 = vector.broadcast %185 : vector<1x1x128xf32> to vector<3x3x128xf32>
    %187 = arith.mulf %186, %184 : vector<3x3x128xf32>
    %188 = arith.addf %181, %187 : vector<3x3x128xf32>
    %c5_76 = arith.constant 5 : index
    %c5_77 = arith.constant 5 : index
    %c0_78 = arith.constant 0 : index
    %189 = vector.load %arg3[%c5_76, %c5_77, %c0_78] : memref<7x7x128xf32, #tpu.memory_space<vmem>>, vector<1x1x128xf32>
    %190 = vector.shape_cast %189 : vector<1x1x128xf32> to vector<128xf32>
    %191 = vector.extract_strided_slice %160 {offsets = [5, 0, 0], sizes = [3, 3, 128], strides = [1, 1, 1]} : vector<9x3x128xf32> to vector<3x3x128xf32>
    %192 = vector.shape_cast %190 : vector<128xf32> to vector<1x1x128xf32>
    %193 = vector.broadcast %192 : vector<1x1x128xf32> to vector<3x3x128xf32>
    %194 = arith.mulf %193, %191 : vector<3x3x128xf32>
    %195 = arith.addf %188, %194 : vector<3x3x128xf32>
    %c0_79 = arith.constant 0 : index
    %c0_80 = arith.constant 0 : index
    %c0_81 = arith.constant 0 : index
    %c0_82 = arith.constant 0 : index
    %196 = vector.load %arg5[%c0_79, %c0_80, %c0_81, %c0_82] : memref<1x3x3x128xf32, #tpu.memory_space<vmem>>, vector<1x3x3x128xf32>
    %197 = vector.shape_cast %196 : vector<1x3x3x128xf32> to vector<3x3x128xf32>
    %198 = vector.shape_cast %195 : vector<3x3x128xf32> to vector<1x3x3x128xf32>
    tpu.vector_store %arg5[%c0_79, %c0_80, %c0_81, %c0_82], %198 {strides = array<i32>} : memref<1x3x3x128xf32, #tpu.memory_space<vmem>>, vector<1x3x3x128xf32>,
    return
  }
  func.func @transform_0(%arg0: i32, %arg1: i32) -> (i32, i32, i32, i32) {
    %c0_i32 = arith.constant 0 : i32
    %c0_i32_0 = arith.constant 0 : i32
    %c0_i32_1 = arith.constant 0 : i32
    return %arg0, %c0_i32, %c0_i32_0, %arg1 : i32, i32, i32, i32
  }
  func.func @transform_1(%arg0: i32, %arg1: i32) -> (i32, i32, i32) {
    %c0_i32 = arith.constant 0 : i32
    %c0_i32_0 = arith.constant 0 : i32
    %c0_i32_1 = arith.constant 0 : i32
    return %c0_i32, %c0_i32_0, %arg1 : i32, i32, i32
  }
  func.func @transform_2(%arg0: i32, %arg1: i32) -> (i32, i32) {
    %c0_i32 = arith.constant 0 : i32
    %c0_i32_0 = arith.constant 0 : i32
    return %c0_i32, %arg1 : i32, i32
  }
  func.func @transform_3(%arg0: i32, %arg1: i32) -> (i32, i32, i32, i32) {
    %c0_i32 = arith.constant 0 : i32
    %c0_i32_0 = arith.constant 0 : i32
    %c0_i32_1 = arith.constant 0 : i32
    return %arg0, %c0_i32, %c0_i32_0, %arg1 : i32, i32, i32, i32
  }
}

module attributes {stable_mosaic.version = 11 : i64} {
  func.func @_ln_matmul_kernel(%arg0: i32, %arg1: memref<20x512xf32, #tpu.memory_space<vmem>>, %arg2: memref<1x512xf32, #tpu.memory_space<vmem>>, %arg3: memref<1x512xf32, #tpu.memory_space<vmem>>, %arg4: memref<512x1536xbf16, #tpu.memory_space<vmem>>, %arg5: memref<1x1536xf32, #tpu.memory_space<vmem>>, %arg6: memref<20x1536xbf16, #tpu.memory_space<vmem>>) attributes {dimension_semantics = [#tpu.dimension_semantics<parallel>], iteration_bounds = array<i64: 1>, scalar_prefetch = 0 : i64, scratch_operands = 0 : i64, tpu.core_type = #tpu.core_type<tc>, window_params = [{transform_indices = @transform_0, window_bounds = array<i64: 20, 512>}, {pipeline_mode = #tpu.pipeline_mode<synchronous>, transform_indices = @transform_1, window_bounds = array<i64: 1, 512>}, {pipeline_mode = #tpu.pipeline_mode<synchronous>, transform_indices = @transform_2, window_bounds = array<i64: 1, 512>}, {pipeline_mode = #tpu.pipeline_mode<synchronous>, transform_indices = @transform_3, window_bounds = array<i64: 512, 1536>}, {pipeline_mode = #tpu.pipeline_mode<synchronous>, transform_indices = @transform_4, window_bounds = array<i64: 1, 1536>}, {transform_indices = @transform_5, window_bounds = array<i64: 20, 1536>}]} {
    %c0 = arith.constant 0 : index
    %c0_0 = arith.constant 0 : index
    %0 = vector.load %arg1[%c0, %c0_0] : memref<20x512xf32, #tpu.memory_space<vmem>>, vector<20x512xf32>
    %cst = arith.constant dense<0.000000e+00> : vector<20xf32>
    %1 = vector.multi_reduction <add>, %0, %cst [1] : vector<20x512xf32> to vector<20xf32>
    %2 = vector.shape_cast %1 : vector<20xf32> to vector<20x1xf32>
    %cst_1 = arith.constant 5.120000e+02 : f32
    %3 = vector.broadcast %cst_1 : f32 to vector<20x1xf32>
    %4 = arith.divf %2, %3 : vector<20x1xf32>
    %5 = vector.broadcast %4 : vector<20x1xf32> to vector<20x512xf32>
    %6 = arith.subf %0, %5 : vector<20x512xf32>
    %7 = arith.mulf %6, %6 : vector<20x512xf32>
    %cst_2 = arith.constant dense<0.000000e+00> : vector<20xf32>
    %8 = vector.multi_reduction <add>, %7, %cst_2 [1] : vector<20x512xf32> to vector<20xf32>
    %9 = vector.shape_cast %8 : vector<20xf32> to vector<20x1xf32>
    %cst_3 = arith.constant 5.120000e+02 : f32
    %10 = vector.broadcast %cst_3 : f32 to vector<20x1xf32>
    %11 = arith.divf %9, %10 : vector<20x1xf32>
    %12 = vector.broadcast %4 : vector<20x1xf32> to vector<20x512xf32>
    %13 = arith.subf %0, %12 : vector<20x512xf32>
    %cst_4 = arith.constant 9.99999974E-6 : f32
    %14 = vector.broadcast %cst_4 : f32 to vector<20x1xf32>
    %15 = arith.addf %11, %14 : vector<20x1xf32>
    %16 = math.rsqrt %15 : vector<20x1xf32>
    %17 = vector.broadcast %16 : vector<20x1xf32> to vector<20x512xf32>
    %18 = arith.mulf %13, %17 : vector<20x512xf32>
    %c0_5 = arith.constant 0 : index
    %c0_6 = arith.constant 0 : index
    %19 = vector.load %arg2[%c0_5, %c0_6] : memref<1x512xf32, #tpu.memory_space<vmem>>, vector<1x512xf32>
    %20 = vector.broadcast %19 : vector<1x512xf32> to vector<20x512xf32>
    %21 = arith.mulf %18, %20 : vector<20x512xf32>
    %c0_7 = arith.constant 0 : index
    %c0_8 = arith.constant 0 : index
    %22 = vector.load %arg3[%c0_7, %c0_8] : memref<1x512xf32, #tpu.memory_space<vmem>>, vector<1x512xf32>
    %23 = vector.broadcast %22 : vector<1x512xf32> to vector<20x512xf32>
    %24 = arith.addf %21, %23 : vector<20x512xf32>
    %25 = arith.truncf %24 : vector<20x512xf32> to vector<20x512xbf16>
    %c0_9 = arith.constant 0 : index
    %c0_10 = arith.constant 0 : index
    %26 = vector.load %arg4[%c0_9, %c0_10] : memref<512x1536xbf16, #tpu.memory_space<vmem>>, vector<512x1536xbf16>
    %cst_11 = arith.constant dense<0.000000e+00> : vector<20x1536xf32>
    %27 = tpu.matmul %25, %26, %cst_11 {dimension_numbers = #tpu.dot_dimension_numbers<[1], [0], [0], [1], [0, 0, 1, 1], [], []>} : vector<20x512xbf16>, vector<512x1536xbf16>, vector<20x1536xf32> -> vector<20x1536xf32>
    %c0_12 = arith.constant 0 : index
    %c0_13 = arith.constant 0 : index
    %28 = vector.load %arg5[%c0_12, %c0_13] : memref<1x1536xf32, #tpu.memory_space<vmem>>, vector<1x1536xf32>
    %29 = vector.broadcast %28 : vector<1x1536xf32> to vector<20x1536xf32>
    %30 = arith.addf %27, %29 : vector<20x1536xf32>
    %31 = arith.truncf %30 : vector<20x1536xf32> to vector<20x1536xbf16>
    %c0_14 = arith.constant 0 : index
    %c0_15 = arith.constant 0 : index
    %32 = vector.load %arg6[%c0_14, %c0_15] : memref<20x1536xbf16, #tpu.memory_space<vmem>>, vector<20x1536xbf16>
    tpu.vector_store %arg6[%c0_14, %c0_15], %31 {strides = array<i32>} : memref<20x1536xbf16, #tpu.memory_space<vmem>>, vector<20x1536xbf16>,
    return
  }
  func.func @transform_0(%arg0: i32) -> (i32, i32) {
    %c0_i32 = arith.constant 0 : i32
    %c0_i32_0 = arith.constant 0 : i32
    return %arg0, %c0_i32 : i32, i32
  }
  func.func @transform_1(%arg0: i32) -> (i32, i32) {
    %c0_i32 = arith.constant 0 : i32
    %c0_i32_0 = arith.constant 0 : i32
    %c0_i32_1 = arith.constant 0 : i32
    return %c0_i32, %c0_i32_0 : i32, i32
  }
  func.func @transform_2(%arg0: i32) -> (i32, i32) {
    %c0_i32 = arith.constant 0 : i32
    %c0_i32_0 = arith.constant 0 : i32
    %c0_i32_1 = arith.constant 0 : i32
    return %c0_i32, %c0_i32_0 : i32, i32
  }
  func.func @transform_3(%arg0: i32) -> (i32, i32) {
    %c0_i32 = arith.constant 0 : i32
    %c0_i32_0 = arith.constant 0 : i32
    %c0_i32_1 = arith.constant 0 : i32
    return %c0_i32, %c0_i32_0 : i32, i32
  }
  func.func @transform_4(%arg0: i32) -> (i32, i32) {
    %c0_i32 = arith.constant 0 : i32
    %c0_i32_0 = arith.constant 0 : i32
    %c0_i32_1 = arith.constant 0 : i32
    return %c0_i32, %c0_i32_0 : i32, i32
  }
  func.func @transform_5(%arg0: i32) -> (i32, i32) {
    %c0_i32 = arith.constant 0 : i32
    %c0_i32_0 = arith.constant 0 : i32
    return %arg0, %c0_i32 : i32, i32
  }
}

module attributes {stable_mosaic.version = 11 : i64} {
  func.func @_cls_head_kernel(%arg0: memref<2x512xf32, #tpu.memory_space<vmem>>, %arg1: memref<1x512xf32, #tpu.memory_space<vmem>>, %arg2: memref<1x512xf32, #tpu.memory_space<vmem>>, %arg3: memref<512x128xbf16, #tpu.memory_space<vmem>>, %arg4: memref<1x128xf32, #tpu.memory_space<vmem>>, %arg5: memref<2x512xf32, #tpu.memory_space<vmem>>, %arg6: memref<2x128xf32, #tpu.memory_space<vmem>>) attributes {dimension_semantics = [], scalar_prefetch = 0 : i64, scratch_operands = 0 : i64, tpu.core_type = #tpu.core_type<tc>} {
    %c0 = arith.constant 0 : index
    %c0_0 = arith.constant 0 : index
    %0 = vector.load %arg0[%c0, %c0_0] : memref<2x512xf32, #tpu.memory_space<vmem>>, vector<2x512xf32>
    %cst = arith.constant dense<0.000000e+00> : vector<2xf32>
    %1 = vector.multi_reduction <add>, %0, %cst [1] : vector<2x512xf32> to vector<2xf32>
    %2 = vector.shape_cast %1 : vector<2xf32> to vector<2x1xf32>
    %cst_1 = arith.constant 5.120000e+02 : f32
    %3 = vector.broadcast %cst_1 : f32 to vector<2x1xf32>
    %4 = arith.divf %2, %3 : vector<2x1xf32>
    %5 = vector.broadcast %4 : vector<2x1xf32> to vector<2x512xf32>
    %6 = arith.subf %0, %5 : vector<2x512xf32>
    %7 = arith.mulf %6, %6 : vector<2x512xf32>
    %cst_2 = arith.constant dense<0.000000e+00> : vector<2xf32>
    %8 = vector.multi_reduction <add>, %7, %cst_2 [1] : vector<2x512xf32> to vector<2xf32>
    %9 = vector.shape_cast %8 : vector<2xf32> to vector<2x1xf32>
    %cst_3 = arith.constant 5.120000e+02 : f32
    %10 = vector.broadcast %cst_3 : f32 to vector<2x1xf32>
    %11 = arith.divf %9, %10 : vector<2x1xf32>
    %12 = vector.broadcast %4 : vector<2x1xf32> to vector<2x512xf32>
    %13 = arith.subf %0, %12 : vector<2x512xf32>
    %cst_4 = arith.constant 9.99999974E-6 : f32
    %14 = vector.broadcast %cst_4 : f32 to vector<2x1xf32>
    %15 = arith.addf %11, %14 : vector<2x1xf32>
    %16 = math.rsqrt %15 : vector<2x1xf32>
    %17 = vector.broadcast %16 : vector<2x1xf32> to vector<2x512xf32>
    %18 = arith.mulf %13, %17 : vector<2x512xf32>
    %c0_5 = arith.constant 0 : index
    %c0_6 = arith.constant 0 : index
    %19 = vector.load %arg1[%c0_5, %c0_6] : memref<1x512xf32, #tpu.memory_space<vmem>>, vector<1x512xf32>
    %20 = vector.broadcast %19 : vector<1x512xf32> to vector<2x512xf32>
    %21 = arith.mulf %18, %20 : vector<2x512xf32>
    %c0_7 = arith.constant 0 : index
    %c0_8 = arith.constant 0 : index
    %22 = vector.load %arg2[%c0_7, %c0_8] : memref<1x512xf32, #tpu.memory_space<vmem>>, vector<1x512xf32>
    %23 = vector.broadcast %22 : vector<1x512xf32> to vector<2x512xf32>
    %24 = arith.addf %21, %23 : vector<2x512xf32>
    %c0_9 = arith.constant 0 : index
    %c0_10 = arith.constant 0 : index
    %25 = vector.load %arg5[%c0_9, %c0_10] : memref<2x512xf32, #tpu.memory_space<vmem>>, vector<2x512xf32>
    tpu.vector_store %arg5[%c0_9, %c0_10], %24 {strides = array<i32>} : memref<2x512xf32, #tpu.memory_space<vmem>>, vector<2x512xf32>,
    %26 = arith.truncf %24 : vector<2x512xf32> to vector<2x512xbf16>
    %c0_11 = arith.constant 0 : index
    %c0_12 = arith.constant 0 : index
    %27 = vector.load %arg3[%c0_11, %c0_12] : memref<512x128xbf16, #tpu.memory_space<vmem>>, vector<512x128xbf16>
    %cst_13 = arith.constant dense<0.000000e+00> : vector<2x128xf32>
    %28 = tpu.matmul %26, %27, %cst_13 {dimension_numbers = #tpu.dot_dimension_numbers<[1], [0], [0], [1], [0, 0, 1, 1], [], []>} : vector<2x512xbf16>, vector<512x128xbf16>, vector<2x128xf32> -> vector<2x128xf32>
    %c0_14 = arith.constant 0 : index
    %c0_15 = arith.constant 0 : index
    %29 = vector.load %arg4[%c0_14, %c0_15] : memref<1x128xf32, #tpu.memory_space<vmem>>, vector<1x128xf32>
    %30 = vector.broadcast %29 : vector<1x128xf32> to vector<2x128xf32>
    %31 = arith.addf %28, %30 : vector<2x128xf32>
    %c0_16 = arith.constant 0 : index
    %c0_17 = arith.constant 0 : index
    %32 = vector.load %arg6[%c0_16, %c0_17] : memref<2x128xf32, #tpu.memory_space<vmem>>, vector<2x128xf32>
    tpu.vector_store %arg6[%c0_16, %c0_17], %31 {strides = array<i32>} : memref<2x128xf32, #tpu.memory_space<vmem>>, vector<2x128xf32>,
    return
  }
}

module attributes {stable_mosaic.version = 11 : i64} {
  func.func @_graph_sim_kernel(%arg0: memref<8x512xf32, #tpu.memory_space<vmem>>, %arg1: memref<512x512xbf16, #tpu.memory_space<vmem>>, %arg2: memref<1x512xf32, #tpu.memory_space<vmem>>, %arg3: memref<8x8xf32, #tpu.memory_space<vmem>>) attributes {dimension_semantics = [], scalar_prefetch = 0 : i64, scratch_operands = 0 : i64, tpu.core_type = #tpu.core_type<tc>} {
    %c0 = arith.constant 0 : index
    %c0_0 = arith.constant 0 : index
    %0 = vector.load %arg0[%c0, %c0_0] : memref<8x512xf32, #tpu.memory_space<vmem>>, vector<8x512xf32>
    %1 = arith.truncf %0 : vector<8x512xf32> to vector<8x512xbf16>
    %c0_1 = arith.constant 0 : index
    %c0_2 = arith.constant 0 : index
    %2 = vector.load %arg1[%c0_1, %c0_2] : memref<512x512xbf16, #tpu.memory_space<vmem>>, vector<512x512xbf16>
    %cst = arith.constant dense<0.000000e+00> : vector<8x512xf32>
    %3 = tpu.matmul %1, %2, %cst {dimension_numbers = #tpu.dot_dimension_numbers<[1], [0], [0], [1], [0, 0, 1, 1], [], []>} : vector<8x512xbf16>, vector<512x512xbf16>, vector<8x512xf32> -> vector<8x512xf32>
    %c0_3 = arith.constant 0 : index
    %c0_4 = arith.constant 0 : index
    %4 = vector.load %arg2[%c0_3, %c0_4] : memref<1x512xf32, #tpu.memory_space<vmem>>, vector<1x512xf32>
    %5 = vector.broadcast %4 : vector<1x512xf32> to vector<8x512xf32>
    %6 = arith.addf %3, %5 : vector<8x512xf32>
    %cst_5 = arith.constant 0.000000e+00 : f32
    %7 = vector.broadcast %cst_5 : f32 to vector<8x512xf32>
    %8 = arith.cmpf ogt, %6, %7 : vector<8x512xf32>
    %cst_6 = arith.constant 0.00999999977 : f32
    %9 = vector.broadcast %cst_6 : f32 to vector<8x512xf32>
    %10 = arith.mulf %9, %6 : vector<8x512xf32>
    %11 = arith.select %8, %6, %10 : vector<8x512xi1>, vector<8x512xf32>
    %12 = arith.mulf %11, %11 : vector<8x512xf32>
    %cst_7 = arith.constant dense<0.000000e+00> : vector<8xf32>
    %13 = vector.multi_reduction <add>, %12, %cst_7 [1] : vector<8x512xf32> to vector<8xf32>
    %14 = vector.shape_cast %13 : vector<8xf32> to vector<8x1xf32>
    %cst_8 = arith.constant 9.99999996E-13 : f32
    %15 = vector.broadcast %cst_8 : f32 to vector<8x1xf32>
    %16 = arith.addf %14, %15 : vector<8x1xf32>
    %17 = math.rsqrt %16 : vector<8x1xf32>
    %18 = vector.broadcast %17 : vector<8x1xf32> to vector<8x512xf32>
    %19 = arith.mulf %11, %18 : vector<8x512xf32>
    %cst_9 = arith.constant dense<0.000000e+00> : vector<8x8xf32>
    %20 = tpu.matmul %19, %19, %cst_9 {dimension_numbers = #tpu.dot_dimension_numbers<[1], [1], [0], [0], [0, 0, 1, 0], [], []>} : vector<8x512xf32>, vector<8x512xf32>, vector<8x8xf32> -> vector<8x8xf32>
    %c0_10 = arith.constant 0 : index
    %c0_11 = arith.constant 0 : index
    %21 = vector.load %arg3[%c0_10, %c0_11] : memref<8x8xf32, #tpu.memory_space<vmem>>, vector<8x8xf32>
    tpu.vector_store %arg3[%c0_10, %c0_11], %20 {strides = array<i32>} : memref<8x8xf32, #tpu.memory_space<vmem>>, vector<8x8xf32>,
    return
  }
}

module attributes {stable_mosaic.version = 11 : i64} {
  func.func @_gcn_kernel(%arg0: memref<8x8xf32, #tpu.memory_space<vmem>>, %arg1: memref<8x512xf32, #tpu.memory_space<vmem>>, %arg2: memref<512x256xbf16, #tpu.memory_space<vmem>>, %arg3: memref<1x256xf32, #tpu.memory_space<vmem>>, %arg4: memref<256x128xbf16, #tpu.memory_space<vmem>>, %arg5: memref<1x128xf32, #tpu.memory_space<vmem>>, %arg6: memref<8x128xf32, #tpu.memory_space<vmem>>) attributes {dimension_semantics = [], scalar_prefetch = 0 : i64, scratch_operands = 0 : i64, tpu.core_type = #tpu.core_type<tc>} {
    %c0 = arith.constant 0 : index
    %c0_0 = arith.constant 0 : index
    %0 = vector.load %arg0[%c0, %c0_0] : memref<8x8xf32, #tpu.memory_space<vmem>>, vector<8x8xf32>
    %c0_1 = arith.constant 0 : index
    %c0_2 = arith.constant 0 : index
    %1 = vector.load %arg1[%c0_1, %c0_2] : memref<8x512xf32, #tpu.memory_space<vmem>>, vector<8x512xf32>
    %2 = arith.truncf %1 : vector<8x512xf32> to vector<8x512xbf16>
    %c0_3 = arith.constant 0 : index
    %c0_4 = arith.constant 0 : index
    %3 = vector.load %arg2[%c0_3, %c0_4] : memref<512x256xbf16, #tpu.memory_space<vmem>>, vector<512x256xbf16>
    %cst = arith.constant dense<0.000000e+00> : vector<8x256xf32>
    %4 = tpu.matmul %2, %3, %cst {dimension_numbers = #tpu.dot_dimension_numbers<[1], [0], [0], [1], [0, 0, 1, 1], [], []>} : vector<8x512xbf16>, vector<512x256xbf16>, vector<8x256xf32> -> vector<8x256xf32>
    %cst_5 = arith.constant dense<0.000000e+00> : vector<8x256xf32>
    %5 = tpu.matmul %0, %4, %cst_5 {dimension_numbers = #tpu.dot_dimension_numbers<[1], [0], [0], [1], [0, 0, 1, 1], [], []>} : vector<8x8xf32>, vector<8x256xf32>, vector<8x256xf32> -> vector<8x256xf32>
    %c0_6 = arith.constant 0 : index
    %c0_7 = arith.constant 0 : index
    %6 = vector.load %arg3[%c0_6, %c0_7] : memref<1x256xf32, #tpu.memory_space<vmem>>, vector<1x256xf32>
    %7 = vector.broadcast %6 : vector<1x256xf32> to vector<8x256xf32>
    %8 = arith.addf %5, %7 : vector<8x256xf32>
    %cst_8 = arith.constant 0.000000e+00 : f32
    %9 = vector.broadcast %cst_8 : f32 to vector<8x256xf32>
    %10 = arith.maximumf %8, %9 : vector<8x256xf32>
    %11 = arith.truncf %10 : vector<8x256xf32> to vector<8x256xbf16>
    %c0_9 = arith.constant 0 : index
    %c0_10 = arith.constant 0 : index
    %12 = vector.load %arg4[%c0_9, %c0_10] : memref<256x128xbf16, #tpu.memory_space<vmem>>, vector<256x128xbf16>
    %cst_11 = arith.constant dense<0.000000e+00> : vector<8x128xf32>
    %13 = tpu.matmul %11, %12, %cst_11 {dimension_numbers = #tpu.dot_dimension_numbers<[1], [0], [0], [1], [0, 0, 1, 1], [], []>} : vector<8x256xbf16>, vector<256x128xbf16>, vector<8x128xf32> -> vector<8x128xf32>
    %cst_12 = arith.constant dense<0.000000e+00> : vector<8x128xf32>
    %14 = tpu.matmul %0, %13, %cst_12 {dimension_numbers = #tpu.dot_dimension_numbers<[1], [0], [0], [1], [0, 0, 1, 1], [], []>} : vector<8x8xf32>, vector<8x128xf32>, vector<8x128xf32> -> vector<8x128xf32>
    %c0_13 = arith.constant 0 : index
    %c0_14 = arith.constant 0 : index
    %15 = vector.load %arg5[%c0_13, %c0_14] : memref<1x128xf32, #tpu.memory_space<vmem>>, vector<1x128xf32>
    %16 = vector.broadcast %15 : vector<1x128xf32> to vector<8x128xf32>
    %17 = arith.addf %14, %16 : vector<8x128xf32>
    %c0_15 = arith.constant 0 : index
    %c0_16 = arith.constant 0 : index
    %18 = vector.load %arg6[%c0_15, %c0_16] : memref<8x128xf32, #tpu.memory_space<vmem>>, vector<8x128xf32>
    tpu.vector_store %arg6[%c0_15, %c0_16], %17 {strides = array<i32>} : memref<8x128xf32, #tpu.memory_space<vmem>>, vector<8x128xf32>,
    return
  }
}

</mosaic_0001>

<bundles_post_ra>
// kernel: forward.11
= control target key start
LH: loop header
LB: loop body
LE: loop exit
PB: predicated region body
PF: predicated region fallthrough
CT: control target
= control target key end

     0   :  { %8 = vsyncpa [#allocation3], 0  ;;  %s495_s0 = inlined_call_operand.hbm [shape: f32[16,64], index: 0, kind: input, shape index: {}]   ;;  %s496_s1 = inlined_call_operand.hbm [shape: bf16[64,512], index: 1, kind: input, shape index: {}]   ;;  %s497_s2 = inlined_call_operand.hbm [shape: f32[1,512], index: 2, kind: input, shape index: {}]   ;;  %s498_s3 = inlined_call_operand.vmem [shape: f32[16,512], index: 3, kind: output, shape index: {}]  }
   0x1   :  { %9 = vsyncpa [#allocation5], 0  ;;  %s407_s12 = smov [#allocation4]   ;;  %s337_s16 = scalar_lea.hbm %s496_s1, 2048 }
   0x2   :  { %s27_s13 = sshll.u32 %s407_s12, 4  ;;  %p338_p0 = scmp.ne.s32.totalorder %s496_s1, %s337_s16  ;;  %s28_s13 = int_to_ptr.vmem [resolvable:$true] %s27_s13 }
   0x3   :  { %p341_p1 = scmp.lt.u32.totalorder %s337_s16, %s496_s1 }
   0x5   :  { %p343_p2 = pnand %p341_p1, %p338_p0 }
   0x7   :  { %346 = shalt.err (!%p343_p2)
}
   0x8   :  { %s347_s21 = scalar_lea.vmem %s28_s13, 2048  ;;  %p352_p4 = scmp.lt.s32.totalorder %s28_s13, %s28_s13 }
   0x9   :  { %p348_p3 = scmp.ne.s32.totalorder %s28_s13, %s347_s21  ;;  %p353_p5 = scmp.lt.s32.totalorder %s347_s21, %s347_s21 }
   0xb   :  { %p354_p6 = por %p353_p5, %p352_p4 }
   0xd   :  { %p355_p7 = pnand %p354_p6, %p348_p3 }
   0xf   :  { %358 = shalt.err (!%p355_p7)
}
  0x10   :  { %s408_s22 = smov 256   ;;  %s409_s23 = smov 16  }
  0x11   :  { %33 = dma.hbm_to_vmem [thread:$0]  %s496_s1, 2048, %s28_s13, [#allocation5], %s408_s22, %s408_s22, %s409_s23  }
  0x12   :  { %s410_s26 = smov [#allocation2]   ;;  %s359_s30 = scalar_lea.hbm %s495_s0, 256 }
  0x13   :  { %s15_s27 = sshll.u32 %s410_s26, 4  ;;  %p360_p8 = scmp.ne.s32.totalorder %s495_s0, %s359_s30  ;;  %s16_s27 = int_to_ptr.vmem [resolvable:$true] %s15_s27 }
  0x14   :  { %p363_p9 = scmp.lt.u32.totalorder %s359_s30, %s495_s0 }
  0x16   :  { %p365_p10 = pnand %p363_p9, %p360_p8 }
  0x18   :  { %368 = shalt.err (!%p365_p10)
}
  0x19   :  { %s369_s8 = scalar_lea.vmem %s16_s27, 256  ;;  %p374_p12 = scmp.lt.s32.totalorder %s16_s27, %s16_s27 }
  0x1a   :  { %p370_p11 = scmp.ne.s32.totalorder %s16_s27, %s369_s8  ;;  %p375_p13 = scmp.lt.s32.totalorder %s369_s8, %s369_s8 }
  0x1c   :  { %p376_p0 = por %p375_p13, %p374_p12 }
  0x1e   :  { %p377_p1 = pnand %p376_p0, %p370_p11 }
  0x20   :  { %380 = shalt.err (!%p377_p1)
}
  0x21   :  { %s411_s1 = smov 128   ;;  %s412_s9 = smov 8  }
  0x22   :  { %21 = dma.hbm_to_vmem [thread:$0]  %s495_s0, 256, %s16_s27, [#allocation3], %s411_s1, %s411_s1, %s412_s9  }
  0x23   :  { %s413_s12 = smov [#allocation6]   ;;  %s381_s16 = scalar_lea.hbm %s497_s2, 64 }
  0x24   :  { %s40_s13 = sshll.u32 %s413_s12, 4  ;;  %p382_p2 = scmp.ne.s32.totalorder %s497_s2, %s381_s16  ;;  %s41_s13 = int_to_ptr.vmem [resolvable:$true] %s40_s13 }
  0x25   :  { %p385_p3 = scmp.lt.u32.totalorder %s381_s16, %s497_s2 }
  0x27   :  { %p387_p4 = pnand %p385_p3, %p382_p2 }
  0x29   :  { %390 = shalt.err (!%p387_p4)
}
  0x2a   :  { %s391_s21 = scalar_lea.vmem %s41_s13, 64  ;;  %p396_p6 = scmp.lt.s32.totalorder %s41_s13, %s41_s13 }
  0x2b   :  { %p392_p5 = scmp.ne.s32.totalorder %s41_s13, %s391_s21  ;;  %p397_p7 = scmp.lt.s32.totalorder %s391_s21, %s391_s21 }
  0x2d   :  { %p398_p8 = por %p397_p7, %p396_p6 }
  0x2f   :  { %p399_p9 = pnand %p398_p8, %p392_p5 }
  0x31   :  { %402 = shalt.err (!%p399_p9)
}
  0x32   :  { %43 = dma.hbm_to_vmem [thread:$0]  %s497_s2, 64, %s41_s13, [#allocation5]  }
  0x33   :  { %403 = dma.done.wait [#allocation3], 256  }
  0x34   :  { %404 = vsyncadd [#allocation3], 4294967040 }
  0x35   :  { %405 = dma.done.wait [#allocation5], 2112  }
  0x36   :  { %406 = vsyncadd [#allocation5], 4294965184  ;;  %v414_v0 = vmov 0   ;;  %v313_v1 = vld [vmem:[#allocation4 + $0x4] ss:$16 sps:$4 sm:$0xff]   ;;  %v55_v18 = vld [vmem:[#allocation2 + $0x8] sm:$0xff]  ;;  %v75_v20 = vlaneseq }
  0x37   :  { %211 = vmatprep.mubr.bf16.mxu0 %v414_v0  ;;  %254 = vmatprep.mubr.bf16.mxu1 %v414_v0  ;;  %v315_v2 = vld [vmem:[#allocation4 + $0xc] ss:$16 sps:$4 sm:$0xff]   ;;  %v317_v3 = vld [vmem:[#allocation4] ss:$16 sps:$4 sm:$0xff]   ;;  %v318_v4 = vld [vmem:[#allocation4 + $0x8] ss:$16 sps:$4 sm:$0xff]  }
  0x38   :  { %179 = vmatprep.subr.bf16.mxu0 %v313_v1  ;;  %222 = vmatprep.subr.bf16.mxu1 %v315_v2  ;;  %v319_v5 = vld [vmem:[#allocation4 + $0x24] ss:$16 sps:$4 sm:$0xff]   ;;  %v321_v6 = vld [vmem:[#allocation4 + $0x2c] ss:$16 sps:$4 sm:$0xff]   ;;  %v323_v7 = vld [vmem:[#allocation4 + $0x20] ss:$16 sps:$4 sm:$0xff]  }
  0x39   :  { %180 = vmatpush1.bf16.msra.mxu0 %v317_v3  ;;  %223 = vmatpush1.bf16.msra.mxu1 %v318_v4  ;;  %v324_v8 = vld [vmem:[#allocation4 + $0x28] ss:$16 sps:$4 sm:$0xff]   ;;  %v325_v9 = vld [vmem:[#allocation4 + $0x44] ss:$16 sps:$4 sm:$0xff]   ;;  %v327_v10 = vld [vmem:[#allocation4 + $0x4c] ss:$16 sps:$4 sm:$0xff]  }
  0x3a   :  { %181 = vmatprep.subr.bf16.mxu0 %v319_v5  ;;  %224 = vmatprep.subr.bf16.mxu1 %v321_v6  ;;  %v329_v11 = vld [vmem:[#allocation4 + $0x40] ss:$16 sps:$4 sm:$0xff]   ;;  %v330_v12 = vld [vmem:[#allocation4 + $0x48] ss:$16 sps:$4 sm:$0xff]   ;;  %v331_v13 = vld [vmem:[#allocation4 + $0x64] ss:$16 sps:$4 sm:$0xff]  }
  0x3b   :  { %v333_v14 = vld [vmem:[#allocation4 + $0x6c] ss:$16 sps:$4 sm:$0xff]   ;;  %v335_v15 = vld [vmem:[#allocation4 + $0x60] ss:$16 sps:$4 sm:$0xff]   ;;  %v336_v16 = vld [vmem:[#allocation4 + $0x68] ss:$16 sps:$4 sm:$0xff]  }
  0x3c   :  { %v54_v17 = vld [vmem:[#allocation2] sm:$0xff]  ;;  %vm175_vm0 = vcmask 523264   ;;  %v76_v21 = vshrl.u32 %v75_v20, 7  ;;  %v73_v24 = vld [vmem:[#allocation6] sm:$0xf] }
  0x3d   :  { %182 = vmatpush1.bf16.msra.mxu0 %v323_v7  ;;  %225 = vmatpush1.bf16.msra.mxu1 %v324_v8  ;;  %v56_v19 = vpack.c.bf16 %v55_v18, %v54_v17 }
  0x3e   :  { %183 = vmatprep.subr.bf16.mxu0 %v325_v9  ;;  %226 = vmatprep.subr.bf16.mxu1 %v327_v10  ;;  %v77_v22 = vsub.s32 0, %v76_v21  ;;  %v85_v23 = vsub.s32 2, %v76_v21  ;;  %v81_v25 = vsub.s32 1, %v76_v21  ;;  %v89_v26 = vsub.s32 3, %v76_v21 }
  0x40   :  { %v78_v27 = vrot.slane %v73_v24, %v77_v22  ;;  %v86_v28 = vrot.slane %v73_v24, %v85_v23  ;;  %v82_v29 = vrot.slane %v73_v24, %v81_v25  ;;  %v90_v30 = vrot.slane %v73_v24, %v89_v26 }
  0x41   :  { %184 = vmatpush1.bf16.msra.mxu0 %v329_v11  ;;  %227 = vmatpush1.bf16.msra.mxu1 %v330_v12 }
  0x42   :  { %185 = vmatprep.subr.bf16.mxu0 %v331_v13  ;;  %228 = vmatprep.subr.bf16.mxu1 %v333_v14 }
  0x45   :  { %186 = vmatpush1.bf16.msra.mxu0 %v335_v15  ;;  %229 = vmatpush1.bf16.msra.mxu1 %v336_v16 }
  0x48   :  { %303 = vmatmul.mubr.msk.bf16.vlgmr.msra.gmra.mrb[0].mxu0 %vm175_vm0, %v56_v19  ;;  %304 = vmatmul.mubr.msk.bf16.vlgmr.msra.gmra.mrb[0].mxu1 %vm175_vm0, %v56_v19 }
 0x11b   :  { %v213_v31 = vpop.f32.mrb[0].mxu0  ;;  %v256_v32 = vpop.f32.mrb[0].mxu1 }
 0x11c   :  { %v214_v33 = vadd.f32 %v213_v31, %v78_v27  ;;  %v257_v34 = vadd.f32 %v256_v32, %v86_v28  ;;  %v215_v35 = vpop.f32.mrb[1].mxu0  ;;  %v258_v36 = vpop.f32.mrb[1].mxu1 }
 0x11d   :  { %v216_v37 = vadd.f32 %v215_v35, %v82_v29  ;;  %v259_v38 = vadd.f32 %v258_v36, %v90_v30  ;;  %v217_v39 = vpop.f32.mrb[2].mxu0  ;;  %v260_v40 = vpop.f32.mrb[2].mxu1 }
 0x11e   :  { %v265_v41 = vmax.f32 %v214_v33, 0.0  ;;  %v267_v42 = vmax.f32 %v257_v34, 0.0  ;;  %v218_v43 = vadd.f32 %v217_v39, %v78_v27  ;;  %v261_v44 = vadd.f32 %v260_v40, %v86_v28  ;;  %v219_v45 = vpop.f32.mrb[3].mxu0  ;;  %v262_v46 = vpop.f32.mrb[3].mxu1 }
 0x11f   :  { %v266_v47 = vmax.f32 %v216_v37, 0.0  ;;  %v268_v48 = vmax.f32 %v259_v38, 0.0  ;;  %v220_v49 = vadd.f32 %v219_v45, %v82_v29  ;;  %v263_v50 = vadd.f32 %v262_v46, %v90_v30 }
 0x120   :  { %273 = vst [vmem:[%s498_s3] sm:$0xff] %v265_v41  ;;  %275 = vst [vmem:[%s498_s3 + $0x10] sm:$0xff] %v267_v42  ;;  %v269_v51 = vmax.f32 %v218_v43, 0.0  ;;  %v271_v52 = vmax.f32 %v261_v44, 0.0 }
 0x121   :  { %274 = vst [vmem:[%s498_s3 + $0x8] sm:$0xff] %v266_v47  ;;  %276 = vst [vmem:[%s498_s3 + $0x18] sm:$0xff] %v268_v48  ;;  %v270_v53 = vmax.f32 %v220_v49, 0.0  ;;  %v272_v54 = vmax.f32 %v263_v50, 0.0 }
 0x122   :  { %277 = vst [vmem:[%s498_s3 + $0x20] sm:$0xff] %v269_v51  ;;  %279 = vst [vmem:[%s498_s3 + $0x30] sm:$0xff] %v271_v52 }
 0x123   :  { %278 = vst [vmem:[%s498_s3 + $0x28] sm:$0xff] %v270_v53  ;;  %280 = vst [vmem:[%s498_s3 + $0x38] sm:$0xff] %v272_v54 }
 0x124   :  { %285 = vsyncpa [#allocation3], 1 }
 0x125   :  { %286 = vsyncpa [#allocation5], 1 }

// kernel: forward.13
= control target key start
LH: loop header
LB: loop body
LE: loop exit
PB: predicated region body
PF: predicated region fallthrough
CT: control target
= control target key end

     0   :  { %s979_s9 = smov 0   ;;  %s981_s10 = smov 0   ;;  %s1161_s0 = inlined_call_operand.vmem [shape: bf16[2,10,1536], index: 0, kind: input, shape index: {}, may-alias: {0,1}]   ;;  %s1162_s1 = inlined_call_operand.vmem [shape: bf16[2,10,1536], index: 1, kind: input, shape index: {}, may-alias: {0,1}]   ;;  %s1163_s2 = inlined_call_operand.vmem [shape: bf16[2,10,512], index: 2, kind: output, shape index: {}]  }
   0x1   :  { %s983_s11 = smov 0   ;;  %s985_s12 = smov 0  }
   0x2   :  { %s987_s13 = smov 0   ;;  %s989_s14 = smov 0  }
   0x3   :  { %s991_s15 = smov 0   ;;  %s993_s16 = smov 0  }
   0x4   :  { %s995_s17 = smov 0  }
   0x5 LB: > { %s725_s18 = sadd.s32 4294967295, %s959_s17   ;;  %s27_s19 = sadd.s32 1, %s951_s15  ;;  %s959_s17 = sphi %s995_s17, %s12_s17   ;;  %s955_s16 = sphi %s993_s16, %s1174_s16   ;;  %s951_s15 = sphi %s991_s15, %s1173_s15   ;;  %s947_s14 = sphi %s989_s14, %s1172_s14   ;;  %s943_s13 = sphi %s987_s13, %s1171_s13   ;;  %s939_s12 = sphi %s985_s12, %s1170_s12   ;;  %s935_s11 = sphi %s983_s11, %s1169_s11   ;;  %s931_s10 = sphi %s981_s10, %s1168_s10   ;;  %s927_s9 = sphi %s979_s9, %s1167_s9  }
   0x6   : > { %p29_p0 = scmp.ge.s32.totalorder %s27_s19, 4  ;;  %s31_s20 = sadd.s32 1, %s955_s16 }
   0x7   : > { %s42_s21 = sadd.s32 1, %s939_s12  ;;  %p49_p1 = scmp.ne.s32.totalorder %s939_s12, %s935_s11 }
   0x8   : > { %s1176_s19 = smov (%p29_p0, %s27_s19), 0  ;;  %s1178_s20 = smov (!%p29_p0, %s31_s20), %s955_s16 }
   0x9   : > { %s38_s22 = ssub.s32 %s951_s15, %s1176_s19  ;;  %p50_p2 = scmp.eq.s32.totalorder %s959_s17, 0 }
   0xa   : > { %p33_p3 = scmp.ge.s32.totalorder %s1178_s20, 2  ;;  %s65_s23 = sadd.s32 2, %s951_s15 }
   0xb   : > { %p1042_p4 = por %p50_p2, %p49_p1  ;;  %s66_s25 = sadd.s32 2, %s1176_s19 }
   0xc   : > { %s1180_s20 = smov (%p33_p3, %s1178_s20), 0  ;;  %s68_s26 = ssub.s32 %s65_s23, %s66_s25 }
   0xd   : > { %s72_s27 = sadd.s32 1, %s931_s10  ;;  %s35_s28 = ssub.s32 %s955_s16, %s1180_s20 }
   0xe   : > { %p79_p5 = scmp.ne.s32.totalorder %s931_s10, %s927_s9  ;;  %s39_s29 = sor.u32 %s38_s22, %s35_s28 }
   0xf   : > { %s69_s30 = sor.u32 %s68_s26, %s35_s28  ;;  %p40_p6 = scmp.eq.s32.totalorder %s39_s29, 0 }
  0x10   : > { %p70_p7 = scmp.eq.s32.totalorder %s69_s30, 0  ;;  %p1056_p8 = por %p79_p5, %p50_p2 }
  0x11   : > { %p113_p9 = scmp.eq.s32.totalorder %s725_s18, 7  ;;  %p728_p11 = scmp.ge.s32.totalorder %s959_s17, 8 }
  0x12   : > { %s1061_s4 = scalar_select %p40_p6, %s939_s12, %s42_s21  }
  0x13   : > { %s1064_s5 = scalar_select %p70_p7, %s931_s10, %s72_s27  }
  0x14   : > { %p1069_p10 = por %p113_p9, %p49_p1  ;;  %135 = sbr.rel (%p728_p11) target bundleno = 44 (0x2c), region = 16 }
  0x1b   : > { %138 = sbr.rel (!%p1042_p4) target bundleno = 35 (0x23), region = 20  ;;  %s140_s7 = sand.u32 (%p1042_p4), 1, %s939_s12  }
  0x1c   : > { %s788_s8 = smul.u32 (%p1042_p4), 24, %s955_s16  ;;  %s729_s18 = sshll.u32 (%p1042_p4), %s140_s7, 3 }
  0x1d   : > { %s142_s27 = scalar_lea.vmem (%p1042_p4), [#allocation2], %s729_s18 }
  0x1e   : > { %s147_s21 = sadd.s32 (%p1042_p4), %s951_s15, %s788_s8 }
  0x1f   : > { %s730_s22 = sshll.u32 (%p1042_p4), %s147_s21, 2 }
  0x20   : > { %s149_s26 = scalar_lea.vmem (%p1042_p4), %s1161_s0, %s730_s22 }
  0x21   : > { %v165_v0 = vld [vmem:[%s149_s26] sm:$0xf] (%p1042_p4)  ;;  %v167_v1 = vld [vmem:[%s149_s26 + $0x30] sm:$0xf] (%p1042_p4) }
  0x22   : > { %166 = vst [vmem:[%s142_s27] sm:$0xf] %v165_v0  ;;  %168 = vst [vmem:[%s142_s27 + $0x4] sm:$0xf] %v167_v1 }
  0x23 PF: > { %195 = sbr.rel (!%p1056_p8) target bundleno = 44 (0x2c), region = 61  ;;  %s197_s24 = sand.u32 (%p1056_p8), 1, %s931_s10  }
  0x24   : > { %s732_s28 = sshll.u32 (%p1056_p8), %s951_s15, 1  ;;  %s731_s29 = sshll.u32 (%p1056_p8), %s197_s24, 4 }
  0x25   : > { %s647_s30 = smul.u32 (%p1056_p8), 24, %s955_s16  ;;  %s199_s18 = scalar_lea.vmem (%p1056_p8), [#allocation3], %s731_s29 }
  0x27   : > { %s648_s7 = sadd.s32 (%p1056_p8), %s732_s28, %s647_s30 }
  0x28   : > { %s733_s8 = sshll.u32 (%p1056_p8), %s648_s7, 2 }
  0x29   : > { %s650_s23 = scalar_lea.vmem (%p1056_p8), %s1162_s1, %s733_s8 }
  0x2a   : > { %v734_v2 = vld [vmem:[%s650_s23 + $0x10] sm:$0xff]  ;;  %v735_v3 = vld [vmem:[%s650_s23 + $0x40] sm:$0xff] }
  0x2b   : > { %236 = vst [vmem:[%s199_s18] sm:$0xff] %v734_v2  ;;  %238 = vst [vmem:[%s199_s18 + $0x8] sm:$0xff] %v735_v3 }
  0x2c PF: > { %p736_p12 = scmp.ge.s32.totalorder %s959_s17, 1  ;;  %p243_p13 = scmp.lt.s32.totalorder %s959_s17, 9 }
  0x2e   : > { %p244_p0 = pnand %p736_p12, %p243_p13 }
  0x2f   : > { %s257_s3 = sand.u32 (!%p244_p0), 1, %s927_s9   ;;  %s250_s25 = sand.u32 (!%p244_p0), 1, %s935_s11   ;;  %v961_v4 = vmov (!%p244_p0), 0.0   ;;  %vm962_vm0 = vmmov (!%p244_p0), 0   ;;  %vm300_vm1 = vcmask (!%p244_p0), 523264   ;;  %vm348_vm2 = vcmask (!%p244_p0), 80896  }
  0x30   : > { %247 = sbr.rel (%p244_p0) target bundleno = 1164 (0x48c), region = 99  ;;  %764 = vmatprep.subr.bf16.mxu0 (!%p244_p0), %v961_v4  ;;  %s1094_s26 = sshll.u32 (!%p244_p0), %s257_s3, 4  ;;  %766 = vmatprep.mubr.msk.bf16.mxu0 (!%p244_p0), %vm962_vm0, %v961_v4  ;;  %vm352_vm3 = vcmask (!%p244_p0), 74752   ;;  %vm375_vm4 = vcmask (!%p244_p0), 1044480  }
  0x31   : > { %s1097_s27 = sshll.u32 (!%p244_p0), %s250_s25, 3  ;;  %770 = vmatprep.subr.bf16.mxu1 (!%p244_p0), %v961_v4  ;;  %772 = vmatprep.mubr.msk.bf16.mxu1 (!%p244_p0), %vm962_vm0, %v961_v4  ;;  %s259_s24 = scalar_lea.vmem (!%p244_p0), [#allocation3], %s1094_s26 }
  0x32   : > { %v869_v5 = vld [vmem:[%s259_s24] ss:$8 sps:$4 sm:$0x1f] (!%p244_p0)   ;;  %s252_s28 = scalar_lea.vmem (!%p244_p0), [#allocation2], %s1097_s27  ;;  %s963_s9 = smov (!%p244_p0), 64  }
  0x33   : > { %v305_v6 = vsel (!%p244_p0), %vm300_vm1, %v869_v5, 0  ;;  %v871_v7 = vld [vmem:[%s252_s28] sm:$0x1f] (!%p244_p0)   ;;  %426 = vrot.lane.b32.xlu1 (!%p244_p0), %v869_v5, %s963_s9  ;;  %s280_s11 = scalar_lea.vmem (!%p244_p0), [#allocation4], %s1097_s27 }
  0x34   : > { %765 = vmatpush3.bf16.xpose.msra.mxu0 (!%p244_p0), %v305_v6  ;;  %v872_v14 = vld [vmem:[%s259_s24 + $0x4] ss:$8 sps:$4 sm:$0x1f] (!%p244_p0)  }
  0x35   : > { %782 = vmatprep.subr.bf16.mxu0 (!%p244_p0), %v961_v4  ;;  %v377_v15 = vsel (!%p244_p0), %vm375_vm4, %v872_v14, 0 }
  0x36   : > { %771 = vmatpush3.bf16.msra.mxu1 (!%p244_p0), %v377_v15 }
  0x37   : > { %424 = vrot.lane.b32.xlu1 %v871_v7, %s963_s9  ;;  %776 = vmatprep.subr.bf16.mxu1 %v961_v4  ;;  %s750_s29 = sshll.u32 (%p1069_p10), %s947_s14, 3 }
  0x38   : > { %s578_s30 = sadd.s32 (%p1069_p10), %s943_s13, %s750_s29 }
  0x39   : > { %s751_s7 = sshll.u32 (%p1069_p10), %s578_s30, 2 }
  0x3a   : > { %s580_s22 = scalar_lea.vmem (%p1069_p10), %s1163_s2, %s751_s7 }
  0x3b   : > { %767 = vmatmul.mubr.msk.bf16.vlgmr.msra.gmra.mrb[0].mxu0 %vm300_vm1, %v871_v7 }
  0x3c   : > { %784 = vmatprep.mubr.msk.bf16.mxu0 %vm962_vm0, %v961_v4 }
  0xa5   : > { %v427_v22 = vpop.permute.xlu1 %426 }
  0xa6   : > { %v432_v25 = vsel %vm300_vm1, %v427_v22, 0 }
  0xa9   : > { %v425_v27 = vpop.permute.xlu1 %424 }
 0x10e   : > { %v341_v8 = vpop.f32.mrb[0].mxu0 }
 0x10f   : > { %v768_v9 = vpop.f32.mrb[1].mxu0  ;;  %v349_v10 = vsel %vm348_vm2, %v341_v8, -inf }
 0x110   : > { %350 = vmax.xlane.f32.xlu0 %v349_v10  ;;  %v344_v11 = vpop.f32.mrb[2].mxu0 }
 0x111   : > { %v769_v12 = vpop.f32.mrb[3].mxu0  ;;  %v353_v13 = vsel %vm352_vm3, %v344_v11, -inf }
 0x114   : > { %354 = vmax.xlane.f32.xlu0 %v353_v13 }
 0x19d   : > { %v351_v16 = vpop.xlane.xlu0 %350 }
 0x19e   : > { %v356_v17 = vsub.f32 %v341_v8, %v351_v16 }
 0x1a0   : > { %v358_v18 = vmul.f32 1.442695, %v356_v17 }
 0x1a1   : > { %v355_v19 = vpop.xlane.xlu0 %354 }
 0x1a2   : > { %v357_v20 = vsub.f32 %v344_v11, %v355_v19  ;;  %873 = vpow2.f32 %v358_v18 }
 0x1a4   : > { %v360_v21 = vmul.f32 1.442695, %v357_v20 }
 0x1a6   : > { %875 = vpow2.f32 %v360_v21 }
 0x1ac   : > { %v874_v23 = vpop.eup %873 }
 0x1ad   : > { %v362_v51 = vsel %vm348_vm2, %v874_v23, 0.0 }
 0x1b0   : > { %v876_v24 = vpop.eup %875 }
 0x1b1   : > { %v368_v26 = vpack.c.bf16 %v876_v24, %v874_v23  ;;  %v365_v52 = vsel %vm352_vm3, %v876_v24, 0.0 }
 0x1b3   : > { %773 = vmatmul.mubr.msk.bf16.vlgmr.msra.gmra.mrb[0].mxu1 %vm348_vm2, %v368_v26 }
 0x1b4   : > { %777 = vmatpush3.bf16.xpose.msra.mxu1 %v432_v25  ;;  %778 = vmatprep.mubr.msk.bf16.mxu1 %vm962_vm0, %v961_v4 }
 0x1bb   : > { %779 = vmatmul.mubr.msk.bf16.vlgmr.msra.gmra.mrb[4].mxu1 %vm300_vm1, %v425_v27 }
 0x286   : > { %v413_v28 = vpop.f32.mrb[0].mxu1 }
 0x287   : > { %v774_v29 = vpop.f32.mrb[1].mxu1 }
 0x288   : > { %v416_v30 = vpop.f32.mrb[2].mxu1 }
 0x289   : > { %v775_v31 = vpop.f32.mrb[3].mxu1 }
 0x28e   : > { %v468_v32 = vpop.f32.mrb[4].mxu1 }
 0x28f   : > { %v780_v33 = vpop.f32.mrb[5].mxu1  ;;  %v475_v34 = vsel %vm348_vm2, %v468_v32, -inf }
 0x290   : > { %476 = vmax.xlane.f32.xlu0 %v475_v34  ;;  %v471_v35 = vpop.f32.mrb[6].mxu1 }
 0x291   : > { %v781_v36 = vpop.f32.mrb[7].mxu1  ;;  %v478_v37 = vsel %vm352_vm3, %v471_v35, -inf }
 0x292   : > { %479 = vmax.xlane.f32.xlu1 %v478_v37 }
 0x2a6   : > { %494 = vrot.lane.b32.xlu0 %v872_v14, %s963_s9 }
 0x31d   : > { %v477_v38 = vpop.xlane.xlu0 %476 }
 0x31e   : > { %v481_v39 = vsub.f32 %v468_v32, %v477_v38 }
 0x31f   : > { %v480_v40 = vpop.xlane.xlu1 %479 }
 0x320   : > { %v483_v41 = vmul.f32 1.442695, %v481_v39  ;;  %v482_v42 = vsub.f32 %v471_v35, %v480_v40 }
 0x321   : > { %v495_v43 = vpop.permute.xlu0 %494 }
 0x322   : > { %877 = vpow2.f32 %v483_v41  ;;  %v485_v44 = vmul.f32 1.442695, %v482_v42  ;;  %v500_v45 = vsel %vm375_vm4, %v495_v43, 0 }
 0x323   : > { %783 = vmatpush3.bf16.msra.mxu0 %v500_v45 }
 0x324   : > { %879 = vpow2.f32 %v485_v44 }
 0x32c   : > { %v878_v46 = vpop.eup %877 }
 0x32d   : > { %v487_v47 = vsel %vm348_vm2, %v878_v46, 0.0 }
 0x32e   : > { %v880_v48 = vpop.eup %879  ;;  %488 = vadd.xlane.f32.xlu0 %v487_v47 }
 0x32f   : > { %v490_v49 = vsel %vm352_vm3, %v880_v48, 0.0  ;;  %v493_v50 = vpack.c.bf16 %v880_v48, %v878_v46 }
 0x330   : > { %491 = vadd.xlane.f32.xlu1 %v490_v49 }
 0x331   : > { %785 = vmatmul.mubr.msk.bf16.vlgmr.msra.gmra.mrb[4].mxu0 %vm348_vm2, %v493_v50 }
 0x334   : > { %363 = vadd.xlane.f32.xlu1 %v362_v51 }
 0x338   : > { %366 = vadd.xlane.f32.xlu1 %v365_v52 }
 0x3bb   : > { %v489_v53 = vpop.xlane.xlu0 %488 }
 0x3bc   : > { %881 = vrcp.f32 %v489_v53 }
 0x3bd   : > { %v492_v54 = vpop.xlane.xlu1 %491 }
 0x3be   : > { %883 = vrcp.f32 %v492_v54 }
 0x3c1   : > { %v364_v0 = vpop.xlane.xlu1 %363 }
 0x3c2   : > { %885 = vrcp.f32 %v364_v0 }
 0x3c5   : > { %v367_v1 = vpop.xlane.xlu1 %366 }
 0x3c6   : > { %v882_v56 = vpop.eup %881  ;;  %887 = vrcp.f32 %v367_v1 }
 0x3c8   : > { %v884_v58 = vpop.eup %883 }
 0x3cc   : > { %v886_v2 = vpop.eup %885 }
 0x3cd   : > { %v422_v5 = vmul.f32 %v886_v2, %v413_v28 }
 0x3d0   : > { %v888_v3 = vpop.eup %887 }
 0x3d1   : > { %v423_v6 = vmul.f32 %v888_v3, %v416_v30 }
 0x404   : > { %v536_v55 = vpop.f32.mrb[4].mxu0 }
 0x405   : > { %v786_v57 = vpop.f32.mrb[5].mxu0  ;;  %v545_v60 = vmul.f32 %v882_v56, %v536_v55 }
 0x406   : > { %v539_v59 = vpop.f32.mrb[6].mxu0 }
 0x407   : > { %v546_v61 = vmul.f32 %v884_v58, %v539_v59  ;;  %v787_v62 = vpop.f32.mrb[7].mxu0 }
 0x409   : > { %v864_v63 = vpack.i.bf16 %v546_v61, %v545_v60 }
 0x40b   : > { %865 = vrot.lane.b32.xlu1 %v864_v63, %s963_s9 }
 0x47d   : > { %v866_v4 = vpop.permute.xlu1 %865  ;;  %573 = sbr.rel (!%p1069_p10) target bundleno = 1164 (0x48c), region = 111 }
 0x47e   : > { %v868_v7 = vunpack.i.h.bf16 %v866_v4  ;;  %v867_v8 = vunpack.i.l.bf16 %v866_v4 }
 0x480   : > { %v556_v9 = vsel %vm300_vm1, %v423_v6, %v868_v7  ;;  %v555_v10 = vsel %vm300_vm1, %v422_v5, %v867_v8 }
 0x481   : > { %v755_v11 = vpack.c.bf16 %v556_v9, %v556_v9  ;;  %v754_v12 = vpack.c.bf16 %v555_v10, %v555_v10 }
 0x483   : > { %566 = vst [vmem:[%s280_s11 + $0x4] sm:$0x1] %v755_v11  ;;  %565 = vst [vmem:[%s280_s11] sm:$0xf] %v754_v12 }
 0x48a   : > { %v596_v13 = vld [vmem:[%s280_s11] sm:$0xf]  ;;  %v598_v14 = vld [vmem:[%s280_s11 + $0x4] sm:$0xf] }
 0x48b   : > { %597 = vst [vmem:[%s580_s22] sm:$0xf] %v596_v13  ;;  %599 = vst [vmem:[%s580_s22 + $0x10] sm:$0xf] %v598_v14 }
 0x48c PF: > { %s12_s17 = sadd.s32 1, %s959_s17   ;;  %s1167_s9 = smov %s931_s10 }
 0x48d   : > { %p9_p1 = scmp.ge.s32.totalorder %s12_s17, 10   ;;  %s1168_s10 = smov %s1064_s5 }
 0x48e   : > { %s1169_s11 = smov %s939_s12  ;;  %s1170_s12 = smov %s1061_s4 }
 0x48f   : > { %s1171_s13 = smov %s951_s15  ;;  %s1172_s14 = smov %s955_s16 }
 0x490   : > { %s1173_s15 = smov %s1176_s19  ;;  %s1174_s16 = smov %s1180_s20 }
 0x491   :  { %11 = sbr.rel (!%p9_p1) target bundleno = 5 (0x5), region = 191 }

// kernel: forward.14
= control target key start
LH: loop header
LB: loop body
LE: loop exit
PB: predicated region body
PF: predicated region fallthrough
CT: control target
= control target key end

     0   :  { %s1947_s2 = inlined_call_operand.vmem [shape: bf16[512,512], index: 2, kind: input, shape index: {}]   ;;  %s1948_s0 = inlined_call_operand.vmem [shape: bf16[20,512], index: 0, kind: input, shape index: {}]   ;;  %s1949_s3 = inlined_call_operand.vmem [shape: f32[1,512], index: 3, kind: input, shape index: {}]   ;;  %s1950_s1 = inlined_call_operand.vmem [shape: f32[20,512], index: 1, kind: input, shape index: {}]   ;;  %s1951_s4 = inlined_call_operand.vmem [shape: f32[20,512], index: 4, kind: output, shape index: {}]  }
   0x1   :  { %v1243_v0 = vld [vmem:[%s1947_s2 + $0x4] ss:$16 sps:$4 sm:$0xff]   ;;  %v1245_v1 = vld [vmem:[%s1947_s2 + $0xc] ss:$16 sps:$4 sm:$0xff]   ;;  %v1247_v2 = vld [vmem:[%s1947_s2] ss:$16 sps:$4 sm:$0xff]  }
   0x2   :  { %847 = vmatprep.subr.bf16.mxu0 %v1243_v0  ;;  %v1248_v3 = vld [vmem:[%s1947_s2 + $0x8] ss:$16 sps:$4 sm:$0xff]   ;;  %949 = vmatprep.subr.bf16.mxu1 %v1245_v1  ;;  %v1249_v4 = vld [vmem:[%s1947_s2 + $0x24] ss:$16 sps:$4 sm:$0xff]   ;;  %v1251_v5 = vld [vmem:[%s1947_s2 + $0x2c] ss:$16 sps:$4 sm:$0xff]  }
   0x3   :  { %848 = vmatpush1.bf16.msra.mxu0 %v1247_v2  ;;  %950 = vmatpush1.bf16.msra.mxu1 %v1248_v3  ;;  %v1253_v6 = vld [vmem:[%s1947_s2 + $0x20] ss:$16 sps:$4 sm:$0xff]   ;;  %v1254_v7 = vld [vmem:[%s1947_s2 + $0x28] ss:$16 sps:$4 sm:$0xff]   ;;  %v1255_v8 = vld [vmem:[%s1947_s2 + $0x44] ss:$16 sps:$4 sm:$0xff]  }
   0x4   :  { %849 = vmatprep.subr.bf16.mxu0 %v1249_v4  ;;  %951 = vmatprep.subr.bf16.mxu1 %v1251_v5  ;;  %v1257_v9 = vld [vmem:[%s1947_s2 + $0x4c] ss:$16 sps:$4 sm:$0xff]   ;;  %v1259_v10 = vld [vmem:[%s1947_s2 + $0x40] ss:$16 sps:$4 sm:$0xff]   ;;  %v1260_v11 = vld [vmem:[%s1947_s2 + $0x48] ss:$16 sps:$4 sm:$0xff]  }
   0x5   :  { %v1261_v12 = vld [vmem:[%s1947_s2 + $0x64] ss:$16 sps:$4 sm:$0xff]   ;;  %v1263_v13 = vld [vmem:[%s1947_s2 + $0x6c] ss:$16 sps:$4 sm:$0xff]   ;;  %v1265_v14 = vld [vmem:[%s1947_s2 + $0x60] ss:$16 sps:$4 sm:$0xff]  }
   0x6   :  { %v1266_v15 = vld [vmem:[%s1947_s2 + $0x68] ss:$16 sps:$4 sm:$0xff]   ;;  %v1267_v16 = vld [vmem:[%s1947_s2 + $0x84] ss:$16 sps:$4 sm:$0xff]   ;;  %v1269_v17 = vld [vmem:[%s1947_s2 + $0x8c] ss:$16 sps:$4 sm:$0xff]  }
   0x7   :  { %850 = vmatpush1.bf16.msra.mxu0 %v1253_v6  ;;  %952 = vmatpush1.bf16.msra.mxu1 %v1254_v7  ;;  %v1271_v18 = vld [vmem:[%s1947_s2 + $0x80] ss:$16 sps:$4 sm:$0xff]   ;;  %v1272_v19 = vld [vmem:[%s1947_s2 + $0x88] ss:$16 sps:$4 sm:$0xff]   ;;  %v1273_v20 = vld [vmem:[%s1947_s2 + $0xa4] ss:$16 sps:$4 sm:$0xff]  }
   0x8   :  { %851 = vmatprep.subr.bf16.mxu0 %v1255_v8  ;;  %953 = vmatprep.subr.bf16.mxu1 %v1257_v9  ;;  %v1275_v21 = vld [vmem:[%s1947_s2 + $0xac] ss:$16 sps:$4 sm:$0xff]   ;;  %v1277_v22 = vld [vmem:[%s1947_s2 + $0xa0] ss:$16 sps:$4 sm:$0xff]   ;;  %v1278_v23 = vld [vmem:[%s1947_s2 + $0xa8] ss:$16 sps:$4 sm:$0xff]  }
   0x9   :  { %v1279_v24 = vld [vmem:[%s1947_s2 + $0xc4] ss:$16 sps:$4 sm:$0xff]   ;;  %v1281_v25 = vld [vmem:[%s1947_s2 + $0xcc] ss:$16 sps:$4 sm:$0xff]   ;;  %v1283_v26 = vld [vmem:[%s1947_s2 + $0xc0] ss:$16 sps:$4 sm:$0xff]  }
   0xa   :  { %v1284_v27 = vld [vmem:[%s1947_s2 + $0xc8] ss:$16 sps:$4 sm:$0xff]   ;;  %v1285_v28 = vld [vmem:[%s1947_s2 + $0xe4] ss:$16 sps:$4 sm:$0xff]   ;;  %v1287_v29 = vld [vmem:[%s1947_s2 + $0xec] ss:$16 sps:$4 sm:$0xff]  }
   0xb   :  { %852 = vmatpush1.bf16.msra.mxu0 %v1259_v10  ;;  %954 = vmatpush1.bf16.msra.mxu1 %v1260_v11  ;;  %v1289_v30 = vld [vmem:[%s1947_s2 + $0xe0] ss:$16 sps:$4 sm:$0xff]   ;;  %v1290_v31 = vld [vmem:[%s1947_s2 + $0xe8] ss:$16 sps:$4 sm:$0xff]   ;;  %v1291_v32 = vld [vmem:[%s1947_s2 + $0x104] ss:$16 sps:$4 sm:$0xff]  }
   0xc   :  { %853 = vmatprep.subr.bf16.mxu0 %v1261_v12  ;;  %955 = vmatprep.subr.bf16.mxu1 %v1263_v13  ;;  %v1293_v33 = vld [vmem:[%s1947_s2 + $0x10c] ss:$16 sps:$4 sm:$0xff]   ;;  %v1295_v34 = vld [vmem:[%s1947_s2 + $0x100] ss:$16 sps:$4 sm:$0xff]   ;;  %v1296_v35 = vld [vmem:[%s1947_s2 + $0x108] ss:$16 sps:$4 sm:$0xff]  }
   0xd   :  { %v1297_v36 = vld [vmem:[%s1947_s2 + $0x124] ss:$16 sps:$4 sm:$0xff]   ;;  %v1299_v37 = vld [vmem:[%s1947_s2 + $0x12c] ss:$16 sps:$4 sm:$0xff]   ;;  %v1301_v38 = vld [vmem:[%s1947_s2 + $0x120] ss:$16 sps:$4 sm:$0xff]  }
   0xe   :  { %v1302_v39 = vld [vmem:[%s1947_s2 + $0x128] ss:$16 sps:$4 sm:$0xff]   ;;  %v1303_v40 = vld [vmem:[%s1947_s2 + $0x144] ss:$16 sps:$4 sm:$0xff]   ;;  %v1305_v41 = vld [vmem:[%s1947_s2 + $0x14c] ss:$16 sps:$4 sm:$0xff]  }
   0xf   :  { %854 = vmatpush1.bf16.msra.mxu0 %v1265_v14  ;;  %956 = vmatpush1.bf16.msra.mxu1 %v1266_v15  ;;  %v1307_v42 = vld [vmem:[%s1947_s2 + $0x140] ss:$16 sps:$4 sm:$0xff]   ;;  %v1308_v43 = vld [vmem:[%s1947_s2 + $0x148] ss:$16 sps:$4 sm:$0xff]   ;;  %v1309_v44 = vld [vmem:[%s1947_s2 + $0x164] ss:$16 sps:$4 sm:$0xff]  }
  0x10   :  { %855 = vmatprep.subr.bf16.mxu0 %v1267_v16  ;;  %957 = vmatprep.subr.bf16.mxu1 %v1269_v17  ;;  %v1311_v45 = vld [vmem:[%s1947_s2 + $0x16c] ss:$16 sps:$4 sm:$0xff]   ;;  %v1313_v46 = vld [vmem:[%s1947_s2 + $0x160] ss:$16 sps:$4 sm:$0xff]   ;;  %v1314_v47 = vld [vmem:[%s1947_s2 + $0x168] ss:$16 sps:$4 sm:$0xff]  }
  0x11   :  { %v1341_v48 = vld [vmem:[%s1948_s0 + $0x4] ss:$16 sps:$4 sm:$0xff]   ;;  %v1317_v50 = vld [vmem:[%s1947_s2 + $0x18c] ss:$16 sps:$4 sm:$0xff]   ;;  %v1319_v51 = vld [vmem:[%s1947_s2 + $0x180] ss:$16 sps:$4 sm:$0xff]  }
  0x12   :  { %v1315_v49 = vld [vmem:[%s1947_s2 + $0x184] ss:$16 sps:$4 sm:$0xff]   ;;  %879 = vmatprep.mubr.bf16.mxu0 %v1341_v48  ;;  %981 = vmatprep.mubr.bf16.mxu1 %v1341_v48  ;;  %v1320_v52 = vld [vmem:[%s1947_s2 + $0x188] ss:$16 sps:$4 sm:$0xff]   ;;  %v1323_v54 = vld [vmem:[%s1947_s2 + $0x1ac] ss:$16 sps:$4 sm:$0xff]  }
  0x13   :  { %856 = vmatpush1.bf16.msra.mxu0 %v1271_v18  ;;  %958 = vmatpush1.bf16.msra.mxu1 %v1272_v19  ;;  %v1321_v53 = vld [vmem:[%s1947_s2 + $0x1a4] ss:$16 sps:$4 sm:$0xff]   ;;  %v1325_v55 = vld [vmem:[%s1947_s2 + $0x1a0] ss:$16 sps:$4 sm:$0xff]   ;;  %v1326_v56 = vld [vmem:[%s1947_s2 + $0x1a8] ss:$16 sps:$4 sm:$0xff]  }
  0x14   :  { %857 = vmatprep.subr.bf16.mxu0 %v1273_v20  ;;  %959 = vmatprep.subr.bf16.mxu1 %v1275_v21  ;;  %v1327_v57 = vld [vmem:[%s1947_s2 + $0x1c4] ss:$16 sps:$4 sm:$0xff]   ;;  %v1329_v58 = vld [vmem:[%s1947_s2 + $0x1cc] ss:$16 sps:$4 sm:$0xff]   ;;  %v1331_v59 = vld [vmem:[%s1947_s2 + $0x1c0] ss:$16 sps:$4 sm:$0xff]  }
  0x15   :  { %v1332_v60 = vld [vmem:[%s1947_s2 + $0x1c8] ss:$16 sps:$4 sm:$0xff]   ;;  %v1333_v61 = vld [vmem:[%s1947_s2 + $0x1e4] ss:$16 sps:$4 sm:$0xff]   ;;  %v1335_v62 = vld [vmem:[%s1947_s2 + $0x1ec] ss:$16 sps:$4 sm:$0xff]  }
  0x16   :  { %v1337_v63 = vld [vmem:[%s1947_s2 + $0x1e0] ss:$16 sps:$4 sm:$0xff]   ;;  %v1338_v0 = vld [vmem:[%s1947_s2 + $0x1e8] ss:$16 sps:$4 sm:$0xff]   ;;  %v1344_v1 = vld [vmem:[%s1947_s2 + $0x204] ss:$16 sps:$4 sm:$0xff]  }
  0x17   :  { %858 = vmatpush1.bf16.msra.mxu0 %v1277_v22  ;;  %960 = vmatpush1.bf16.msra.mxu1 %v1278_v23  ;;  %v1347_v2 = vld [vmem:[%s1947_s2 + $0x20c] ss:$16 sps:$4 sm:$0xff]   ;;  %v1339_v3 = vld [vmem:[%s1948_s0] ss:$16 sps:$4 sm:$0xff]   ;;  %v1345_v5 = vld [vmem:[%s1947_s2 + $0x208] ss:$16 sps:$4 sm:$0xff]  }
  0x18   :  { %859 = vmatprep.subr.bf16.mxu0 %v1279_v24  ;;  %961 = vmatprep.subr.bf16.mxu1 %v1281_v25  ;;  %v1342_v4 = vld [vmem:[%s1947_s2 + $0x200] ss:$16 sps:$4 sm:$0xff]   ;;  %v1350_v6 = vld [vmem:[%s1947_s2 + $0x224] ss:$16 sps:$4 sm:$0xff]   ;;  %v1353_v7 = vld [vmem:[%s1947_s2 + $0x22c] ss:$16 sps:$4 sm:$0xff]  }
  0x19   :  { %v1348_v8 = vld [vmem:[%s1947_s2 + $0x220] ss:$16 sps:$4 sm:$0xff]   ;;  %v1351_v9 = vld [vmem:[%s1947_s2 + $0x228] ss:$16 sps:$4 sm:$0xff]   ;;  %v1356_v10 = vld [vmem:[%s1947_s2 + $0x244] ss:$16 sps:$4 sm:$0xff]  }
  0x1a   :  { %v1359_v11 = vld [vmem:[%s1947_s2 + $0x24c] ss:$16 sps:$4 sm:$0xff]   ;;  %v1354_v12 = vld [vmem:[%s1947_s2 + $0x240] ss:$16 sps:$4 sm:$0xff]   ;;  %v1357_v13 = vld [vmem:[%s1947_s2 + $0x248] ss:$16 sps:$4 sm:$0xff]  }
  0x1b   :  { %860 = vmatpush1.bf16.msra.mxu0 %v1283_v26  ;;  %962 = vmatpush1.bf16.msra.mxu1 %v1284_v27  ;;  %v1362_v14 = vld [vmem:[%s1947_s2 + $0x264] ss:$16 sps:$4 sm:$0xff]   ;;  %v1365_v15 = vld [vmem:[%s1947_s2 + $0x26c] ss:$16 sps:$4 sm:$0xff]   ;;  %v1360_v16 = vld [vmem:[%s1947_s2 + $0x260] ss:$16 sps:$4 sm:$0xff]  }
  0x1c   :  { %861 = vmatprep.subr.bf16.mxu0 %v1285_v28  ;;  %963 = vmatprep.subr.bf16.mxu1 %v1287_v29  ;;  %v1363_v17 = vld [vmem:[%s1947_s2 + $0x268] ss:$16 sps:$4 sm:$0xff]   ;;  %v1368_v18 = vld [vmem:[%s1947_s2 + $0x284] ss:$16 sps:$4 sm:$0xff]   ;;  %v1371_v19 = vld [vmem:[%s1947_s2 + $0x28c] ss:$16 sps:$4 sm:$0xff]  }
  0x1d   :  { %v21_v20 = vld [vmem:[%s1948_s0 + $0x20] sm:$0x33]  ;;  %v1369_v24 = vld [vmem:[%s1947_s2 + $0x288] ss:$16 sps:$4 sm:$0xff]   ;;  %v1377_v26 = vld [vmem:[%s1947_s2 + $0x2ac] ss:$16 sps:$4 sm:$0xff]  }
  0x1e   :  { %v1366_v21 = vld [vmem:[%s1947_s2 + $0x280] ss:$16 sps:$4 sm:$0xff]   ;;  %v1096_v22 = vcombine.high %v21_v20, %v21_v20  ;;  %v1095_v23 = vcombine.low %v21_v20, %v21_v20  ;;  %v1374_v25 = vld [vmem:[%s1947_s2 + $0x2a4] ss:$16 sps:$4 sm:$0xff]   ;;  %v1375_v28 = vld [vmem:[%s1947_s2 + $0x2a8] ss:$16 sps:$4 sm:$0xff]  }
  0x1f   :  { %862 = vmatpush1.bf16.msra.mxu0 %v1289_v30  ;;  %964 = vmatpush1.bf16.msra.mxu1 %v1290_v31  ;;  %v1372_v27 = vld [vmem:[%s1947_s2 + $0x2a0] ss:$16 sps:$4 sm:$0xff]   ;;  %v1380_v29 = vld [vmem:[%s1947_s2 + $0x2c4] ss:$16 sps:$4 sm:$0xff]   ;;  %v1383_v30 = vld [vmem:[%s1947_s2 + $0x2cc] ss:$16 sps:$4 sm:$0xff]  }
  0x20   :  { %863 = vmatprep.subr.bf16.mxu0 %v1291_v32  ;;  %965 = vmatprep.subr.bf16.mxu1 %v1293_v33  ;;  %v1378_v31 = vld [vmem:[%s1947_s2 + $0x2c0] ss:$16 sps:$4 sm:$0xff]   ;;  %v1381_v32 = vld [vmem:[%s1947_s2 + $0x2c8] ss:$16 sps:$4 sm:$0xff]   ;;  %v1442_v33 = vld [vmem:[%s1948_s0 + $0xc] ss:$16 sps:$4 sm:$0xff]  }
  0x21   :  { %v1402_v48 = vld [vmem:[%s1947_s2 + $0x340] ss:$16 sps:$4 sm:$0xff]  }
  0x23   :  { %864 = vmatpush1.bf16.msra.mxu0 %v1295_v34  ;;  %966 = vmatpush1.bf16.msra.mxu1 %v1296_v35  ;;  %v1386_v34 = vld [vmem:[%s1947_s2 + $0x2e4] ss:$16 sps:$4 sm:$0xff]   ;;  %v1389_v35 = vld [vmem:[%s1947_s2 + $0x2ec] ss:$16 sps:$4 sm:$0xff]  }
  0x24   :  { %865 = vmatprep.subr.bf16.mxu0 %v1297_v36  ;;  %967 = vmatprep.subr.bf16.mxu1 %v1299_v37  ;;  %v1384_v36 = vld [vmem:[%s1947_s2 + $0x2e0] ss:$16 sps:$4 sm:$0xff]   ;;  %v1387_v37 = vld [vmem:[%s1947_s2 + $0x2e8] ss:$16 sps:$4 sm:$0xff]  }
  0x27   :  { %866 = vmatpush1.bf16.msra.mxu0 %v1301_v38  ;;  %968 = vmatpush1.bf16.msra.mxu1 %v1302_v39  ;;  %v1392_v38 = vld [vmem:[%s1947_s2 + $0x304] ss:$16 sps:$4 sm:$0xff]   ;;  %v1395_v39 = vld [vmem:[%s1947_s2 + $0x30c] ss:$16 sps:$4 sm:$0xff]  }
  0x28   :  { %867 = vmatprep.subr.bf16.mxu0 %v1303_v40  ;;  %969 = vmatprep.subr.bf16.mxu1 %v1305_v41  ;;  %v1390_v40 = vld [vmem:[%s1947_s2 + $0x300] ss:$16 sps:$4 sm:$0xff]   ;;  %v1393_v41 = vld [vmem:[%s1947_s2 + $0x308] ss:$16 sps:$4 sm:$0xff]  }
  0x2b   :  { %868 = vmatpush1.bf16.msra.mxu0 %v1307_v42  ;;  %970 = vmatpush1.bf16.msra.mxu1 %v1308_v43  ;;  %v1398_v42 = vld [vmem:[%s1947_s2 + $0x324] ss:$16 sps:$4 sm:$0xff]   ;;  %v1401_v43 = vld [vmem:[%s1947_s2 + $0x32c] ss:$16 sps:$4 sm:$0xff]  }
  0x2c   :  { %869 = vmatprep.subr.bf16.mxu0 %v1309_v44  ;;  %971 = vmatprep.subr.bf16.mxu1 %v1311_v45  ;;  %v1396_v44 = vld [vmem:[%s1947_s2 + $0x320] ss:$16 sps:$4 sm:$0xff]   ;;  %v1399_v45 = vld [vmem:[%s1947_s2 + $0x328] ss:$16 sps:$4 sm:$0xff]  }
  0x2f   :  { %870 = vmatpush1.bf16.msra.mxu0 %v1313_v46  ;;  %972 = vmatpush1.bf16.msra.mxu1 %v1314_v47  ;;  %v1404_v46 = vld [vmem:[%s1947_s2 + $0x344] ss:$16 sps:$4 sm:$0xff]   ;;  %v1407_v47 = vld [vmem:[%s1947_s2 + $0x34c] ss:$16 sps:$4 sm:$0xff]  }
  0x30   :  { %871 = vmatprep.subr.bf16.mxu0 %v1315_v49  ;;  %973 = vmatprep.subr.bf16.mxu1 %v1317_v50  ;;  %v1405_v49 = vld [vmem:[%s1947_s2 + $0x348] ss:$16 sps:$4 sm:$0xff]   ;;  %v1410_v50 = vld [vmem:[%s1947_s2 + $0x364] ss:$16 sps:$4 sm:$0xff]  }
  0x33   :  { %872 = vmatpush1.bf16.msra.mxu0 %v1319_v51  ;;  %974 = vmatpush1.bf16.msra.mxu1 %v1320_v52  ;;  %v1413_v51 = vld [vmem:[%s1947_s2 + $0x36c] ss:$16 sps:$4 sm:$0xff]   ;;  %v1408_v52 = vld [vmem:[%s1947_s2 + $0x360] ss:$16 sps:$4 sm:$0xff]  }
  0x34   :  { %873 = vmatprep.subr.bf16.mxu0 %v1321_v53  ;;  %975 = vmatprep.subr.bf16.mxu1 %v1323_v54  ;;  %v1411_v53 = vld [vmem:[%s1947_s2 + $0x368] ss:$16 sps:$4 sm:$0xff]   ;;  %v1416_v54 = vld [vmem:[%s1947_s2 + $0x384] ss:$16 sps:$4 sm:$0xff]  }
  0x37   :  { %874 = vmatpush1.bf16.msra.mxu0 %v1325_v55  ;;  %976 = vmatpush1.bf16.msra.mxu1 %v1326_v56  ;;  %v1419_v55 = vld [vmem:[%s1947_s2 + $0x38c] ss:$16 sps:$4 sm:$0xff]   ;;  %v1414_v56 = vld [vmem:[%s1947_s2 + $0x380] ss:$16 sps:$4 sm:$0xff]  }
  0x38   :  { %875 = vmatprep.subr.bf16.mxu0 %v1327_v57  ;;  %977 = vmatprep.subr.bf16.mxu1 %v1329_v58  ;;  %v1417_v57 = vld [vmem:[%s1947_s2 + $0x388] ss:$16 sps:$4 sm:$0xff]   ;;  %v1423_v58 = vld [vmem:[%s1947_s2 + $0x3a4] ss:$16 sps:$4 sm:$0xff]  }
  0x3b   :  { %876 = vmatpush1.bf16.msra.mxu0 %v1331_v59  ;;  %978 = vmatpush1.bf16.msra.mxu1 %v1332_v60  ;;  %v1426_v59 = vld [vmem:[%s1947_s2 + $0x3ac] ss:$16 sps:$4 sm:$0xff]   ;;  %v1421_v60 = vld [vmem:[%s1947_s2 + $0x3a0] ss:$16 sps:$4 sm:$0xff]  }
  0x3c   :  { %877 = vmatprep.subr.bf16.mxu0 %v1333_v61  ;;  %979 = vmatprep.subr.bf16.mxu1 %v1335_v62  ;;  %v1424_v61 = vld [vmem:[%s1947_s2 + $0x3a8] ss:$16 sps:$4 sm:$0xff]   ;;  %v1430_v62 = vld [vmem:[%s1947_s2 + $0x3c4] ss:$16 sps:$4 sm:$0xff]  }
  0x3f   :  { %878 = vmatpush1.bf16.msra.mxu0 %v1337_v63  ;;  %980 = vmatpush1.bf16.msra.mxu1 %v1338_v0  ;;  %v1433_v63 = vld [vmem:[%s1947_s2 + $0x3cc] ss:$16 sps:$4 sm:$0xff]   ;;  %v1428_v0 = vld [vmem:[%s1947_s2 + $0x3c0] ss:$16 sps:$4 sm:$0xff]  }
  0x40   :  { %898 = vmatprep.subr.bf16.mxu0 %v1344_v1  ;;  %1000 = vmatprep.subr.bf16.mxu1 %v1347_v2  ;;  %v1431_v1 = vld [vmem:[%s1947_s2 + $0x3c8] ss:$16 sps:$4 sm:$0xff]   ;;  %v1436_v2 = vld [vmem:[%s1947_s2 + $0x3e4] ss:$16 sps:$4 sm:$0xff]  }
  0x42   :  { %880 = vmatmul.mubr.bf16.vlgmr.msra.gmra.mrb[0].mxu0 %v1339_v3  ;;  %982 = vmatmul.mubr.bf16.vlgmr.msra.gmra.mrb[0].mxu1 %v1339_v3  ;;  %v1439_v3 = vld [vmem:[%s1947_s2 + $0x3ec] ss:$16 sps:$4 sm:$0xff]  }
  0x43   :  { %899 = vmatpush1.bf16.msra.mxu0 %v1342_v4  ;;  %1001 = vmatpush1.bf16.msra.mxu1 %v1345_v5  ;;  %v1434_v4 = vld [vmem:[%s1947_s2 + $0x3e0] ss:$16 sps:$4 sm:$0xff]   ;;  %v1437_v5 = vld [vmem:[%s1947_s2 + $0x3e8] ss:$16 sps:$4 sm:$0xff]  }
  0x44   :  { %900 = vmatprep.subr.bf16.mxu0 %v1350_v6  ;;  %1002 = vmatprep.subr.bf16.mxu1 %v1353_v7  ;;  %v22_v6 = vld [vmem:[%s1948_s0 + $0x28] sm:$0x33] }
  0x45   :  { %889 = vmatprep.mubr.bf16.mxu0 %v1096_v22  ;;  %991 = vmatprep.mubr.bf16.mxu1 %v1096_v22  ;;  %v1440_v7 = vld [vmem:[%s1948_s0 + $0x8] ss:$16 sps:$4 sm:$0xff]   ;;  %v151_v22 = vld [vmem:[%s1949_s3] sm:$0xf] }
  0x47   :  { %901 = vmatpush1.bf16.msra.mxu0 %v1348_v8  ;;  %1003 = vmatpush1.bf16.msra.mxu1 %v1351_v9  ;;  %v1098_v8 = vcombine.high %v22_v6, %v22_v6  ;;  %v1097_v9 = vcombine.low %v22_v6, %v22_v6 }
  0x48   :  { %902 = vmatprep.subr.bf16.mxu0 %v1356_v10  ;;  %1004 = vmatprep.subr.bf16.mxu1 %v1359_v11 }
  0x4a   :  { %890 = vmatmul.mubr.bf16.gmra.mrb[4].mxu0 %v1095_v23  ;;  %992 = vmatmul.mubr.bf16.gmra.mrb[4].mxu1 %v1095_v23 }
  0x4b   :  { %903 = vmatpush1.bf16.msra.mxu0 %v1354_v12  ;;  %1005 = vmatpush1.bf16.msra.mxu1 %v1357_v13 }
  0x4c   :  { %904 = vmatprep.subr.bf16.mxu0 %v1362_v14  ;;  %1006 = vmatprep.subr.bf16.mxu1 %v1365_v15 }
  0x4d   :  { %930 = vmatprep.mubr.bf16.mxu0 %v1442_v33  ;;  %1032 = vmatprep.mubr.bf16.mxu1 %v1442_v33 }
  0x4f   :  { %905 = vmatpush1.bf16.msra.mxu0 %v1360_v16  ;;  %1007 = vmatpush1.bf16.msra.mxu1 %v1363_v17 }
  0x50   :  { %906 = vmatprep.subr.bf16.mxu0 %v1368_v18  ;;  %1008 = vmatprep.subr.bf16.mxu1 %v1371_v19  ;;  %v153_v18 = vlaneseq }
  0x52   :  { %v154_v19 = vshrl.u32 %v153_v18, 7 }
  0x53   :  { %907 = vmatpush1.bf16.msra.mxu0 %v1366_v21  ;;  %1009 = vmatpush1.bf16.msra.mxu1 %v1369_v24 }
  0x54   :  { %908 = vmatprep.subr.bf16.mxu0 %v1374_v25  ;;  %1010 = vmatprep.subr.bf16.mxu1 %v1377_v26  ;;  %v155_v20 = vsub.s32 0, %v154_v19  ;;  %v163_v21 = vsub.s32 2, %v154_v19  ;;  %v159_v23 = vsub.s32 1, %v154_v19  ;;  %v167_v24 = vsub.s32 3, %v154_v19 }
  0x56   :  { %v156_v25 = vrot.slane %v151_v22, %v155_v20  ;;  %v164_v26 = vrot.slane %v151_v22, %v163_v21 }
  0x57   :  { %909 = vmatpush1.bf16.msra.mxu0 %v1372_v27  ;;  %1011 = vmatpush1.bf16.msra.mxu1 %v1375_v28  ;;  %v160_v27 = vrot.slane %v151_v22, %v159_v23  ;;  %v168_v28 = vrot.slane %v151_v22, %v167_v24 }
  0x58   :  { %910 = vmatprep.subr.bf16.mxu0 %v1380_v29  ;;  %1012 = vmatprep.subr.bf16.mxu1 %v1383_v30  ;;  %v1051_v30 = vld [vmem:[%s1950_s1] sm:$0xff] }
  0x5b   :  { %911 = vmatpush1.bf16.msra.mxu0 %v1378_v31  ;;  %1013 = vmatpush1.bf16.msra.mxu1 %v1381_v32  ;;  %v1053_v32 = vld [vmem:[%s1950_s1 + $0x10] sm:$0xff] }
  0x5c   :  { %912 = vmatprep.subr.bf16.mxu0 %v1386_v34  ;;  %1014 = vmatprep.subr.bf16.mxu1 %v1389_v35 }
  0x5f   :  { %913 = vmatpush1.bf16.msra.mxu0 %v1384_v36  ;;  %1015 = vmatpush1.bf16.msra.mxu1 %v1387_v37  ;;  %v1052_v36 = vld [vmem:[%s1950_s1 + $0x8] sm:$0xff] }
  0x60   :  { %914 = vmatprep.subr.bf16.mxu0 %v1392_v38  ;;  %1016 = vmatprep.subr.bf16.mxu1 %v1395_v39  ;;  %v1054_v38 = vld [vmem:[%s1950_s1 + $0x18] sm:$0xff] }
  0x63   :  { %915 = vmatpush1.bf16.msra.mxu0 %v1390_v40  ;;  %1017 = vmatpush1.bf16.msra.mxu1 %v1393_v41 }
  0x64   :  { %916 = vmatprep.subr.bf16.mxu0 %v1398_v42  ;;  %1018 = vmatprep.subr.bf16.mxu1 %v1401_v43  ;;  %v1055_v42 = vld [vmem:[%s1950_s1 + $0x20] sm:$0xff] }
  0x67   :  { %917 = vmatpush1.bf16.msra.mxu0 %v1396_v44  ;;  %1019 = vmatpush1.bf16.msra.mxu1 %v1399_v45  ;;  %v1057_v44 = vld [vmem:[%s1950_s1 + $0x30] sm:$0xff] }
  0x68   :  { %918 = vmatprep.subr.bf16.mxu0 %v1404_v46  ;;  %1020 = vmatprep.subr.bf16.mxu1 %v1407_v47 }
  0x6b   :  { %919 = vmatpush1.bf16.msra.mxu0 %v1402_v48  ;;  %1021 = vmatpush1.bf16.msra.mxu1 %v1405_v49 }
  0x6c   :  { %920 = vmatprep.subr.bf16.mxu0 %v1410_v50  ;;  %1022 = vmatprep.subr.bf16.mxu1 %v1413_v51  ;;  %v1056_v50 = vld [vmem:[%s1950_s1 + $0x28] sm:$0xff] }
  0x6f   :  { %921 = vmatpush1.bf16.msra.mxu0 %v1408_v52  ;;  %1023 = vmatpush1.bf16.msra.mxu1 %v1411_v53  ;;  %v1058_v52 = vld [vmem:[%s1950_s1 + $0x38] sm:$0xff] }
  0x70   :  { %922 = vmatprep.subr.bf16.mxu0 %v1416_v54  ;;  %1024 = vmatprep.subr.bf16.mxu1 %v1419_v55 }
  0x73   :  { %923 = vmatpush1.bf16.msra.mxu0 %v1414_v56  ;;  %1025 = vmatpush1.bf16.msra.mxu1 %v1417_v57 }
  0x74   :  { %924 = vmatprep.subr.bf16.mxu0 %v1423_v58  ;;  %1026 = vmatprep.subr.bf16.mxu1 %v1426_v59 }
  0x77   :  { %925 = vmatpush1.bf16.msra.mxu0 %v1421_v60  ;;  %1027 = vmatpush1.bf16.msra.mxu1 %v1424_v61 }
  0x78   :  { %926 = vmatprep.subr.bf16.mxu0 %v1430_v62  ;;  %1028 = vmatprep.subr.bf16.mxu1 %v1433_v63 }
  0x7b   :  { %927 = vmatpush1.bf16.msra.mxu0 %v1428_v0  ;;  %1029 = vmatpush1.bf16.msra.mxu1 %v1431_v1 }
  0x7c   :  { %928 = vmatprep.subr.bf16.mxu0 %v1436_v2  ;;  %1030 = vmatprep.subr.bf16.mxu1 %v1439_v3  ;;  %v1059_v2 = vld [vmem:[%s1950_s1 + $0x40] sm:$0xf] }
  0x7f   :  { %929 = vmatpush1.bf16.msra.mxu0 %v1434_v4  ;;  %1031 = vmatpush1.bf16.msra.mxu1 %v1437_v5  ;;  %v1061_v4 = vld [vmem:[%s1950_s1 + $0x50] sm:$0xf] }
  0x82   :  { %931 = vmatmul.mubr.bf16.vlgmr.msra.gmra.mrb[0].mxu0 %v1440_v7  ;;  %1033 = vmatmul.mubr.bf16.vlgmr.msra.gmra.mrb[0].mxu1 %v1440_v7 }
  0x83   :  { %940 = vmatprep.mubr.bf16.mxu0 %v1098_v8  ;;  %1042 = vmatprep.mubr.bf16.mxu1 %v1098_v8  ;;  %v1060_v8 = vld [vmem:[%s1950_s1 + $0x48] sm:$0xf] }
  0x8a   :  { %941 = vmatmul.mubr.bf16.gmra.mrb[8].mxu0 %v1097_v9  ;;  %1043 = vmatmul.mubr.bf16.gmra.mrb[8].mxu1 %v1097_v9 }
 0x11d   :  { %v891_v10 = vpop.f32.mrb[4].mxu0  ;;  %v993_v11 = vpop.f32.mrb[4].mxu1 }
 0x11e   :  { %v893_v12 = vpop.f32.mrb[5].mxu0  ;;  %v995_v13 = vpop.f32.mrb[5].mxu1  ;;  %v892_v61 = vadd.f32 %v891_v10, %v156_v25  ;;  %v994_v62 = vadd.f32 %v993_v11, %v164_v26  ;;  %v1062_v10 = vld [vmem:[%s1950_s1 + $0x58] sm:$0xf] }
 0x11f   :  { %v895_v14 = vpop.f32.mrb[6].mxu0  ;;  %v997_v15 = vpop.f32.mrb[6].mxu1  ;;  %v894_v63 = vadd.f32 %v893_v12, %v160_v27  ;;  %v996_v0 = vadd.f32 %v995_v13, %v168_v28 }
 0x120   :  { %v896_v16 = vpop.f32.mrb[7].mxu0  ;;  %v998_v17 = vpop.f32.mrb[7].mxu1 }
 0x155   :  { %v932_v29 = vpop.f32.mrb[0].mxu0  ;;  %v1034_v31 = vpop.f32.mrb[0].mxu1 }
 0x156   :  { %v1227_v33 = vadd.f32 %v932_v29, %v156_v25  ;;  %v1231_v34 = vadd.f32 %v1034_v31, %v164_v26  ;;  %v934_v35 = vpop.f32.mrb[1].mxu0  ;;  %v1036_v37 = vpop.f32.mrb[1].mxu1 }
 0x157   :  { %v1228_v39 = vadd.f32 %v934_v35, %v160_v27  ;;  %v1232_v40 = vadd.f32 %v1036_v37, %v168_v28  ;;  %v936_v41 = vpop.f32.mrb[2].mxu0  ;;  %v1038_v43 = vpop.f32.mrb[2].mxu1 }
 0x158   :  { %v1063_v45 = vadd.f32 %v1227_v33, %v1051_v30  ;;  %v1065_v46 = vadd.f32 %v1231_v34, %v1053_v32  ;;  %v1229_v47 = vadd.f32 %v936_v41, %v156_v25  ;;  %v1233_v48 = vadd.f32 %v1038_v43, %v164_v26  ;;  %v938_v49 = vpop.f32.mrb[3].mxu0  ;;  %v1040_v51 = vpop.f32.mrb[3].mxu1 }
 0x159   :  { %v1064_v53 = vadd.f32 %v1228_v39, %v1052_v36  ;;  %v1066_v54 = vadd.f32 %v1232_v40, %v1054_v38  ;;  %v1230_v55 = vadd.f32 %v938_v49, %v160_v27  ;;  %v1234_v56 = vadd.f32 %v1040_v51, %v168_v28 }
 0x15a   :  { %1075 = vst [vmem:[%s1951_s4] sm:$0xff] %v1063_v45  ;;  %1077 = vst [vmem:[%s1951_s4 + $0x10] sm:$0xff] %v1065_v46  ;;  %v1067_v57 = vadd.f32 %v1229_v47, %v1055_v42  ;;  %v1069_v58 = vadd.f32 %v1233_v48, %v1057_v44 }
 0x15b   :  { %1076 = vst [vmem:[%s1951_s4 + $0x8] sm:$0xff] %v1064_v53  ;;  %1078 = vst [vmem:[%s1951_s4 + $0x18] sm:$0xff] %v1066_v54  ;;  %v1068_v59 = vadd.f32 %v1230_v55, %v1056_v50  ;;  %v1070_v60 = vadd.f32 %v1234_v56, %v1058_v52 }
 0x15c   :  { %1079 = vst [vmem:[%s1951_s4 + $0x20] sm:$0xff] %v1067_v57  ;;  %1081 = vst [vmem:[%s1951_s4 + $0x30] sm:$0xff] %v1069_v58 }
 0x15d   :  { %1080 = vst [vmem:[%s1951_s4 + $0x28] sm:$0xff] %v1068_v59  ;;  %1082 = vst [vmem:[%s1951_s4 + $0x38] sm:$0xff] %v1070_v60  ;;  %v942_v1 = vpop.f32.mrb[8].mxu0  ;;  %v1044_v3 = vpop.f32.mrb[8].mxu1 }
 0x15e   :  { %v943_v5 = vadd.f32 %v942_v1, %v892_v61  ;;  %v1045_v6 = vadd.f32 %v1044_v3, %v994_v62  ;;  %v944_v7 = vpop.f32.mrb[9].mxu0  ;;  %v1046_v9 = vpop.f32.mrb[9].mxu1 }
 0x15f   :  { %v945_v11 = vadd.f32 %v944_v7, %v894_v63  ;;  %v1047_v12 = vadd.f32 %v1046_v9, %v996_v0  ;;  %v946_v13 = vpop.f32.mrb[10].mxu0  ;;  %v1048_v14 = vpop.f32.mrb[10].mxu1 }
 0x160   :  { %v1071_v15 = vadd.f32 %v1059_v2, %v943_v5  ;;  %v1073_v16 = vadd.f32 %v1061_v4, %v1045_v6  ;;  %v947_v17 = vpop.f32.mrb[11].mxu0  ;;  %v1049_v18 = vpop.f32.mrb[11].mxu1 }
 0x161   :  { %v1072_v19 = vadd.f32 %v1060_v8, %v945_v11  ;;  %v1074_v20 = vadd.f32 %v1062_v10, %v1047_v12 }
 0x162   :  { %1083 = vst [vmem:[%s1951_s4 + $0x40] sm:$0xf] %v1071_v15  ;;  %1085 = vst [vmem:[%s1951_s4 + $0x50] sm:$0xf] %v1073_v16 }
 0x163   :  { %1084 = vst [vmem:[%s1951_s4 + $0x48] sm:$0xf] %v1072_v19  ;;  %1086 = vst [vmem:[%s1951_s4 + $0x58] sm:$0xf] %v1074_v20 }

// kernel: forward.15
= control target key start
LH: loop header
LB: loop body
LE: loop exit
PB: predicated region body
PF: predicated region fallthrough
CT: control target
= control target key end

     0   :  { %s1054_s12 = smov 0   ;;  %s1056_s13 = smov 0   ;;  %s1282_s0 = inlined_call_operand.vmem [shape: f32[2,3,3,512], index: 0, kind: input, shape index: {}]   ;;  %s1283_s1 = inlined_call_operand.vmem [shape: f32[7,7,512], index: 1, kind: input, shape index: {}]   ;;  %s1284_s2 = inlined_call_operand.vmem [shape: f32[1,512], index: 2, kind: input, shape index: {}]   ;;  %s1285_s3 = inlined_call_operand.vmem [shape: f32[2,3,3,512], index: 3, kind: output, shape index: {}]  }
   0x1   :  { %s1058_s14 = smov 0   ;;  %s1060_s15 = smov 0  }
   0x2   :  { %s1062_s16 = smov 0   ;;  %s1064_s17 = smov 0  }
   0x3   :  { %s1066_s18 = smov 0   ;;  %s1068_s19 = smov 0  }
   0x4   :  { %s1070_s20 = smov 0  }
   0x5 LB: > { %s821_s21 = sadd.s32 4294967295, %s1031_s20   ;;  %s22_s22 = sadd.s32 1, %s1023_s18  ;;  %s1031_s20 = sphi %s1070_s20, %s13_s20   ;;  %s1027_s19 = sphi %s1068_s19, %s1296_s19   ;;  %s1023_s18 = sphi %s1066_s18, %s1295_s18   ;;  %s1019_s17 = sphi %s1064_s17, %s1294_s17   ;;  %s1015_s16 = sphi %s1062_s16, %s1293_s16   ;;  %s1011_s15 = sphi %s1060_s15, %s1292_s15   ;;  %s1007_s14 = sphi %s1058_s14, %s1291_s14   ;;  %s1003_s13 = sphi %s1056_s13, %s1290_s13   ;;  %s999_s12 = sphi %s1054_s12, %s1289_s12  }
   0x6   : > { %p23_p0 = scmp.ge.s32.totalorder %s22_s22, 4  ;;  %s25_s23 = sadd.s32 1, %s1027_s19 }
   0x7   : > { %s34_s24 = sadd.s32 1, %s1011_s15  ;;  %p41_p1 = scmp.ne.s32.totalorder %s1011_s15, %s1007_s14 }
   0x8   : > { %s1298_s22 = smov (%p23_p0, %s22_s22), 0  ;;  %s1300_s23 = smov (!%p23_p0, %s25_s23), %s1027_s19 }
   0x9   : > { %s30_s25 = ssub.s32 %s1023_s18, %s1298_s22  ;;  %p42_p2 = scmp.eq.s32.totalorder %s1031_s20, 0 }
   0xa   : > { %p27_p3 = scmp.ge.s32.totalorder %s1300_s23, 2  ;;  %p58_p4 = scmp.eq.s32.totalorder %s30_s25, 0 }
   0xb   : > { %p1114_p5 = por %p42_p2, %p41_p1  ;;  %s60_s27 = sadd.s32 1, %s1003_s13 }
   0xc   : > { %s1302_s23 = smov (%p27_p3, %s1300_s23), 0  ;;  %p67_p6 = scmp.ne.s32.totalorder %s1003_s13, %s999_s12 }
   0xd   : > { %s1122_s28 = scalar_select %p58_p4, %s1003_s13, %s60_s27  }
   0xe   : > { %s29_s29 = ssub.s32 %s1027_s19, %s1302_s23  ;;  %p125_p7 = scmp.eq.s32.totalorder %s821_s21, 7 }
   0xf   : > { %s31_s30 = sor.u32 %s30_s25, %s29_s29  ;;  %p1128_p9 = por %p67_p6, %p42_p2 }
  0x10   : > { %p32_p8 = scmp.eq.s32.totalorder %s31_s30, 0  ;;  %p1135_p10 = por %p125_p7, %p41_p1 }
  0x11   : > { %p824_p11 = scmp.ge.s32.totalorder %s1031_s20, 8 }
  0x12   : > { %s1140_s6 = scalar_select %p32_p8, %s1011_s15, %s34_s24  }
  0x13   : > { %147 = sbr.rel (%p824_p11) target bundleno = 46 (0x2e), region = 16 }
  0x1a   : > { %150 = sbr.rel (!%p1114_p5) target bundleno = 35 (0x23), region = 20  ;;  %s152_s7 = sand.u32 (%p1114_p5), 1, %s1011_s15  }
  0x1b   : > { %s883_s8 = smul.u32 (%p1114_p5), 12, %s1027_s19 }
  0x1c   : > { %s882_s9 = smul.u32 (%p1114_p5), 12, %s152_s7 }
  0x1d   : > { %s156_s10 = sadd.s32 (%p1114_p5), %s1023_s18, %s883_s8 }
  0x1e   : > { %s825_s11 = sshll.u32 (%p1114_p5), %s156_s10, 2  ;;  %s154_s24 = scalar_lea.vmem (%p1114_p5), [#allocation2], %s882_s9 }
  0x1f   : > { %s158_s27 = scalar_lea.vmem (%p1114_p5), %s1282_s0, %s825_s11 }
  0x20   : > { %v174_v0 = vld [vmem:[%s158_s27] sm:$0xf] (%p1114_p5)  ;;  %v176_v1 = vld [vmem:[%s158_s27 + $0x10] sm:$0xf] (%p1114_p5) }
  0x21   : > { %v178_v2 = vld [vmem:[%s158_s27 + $0x20] sm:$0xf]  ;;  %175 = vst [vmem:[%s154_s24] sm:$0xf] %v174_v0  ;;  %177 = vst [vmem:[%s154_s24 + $0x4] sm:$0xf] %v176_v1 }
  0x22   : > { %179 = vst [vmem:[%s154_s24 + $0x8] sm:$0xf] %v178_v2 }
  0x23 PF: > { %208 = sbr.rel (!%p1128_p9) target bundleno = 46 (0x2e), region = 61  ;;  %s210_s26 = sand.u32 (%p1128_p9), 1, %s1003_s13  }
  0x24   : > { %s826_s29 = sshll.u32 (%p1128_p9), %s1023_s18, 3  ;;  %s884_s30 = smul.u32 (%p1128_p9), 56, %s210_s26 }
  0x25   : > { %s214_s10 = scalar_lea.vmem (%p1128_p9), %s1283_s1, %s826_s29 }
  0x26   : > { %v254_v3 = vld [vmem:[%s214_s10] sm:$0xff] (%p1128_p9)  ;;  %s212_s9 = scalar_lea.vmem (%p1128_p9), [#allocation3], %s884_s30 }
  0x27   : > { %v256_v4 = vld [vmem:[%s214_s10 + $0x20] sm:$0xff] (%p1128_p9)  ;;  %255 = vst [vmem:[%s212_s9] sm:$0xff] (%p1128_p9), %v254_v3 }
  0x28   : > { %v258_v5 = vld [vmem:[%s214_s10 + $0x40] sm:$0xff] (%p1128_p9)  ;;  %257 = vst [vmem:[%s212_s9 + $0x8] sm:$0xff] (%p1128_p9), %v256_v4 }
  0x29   : > { %v260_v6 = vld [vmem:[%s214_s10 + $0x60] sm:$0xff] (%p1128_p9)  ;;  %259 = vst [vmem:[%s212_s9 + $0x10] sm:$0xff] (%p1128_p9), %v258_v5 }
  0x2a   : > { %v262_v7 = vld [vmem:[%s214_s10 + $0x80] sm:$0xff]  ;;  %261 = vst [vmem:[%s212_s9 + $0x18] sm:$0xff] %v260_v6 }
  0x2b   : > { %v264_v8 = vld [vmem:[%s214_s10 + $0xa0] sm:$0xff]  ;;  %263 = vst [vmem:[%s212_s9 + $0x20] sm:$0xff] %v262_v7 }
  0x2c   : > { %265 = vst [vmem:[%s212_s9 + $0x28] sm:$0xff] %v264_v8  ;;  %v266_v9 = vld [vmem:[%s214_s10 + $0xc0] sm:$0xff] }
  0x2d   : > { %267 = vst [vmem:[%s212_s9 + $0x30] sm:$0xff] %v266_v9 }
  0x2e PF: > { %p827_p12 = scmp.ge.s32.totalorder %s1031_s20, 1  ;;  %p278_p13 = scmp.lt.s32.totalorder %s1031_s20, 9 }
  0x30   : > { %p279_p0 = pnand %p827_p12, %p278_p13 }
  0x31   : > { %s285_s4 = sand.u32 (!%p279_p0), 1, %s1007_s14   ;;  %s292_s11 = sand.u32 (!%p279_p0), 1, %s999_s12   ;;  %v1033_v10 = vmov (!%p279_p0), 0.0   ;;  %vm349_vm0 = vcmask (!%p279_p0), 1041408   ;;  %vm420_vm1 = vcmask (!%p279_p0), 1040384  }
  0x32   : > { %282 = sbr.rel (%p279_p0) target bundleno = 123 (0x7b), region = 103  ;;  %p321_p1 = scmp.lt.s32.totalorder (!%p279_p0), %s1015_s16, 3  ;;  %v341_v11 = vrot.slane (!%p279_p0), %v1033_v10, 6  ;;  %v412_v25 = vrot.slane (!%p279_p0), %v1033_v10, 7 }
  0x33   : > { %s1162_s21 = smul.u32 (!%p279_p0), 12, %s285_s4 }
  0x34   : > { %s886_s25 = smul.u32 (!%p279_p0), 56, %s292_s11  ;;  %v350_v14 = vsel (!%p279_p0), %vm349_vm0, 0.0, %v341_v11  ;;  %v421_v47 = vsel (!%p279_p0), %vm420_vm1, 0.0, %v412_v25 }
  0x35   : > { %s287_s27 = scalar_lea.vmem (!%p279_p0), [#allocation2], %s1162_s21  ;;  %s320_s30 = scalar_lea.vmem (!%p279_p0), [#allocation4], %s1162_s21 }
  0x36   : > { %v1167_v12 = vld [vmem:[%s287_s27] sm:$0x7] (!%p279_p0)  ;;  %v1169_v13 = vld [vmem:[%s287_s27 + $0x4] sm:$0x7] (!%p279_p0)  ;;  %v1173_v15 = vld [vmem:[%s287_s27 + $0x8] sm:$0x7] (!%p279_p0) }
  0x37   : > { %v342_v16 = vrot.slane (!%p279_p0), %v1167_v12, 6  ;;  %v343_v17 = vrot.slane (!%p279_p0), %v1169_v13, 6  ;;  %v344_v18 = vrot.slane (!%p279_p0), %v1173_v15, 6  ;;  %s1178_s12 = scalar_lea.vmem (!%p279_p0), [#allocation3], %s886_s25  ;;  %v413_v38 = vrot.slane (!%p279_p0), %v1167_v12, 7 }
  0x38   : > { %v830_v19 = vld [vmem:[%s1178_s12 + $0x9] ss:$0 sm:$0xff] (!%p279_p0)  ;;  %v832_v20 = vld [vmem:[%s1178_s12 + $0x11] ss:$0 sm:$0xff] (!%p279_p0)  ;;  %v834_v24 = vld [vmem:[%s1178_s12 + $0x19] ss:$0 sm:$0xff] (!%p279_p0) }
  0x39   : > { %s322_s24 = scalar_select %p321_p1, %s1015_s16, 3  ;;  %v351_v21 = vsel %vm349_vm0, 0.0, %v342_v16  ;;  %v352_v22 = vsel %vm349_vm0, 0.0, %v343_v17  ;;  %v360_v23 = vmul.f32 %v830_v19, %v350_v14  ;;  %v353_v27 = vsel %vm349_vm0, 0.0, %v344_v18  ;;  %v836_v35 = vld [vmem:[%s1178_s12 + $0x21] ss:$0 sm:$0xff] }
  0x3a   : > { %v361_v28 = vmul.f32 %v830_v19, %v351_v21  ;;  %v371_v29 = vmul.f32 %v832_v20, %v350_v14  ;;  %v372_v30 = vmul.f32 %v832_v20, %v351_v21  ;;  %v373_v34 = vmul.f32 %v832_v20, %v352_v22  ;;  %v838_v43 = vld [vmem:[%s1178_s12 + $0x29] ss:$0 sm:$0xff]  ;;  %v840_v52 = vld [vmem:[%s1178_s12 + $0xa] ss:$0 sm:$0xff]  ;;  %v842_v60 = vld [vmem:[%s1178_s12 + $0x12] ss:$0 sm:$0xff] }
  0x3b   : > { %s323_s29 = scalar_lea.vmem %s1284_s2, %s322_s24  ;;  %v383_v36 = vmul.f32 %v834_v24, %v351_v21  ;;  %v384_v37 = vmul.f32 %v834_v24, %v352_v22  ;;  %v385_v42 = vmul.f32 %v834_v24, %v353_v27  ;;  %v395_v44 = vmul.f32 %v836_v35, %v352_v22  ;;  %v844_v3 = vld [vmem:[%s1178_s12 + $0x1a] ss:$0 sm:$0xff]  ;;  %v848_v22 = vld [vmem:[%s1178_s12 + $0x2a] ss:$0 sm:$0xff]  ;;  %s887_s7 = smul.u32 (%p1135_p10), 12, %s1019_s17 }
  0x3c   : > { %v828_v26 = vld [vmem:[%s323_s29] ss:$0 sm:$0xff]  ;;  %v396_v45 = vmul.f32 %v836_v35, %v353_v27  ;;  %v414_v46 = vrot.slane %v1169_v13, 7  ;;  %v397_v51 = vmul.f32 %v836_v35, %v350_v14  ;;  %v407_v53 = vmul.f32 %v838_v43, %v353_v27  ;;  %v852_v35 = vld [vmem:[%s1178_s12 + $0x13] ss:$0 sm:$0xff] }
  0x3d   : > { %v334_v31 = vadd.f32 %v828_v26, %v1167_v12  ;;  %v335_v32 = vadd.f32 %v828_v26, %v1169_v13  ;;  %v336_v33 = vadd.f32 %v828_v26, %v1173_v15  ;;  %v415_v54 = vrot.slane %v1173_v15, 7  ;;  %s672_s8 = sadd.s32 (%p1135_p10), %s1015_s16, %s887_s7 }
  0x3e   : > { %v422_v55 = vsel %vm420_vm1, 0.0, %v413_v38  ;;  %v408_v59 = vmul.f32 %v838_v43, %v350_v14  ;;  %v423_v61 = vsel %vm420_vm1, 0.0, %v414_v46  ;;  %v430_v62 = vmul.f32 %v840_v52, %v421_v47  ;;  %v846_v14 = vld [vmem:[%s1178_s12 + $0x22] ss:$0 sm:$0xff]  ;;  %s879_s10 = sshll.u32 (%p1135_p10), %s672_s8, 2 }
  0x3f   : > { %v362_v39 = vadd.f32 %v360_v23, %v334_v31  ;;  %v363_v40 = vadd.f32 %v360_v23, %v335_v32  ;;  %v364_v41 = vadd.f32 %v361_v28, %v336_v33  ;;  %v431_v2 = vmul.f32 %v840_v52, %v422_v55  ;;  %s674_s11 = scalar_lea.vmem (%p1135_p10), %s1285_s3, %s879_s10 }
  0x40   : > { %v424_v4 = vsel %vm420_vm1, 0.0, %v415_v54  ;;  %v440_v5 = vmul.f32 %v842_v60, %v421_v47  ;;  %v441_v6 = vmul.f32 %v842_v60, %v422_v55  ;;  %v442_v11 = vmul.f32 %v842_v60, %v423_v61 }
  0x41   : > { %v374_v48 = vadd.f32 %v371_v29, %v362_v39  ;;  %v375_v49 = vadd.f32 %v372_v30, %v363_v40  ;;  %v376_v50 = vadd.f32 %v373_v34, %v364_v41  ;;  %v451_v16 = vmul.f32 %v844_v3, %v422_v55  ;;  %v850_v29 = vld [vmem:[%s1178_s12 + $0xb] ss:$0 sm:$0xff]  ;;  %v854_v41 = vld [vmem:[%s1178_s12 + $0x1b] ss:$0 sm:$0xff] }
  0x42   : > { %v452_v17 = vmul.f32 %v844_v3, %v423_v61  ;;  %v453_v21 = vmul.f32 %v844_v3, %v424_v4  ;;  %v462_v23 = vmul.f32 %v846_v14, %v423_v61  ;;  %v463_v24 = vmul.f32 %v846_v14, %v424_v4 }
  0x43   : > { %v386_v56 = vadd.f32 %v383_v36, %v374_v48  ;;  %v387_v57 = vadd.f32 %v384_v37, %v375_v49  ;;  %v388_v58 = vadd.f32 %v385_v42, %v376_v50  ;;  %v464_v28 = vmul.f32 %v846_v14, %v421_v47 }
  0x44   : > { %v473_v30 = vmul.f32 %v848_v22, %v424_v4  ;;  %v474_v34 = vmul.f32 %v848_v22, %v421_v47  ;;  %v483_v36 = vmul.f32 0.0, %v850_v29  ;;  %v484_v40 = vmul.f32 %v850_v29, %v1167_v12  ;;  %v856_v47 = vld [vmem:[%s1178_s12 + $0x23] ss:$0 sm:$0xff] }
  0x45   : > { %v398_v63 = vadd.f32 %v395_v44, %v386_v56  ;;  %v399_v0 = vadd.f32 %v396_v45, %v387_v57  ;;  %v400_v1 = vadd.f32 %v397_v51, %v388_v58  ;;  %v493_v42 = vmul.f32 0.0, %v852_v35  ;;  %v858_v57 = vld [vmem:[%s1178_s12 + $0x2b] ss:$0 sm:$0xff] }
  0x46   : > { %v494_v43 = vmul.f32 %v852_v35, %v1167_v12  ;;  %v531_v44 = vrot.slane %v1033_v10, 1  ;;  %v495_v49 = vmul.f32 %v852_v35, %v1169_v13  ;;  %v504_v50 = vmul.f32 %v854_v41, %v1167_v12 }
  0x47   : > { %v409_v7 = vadd.f32 %v407_v53, %v398_v63  ;;  %v410_v8 = vadd.f32 %v408_v59, %v399_v0  ;;  %v411_v9 = vadd.f32 %v408_v59, %v400_v1  ;;  %v505_v51 = vmul.f32 %v854_v41, %v1169_v13 }
  0x48   : > { %v532_v52 = vrot.slane %v1167_v12, 1  ;;  %v506_v56 = vmul.f32 %v854_v41, %v1173_v15  ;;  %v515_v58 = vmul.f32 %v856_v47, %v1169_v13  ;;  %v516_v59 = vmul.f32 %v856_v47, %v1173_v15 }
  0x49   : > { %v432_v18 = vadd.f32 %v430_v62, %v409_v7  ;;  %v433_v19 = vadd.f32 %v430_v62, %v410_v8  ;;  %v434_v20 = vadd.f32 %v431_v2, %v411_v9  ;;  %v533_v60 = vrot.slane %v1169_v13, 1  ;;  %v860_v2 = vld [vmem:[%s1178_s12 + $0xc] ss:$0 sm:$0xff] }
  0x4a   : > { %v539_v61 = vsel %vm349_vm0, %v531_v44, 0.0  ;;  %v517_v1 = vmul.f32 0.0, %v856_v47  ;;  %v526_v3 = vmul.f32 %v858_v57, %v1173_v15  ;;  %v534_v4 = vrot.slane %v1173_v15, 1 }
  0x4b   : > { %v443_v25 = vadd.f32 %v440_v5, %v432_v18  ;;  %v444_v26 = vadd.f32 %v441_v6, %v433_v19  ;;  %v445_v27 = vadd.f32 %v442_v11, %v434_v20  ;;  %v540_v5 = vsel %vm349_vm0, %v532_v52, 0.0  ;;  %v862_v11 = vld [vmem:[%s1178_s12 + $0x14] ss:$0 sm:$0xff] }
  0x4c   : > { %v527_v9 = vmul.f32 0.0, %v858_v57  ;;  %v541_v14 = vsel %vm349_vm0, %v533_v60, 0.0  ;;  %v549_v20 = vmul.f32 %v860_v2, %v540_v5  ;;  %v542_v22 = vsel %vm349_vm0, %v534_v4, 0.0 }
  0x4d   : > { %v454_v31 = vadd.f32 %v451_v16, %v443_v25  ;;  %v455_v32 = vadd.f32 %v452_v17, %v444_v26  ;;  %v456_v33 = vadd.f32 %v453_v21, %v445_v27  ;;  %v548_v16 = vmul.f32 %v860_v2, %v539_v61  ;;  %v864_v21 = vld [vmem:[%s1178_s12 + $0x1c] ss:$0 sm:$0xff] }
  0x4e   : > { %v596_v25 = vrot.slane %v1033_v10, 2  ;;  %v560_v29 = vmul.f32 %v862_v11, %v541_v14  ;;  %v598_v10 = vrot.slane %v1169_v13, 2 }
  0x4f   : > { %v465_v37 = vadd.f32 %v462_v23, %v454_v31  ;;  %v466_v38 = vadd.f32 %v463_v24, %v455_v32  ;;  %v467_v39 = vadd.f32 %v464_v28, %v456_v33  ;;  %v558_v23 = vmul.f32 %v862_v11, %v539_v61 }
  0x50   : > { %v559_v24 = vmul.f32 %v862_v11, %v540_v5  ;;  %v569_v31 = vmul.f32 %v864_v21, %v540_v5  ;;  %v570_v32 = vmul.f32 %v864_v21, %v541_v14  ;;  %v597_v33 = vrot.slane %v1167_v12, 2 }
  0x51   : > { %v475_v45 = vadd.f32 %v473_v30, %v465_v37  ;;  %v476_v46 = vadd.f32 %v474_v34, %v466_v38  ;;  %v477_v48 = vadd.f32 %v474_v34, %v467_v39  ;;  %v866_v30 = vld [vmem:[%s1178_s12 + $0x24] ss:$0 sm:$0xff]  ;;  %v571_v37 = vmul.f32 %v864_v21, %v542_v22  ;;  %v868_v38 = vld [vmem:[%s1178_s12 + $0x2c] ss:$0 sm:$0xff] }
  0x52   : > { %v580_v39 = vmul.f32 %v866_v30, %v541_v14  ;;  %v604_v41 = vsel %vm420_vm1, %v596_v25, 0.0  ;;  %v599_v12 = vrot.slane %v1173_v15, 2  ;;  %v592_v52 = vmul.f32 %v868_v38, %v539_v61 }
  0x53   : > { %v485_v53 = vadd.f32 %v483_v36, %v475_v45  ;;  %v486_v54 = vadd.f32 %v483_v36, %v476_v46  ;;  %v487_v55 = vadd.f32 %v484_v40, %v477_v48  ;;  %v581_v40 = vmul.f32 %v866_v30, %v542_v22  ;;  %v870_v46 = vld [vmem:[%s1178_s12 + $0xd] ss:$0 sm:$0xff] }
  0x54   : > { %v582_v45 = vmul.f32 %v866_v30, %v539_v61  ;;  %v591_v48 = vmul.f32 %v868_v38, %v542_v22  ;;  %v606_v13 = vsel %vm420_vm1, %v598_v10, 0.0  ;;  %v607_v60 = vsel %vm420_vm1, %v599_v12, 0.0  ;;  %v876_v61 = vld [vmem:[%s1178_s12 + $0x25] ss:$0 sm:$0xff] }
  0x55   : > { %v496_v62 = vadd.f32 %v493_v42, %v485_v53  ;;  %v497_v63 = vadd.f32 %v494_v43, %v486_v54  ;;  %v498_v0 = vadd.f32 %v495_v49, %v487_v55  ;;  %v605_v49 = vsel %vm420_vm1, %v597_v33, 0.0  ;;  %v872_v53 = vld [vmem:[%s1178_s12 + $0x15] ss:$0 sm:$0xff] }
  0x56   : > { %v613_v54 = vmul.f32 %v870_v46, %v604_v41  ;;  %v623_v15 = vmul.f32 %v872_v53, %v604_v41  ;;  %v625_v2 = vmul.f32 %v872_v53, %v606_v13  ;;  %v645_v11 = vmul.f32 %v876_v61, %v606_v13 }
  0x57   : > { %v507_v6 = vadd.f32 %v504_v50, %v496_v62  ;;  %v508_v7 = vadd.f32 %v505_v51, %v497_v63  ;;  %v509_v8 = vadd.f32 %v506_v56, %v498_v0  ;;  %v624_v62 = vmul.f32 %v872_v53, %v605_v49 }
  0x58   : > { %v646_v14 = vmul.f32 %v876_v61, %v607_v60 }
  0x59   : > { %v518_v17 = vadd.f32 %v515_v58, %v507_v6  ;;  %v519_v18 = vadd.f32 %v516_v59, %v508_v7  ;;  %v520_v19 = vadd.f32 %v517_v1, %v509_v8  ;;  %v614_v58 = vmul.f32 %v870_v46, %v605_v49  ;;  %v874_v59 = vld [vmem:[%s1178_s12 + $0x1d] ss:$0 sm:$0xff] }
  0x5a   : > { %v635_v4 = vmul.f32 %v874_v59, %v606_v13  ;;  %v636_v8 = vmul.f32 %v874_v59, %v607_v60 }
  0x5b   : > { %v528_v26 = vadd.f32 %v526_v3, %v518_v17  ;;  %v529_v27 = vadd.f32 %v527_v9, %v519_v18  ;;  %v530_v28 = vadd.f32 %v527_v9, %v520_v19  ;;  %v634_v3 = vmul.f32 %v874_v59, %v605_v49  ;;  %v878_v9 = vld [vmem:[%s1178_s12 + $0x2d] ss:$0 sm:$0xff] }
  0x5c   : > { %v647_v19 = vmul.f32 %v876_v61, %v604_v41 }
  0x5d   : > { %v550_v34 = vadd.f32 %v548_v16, %v528_v26  ;;  %v551_v35 = vadd.f32 %v548_v16, %v529_v27  ;;  %v552_v36 = vadd.f32 %v549_v20, %v530_v28  ;;  %v656_v20 = vmul.f32 %v878_v9, %v607_v60 }
  0x5f   : > { %v561_v42 = vadd.f32 %v558_v23, %v550_v34  ;;  %v562_v43 = vadd.f32 %v559_v24, %v551_v35  ;;  %v563_v44 = vadd.f32 %v560_v29, %v552_v36  ;;  %v657_v24 = vmul.f32 %v878_v9, %v604_v41 }
  0x61   : > { %v572_v47 = vadd.f32 %v569_v31, %v561_v42  ;;  %v573_v50 = vadd.f32 %v570_v32, %v562_v43  ;;  %v574_v51 = vadd.f32 %v571_v37, %v563_v44 }
  0x63   : > { %v583_v55 = vadd.f32 %v580_v39, %v572_v47  ;;  %v584_v56 = vadd.f32 %v581_v40, %v573_v50  ;;  %v585_v57 = vadd.f32 %v582_v45, %v574_v51 }
  0x65   : > { %v593_v63 = vadd.f32 %v591_v48, %v583_v55  ;;  %v594_v0 = vadd.f32 %v592_v52, %v584_v56  ;;  %v595_v1 = vadd.f32 %v592_v52, %v585_v57 }
  0x67   : > { %v615_v5 = vadd.f32 %v613_v54, %v593_v63  ;;  %v616_v6 = vadd.f32 %v613_v54, %v594_v0  ;;  %v617_v7 = vadd.f32 %v614_v58, %v595_v1 }
  0x69   : > { %v626_v16 = vadd.f32 %v623_v15, %v615_v5  ;;  %v627_v17 = vadd.f32 %v624_v62, %v616_v6  ;;  %v628_v18 = vadd.f32 %v625_v2, %v617_v7 }
  0x6b   : > { %v637_v21 = vadd.f32 %v634_v3, %v626_v16  ;;  %v638_v22 = vadd.f32 %v635_v4, %v627_v17  ;;  %v639_v23 = vadd.f32 %v636_v8, %v628_v18 }
  0x6c   : > { %670 = sbr.rel (!%p1135_p10) target bundleno = 123 (0x7b), region = 115 }
  0x6d   : > { %v648_v25 = vadd.f32 %v645_v11, %v637_v21  ;;  %v649_v26 = vadd.f32 %v646_v14, %v638_v22  ;;  %v650_v27 = vadd.f32 %v647_v19, %v639_v23 }
  0x6f   : > { %v658_v28 = vadd.f32 %v656_v20, %v648_v25  ;;  %v659_v29 = vadd.f32 %v657_v24, %v649_v26  ;;  %v660_v30 = vadd.f32 %v657_v24, %v650_v27 }
  0x71   : > { %661 = vst [vmem:[%s320_s30] sm:$0x7] %v658_v28  ;;  %662 = vst [vmem:[%s320_s30 + $0x4] sm:$0x7] %v659_v29 }
  0x72   : > { %663 = vst [vmem:[%s320_s30 + $0x8] sm:$0x7] %v660_v30 }
  0x78   : > { %v690_v31 = vld [vmem:[%s320_s30] sm:$0xf]  ;;  %v692_v32 = vld [vmem:[%s320_s30 + $0x4] sm:$0xf] }
  0x79   : > { %v694_v33 = vld [vmem:[%s320_s30 + $0x8] sm:$0xf]  ;;  %691 = vst [vmem:[%s674_s11] sm:$0xf] %v690_v31  ;;  %693 = vst [vmem:[%s674_s11 + $0x10] sm:$0xf] %v692_v32 }
  0x7a   : > { %695 = vst [vmem:[%s674_s11 + $0x20] sm:$0xf] %v694_v33 }
  0x7b PF: > { %s13_s20 = sadd.s32 1, %s1031_s20   ;;  %s1289_s12 = smov %s1003_s13 }
  0x7c   : > { %p10_p2 = scmp.ge.s32.totalorder %s13_s20, 10   ;;  %s1290_s13 = smov %s1122_s28 }
  0x7d   : > { %s1291_s14 = smov %s1011_s15  ;;  %s1292_s15 = smov %s1140_s6 }
  0x7e   : > { %s1293_s16 = smov %s1023_s18  ;;  %s1294_s17 = smov %s1027_s19 }
  0x7f   : > { %s1295_s18 = smov %s1298_s22  ;;  %s1296_s19 = smov %s1302_s23 }
  0x80   :  { %12 = sbr.rel (!%p10_p2) target bundleno = 5 (0x5), region = 203 }

// kernel: forward.12
= control target key start
LH: loop header
LB: loop body
LE: loop exit
PB: predicated region body
PF: predicated region fallthrough
CT: control target
= control target key end

     0   :  { %10 = vsyncpa [#allocation3], 0  ;;  %s4974_s0 = inlined_call_operand.vmem [shape: f32[20,512], index: 0, kind: input, shape index: {}]   ;;  %s4975_s1 = inlined_call_operand.hbm [shape: f32[1,512], index: 1, kind: input, shape index: {}]   ;;  %s4976_s2 = inlined_call_operand.hbm [shape: f32[1,512], index: 2, kind: input, shape index: {}]   ;;  %s4977_s3 = inlined_call_operand.hbm [shape: bf16[512,1536], index: 3, kind: input, shape index: {}]   ;;  %s4978_s4 = inlined_call_operand.hbm [shape: f32[1,1536], index: 4, kind: input, shape index: {}]   ;;  %s4979_s5 = inlined_call_operand.vmem [shape: bf16[20,1536], index: 5, kind: output, shape index: {}]  }
   0x1   :  { %11 = vsyncpa [#allocation5], 0 }
   0x2   :  { %12 = vsyncpa [#allocation8], 0  ;;  %s4556_s18 = smov [#allocation4]   ;;  %s4557_s20 = smov [#allocation2]  }
   0x3   :  { %s31_s19 = sshll.u32 %s4556_s18, 4  ;;  %s21_s21 = sshll.u32 %s4557_s20, 4  ;;  %s32_s19 = int_to_ptr.vmem [resolvable:$true] %s31_s19  ;;  %s22_s21 = int_to_ptr.vmem [resolvable:$true] %s21_s21 }
   0x4   :  { %s4462_s24 = scalar_lea.hbm %s4976_s2, 64 }
   0x5   :  { %p4463_p0 = scmp.ne.s32.totalorder %s4976_s2, %s4462_s24  ;;  %p4466_p1 = scmp.lt.u32.totalorder %s4462_s24, %s4976_s2 }
   0x7   :  { %p4468_p2 = pnand %p4466_p1, %p4463_p0 }
   0x9   :  { %4471 = shalt.err (!%p4468_p2)
}
   0xa   :  { %s4472_s29 = scalar_lea.vmem %s32_s19, 64  ;;  %p4477_p4 = scmp.lt.s32.totalorder %s32_s19, %s32_s19 }
   0xb   :  { %p4473_p3 = scmp.ne.s32.totalorder %s32_s19, %s4472_s29  ;;  %p4478_p5 = scmp.lt.s32.totalorder %s4472_s29, %s4472_s29 }
   0xd   :  { %p4479_p6 = por %p4478_p5, %p4477_p4 }
   0xf   :  { %p4480_p7 = pnand %p4479_p6, %p4473_p3 }
  0x11   :  { %4483 = shalt.err (!%p4480_p7)
}
  0x12   :  { %34 = dma.hbm_to_vmem [thread:$0]  %s4976_s2, 64, %s32_s19, [#allocation5]  }
  0x13   :  { %s4484_s9 = scalar_lea.hbm %s4975_s1, 64 }
  0x14   :  { %p4485_p8 = scmp.ne.s32.totalorder %s4975_s1, %s4484_s9  ;;  %p4488_p9 = scmp.lt.u32.totalorder %s4484_s9, %s4975_s1 }
  0x16   :  { %p4490_p10 = pnand %p4488_p9, %p4485_p8 }
  0x18   :  { %4493 = shalt.err (!%p4490_p10)
}
  0x19   :  { %s4494_s14 = scalar_lea.vmem %s22_s21, 64  ;;  %p4499_p12 = scmp.lt.s32.totalorder %s22_s21, %s22_s21 }
  0x1a   :  { %p4495_p11 = scmp.ne.s32.totalorder %s22_s21, %s4494_s14  ;;  %p4500_p13 = scmp.lt.s32.totalorder %s4494_s14, %s4494_s14 }
  0x1c   :  { %p4501_p0 = por %p4500_p13, %p4499_p12 }
  0x1e   :  { %p4502_p1 = pnand %p4501_p0, %p4495_p11 }
  0x20   :  { %4505 = shalt.err (!%p4502_p1)
}
  0x21   :  { %24 = dma.hbm_to_vmem [thread:$0]  %s4975_s1, 64, %s22_s21, [#allocation3]  }
  0x22   :  { %s4558_s16 = smov [#allocation6]   ;;  %s4506_s20 = scalar_lea.hbm %s4977_s3, 49152 }
  0x23   :  { %s40_s17 = sshll.u32 %s4558_s16, 4  ;;  %p4507_p2 = scmp.ne.s32.totalorder %s4977_s3, %s4506_s20  ;;  %s41_s17 = int_to_ptr.vmem [resolvable:$true] %s40_s17 }
  0x24   :  { %p4510_p3 = scmp.lt.u32.totalorder %s4506_s20, %s4977_s3 }
  0x26   :  { %p4512_p4 = pnand %p4510_p3, %p4507_p2 }
  0x28   :  { %4515 = shalt.err (!%p4512_p4)
}
  0x29   :  { %s4516_s26 = scalar_lea.vmem %s41_s17, 49152  ;;  %p4521_p6 = scmp.lt.s32.totalorder %s41_s17, %s41_s17 }
  0x2a   :  { %p4517_p5 = scmp.ne.s32.totalorder %s41_s17, %s4516_s26  ;;  %p4522_p7 = scmp.lt.s32.totalorder %s4516_s26, %s4516_s26 }
  0x2c   :  { %p4523_p8 = por %p4522_p7, %p4521_p6 }
  0x2e   :  { %p4524_p9 = pnand %p4523_p8, %p4517_p5 }
  0x30   :  { %4527 = shalt.err (!%p4524_p9)
}
  0x31   :  { %s4559_s1 = smov 768   ;;  %s4560_s21 = smov 48  }
  0x32   :  { %46 = dma.hbm_to_vmem [thread:$0]  %s4977_s3, 49152, %s41_s17, [#allocation5], %s4559_s1, %s4559_s1, %s4560_s21  }
  0x33   :  { %s4561_s29 = smov [#allocation7]   ;;  %s4528_s8 = scalar_lea.hbm %s4978_s4, 192 }
  0x34   :  { %s53_s30 = sshll.u32 %s4561_s29, 4  ;;  %p4529_p10 = scmp.ne.s32.totalorder %s4978_s4, %s4528_s8  ;;  %s54_s30 = int_to_ptr.vmem [resolvable:$true] %s53_s30 }
  0x35   :  { %p4532_p11 = scmp.lt.u32.totalorder %s4528_s8, %s4978_s4 }
  0x37   :  { %p4534_p12 = pnand %p4532_p11, %p4529_p10 }
  0x39   :  { %4537 = shalt.err (!%p4534_p12)
}
  0x3a   :  { %s4538_s13 = scalar_lea.vmem %s54_s30, 192  ;;  %p4543_p0 = scmp.lt.s32.totalorder %s54_s30, %s54_s30 }
  0x3b   :  { %p4539_p13 = scmp.ne.s32.totalorder %s54_s30, %s4538_s13  ;;  %p4544_p1 = scmp.lt.s32.totalorder %s4538_s13, %s4538_s13 }
  0x3d   :  { %p4545_p2 = por %p4544_p1, %p4543_p0 }
  0x3f   :  { %p4546_p3 = pnand %p4545_p2, %p4539_p13 }
  0x41   :  { %4549 = shalt.err (!%p4546_p3)
}
  0x42   :  { %56 = dma.hbm_to_vmem [thread:$0]  %s4978_s4, 192, %s54_s30, [#allocation8]  }
  0x43   :  { %4550 = dma.done.wait [#allocation3], 64  }
  0x44   :  { %4551 = vsyncadd [#allocation3], 4294967232 }
  0x45   :  { %4552 = dma.done.wait [#allocation5], 49216  }
  0x46   :  { %4553 = vsyncadd [#allocation5], 4294918080 }
  0x47   :  { %4554 = dma.done.wait [#allocation8], 192  }
  0x48   :  { %4555 = vsyncadd [#allocation8], 4294967104  ;;  %vm91_vm0 = vcmask 1043456   ;;  %v4643_v0 = vld [vmem:[%s4974_s0] sm:$0xff]  ;;  %v4648_v1 = vld [vmem:[%s4974_s0 + $0x8] sm:$0xff] }
  0x49   :  { %v4653_v2 = vld [vmem:[%s4974_s0 + $0x10] sm:$0xff]  ;;  %v4658_v3 = vld [vmem:[%s4974_s0 + $0x18] sm:$0xff]  ;;  %v81_v4 = vadd.f32 %v4648_v1, %v4643_v0  ;;  %v4665_v5 = vld [vmem:[%s4974_s0 + $0x40] sm:$0xf] }
  0x4a   :  { %v4670_v6 = vld [vmem:[%s4974_s0 + $0x48] sm:$0xf]  ;;  %v4675_v7 = vld [vmem:[%s4974_s0 + $0x50] sm:$0xf]  ;;  %v4680_v8 = vld [vmem:[%s4974_s0 + $0x58] sm:$0xf] }
  0x4b   :  { %v92_v9 = vsel %vm91_vm0, %v4665_v5, 0.0  ;;  %v93_v10 = vsel %vm91_vm0, %v4670_v6, 0.0  ;;  %v82_v11 = vadd.f32 %v81_v4, %v4653_v2  ;;  %v95_v13 = vsel %vm91_vm0, %v4675_v7, 0.0  ;;  %v4692_v14 = vld [vmem:[%s4974_s0 + $0x20] sm:$0xff]  ;;  %v4697_v15 = vld [vmem:[%s4974_s0 + $0x28] sm:$0xff]  ;;  %v4702_v16 = vld [vmem:[%s4974_s0 + $0x30] sm:$0xff] }
  0x4c   :  { %v94_v12 = vadd.f32 %v93_v10, %v92_v9  ;;  %v97_v17 = vsel %vm91_vm0, %v4680_v8, 0.0  ;;  %v4709_v18 = vld [vmem:[%s4974_s0 + $0x38] sm:$0xff]  ;;  %v86_v19 = vadd.f32 %v4697_v15, %v4692_v14  ;;  %v3882_v26 = vld [vmem:[#allocation6 + $0xc] ss:$48 sps:$4 sm:$0xff]   ;;  %v3885_v28 = vld [vmem:[#allocation6 + $0x8] ss:$48 sps:$4 sm:$0xff]  }
  0x4d   :  { %v83_v20 = vadd.f32 %v82_v11, %v4658_v3  ;;  %v3880_v25 = vld [vmem:[#allocation6 + $0x4] ss:$48 sps:$4 sm:$0xff]   ;;  %v3884_v27 = vld [vmem:[#allocation6] ss:$48 sps:$4 sm:$0xff]   ;;  %v3888_v30 = vld [vmem:[#allocation6 + $0x6c] ss:$48 sps:$4 sm:$0xff]   ;;  %2715 = vmatprep.subr.bf16.mxu1 %v3882_v26 }
  0x4e   :  { %v96_v21 = vadd.f32 %v95_v13, %v94_v12  ;;  %v87_v22 = vadd.f32 %v86_v19, %v4702_v16  ;;  %v3886_v29 = vld [vmem:[#allocation6 + $0x64] ss:$48 sps:$4 sm:$0xff]   ;;  %2613 = vmatprep.subr.bf16.mxu0 %v3880_v25  ;;  %2716 = vmatpush1.bf16.msra.mxu1 %v3885_v28  ;;  %v3890_v31 = vld [vmem:[#allocation6 + $0x60] ss:$48 sps:$4 sm:$0xff]   ;;  %v3891_v32 = vld [vmem:[#allocation6 + $0x68] ss:$48 sps:$4 sm:$0xff]  }
  0x4f   :  { %84 = vadd.xlane.f32.xlu0 %v83_v20  ;;  %2614 = vmatpush1.bf16.msra.mxu0 %v3884_v27  ;;  %v3892_v33 = vld [vmem:[#allocation6 + $0xc4] ss:$48 sps:$4 sm:$0xff]   ;;  %v3894_v34 = vld [vmem:[#allocation6 + $0xcc] ss:$48 sps:$4 sm:$0xff]   ;;  %v3896_v35 = vld [vmem:[#allocation6 + $0xc0] ss:$48 sps:$4 sm:$0xff]  }
  0x50   :  { %v98_v23 = vadd.f32 %v97_v17, %v96_v21  ;;  %v88_v24 = vadd.f32 %v87_v22, %v4709_v18  ;;  %2615 = vmatprep.subr.bf16.mxu0 %v3886_v29  ;;  %2717 = vmatprep.subr.bf16.mxu1 %v3888_v30  ;;  %v3897_v36 = vld [vmem:[#allocation6 + $0xc8] ss:$48 sps:$4 sm:$0xff]   ;;  %v3898_v37 = vld [vmem:[#allocation6 + $0x124] ss:$48 sps:$4 sm:$0xff]   ;;  %v3900_v38 = vld [vmem:[#allocation6 + $0x12c] ss:$48 sps:$4 sm:$0xff]  }
  0x51   :  { %v3902_v39 = vld [vmem:[#allocation6 + $0x120] ss:$48 sps:$4 sm:$0xff]   ;;  %v3903_v40 = vld [vmem:[#allocation6 + $0x128] ss:$48 sps:$4 sm:$0xff]   ;;  %v3904_v41 = vld [vmem:[#allocation6 + $0x184] ss:$48 sps:$4 sm:$0xff]  }
  0x52   :  { %99 = vadd.xlane.f32.xlu1 %v98_v23  ;;  %2718 = vmatpush1.bf16.msra.mxu1 %v3891_v32  ;;  %v3906_v42 = vld [vmem:[#allocation6 + $0x18c] ss:$48 sps:$4 sm:$0xff]   ;;  %v3908_v43 = vld [vmem:[#allocation6 + $0x180] ss:$48 sps:$4 sm:$0xff]   ;;  %v3909_v44 = vld [vmem:[#allocation6 + $0x188] ss:$48 sps:$4 sm:$0xff]  }
  0x53   :  { %89 = vadd.xlane.f32.xlu0 %v88_v24  ;;  %2616 = vmatpush1.bf16.msra.mxu0 %v3890_v31  ;;  %v3910_v45 = vld [vmem:[#allocation6 + $0x1e4] ss:$48 sps:$4 sm:$0xff]   ;;  %v3912_v46 = vld [vmem:[#allocation6 + $0x1ec] ss:$48 sps:$4 sm:$0xff]   ;;  %v3914_v47 = vld [vmem:[#allocation6 + $0x1e0] ss:$48 sps:$4 sm:$0xff]  }
  0x54   :  { %2617 = vmatprep.subr.bf16.mxu0 %v3892_v33  ;;  %2719 = vmatprep.subr.bf16.mxu1 %v3894_v34  ;;  %v3915_v48 = vld [vmem:[#allocation6 + $0x1e8] ss:$48 sps:$4 sm:$0xff]   ;;  %v3916_v49 = vld [vmem:[#allocation6 + $0x244] ss:$48 sps:$4 sm:$0xff]   ;;  %v3918_v50 = vld [vmem:[#allocation6 + $0x24c] ss:$48 sps:$4 sm:$0xff]  }
  0x55   :  { %v3920_v51 = vld [vmem:[#allocation6 + $0x240] ss:$48 sps:$4 sm:$0xff]   ;;  %v3921_v52 = vld [vmem:[#allocation6 + $0x248] ss:$48 sps:$4 sm:$0xff]   ;;  %v3922_v53 = vld [vmem:[#allocation6 + $0x2a4] ss:$48 sps:$4 sm:$0xff]  }
  0x56   :  { %2720 = vmatpush1.bf16.msra.mxu1 %v3897_v36  ;;  %v3924_v54 = vld [vmem:[#allocation6 + $0x2ac] ss:$48 sps:$4 sm:$0xff]   ;;  %v3926_v55 = vld [vmem:[#allocation6 + $0x2a0] ss:$48 sps:$4 sm:$0xff]   ;;  %v3927_v56 = vld [vmem:[#allocation6 + $0x2a8] ss:$48 sps:$4 sm:$0xff]  }
  0x57   :  { %2618 = vmatpush1.bf16.msra.mxu0 %v3896_v35  ;;  %2721 = vmatprep.subr.bf16.mxu1 %v3900_v38  ;;  %v3928_v57 = vld [vmem:[#allocation6 + $0x304] ss:$48 sps:$4 sm:$0xff]   ;;  %v3930_v58 = vld [vmem:[#allocation6 + $0x30c] ss:$48 sps:$4 sm:$0xff]   ;;  %v3932_v59 = vld [vmem:[#allocation6 + $0x300] ss:$48 sps:$4 sm:$0xff]  }
  0x58   :  { %2619 = vmatprep.subr.bf16.mxu0 %v3898_v37  ;;  %v3933_v60 = vld [vmem:[#allocation6 + $0x308] ss:$48 sps:$4 sm:$0xff]   ;;  %v3934_v61 = vld [vmem:[#allocation6 + $0x364] ss:$48 sps:$4 sm:$0xff]   ;;  %v3936_v62 = vld [vmem:[#allocation6 + $0x36c] ss:$48 sps:$4 sm:$0xff]  }
  0x5a   :  { %2722 = vmatpush1.bf16.msra.mxu1 %v3903_v40 }
  0x5b   :  { %2620 = vmatpush1.bf16.msra.mxu0 %v3902_v39  ;;  %2723 = vmatprep.subr.bf16.mxu1 %v3906_v42  ;;  %v3938_v42 = vld [vmem:[#allocation6 + $0x360] ss:$48 sps:$4 sm:$0xff]  }
  0x5c   :  { %2621 = vmatprep.subr.bf16.mxu0 %v3904_v41 }
  0x5e   :  { %2724 = vmatpush1.bf16.msra.mxu1 %v3909_v44  ;;  %v3940_v44 = vld [vmem:[#allocation6 + $0x3c4] ss:$48 sps:$4 sm:$0xff]  }
  0x5f   :  { %2622 = vmatpush1.bf16.msra.mxu0 %v3908_v43  ;;  %2725 = vmatprep.subr.bf16.mxu1 %v3912_v46  ;;  %v3939_v43 = vld [vmem:[#allocation6 + $0x368] ss:$48 sps:$4 sm:$0xff]   ;;  %v3944_v46 = vld [vmem:[#allocation6 + $0x3c0] ss:$48 sps:$4 sm:$0xff]  }
  0x60   :  { %2623 = vmatprep.subr.bf16.mxu0 %v3910_v45  ;;  %v3942_v45 = vld [vmem:[#allocation6 + $0x3cc] ss:$48 sps:$4 sm:$0xff]  }
  0x62   :  { %2726 = vmatpush1.bf16.msra.mxu1 %v3915_v48  ;;  %v3946_v48 = vld [vmem:[#allocation6 + $0x424] ss:$48 sps:$4 sm:$0xff]  }
  0x63   :  { %2624 = vmatpush1.bf16.msra.mxu0 %v3914_v47  ;;  %2727 = vmatprep.subr.bf16.mxu1 %v3918_v50  ;;  %v3945_v47 = vld [vmem:[#allocation6 + $0x3c8] ss:$48 sps:$4 sm:$0xff]   ;;  %v3950_v50 = vld [vmem:[#allocation6 + $0x420] ss:$48 sps:$4 sm:$0xff]  }
  0x64   :  { %2625 = vmatprep.subr.bf16.mxu0 %v3916_v49  ;;  %v3948_v49 = vld [vmem:[#allocation6 + $0x42c] ss:$48 sps:$4 sm:$0xff]  }
  0x66   :  { %2728 = vmatpush1.bf16.msra.mxu1 %v3921_v52  ;;  %v3952_v52 = vld [vmem:[#allocation6 + $0x484] ss:$48 sps:$4 sm:$0xff]  }
  0x67   :  { %2626 = vmatpush1.bf16.msra.mxu0 %v3920_v51  ;;  %2729 = vmatprep.subr.bf16.mxu1 %v3924_v54  ;;  %v3951_v51 = vld [vmem:[#allocation6 + $0x428] ss:$48 sps:$4 sm:$0xff]   ;;  %v3956_v54 = vld [vmem:[#allocation6 + $0x480] ss:$48 sps:$4 sm:$0xff]  }
  0x68   :  { %2627 = vmatprep.subr.bf16.mxu0 %v3922_v53  ;;  %v3954_v53 = vld [vmem:[#allocation6 + $0x48c] ss:$48 sps:$4 sm:$0xff]  }
  0x6a   :  { %2730 = vmatpush1.bf16.msra.mxu1 %v3927_v56  ;;  %v3958_v56 = vld [vmem:[#allocation6 + $0x4e4] ss:$48 sps:$4 sm:$0xff]  }
  0x6b   :  { %2628 = vmatpush1.bf16.msra.mxu0 %v3926_v55  ;;  %2731 = vmatprep.subr.bf16.mxu1 %v3930_v58  ;;  %v3957_v55 = vld [vmem:[#allocation6 + $0x488] ss:$48 sps:$4 sm:$0xff]   ;;  %v3962_v58 = vld [vmem:[#allocation6 + $0x4e0] ss:$48 sps:$4 sm:$0xff]  }
  0x6c   :  { %2629 = vmatprep.subr.bf16.mxu0 %v3928_v57  ;;  %v3960_v57 = vld [vmem:[#allocation6 + $0x4ec] ss:$48 sps:$4 sm:$0xff]  }
  0x6e   :  { %2732 = vmatpush1.bf16.msra.mxu1 %v3933_v60  ;;  %v3964_v60 = vld [vmem:[#allocation6 + $0x544] ss:$48 sps:$4 sm:$0xff]  }
  0x6f   :  { %2630 = vmatpush1.bf16.msra.mxu0 %v3932_v59  ;;  %2733 = vmatprep.subr.bf16.mxu1 %v3936_v62  ;;  %v3963_v59 = vld [vmem:[#allocation6 + $0x4e8] ss:$48 sps:$4 sm:$0xff]   ;;  %v3968_v62 = vld [vmem:[#allocation6 + $0x540] ss:$48 sps:$4 sm:$0xff]  }
  0x70   :  { %2631 = vmatprep.subr.bf16.mxu0 %v3934_v61  ;;  %v3966_v61 = vld [vmem:[#allocation6 + $0x54c] ss:$48 sps:$4 sm:$0xff]  }
  0x72   :  { %2734 = vmatpush1.bf16.msra.mxu1 %v3939_v43 }
  0x73   :  { %2632 = vmatpush1.bf16.msra.mxu0 %v3938_v42  ;;  %2735 = vmatprep.subr.bf16.mxu1 %v3942_v45 }
  0x74   :  { %2633 = vmatprep.subr.bf16.mxu0 %v3940_v44 }
  0x76   :  { %2736 = vmatpush1.bf16.msra.mxu1 %v3945_v47 }
  0x77   :  { %2634 = vmatpush1.bf16.msra.mxu0 %v3944_v46  ;;  %2737 = vmatprep.subr.bf16.mxu1 %v3948_v49 }
  0x78   :  { %2635 = vmatprep.subr.bf16.mxu0 %v3946_v48 }
  0x7a   :  { %2738 = vmatpush1.bf16.msra.mxu1 %v3951_v51 }
  0x7b   :  { %2636 = vmatpush1.bf16.msra.mxu0 %v3950_v50  ;;  %2739 = vmatprep.subr.bf16.mxu1 %v3954_v53 }
  0x7c   :  { %2637 = vmatprep.subr.bf16.mxu0 %v3952_v52 }
  0x7e   :  { %2740 = vmatpush1.bf16.msra.mxu1 %v3957_v55 }
  0x7f   :  { %2638 = vmatpush1.bf16.msra.mxu0 %v3956_v54  ;;  %2741 = vmatprep.subr.bf16.mxu1 %v3960_v57 }
  0x80   :  { %2639 = vmatprep.subr.bf16.mxu0 %v3958_v56 }
  0x82   :  { %2742 = vmatpush1.bf16.msra.mxu1 %v3963_v59 }
  0x83   :  { %2640 = vmatpush1.bf16.msra.mxu0 %v3962_v58  ;;  %2743 = vmatprep.subr.bf16.mxu1 %v3966_v61 }
  0x84   :  { %2641 = vmatprep.subr.bf16.mxu0 %v3964_v60 }
  0x87   :  { %2642 = vmatpush1.bf16.msra.mxu0 %v3968_v62 }
  0xdc   :  { %v85_v63 = vpop.xlane.xlu0 %84 }
  0xdd   :  { %v102_v4 = vmul.f32 0.001953125, %v85_v63  ;;  %v3969_v63 = vld [vmem:[#allocation6 + $0x548] ss:$48 sps:$4 sm:$0xff]  }
  0xde   :  { %2744 = vmatpush1.bf16.msra.mxu1 %v3969_v63  ;;  %v3976_v63 = vld [vmem:[#allocation6 + $0x600] ss:$48 sps:$4 sm:$0xff]  }
  0xdf   :  { %v100_v9 = vpop.xlane.xlu1 %99  ;;  %v4717_v10 = vsub.f32 %v4643_v0, %v102_v4  ;;  %v4720_v11 = vsub.f32 %v4648_v1, %v102_v4  ;;  %v4723_v13 = vsub.f32 %v4653_v2, %v102_v4  ;;  %v4726_v19 = vsub.f32 %v4658_v3, %v102_v4  ;;  %v3970_v4 = vld [vmem:[#allocation6 + $0x5a4] ss:$48 sps:$4 sm:$0xff]  }
  0xe0   :  { %v104_v12 = vmul.f32 0.001953125, %v100_v9  ;;  %v90_v17 = vpop.xlane.xlu0 %89  ;;  %v3972_v9 = vld [vmem:[#allocation6 + $0x5ac] ss:$48 sps:$4 sm:$0xff]   ;;  %2643 = vmatprep.subr.bf16.mxu0 %v3970_v4  ;;  %v3979_v4 = vld [vmem:[#allocation6 + $0x608] ss:$48 sps:$4 sm:$0xff]  }
  0xe1   :  { %v103_v22 = vmul.f32 0.001953125, %v90_v17  ;;  %v117_v0 = vmul.f32 %v4717_v10, %v4717_v10  ;;  %v118_v1 = vmul.f32 %v4720_v11, %v4720_v11  ;;  %v119_v2 = vmul.f32 %v4723_v13, %v4723_v13  ;;  %v3975_v17 = vld [vmem:[#allocation6 + $0x5a8] ss:$48 sps:$4 sm:$0xff]   ;;  %2745 = vmatprep.subr.bf16.mxu1 %v3972_v9 }
  0xe2   :  { %v4729_v20 = vsub.f32 %v4665_v5, %v104_v12  ;;  %v4732_v21 = vsub.f32 %v4670_v6, %v104_v12  ;;  %v120_v3 = vmul.f32 %v4726_v19, %v4726_v19  ;;  %v4743_v23 = vsub.f32 %v4675_v7, %v104_v12  ;;  %2746 = vmatpush1.bf16.msra.mxu1 %v3975_v17 }
  0xe3   :  { %v4746_v5 = vsub.f32 %v4692_v14, %v103_v22  ;;  %v4749_v6 = vsub.f32 %v4697_v15, %v103_v22  ;;  %v4752_v24 = vsub.f32 %v4680_v8, %v104_v12  ;;  %v129_v26 = vadd.f32 %v118_v1, %v117_v0  ;;  %v3974_v12 = vld [vmem:[#allocation6 + $0x5a0] ss:$48 sps:$4 sm:$0xff]   ;;  %v3981_v0 = vld [vmem:[#allocation6 + $0x60c] ss:$48 sps:$4 sm:$0xff]  }
  0xe4   :  { %v125_v25 = vmul.f32 %v4729_v20, %v4729_v20  ;;  %v126_v27 = vmul.f32 %v4732_v21, %v4732_v21  ;;  %v127_v7 = vmul.f32 %v4743_v23, %v4743_v23  ;;  %v4761_v28 = vsub.f32 %v4702_v16, %v103_v22  ;;  %2644 = vmatpush1.bf16.msra.mxu0 %v3974_v12 }
  0xe5   :  { %v128_v14 = vmul.f32 %v4752_v24, %v4752_v24  ;;  %v4767_v8 = vsub.f32 %v4709_v18, %v103_v22  ;;  %v121_v29 = vmul.f32 %v4746_v5, %v4746_v5  ;;  %v130_v30 = vadd.f32 %v129_v26, %v119_v2  ;;  %v3978_v22 = vld [vmem:[#allocation6 + $0x604] ss:$48 sps:$4 sm:$0xff]   ;;  %2766 = vmatprep.subr.bf16.mxu1 %v3981_v0  ;;  %v3987_v0 = vld [vmem:[#allocation6 + $0x66c] ss:$48 sps:$4 sm:$0xff]  }
  0xe6   :  { %v139_v15 = vsel %vm91_vm0, %v125_v25, 0.0  ;;  %v140_v31 = vsel %vm91_vm0, %v126_v27, 0.0  ;;  %v142_v32 = vsel %vm91_vm0, %v127_v7, 0.0  ;;  %v122_v16 = vmul.f32 %v4749_v6, %v4749_v6  ;;  %2664 = vmatprep.subr.bf16.mxu0 %v3978_v22 }
  0xe7   :  { %v141_v33 = vadd.f32 %v140_v31, %v139_v15  ;;  %v131_v34 = vadd.f32 %v130_v30, %v120_v3  ;;  %v144_v35 = vsel %vm91_vm0, %v128_v14, 0.0  ;;  %v123_v36 = vmul.f32 %v4761_v28, %v4761_v28 }
  0xe8   :  { %v134_v18 = vadd.f32 %v122_v16, %v121_v29  ;;  %v124_v38 = vmul.f32 %v4767_v8, %v4767_v8  ;;  %v171_v3 = vlaneseq }
  0xe9   :  { %v143_v37 = vadd.f32 %v142_v32, %v141_v33  ;;  %132 = vadd.xlane.f32.xlu1 %v131_v34  ;;  %v169_v32 = vld [vmem:[#allocation2] sm:$0xf] }
  0xea   :  { %v135_v39 = vadd.f32 %v134_v18, %v123_v36  ;;  %v4780_v15 = vshrl.u32 %v171_v3, 7  ;;  %v203_v36 = vld [vmem:[#allocation4] sm:$0xf]  ;;  %v3985_v3 = vld [vmem:[#allocation6 + $0x668] ss:$48 sps:$4 sm:$0xff]  }
  0xeb   :  { %v145_v40 = vadd.f32 %v144_v35, %v143_v37 }
  0xec   :  { %v136_v41 = vadd.f32 %v135_v39, %v124_v38  ;;  %v4783_v31 = vsub.s32 2, %v4780_v15  ;;  %v4786_v16 = vsub.s32 1, %v4780_v15  ;;  %v4789_v33 = vsub.s32 0, %v4780_v15 }
  0xed   :  { %146 = vadd.xlane.f32.xlu1 %v145_v40  ;;  %v4808_v54 = vsub.s32 3, %v4780_v15 }
  0xee   :  { %137 = vadd.xlane.f32.xlu0 %v136_v41  ;;  %v182_v34 = vrot.slane %v169_v32, %v4783_v31  ;;  %v178_v38 = vrot.slane %v169_v32, %v4786_v16  ;;  %v174_v40 = vrot.slane %v169_v32, %v4789_v33  ;;  %v216_v42 = vrot.slane %v203_v36, %v4783_v31 }
  0xef   :  { %v212_v45 = vrot.slane %v203_v36, %v4786_v16  ;;  %v208_v46 = vrot.slane %v203_v36, %v4789_v33 }
 0x176   :  { %v133_v1 = vpop.xlane.xlu1 %132 }
 0x177   :  { %v148_v2 = vmul.f32 0.001953125, %v133_v1 }
 0x179   :  { %v151_v25 = vadd.f32 1e-05, %v148_v2 }
 0x17a   :  { %v147_v26 = vpop.xlane.xlu1 %146 }
 0x17b   :  { %v138_v27 = vpop.xlane.xlu0 %137  ;;  %4456 = vrsqrt.f32 %v151_v25  ;;  %v150_v7 = vmul.f32 0.001953125, %v147_v26  ;;  %v3990_v25 = vld [vmem:[#allocation6 + $0x6c4] ss:$48 sps:$4 sm:$0xff]   ;;  %v3993_v26 = vld [vmem:[#allocation6 + $0x6cc] ss:$48 sps:$4 sm:$0xff]  }
 0x17c   :  { %v149_v14 = vmul.f32 0.001953125, %v138_v27 }
 0x17d   :  { %v153_v29 = vadd.f32 1e-05, %v150_v7 }
 0x17e   :  { %v152_v30 = vadd.f32 1e-05, %v149_v14  ;;  %v4838_v14 = vrot.slane %v203_v36, %v4808_v54 }
 0x17f   :  { %4458 = vrsqrt.f32 %v153_v29 }
 0x180   :  { %4460 = vrsqrt.f32 %v152_v30  ;;  %v3988_v30 = vld [vmem:[#allocation6 + $0x6c0] ss:$48 sps:$4 sm:$0xff]  }
 0x185   :  { %v4457_v35 = vpop.eup %4456 }
 0x186   :  { %v159_v18 = vmul.f32 %v4457_v35, %v4723_v13  ;;  %v158_v37 = vmul.f32 %v4457_v35, %v4720_v11  ;;  %v157_v39 = vmul.f32 %v4457_v35, %v4717_v10 }
 0x188   :  { %v193_v41 = vmul.f32 %v182_v34, %v159_v18  ;;  %v192_v47 = vmul.f32 %v178_v38, %v158_v37  ;;  %v191_v48 = vmul.f32 %v174_v40, %v157_v39  ;;  %v3996_v18 = vld [vmem:[#allocation6 + $0x724] ss:$48 sps:$4 sm:$0xff]   ;;  %v3999_v37 = vld [vmem:[#allocation6 + $0x72c] ss:$48 sps:$4 sm:$0xff]   ;;  %v3997_v39 = vld [vmem:[#allocation6 + $0x728] ss:$48 sps:$4 sm:$0xff]  }
 0x189   :  { %v4798_v43 = vpop.eup %4458 }
 0x18a   :  { %v4461_v44 = vpop.eup %4460  ;;  %v166_v13 = vmul.f32 %v4798_v43, %v4732_v21  ;;  %v227_v51 = vadd.f32 %v216_v42, %v193_v41  ;;  %v165_v55 = vmul.f32 %v4798_v43, %v4729_v20  ;;  %v167_v21 = vmul.f32 %v4798_v43, %v4743_v23  ;;  %v4005_v41 = vld [vmem:[#allocation6 + $0x78c] ss:$48 sps:$4 sm:$0xff]  }
 0x18b   :  { %v162_v11 = vmul.f32 %v4461_v44, %v4749_v6  ;;  %v161_v10 = vmul.f32 %v4461_v44, %v4746_v5  ;;  %v163_v50 = vmul.f32 %v4461_v44, %v4761_v28  ;;  %v226_v6 = vadd.f32 %v212_v45, %v192_v47  ;;  %v4014_v47 = vld [vmem:[#allocation6 + $0x844] ss:$48 sps:$4 sm:$0xff]  }
 0x18c   :  { %v200_v49 = vmul.f32 %v178_v38, %v166_v13  ;;  %v225_v5 = vadd.f32 %v208_v46, %v191_v48  ;;  %v164_v28 = vmul.f32 %v4461_v44, %v4767_v8  ;;  %v201_v61 = vmul.f32 %v182_v34, %v167_v21  ;;  %v3984_v8 = vld [vmem:[#allocation6 + $0x664] ss:$48 sps:$4 sm:$0xff]   ;;  %v4003_v44 = vld [vmem:[#allocation6 + $0x788] ss:$48 sps:$4 sm:$0xff]   ;;  %v4006_v13 = vld [vmem:[#allocation6 + $0x7e0] ss:$48 sps:$4 sm:$0xff]  }
 0x18d   :  { %v196_v52 = vmul.f32 %v178_v38, %v162_v11  ;;  %v195_v53 = vmul.f32 %v174_v40, %v161_v10  ;;  %v197_v56 = vmul.f32 %v182_v34, %v163_v50  ;;  %v4820_v20 = vrot.slane %v169_v32, %v4808_v54  ;;  %v3991_v32 = vld [vmem:[#allocation6 + $0x6c8] ss:$48 sps:$4 sm:$0xff]   ;;  %v3994_v38 = vld [vmem:[#allocation6 + $0x720] ss:$48 sps:$4 sm:$0xff]   ;;  %v4017_v10 = vld [vmem:[#allocation6 + $0x84c] ss:$48 sps:$4 sm:$0xff]  }
 0x18e   :  { %v234_v59 = vadd.f32 %v212_v45, %v200_v49  ;;  %v199_v12 = vmul.f32 %v174_v40, %v165_v55  ;;  %v160_v23 = vmul.f32 %v4457_v35, %v4726_v19  ;;  %v4825_v22 = vadd.f32 %v216_v42, %v201_v61  ;;  %v3982_v19 = vld [vmem:[#allocation6 + $0x660] ss:$48 sps:$4 sm:$0xff]   ;;  %v4002_v40 = vld [vmem:[#allocation6 + $0x784] ss:$48 sps:$4 sm:$0xff]   ;;  %v4009_v11 = vld [vmem:[#allocation6 + $0x7e8] ss:$48 sps:$4 sm:$0xff]  }
 0x18f   :  { %v230_v57 = vadd.f32 %v212_v45, %v196_v52  ;;  %v229_v58 = vadd.f32 %v208_v46, %v195_v53  ;;  %v231_v60 = vadd.f32 %v216_v42, %v197_v56  ;;  %v198_v2 = vmul.f32 %v4820_v20, %v164_v28  ;;  %v4000_v42 = vld [vmem:[#allocation6 + $0x780] ss:$48 sps:$4 sm:$0xff]   ;;  %v4008_v45 = vld [vmem:[#allocation6 + $0x7e4] ss:$48 sps:$4 sm:$0xff]   ;;  %v4015_v49 = vld [vmem:[#allocation6 + $0x848] ss:$48 sps:$4 sm:$0xff]  }
 0x190   :  { %v4831_v1 = vpack.c.bf16 %v234_v59, %v234_v59  ;;  %v233_v27 = vadd.f32 %v208_v46, %v199_v12  ;;  %v194_v7 = vmul.f32 %v4820_v20, %v160_v23  ;;  %v4011_v46 = vld [vmem:[#allocation6 + $0x7ec] ss:$48 sps:$4 sm:$0xff]   ;;  %v4012_v48 = vld [vmem:[#allocation6 + $0x840] ss:$48 sps:$4 sm:$0xff]   ;;  %v4020_v50 = vld [vmem:[#allocation6 + $0x8a4] ss:$48 sps:$4 sm:$0xff]  }
 0x191   :  { %v4815_v62 = vpack.c.bf16 %v230_v57, %v226_v6  ;;  %v4817_v9 = vpack.c.bf16 %v229_v58, %v225_v5  ;;  %v4823_v17 = vpack.c.bf16 %v231_v60, %v227_v51  ;;  %v232_v29 = vadd.f32 %v4838_v14, %v198_v2  ;;  %v4023_v51 = vld [vmem:[#allocation6 + $0x8ac] ss:$48 sps:$4 sm:$0xff]   ;;  %v4018_v52 = vld [vmem:[#allocation6 + $0x8a0] ss:$48 sps:$4 sm:$0xff]   ;;  %v4021_v53 = vld [vmem:[#allocation6 + $0x8a8] ss:$48 sps:$4 sm:$0xff]  }
 0x192   :  { %v4841_v34 = vpack.c.bf16 %v233_v27, %v233_v27  ;;  %v228_v35 = vadd.f32 %v4838_v14, %v194_v7  ;;  %v4026_v55 = vld [vmem:[#allocation6 + $0x904] ss:$48 sps:$4 sm:$0xff]   ;;  %v4029_v56 = vld [vmem:[#allocation6 + $0x90c] ss:$48 sps:$4 sm:$0xff]   ;;  %v4024_v21 = vld [vmem:[#allocation6 + $0x900] ss:$48 sps:$4 sm:$0xff]  }
 0x193   :  { %2645 = vmatprep.mubr.bf16.mxu0 %v4815_v62  ;;  %2747 = vmatprep.mubr.bf16.mxu1 %v4815_v62  ;;  %v4027_v6 = vld [vmem:[#allocation6 + $0x908] ss:$48 sps:$4 sm:$0xff]   ;;  %v4032_v57 = vld [vmem:[#allocation6 + $0x964] ss:$48 sps:$4 sm:$0xff]   ;;  %v4035_v5 = vld [vmem:[#allocation6 + $0x96c] ss:$48 sps:$4 sm:$0xff]  }
 0x194   :  { %2646 = vmatmul.mubr.bf16.vlgmr.msra.gmra.mrb[0].mxu0 %v4817_v9  ;;  %2748 = vmatmul.mubr.bf16.vlgmr.msra.gmra.mrb[0].mxu1 %v4817_v9  ;;  %v4846_v36 = vpack.c.bf16 %v232_v29, %v228_v35  ;;  %v4030_v58 = vld [vmem:[#allocation6 + $0x960] ss:$48 sps:$4 sm:$0xff]   ;;  %v4033_v59 = vld [vmem:[#allocation6 + $0x968] ss:$48 sps:$4 sm:$0xff]   ;;  %v4038_v28 = vld [vmem:[#allocation6 + $0x9c4] ss:$48 sps:$4 sm:$0xff]  }
 0x195   :  { %2665 = vmatpush1.bf16.msra.mxu0 %v3976_v63  ;;  %2767 = vmatpush1.bf16.msra.mxu1 %v3979_v4  ;;  %v4041_v60 = vld [vmem:[#allocation6 + $0x9cc] ss:$48 sps:$4 sm:$0xff]   ;;  %v4036_v61 = vld [vmem:[#allocation6 + $0x9c0] ss:$48 sps:$4 sm:$0xff]   ;;  %v4039_v63 = vld [vmem:[#allocation6 + $0x9c8] ss:$48 sps:$4 sm:$0xff]  }
 0x196   :  { %2655 = vmatprep.mubr.bf16.mxu0 %v4831_v1  ;;  %2757 = vmatprep.mubr.bf16.mxu1 %v4831_v1  ;;  %v4044_v4 = vld [vmem:[#allocation6 + $0xa24] ss:$48 sps:$4 sm:$0xff]   ;;  %v4047_v12 = vld [vmem:[#allocation6 + $0xa2c] ss:$48 sps:$4 sm:$0xff]   ;;  %v4042_v23 = vld [vmem:[#allocation6 + $0xa20] ss:$48 sps:$4 sm:$0xff]  }
 0x197   :  { %2666 = vmatprep.subr.bf16.mxu0 %v3984_v8  ;;  %2768 = vmatprep.subr.bf16.mxu1 %v3987_v0  ;;  %v4045_v8 = vld [vmem:[#allocation6 + $0xa28] ss:$48 sps:$4 sm:$0xff]   ;;  %v4050_v0 = vld [vmem:[#allocation6 + $0xa84] ss:$48 sps:$4 sm:$0xff]   ;;  %v4053_v2 = vld [vmem:[#allocation6 + $0xa8c] ss:$48 sps:$4 sm:$0xff]  }
 0x198   :  { %v4054_v27 = vld [vmem:[#allocation6 + $0xae0] ss:$48 sps:$4 sm:$0xff]   ;;  %v4057_v7 = vld [vmem:[#allocation6 + $0xae8] ss:$48 sps:$4 sm:$0xff]   ;;  %v4062_v29 = vld [vmem:[#allocation6 + $0xb44] ss:$48 sps:$4 sm:$0xff]  }
 0x199   :  { %2667 = vmatpush1.bf16.msra.mxu0 %v3982_v19  ;;  %2769 = vmatpush1.bf16.msra.mxu1 %v3985_v3  ;;  %v4048_v19 = vld [vmem:[#allocation6 + $0xa80] ss:$48 sps:$4 sm:$0xff]   ;;  %v4051_v3 = vld [vmem:[#allocation6 + $0xa88] ss:$48 sps:$4 sm:$0xff]  }
 0x19a   :  { %2668 = vmatprep.subr.bf16.mxu0 %v3990_v25  ;;  %2770 = vmatprep.subr.bf16.mxu1 %v3993_v26  ;;  %v4056_v25 = vld [vmem:[#allocation6 + $0xae4] ss:$48 sps:$4 sm:$0xff]   ;;  %v4059_v26 = vld [vmem:[#allocation6 + $0xaec] ss:$48 sps:$4 sm:$0xff]   ;;  %v4060_v35 = vld [vmem:[#allocation6 + $0xb40] ss:$48 sps:$4 sm:$0xff]  }
 0x19c   :  { %2656 = vmatmul.mubr.bf16.gmra.mrb[4].mxu0 %v4841_v34  ;;  %2758 = vmatmul.mubr.bf16.gmra.mrb[4].mxu1 %v4841_v34 }
 0x19d   :  { %2669 = vmatpush1.bf16.msra.mxu0 %v3988_v30  ;;  %2771 = vmatpush1.bf16.msra.mxu1 %v3991_v32  ;;  %v4065_v30 = vld [vmem:[#allocation6 + $0xb4c] ss:$48 sps:$4 sm:$0xff]   ;;  %v168_v32 = vmul.f32 %v4798_v43, %v4752_v24  ;;  %v4072_v43 = vld [vmem:[#allocation6 + $0x10] ss:$48 sps:$4 sm:$0xff]  }
 0x19e   :  { %2696 = vmatprep.mubr.bf16.mxu0 %v4846_v36  ;;  %2798 = vmatprep.mubr.bf16.mxu1 %v4846_v36 }
 0x19f   :  { %2670 = vmatprep.subr.bf16.mxu0 %v3996_v18  ;;  %2772 = vmatprep.subr.bf16.mxu1 %v3999_v37  ;;  %v4063_v18 = vld [vmem:[#allocation6 + $0xb48] ss:$48 sps:$4 sm:$0xff]   ;;  %v4068_v37 = vld [vmem:[#allocation6 + $0xba4] ss:$48 sps:$4 sm:$0xff]  }
 0x1a1   :  { %2671 = vmatpush1.bf16.msra.mxu0 %v3994_v38  ;;  %2773 = vmatpush1.bf16.msra.mxu1 %v3997_v39  ;;  %v4071_v38 = vld [vmem:[#allocation6 + $0xbac] ss:$48 sps:$4 sm:$0xff]   ;;  %v202_v39 = vmul.f32 %v4820_v20, %v168_v32  ;;  %v4132_v32 = vld [vmem:[#allocation6 + $0x3d0] ss:$48 sps:$4 sm:$0xff]  }
 0x1a2   :  { %2672 = vmatprep.subr.bf16.mxu0 %v4002_v40  ;;  %2774 = vmatprep.subr.bf16.mxu1 %v4005_v41  ;;  %v4066_v40 = vld [vmem:[#allocation6 + $0xba0] ss:$48 sps:$4 sm:$0xff]   ;;  %v4069_v41 = vld [vmem:[#allocation6 + $0xba8] ss:$48 sps:$4 sm:$0xff]   ;;  %v4083_v20 = vld [vmem:[#allocation6 + $0x7c] ss:$48 sps:$4 sm:$0xff]  }
 0x1a3   :  { %v236_v24 = vadd.f32 %v4838_v14, %v202_v39  ;;  %v4078_v14 = vld [vmem:[#allocation6 + $0x70] ss:$48 sps:$4 sm:$0xff]   ;;  %v4141_v39 = vld [vmem:[#allocation6 + $0x438] ss:$48 sps:$4 sm:$0xff]  }
 0x1a5   :  { %2673 = vmatpush1.bf16.msra.mxu0 %v4000_v42  ;;  %2775 = vmatpush1.bf16.msra.mxu1 %v4003_v44  ;;  %v4074_v42 = vld [vmem:[#allocation6 + $0x14] ss:$48 sps:$4 sm:$0xff]   ;;  %v4077_v44 = vld [vmem:[#allocation6 + $0x1c] ss:$48 sps:$4 sm:$0xff]  }
 0x1a6   :  { %2674 = vmatprep.subr.bf16.mxu0 %v4008_v45  ;;  %2776 = vmatprep.subr.bf16.mxu1 %v4011_v46  ;;  %v4075_v45 = vld [vmem:[#allocation6 + $0x18] ss:$48 sps:$4 sm:$0xff]   ;;  %v4854_v46 = vpack.c.bf16 %v236_v24, %v236_v24  ;;  %v4152_v24 = vld [vmem:[#allocation6 + $0x4f4] ss:$48 sps:$4 sm:$0xff]  }
 0x1a9   :  { %2675 = vmatpush1.bf16.msra.mxu0 %v4006_v13  ;;  %2777 = vmatpush1.bf16.msra.mxu1 %v4009_v11  ;;  %v4080_v13 = vld [vmem:[#allocation6 + $0x74] ss:$48 sps:$4 sm:$0xff]   ;;  %v4081_v11 = vld [vmem:[#allocation6 + $0x78] ss:$48 sps:$4 sm:$0xff]  }
 0x1aa   :  { %2676 = vmatprep.subr.bf16.mxu0 %v4014_v47  ;;  %2778 = vmatprep.subr.bf16.mxu1 %v4017_v10  ;;  %v4086_v47 = vld [vmem:[#allocation6 + $0xd4] ss:$48 sps:$4 sm:$0xff]   ;;  %v4089_v10 = vld [vmem:[#allocation6 + $0xdc] ss:$48 sps:$4 sm:$0xff]  }
 0x1ad   :  { %2677 = vmatpush1.bf16.msra.mxu0 %v4012_v48  ;;  %2779 = vmatpush1.bf16.msra.mxu1 %v4015_v49  ;;  %v4862_v48 = vpack.c.bf16 %v4825_v22, %v4825_v22  ;;  %v4084_v49 = vld [vmem:[#allocation6 + $0xd0] ss:$48 sps:$4 sm:$0xff]   ;;  %v4098_v22 = vld [vmem:[#allocation6 + $0x194] ss:$48 sps:$4 sm:$0xff]  }
 0x1ae   :  { %2678 = vmatprep.subr.bf16.mxu0 %v4020_v50  ;;  %2780 = vmatprep.subr.bf16.mxu1 %v4023_v51  ;;  %v4087_v50 = vld [vmem:[#allocation6 + $0xd8] ss:$48 sps:$4 sm:$0xff]   ;;  %v4092_v51 = vld [vmem:[#allocation6 + $0x134] ss:$48 sps:$4 sm:$0xff]  }
 0x1b1   :  { %2679 = vmatpush1.bf16.msra.mxu0 %v4018_v52  ;;  %2781 = vmatpush1.bf16.msra.mxu1 %v4021_v53  ;;  %v4095_v52 = vld [vmem:[#allocation6 + $0x13c] ss:$48 sps:$4 sm:$0xff]   ;;  %v4090_v53 = vld [vmem:[#allocation6 + $0x130] ss:$48 sps:$4 sm:$0xff]  }
 0x1b2   :  { %2680 = vmatprep.subr.bf16.mxu0 %v4026_v55  ;;  %2782 = vmatprep.subr.bf16.mxu1 %v4029_v56  ;;  %v4093_v55 = vld [vmem:[#allocation6 + $0x138] ss:$48 sps:$4 sm:$0xff]   ;;  %v4101_v56 = vld [vmem:[#allocation6 + $0x19c] ss:$48 sps:$4 sm:$0xff]  }
 0x1b5   :  { %2681 = vmatpush1.bf16.msra.mxu0 %v4024_v21  ;;  %2783 = vmatpush1.bf16.msra.mxu1 %v4027_v6  ;;  %v4096_v21 = vld [vmem:[#allocation6 + $0x190] ss:$48 sps:$4 sm:$0xff]   ;;  %v4099_v6 = vld [vmem:[#allocation6 + $0x198] ss:$48 sps:$4 sm:$0xff]  }
 0x1b6   :  { %2682 = vmatprep.subr.bf16.mxu0 %v4032_v57  ;;  %2784 = vmatprep.subr.bf16.mxu1 %v4035_v5  ;;  %v4104_v57 = vld [vmem:[#allocation6 + $0x1f4] ss:$48 sps:$4 sm:$0xff]   ;;  %v4107_v5 = vld [vmem:[#allocation6 + $0x1fc] ss:$48 sps:$4 sm:$0xff]  }
 0x1b9   :  { %2683 = vmatpush1.bf16.msra.mxu0 %v4030_v58  ;;  %2785 = vmatpush1.bf16.msra.mxu1 %v4033_v59  ;;  %v4102_v58 = vld [vmem:[#allocation6 + $0x1f0] ss:$48 sps:$4 sm:$0xff]   ;;  %v4105_v59 = vld [vmem:[#allocation6 + $0x1f8] ss:$48 sps:$4 sm:$0xff]  }
 0x1ba   :  { %2684 = vmatprep.subr.bf16.mxu0 %v4038_v28  ;;  %2786 = vmatprep.subr.bf16.mxu1 %v4041_v60  ;;  %v4110_v28 = vld [vmem:[#allocation6 + $0x254] ss:$48 sps:$4 sm:$0xff]   ;;  %v4113_v60 = vld [vmem:[#allocation6 + $0x25c] ss:$48 sps:$4 sm:$0xff]  }
 0x1bd   :  { %2685 = vmatpush1.bf16.msra.mxu0 %v4036_v61  ;;  %2787 = vmatpush1.bf16.msra.mxu1 %v4039_v63  ;;  %v4108_v61 = vld [vmem:[#allocation6 + $0x250] ss:$48 sps:$4 sm:$0xff]   ;;  %v4111_v63 = vld [vmem:[#allocation6 + $0x258] ss:$48 sps:$4 sm:$0xff]  }
 0x1be   :  { %2686 = vmatprep.subr.bf16.mxu0 %v4044_v4  ;;  %2788 = vmatprep.subr.bf16.mxu1 %v4047_v12  ;;  %v4116_v4 = vld [vmem:[#allocation6 + $0x2b4] ss:$48 sps:$4 sm:$0xff]   ;;  %v4119_v12 = vld [vmem:[#allocation6 + $0x2bc] ss:$48 sps:$4 sm:$0xff]  }
 0x1c1   :  { %2687 = vmatpush1.bf16.msra.mxu0 %v4042_v23  ;;  %2789 = vmatpush1.bf16.msra.mxu1 %v4045_v8  ;;  %v4114_v23 = vld [vmem:[#allocation6 + $0x2b0] ss:$48 sps:$4 sm:$0xff]   ;;  %v4117_v8 = vld [vmem:[#allocation6 + $0x2b8] ss:$48 sps:$4 sm:$0xff]  }
 0x1c2   :  { %2688 = vmatprep.subr.bf16.mxu0 %v4050_v0  ;;  %2790 = vmatprep.subr.bf16.mxu1 %v4053_v2  ;;  %v4122_v0 = vld [vmem:[#allocation6 + $0x314] ss:$48 sps:$4 sm:$0xff]   ;;  %v4125_v2 = vld [vmem:[#allocation6 + $0x31c] ss:$48 sps:$4 sm:$0xff]  }
 0x1c5   :  { %2689 = vmatpush1.bf16.msra.mxu0 %v4048_v19  ;;  %2791 = vmatpush1.bf16.msra.mxu1 %v4051_v3  ;;  %v4120_v19 = vld [vmem:[#allocation6 + $0x310] ss:$48 sps:$4 sm:$0xff]   ;;  %v4123_v3 = vld [vmem:[#allocation6 + $0x318] ss:$48 sps:$4 sm:$0xff]  }
 0x1c6   :  { %2690 = vmatprep.subr.bf16.mxu0 %v4056_v25  ;;  %2792 = vmatprep.subr.bf16.mxu1 %v4059_v26  ;;  %v4128_v25 = vld [vmem:[#allocation6 + $0x374] ss:$48 sps:$4 sm:$0xff]   ;;  %v4131_v26 = vld [vmem:[#allocation6 + $0x37c] ss:$48 sps:$4 sm:$0xff]  }
 0x1c9   :  { %2691 = vmatpush1.bf16.msra.mxu0 %v4054_v27  ;;  %2793 = vmatpush1.bf16.msra.mxu1 %v4057_v7  ;;  %v4126_v27 = vld [vmem:[#allocation6 + $0x370] ss:$48 sps:$4 sm:$0xff]   ;;  %v4129_v7 = vld [vmem:[#allocation6 + $0x378] ss:$48 sps:$4 sm:$0xff]  }
 0x1ca   :  { %2692 = vmatprep.subr.bf16.mxu0 %v4062_v29  ;;  %2794 = vmatprep.subr.bf16.mxu1 %v4065_v30  ;;  %v4134_v29 = vld [vmem:[#allocation6 + $0x3d4] ss:$48 sps:$4 sm:$0xff]   ;;  %v4137_v30 = vld [vmem:[#allocation6 + $0x3dc] ss:$48 sps:$4 sm:$0xff]  }
 0x1cd   :  { %2693 = vmatpush1.bf16.msra.mxu0 %v4060_v35  ;;  %2795 = vmatpush1.bf16.msra.mxu1 %v4063_v18  ;;  %v4135_v35 = vld [vmem:[#allocation6 + $0x3d8] ss:$48 sps:$4 sm:$0xff]   ;;  %v4140_v18 = vld [vmem:[#allocation6 + $0x434] ss:$48 sps:$4 sm:$0xff]  }
 0x1ce   :  { %2694 = vmatprep.subr.bf16.mxu0 %v4068_v37  ;;  %2796 = vmatprep.subr.bf16.mxu1 %v4071_v38  ;;  %v4143_v37 = vld [vmem:[#allocation6 + $0x43c] ss:$48 sps:$4 sm:$0xff]   ;;  %v4138_v38 = vld [vmem:[#allocation6 + $0x430] ss:$48 sps:$4 sm:$0xff]  }
 0x1d1   :  { %2695 = vmatpush1.bf16.msra.mxu0 %v4066_v40  ;;  %2797 = vmatpush1.bf16.msra.mxu1 %v4069_v41  ;;  %v4146_v40 = vld [vmem:[#allocation6 + $0x494] ss:$48 sps:$4 sm:$0xff]   ;;  %v4149_v41 = vld [vmem:[#allocation6 + $0x49c] ss:$48 sps:$4 sm:$0xff]  }
 0x1d2   :  { %2817 = vmatprep.subr.bf16.mxu0 %v4074_v42  ;;  %2919 = vmatprep.subr.bf16.mxu1 %v4077_v44  ;;  %v4144_v42 = vld [vmem:[#allocation6 + $0x490] ss:$48 sps:$4 sm:$0xff]   ;;  %v4147_v44 = vld [vmem:[#allocation6 + $0x498] ss:$48 sps:$4 sm:$0xff]  }
 0x1d4   :  { %2697 = vmatmul.mubr.bf16.vlgmr.msra.gmra.mrb[0].mxu0 %v4823_v17  ;;  %2799 = vmatmul.mubr.bf16.vlgmr.msra.gmra.mrb[0].mxu1 %v4823_v17 }
 0x1d5   :  { %2706 = vmatprep.mubr.bf16.mxu0 %v4854_v46  ;;  %2808 = vmatprep.mubr.bf16.mxu1 %v4854_v46 }
 0x1d6   :  { %2818 = vmatpush1.bf16.msra.mxu0 %v4072_v43  ;;  %2920 = vmatpush1.bf16.msra.mxu1 %v4075_v45  ;;  %v4155_v43 = vld [vmem:[#allocation6 + $0x4fc] ss:$48 sps:$4 sm:$0xff]   ;;  %v4150_v45 = vld [vmem:[#allocation6 + $0x4f0] ss:$48 sps:$4 sm:$0xff]  }
 0x1d7   :  { %2819 = vmatprep.subr.bf16.mxu0 %v4080_v13  ;;  %2921 = vmatprep.subr.bf16.mxu1 %v4083_v20  ;;  %v4153_v13 = vld [vmem:[#allocation6 + $0x4f8] ss:$48 sps:$4 sm:$0xff]   ;;  %v4158_v20 = vld [vmem:[#allocation6 + $0x554] ss:$48 sps:$4 sm:$0xff]  }
 0x1da   :  { %2820 = vmatpush1.bf16.msra.mxu0 %v4078_v14  ;;  %2922 = vmatpush1.bf16.msra.mxu1 %v4081_v11  ;;  %v4161_v14 = vld [vmem:[#allocation6 + $0x55c] ss:$48 sps:$4 sm:$0xff]   ;;  %v4156_v11 = vld [vmem:[#allocation6 + $0x550] ss:$48 sps:$4 sm:$0xff]  }
 0x1db   :  { %2821 = vmatprep.subr.bf16.mxu0 %v4086_v47  ;;  %2923 = vmatprep.subr.bf16.mxu1 %v4089_v10  ;;  %v4159_v47 = vld [vmem:[#allocation6 + $0x558] ss:$48 sps:$4 sm:$0xff]   ;;  %v4164_v10 = vld [vmem:[#allocation6 + $0x5b4] ss:$48 sps:$4 sm:$0xff]  }
 0x1dc   :  { %2707 = vmatmul.mubr.bf16.gmra.mrb[4].mxu0 %v4862_v48  ;;  %2809 = vmatmul.mubr.bf16.gmra.mrb[4].mxu1 %v4862_v48 }
 0x1dd   :  { %2849 = vmatprep.mubr.bf16.mxu0 %v4815_v62  ;;  %2951 = vmatprep.mubr.bf16.mxu1 %v4815_v62 }
 0x1de   :  { %2822 = vmatpush1.bf16.msra.mxu0 %v4084_v49  ;;  %2924 = vmatpush1.bf16.msra.mxu1 %v4087_v50  ;;  %v4167_v49 = vld [vmem:[#allocation6 + $0x5bc] ss:$48 sps:$4 sm:$0xff]   ;;  %v4162_v50 = vld [vmem:[#allocation6 + $0x5b0] ss:$48 sps:$4 sm:$0xff]  }
 0x1df   :  { %2823 = vmatprep.subr.bf16.mxu0 %v4092_v51  ;;  %2925 = vmatprep.subr.bf16.mxu1 %v4095_v52  ;;  %v4165_v51 = vld [vmem:[#allocation6 + $0x5b8] ss:$48 sps:$4 sm:$0xff]   ;;  %v4170_v52 = vld [vmem:[#allocation6 + $0x614] ss:$48 sps:$4 sm:$0xff]  }
 0x1e2   :  { %2824 = vmatpush1.bf16.msra.mxu0 %v4090_v53  ;;  %2926 = vmatpush1.bf16.msra.mxu1 %v4093_v55  ;;  %v4173_v53 = vld [vmem:[#allocation6 + $0x61c] ss:$48 sps:$4 sm:$0xff]   ;;  %v4168_v55 = vld [vmem:[#allocation6 + $0x610] ss:$48 sps:$4 sm:$0xff]  }
 0x1e3   :  { %2825 = vmatprep.subr.bf16.mxu0 %v4098_v22  ;;  %2927 = vmatprep.subr.bf16.mxu1 %v4101_v56  ;;  %v4171_v22 = vld [vmem:[#allocation6 + $0x618] ss:$48 sps:$4 sm:$0xff]   ;;  %v4176_v56 = vld [vmem:[#allocation6 + $0x674] ss:$48 sps:$4 sm:$0xff]  }
 0x1e6   :  { %2826 = vmatpush1.bf16.msra.mxu0 %v4096_v21  ;;  %2928 = vmatpush1.bf16.msra.mxu1 %v4099_v6  ;;  %v4179_v21 = vld [vmem:[#allocation6 + $0x67c] ss:$48 sps:$4 sm:$0xff]   ;;  %v4174_v6 = vld [vmem:[#allocation6 + $0x670] ss:$48 sps:$4 sm:$0xff]  }
 0x1e7   :  { %2827 = vmatprep.subr.bf16.mxu0 %v4104_v57  ;;  %2929 = vmatprep.subr.bf16.mxu1 %v4107_v5  ;;  %v4177_v57 = vld [vmem:[#allocation6 + $0x678] ss:$48 sps:$4 sm:$0xff]   ;;  %v4182_v5 = vld [vmem:[#allocation6 + $0x6d4] ss:$48 sps:$4 sm:$0xff]  }
 0x1ea   :  { %2828 = vmatpush1.bf16.msra.mxu0 %v4102_v58  ;;  %2930 = vmatpush1.bf16.msra.mxu1 %v4105_v59  ;;  %v4185_v58 = vld [vmem:[#allocation6 + $0x6dc] ss:$48 sps:$4 sm:$0xff]   ;;  %v4180_v59 = vld [vmem:[#allocation6 + $0x6d0] ss:$48 sps:$4 sm:$0xff]  }
 0x1eb   :  { %2829 = vmatprep.subr.bf16.mxu0 %v4110_v28  ;;  %2931 = vmatprep.subr.bf16.mxu1 %v4113_v60  ;;  %v4183_v28 = vld [vmem:[#allocation6 + $0x6d8] ss:$48 sps:$4 sm:$0xff]   ;;  %v4188_v60 = vld [vmem:[#allocation6 + $0x734] ss:$48 sps:$4 sm:$0xff]  }
 0x1ee   :  { %2830 = vmatpush1.bf16.msra.mxu0 %v4108_v61  ;;  %2932 = vmatpush1.bf16.msra.mxu1 %v4111_v63  ;;  %v4191_v61 = vld [vmem:[#allocation6 + $0x73c] ss:$48 sps:$4 sm:$0xff]   ;;  %v4186_v63 = vld [vmem:[#allocation6 + $0x730] ss:$48 sps:$4 sm:$0xff]  }
 0x1ef   :  { %2831 = vmatprep.subr.bf16.mxu0 %v4116_v4  ;;  %2933 = vmatprep.subr.bf16.mxu1 %v4119_v12  ;;  %v4189_v4 = vld [vmem:[#allocation6 + $0x738] ss:$48 sps:$4 sm:$0xff]   ;;  %v4194_v12 = vld [vmem:[#allocation6 + $0x794] ss:$48 sps:$4 sm:$0xff]  }
 0x1f2   :  { %2832 = vmatpush1.bf16.msra.mxu0 %v4114_v23  ;;  %2934 = vmatpush1.bf16.msra.mxu1 %v4117_v8  ;;  %v4197_v23 = vld [vmem:[#allocation6 + $0x79c] ss:$48 sps:$4 sm:$0xff]   ;;  %v4192_v8 = vld [vmem:[#allocation6 + $0x790] ss:$48 sps:$4 sm:$0xff]  }
 0x1f3   :  { %2833 = vmatprep.subr.bf16.mxu0 %v4122_v0  ;;  %2935 = vmatprep.subr.bf16.mxu1 %v4125_v2  ;;  %v4195_v0 = vld [vmem:[#allocation6 + $0x798] ss:$48 sps:$4 sm:$0xff]   ;;  %v4200_v2 = vld [vmem:[#allocation6 + $0x7f4] ss:$48 sps:$4 sm:$0xff]  }
 0x1f6   :  { %2834 = vmatpush1.bf16.msra.mxu0 %v4120_v19  ;;  %2936 = vmatpush1.bf16.msra.mxu1 %v4123_v3  ;;  %v4203_v19 = vld [vmem:[#allocation6 + $0x7fc] ss:$48 sps:$4 sm:$0xff]   ;;  %v4198_v3 = vld [vmem:[#allocation6 + $0x7f0] ss:$48 sps:$4 sm:$0xff]  }
 0x1f7   :  { %2835 = vmatprep.subr.bf16.mxu0 %v4128_v25  ;;  %2937 = vmatprep.subr.bf16.mxu1 %v4131_v26  ;;  %v4201_v25 = vld [vmem:[#allocation6 + $0x7f8] ss:$48 sps:$4 sm:$0xff]   ;;  %v4206_v26 = vld [vmem:[#allocation6 + $0x854] ss:$48 sps:$4 sm:$0xff]  }
 0x1fa   :  { %2836 = vmatpush1.bf16.msra.mxu0 %v4126_v27  ;;  %2938 = vmatpush1.bf16.msra.mxu1 %v4129_v7  ;;  %v4209_v27 = vld [vmem:[#allocation6 + $0x85c] ss:$48 sps:$4 sm:$0xff]   ;;  %v4204_v7 = vld [vmem:[#allocation6 + $0x850] ss:$48 sps:$4 sm:$0xff]  }
 0x1fb   :  { %2837 = vmatprep.subr.bf16.mxu0 %v4134_v29  ;;  %2939 = vmatprep.subr.bf16.mxu1 %v4137_v30  ;;  %v4207_v29 = vld [vmem:[#allocation6 + $0x858] ss:$48 sps:$4 sm:$0xff]   ;;  %v4212_v30 = vld [vmem:[#allocation6 + $0x8b4] ss:$48 sps:$4 sm:$0xff]  }
 0x1fe   :  { %2838 = vmatpush1.bf16.msra.mxu0 %v4132_v32  ;;  %2940 = vmatpush1.bf16.msra.mxu1 %v4135_v35  ;;  %v4215_v32 = vld [vmem:[#allocation6 + $0x8bc] ss:$48 sps:$4 sm:$0xff]   ;;  %v4210_v35 = vld [vmem:[#allocation6 + $0x8b0] ss:$48 sps:$4 sm:$0xff]  }
 0x1ff   :  { %2839 = vmatprep.subr.bf16.mxu0 %v4140_v18  ;;  %2941 = vmatprep.subr.bf16.mxu1 %v4143_v37  ;;  %v4213_v18 = vld [vmem:[#allocation6 + $0x8b8] ss:$48 sps:$4 sm:$0xff]   ;;  %v4218_v37 = vld [vmem:[#allocation6 + $0x914] ss:$48 sps:$4 sm:$0xff]  }
 0x202   :  { %2840 = vmatpush1.bf16.msra.mxu0 %v4138_v38  ;;  %2942 = vmatpush1.bf16.msra.mxu1 %v4141_v39  ;;  %v4221_v38 = vld [vmem:[#allocation6 + $0x91c] ss:$48 sps:$4 sm:$0xff]   ;;  %v4216_v39 = vld [vmem:[#allocation6 + $0x910] ss:$48 sps:$4 sm:$0xff]  }
 0x203   :  { %2841 = vmatprep.subr.bf16.mxu0 %v4146_v40  ;;  %2943 = vmatprep.subr.bf16.mxu1 %v4149_v41  ;;  %v4219_v40 = vld [vmem:[#allocation6 + $0x918] ss:$48 sps:$4 sm:$0xff]   ;;  %v4224_v41 = vld [vmem:[#allocation6 + $0x974] ss:$48 sps:$4 sm:$0xff]  }
 0x206   :  { %2842 = vmatpush1.bf16.msra.mxu0 %v4144_v42  ;;  %2944 = vmatpush1.bf16.msra.mxu1 %v4147_v44  ;;  %v4227_v42 = vld [vmem:[#allocation6 + $0x97c] ss:$48 sps:$4 sm:$0xff]   ;;  %v4222_v44 = vld [vmem:[#allocation6 + $0x970] ss:$48 sps:$4 sm:$0xff]  }
 0x207   :  { %2843 = vmatprep.subr.bf16.mxu0 %v4152_v24  ;;  %2945 = vmatprep.subr.bf16.mxu1 %v4155_v43  ;;  %v4225_v24 = vld [vmem:[#allocation6 + $0x978] ss:$48 sps:$4 sm:$0xff]   ;;  %v4230_v43 = vld [vmem:[#allocation6 + $0x9d4] ss:$48 sps:$4 sm:$0xff]  }
 0x20a   :  { %2844 = vmatpush1.bf16.msra.mxu0 %v4150_v45  ;;  %2946 = vmatpush1.bf16.msra.mxu1 %v4153_v13  ;;  %v4233_v45 = vld [vmem:[#allocation6 + $0x9dc] ss:$48 sps:$4 sm:$0xff]   ;;  %v4228_v13 = vld [vmem:[#allocation6 + $0x9d0] ss:$48 sps:$4 sm:$0xff]  }
 0x20b   :  { %2845 = vmatprep.subr.bf16.mxu0 %v4158_v20  ;;  %2947 = vmatprep.subr.bf16.mxu1 %v4161_v14  ;;  %v4231_v20 = vld [vmem:[#allocation6 + $0x9d8] ss:$48 sps:$4 sm:$0xff]   ;;  %v4236_v14 = vld [vmem:[#allocation6 + $0xa34] ss:$48 sps:$4 sm:$0xff]  }
 0x20e   :  { %2846 = vmatpush1.bf16.msra.mxu0 %v4156_v11  ;;  %2948 = vmatpush1.bf16.msra.mxu1 %v4159_v47  ;;  %v4239_v11 = vld [vmem:[#allocation6 + $0xa3c] ss:$48 sps:$4 sm:$0xff]   ;;  %v4234_v47 = vld [vmem:[#allocation6 + $0xa30] ss:$48 sps:$4 sm:$0xff]  }
 0x20f   :  { %2847 = vmatprep.subr.bf16.mxu0 %v4164_v10  ;;  %2949 = vmatprep.subr.bf16.mxu1 %v4167_v49  ;;  %v4237_v10 = vld [vmem:[#allocation6 + $0xa38] ss:$48 sps:$4 sm:$0xff]   ;;  %v4242_v49 = vld [vmem:[#allocation6 + $0xa94] ss:$48 sps:$4 sm:$0xff]  }
 0x212   :  { %2848 = vmatpush1.bf16.msra.mxu0 %v4162_v50  ;;  %2950 = vmatpush1.bf16.msra.mxu1 %v4165_v51  ;;  %v4245_v50 = vld [vmem:[#allocation6 + $0xa9c] ss:$48 sps:$4 sm:$0xff]   ;;  %v4240_v51 = vld [vmem:[#allocation6 + $0xa90] ss:$48 sps:$4 sm:$0xff]  }
 0x213   :  { %2868 = vmatprep.subr.bf16.mxu0 %v4170_v52  ;;  %2970 = vmatprep.subr.bf16.mxu1 %v4173_v53  ;;  %v4243_v52 = vld [vmem:[#allocation6 + $0xa98] ss:$48 sps:$4 sm:$0xff]   ;;  %v4248_v53 = vld [vmem:[#allocation6 + $0xaf4] ss:$48 sps:$4 sm:$0xff]  }
 0x215   :  { %2850 = vmatmul.mubr.bf16.vlgmr.msra.gmra.mrb[8].mxu0 %v4817_v9  ;;  %2952 = vmatmul.mubr.bf16.vlgmr.msra.gmra.mrb[8].mxu1 %v4817_v9 }
 0x216   :  { %2859 = vmatprep.mubr.bf16.mxu0 %v4831_v1  ;;  %2869 = vmatpush1.bf16.msra.mxu0 %v4168_v55  ;;  %v4251_v55 = vld [vmem:[#allocation6 + $0xafc] ss:$48 sps:$4 sm:$0xff]  }
 0x217   :  { %2961 = vmatprep.mubr.bf16.mxu1 %v4831_v1  ;;  %2971 = vmatpush1.bf16.msra.mxu1 %v4171_v22  ;;  %v4246_v22 = vld [vmem:[#allocation6 + $0xaf0] ss:$48 sps:$4 sm:$0xff]  }
 0x218   :  { %2870 = vmatprep.subr.bf16.mxu0 %v4176_v56  ;;  %2972 = vmatprep.subr.bf16.mxu1 %v4179_v21  ;;  %v4249_v56 = vld [vmem:[#allocation6 + $0xaf8] ss:$48 sps:$4 sm:$0xff]   ;;  %v4254_v21 = vld [vmem:[#allocation6 + $0xb54] ss:$48 sps:$4 sm:$0xff]  }
 0x21a   :  { %2871 = vmatpush1.bf16.msra.mxu0 %v4174_v6  ;;  %v4257_v6 = vld [vmem:[#allocation6 + $0xb5c] ss:$48 sps:$4 sm:$0xff]  }
 0x21b   :  { %2973 = vmatpush1.bf16.msra.mxu1 %v4177_v57  ;;  %2872 = vmatprep.subr.bf16.mxu0 %v4182_v5  ;;  %v4252_v57 = vld [vmem:[#allocation6 + $0xb50] ss:$48 sps:$4 sm:$0xff]   ;;  %v4255_v5 = vld [vmem:[#allocation6 + $0xb58] ss:$48 sps:$4 sm:$0xff]  }
 0x21c   :  { %2974 = vmatprep.subr.bf16.mxu1 %v4185_v58  ;;  %v4260_v58 = vld [vmem:[#allocation6 + $0xbb4] ss:$48 sps:$4 sm:$0xff]  }
 0x21d   :  { %2860 = vmatmul.mubr.bf16.gmra.mrb[12].mxu0 %v4841_v34  ;;  %2962 = vmatmul.mubr.bf16.gmra.mrb[12].mxu1 %v4841_v34 }
 0x21e   :  { %2873 = vmatpush1.bf16.msra.mxu0 %v4180_v59  ;;  %2900 = vmatprep.mubr.bf16.mxu0 %v4846_v36  ;;  %v4263_v59 = vld [vmem:[#allocation6 + $0xbbc] ss:$48 sps:$4 sm:$0xff]  }
 0x21f   :  { %2975 = vmatpush1.bf16.msra.mxu1 %v4183_v28  ;;  %3002 = vmatprep.mubr.bf16.mxu1 %v4846_v36  ;;  %v4258_v28 = vld [vmem:[#allocation6 + $0xbb0] ss:$48 sps:$4 sm:$0xff]  }
 0x220   :  { %2874 = vmatprep.subr.bf16.mxu0 %v4188_v60  ;;  %2976 = vmatprep.subr.bf16.mxu1 %v4191_v61  ;;  %v4261_v60 = vld [vmem:[#allocation6 + $0xbb8] ss:$48 sps:$4 sm:$0xff]   ;;  %v4266_v61 = vld [vmem:[#allocation6 + $0x24] ss:$48 sps:$4 sm:$0xff]  }
 0x222   :  { %2875 = vmatpush1.bf16.msra.mxu0 %v4186_v63  ;;  %v4269_v63 = vld [vmem:[#allocation6 + $0x2c] ss:$48 sps:$4 sm:$0xff]  }
 0x223   :  { %2977 = vmatpush1.bf16.msra.mxu1 %v4189_v4  ;;  %2876 = vmatprep.subr.bf16.mxu0 %v4194_v12  ;;  %v4264_v4 = vld [vmem:[#allocation6 + $0x20] ss:$48 sps:$4 sm:$0xff]   ;;  %v4267_v12 = vld [vmem:[#allocation6 + $0x28] ss:$48 sps:$4 sm:$0xff]  }
 0x224   :  { %2978 = vmatprep.subr.bf16.mxu1 %v4197_v23  ;;  %v4272_v23 = vld [vmem:[#allocation6 + $0x84] ss:$48 sps:$4 sm:$0xff]  }
 0x226   :  { %2877 = vmatpush1.bf16.msra.mxu0 %v4192_v8  ;;  %v4275_v8 = vld [vmem:[#allocation6 + $0x8c] ss:$48 sps:$4 sm:$0xff]  }
 0x227   :  { %2979 = vmatpush1.bf16.msra.mxu1 %v4195_v0  ;;  %2878 = vmatprep.subr.bf16.mxu0 %v4200_v2  ;;  %v4270_v0 = vld [vmem:[#allocation6 + $0x80] ss:$48 sps:$4 sm:$0xff]   ;;  %v4273_v2 = vld [vmem:[#allocation6 + $0x88] ss:$48 sps:$4 sm:$0xff]  }
 0x228   :  { %2980 = vmatprep.subr.bf16.mxu1 %v4203_v19  ;;  %v4278_v19 = vld [vmem:[#allocation6 + $0xe4] ss:$48 sps:$4 sm:$0xff]  }
 0x22a   :  { %2879 = vmatpush1.bf16.msra.mxu0 %v4198_v3  ;;  %v4281_v3 = vld [vmem:[#allocation6 + $0xec] ss:$48 sps:$4 sm:$0xff]  }
 0x22b   :  { %2981 = vmatpush1.bf16.msra.mxu1 %v4201_v25  ;;  %2880 = vmatprep.subr.bf16.mxu0 %v4206_v26  ;;  %v4276_v25 = vld [vmem:[#allocation6 + $0xe0] ss:$48 sps:$4 sm:$0xff]   ;;  %v4279_v26 = vld [vmem:[#allocation6 + $0xe8] ss:$48 sps:$4 sm:$0xff]  }
 0x22c   :  { %2982 = vmatprep.subr.bf16.mxu1 %v4209_v27  ;;  %v4284_v27 = vld [vmem:[#allocation6 + $0x144] ss:$48 sps:$4 sm:$0xff]  }
 0x22e   :  { %2881 = vmatpush1.bf16.msra.mxu0 %v4204_v7  ;;  %v4287_v7 = vld [vmem:[#allocation6 + $0x14c] ss:$48 sps:$4 sm:$0xff]  }
 0x22f   :  { %2983 = vmatpush1.bf16.msra.mxu1 %v4207_v29  ;;  %2882 = vmatprep.subr.bf16.mxu0 %v4212_v30  ;;  %v4282_v29 = vld [vmem:[#allocation6 + $0x140] ss:$48 sps:$4 sm:$0xff]   ;;  %v4285_v30 = vld [vmem:[#allocation6 + $0x148] ss:$48 sps:$4 sm:$0xff]  }
 0x230   :  { %2984 = vmatprep.subr.bf16.mxu1 %v4215_v32  ;;  %v4290_v32 = vld [vmem:[#allocation6 + $0x1a4] ss:$48 sps:$4 sm:$0xff]  }
 0x232   :  { %2883 = vmatpush1.bf16.msra.mxu0 %v4210_v35  ;;  %v4293_v35 = vld [vmem:[#allocation6 + $0x1ac] ss:$48 sps:$4 sm:$0xff]  }
 0x233   :  { %2985 = vmatpush1.bf16.msra.mxu1 %v4213_v18  ;;  %2884 = vmatprep.subr.bf16.mxu0 %v4218_v37  ;;  %v4288_v18 = vld [vmem:[#allocation6 + $0x1a0] ss:$48 sps:$4 sm:$0xff]   ;;  %v4291_v37 = vld [vmem:[#allocation6 + $0x1a8] ss:$48 sps:$4 sm:$0xff]  }
 0x234   :  { %2986 = vmatprep.subr.bf16.mxu1 %v4221_v38  ;;  %v4296_v38 = vld [vmem:[#allocation6 + $0x204] ss:$48 sps:$4 sm:$0xff]  }
 0x236   :  { %2885 = vmatpush1.bf16.msra.mxu0 %v4216_v39  ;;  %v4299_v39 = vld [vmem:[#allocation6 + $0x20c] ss:$48 sps:$4 sm:$0xff]  }
 0x237   :  { %2987 = vmatpush1.bf16.msra.mxu1 %v4219_v40  ;;  %2886 = vmatprep.subr.bf16.mxu0 %v4224_v41  ;;  %v4294_v40 = vld [vmem:[#allocation6 + $0x200] ss:$48 sps:$4 sm:$0xff]   ;;  %v4302_v41 = vld [vmem:[#allocation6 + $0x264] ss:$48 sps:$4 sm:$0xff]  }
 0x238   :  { %2988 = vmatprep.subr.bf16.mxu1 %v4227_v42  ;;  %v4305_v42 = vld [vmem:[#allocation6 + $0x26c] ss:$48 sps:$4 sm:$0xff]  }
 0x23a   :  { %2887 = vmatpush1.bf16.msra.mxu0 %v4222_v44  ;;  %v4300_v44 = vld [vmem:[#allocation6 + $0x260] ss:$48 sps:$4 sm:$0xff]  }
 0x23b   :  { %2989 = vmatpush1.bf16.msra.mxu1 %v4225_v24  ;;  %2888 = vmatprep.subr.bf16.mxu0 %v4230_v43  ;;  %v4303_v24 = vld [vmem:[#allocation6 + $0x268] ss:$48 sps:$4 sm:$0xff]   ;;  %v4308_v43 = vld [vmem:[#allocation6 + $0x2c4] ss:$48 sps:$4 sm:$0xff]  }
 0x23c   :  { %2990 = vmatprep.subr.bf16.mxu1 %v4233_v45  ;;  %v4311_v45 = vld [vmem:[#allocation6 + $0x2cc] ss:$48 sps:$4 sm:$0xff]  }
 0x23e   :  { %2889 = vmatpush1.bf16.msra.mxu0 %v4228_v13  ;;  %v4306_v13 = vld [vmem:[#allocation6 + $0x2c0] ss:$48 sps:$4 sm:$0xff]  }
 0x23f   :  { %2991 = vmatpush1.bf16.msra.mxu1 %v4231_v20  ;;  %2890 = vmatprep.subr.bf16.mxu0 %v4236_v14  ;;  %v4309_v20 = vld [vmem:[#allocation6 + $0x2c8] ss:$48 sps:$4 sm:$0xff]   ;;  %v4314_v14 = vld [vmem:[#allocation6 + $0x324] ss:$48 sps:$4 sm:$0xff]  }
 0x240   :  { %2992 = vmatprep.subr.bf16.mxu1 %v4239_v11  ;;  %v4317_v11 = vld [vmem:[#allocation6 + $0x32c] ss:$48 sps:$4 sm:$0xff]  }
 0x242   :  { %2891 = vmatpush1.bf16.msra.mxu0 %v4234_v47  ;;  %v4312_v47 = vld [vmem:[#allocation6 + $0x320] ss:$48 sps:$4 sm:$0xff]  }
 0x243   :  { %2993 = vmatpush1.bf16.msra.mxu1 %v4237_v10  ;;  %2892 = vmatprep.subr.bf16.mxu0 %v4242_v49  ;;  %v4315_v10 = vld [vmem:[#allocation6 + $0x328] ss:$48 sps:$4 sm:$0xff]   ;;  %v4320_v49 = vld [vmem:[#allocation6 + $0x384] ss:$48 sps:$4 sm:$0xff]  }
 0x244   :  { %2994 = vmatprep.subr.bf16.mxu1 %v4245_v50  ;;  %v4323_v50 = vld [vmem:[#allocation6 + $0x38c] ss:$48 sps:$4 sm:$0xff]  }
 0x246   :  { %2893 = vmatpush1.bf16.msra.mxu0 %v4240_v51  ;;  %v4318_v51 = vld [vmem:[#allocation6 + $0x380] ss:$48 sps:$4 sm:$0xff]  }
 0x247   :  { %2995 = vmatpush1.bf16.msra.mxu1 %v4243_v52  ;;  %2894 = vmatprep.subr.bf16.mxu0 %v4248_v53  ;;  %v4321_v52 = vld [vmem:[#allocation6 + $0x388] ss:$48 sps:$4 sm:$0xff]   ;;  %v4326_v53 = vld [vmem:[#allocation6 + $0x3e4] ss:$48 sps:$4 sm:$0xff]  }
 0x248   :  { %2996 = vmatprep.subr.bf16.mxu1 %v4251_v55  ;;  %v4329_v55 = vld [vmem:[#allocation6 + $0x3ec] ss:$48 sps:$4 sm:$0xff]  }
 0x24a   :  { %2895 = vmatpush1.bf16.msra.mxu0 %v4246_v22  ;;  %v4324_v22 = vld [vmem:[#allocation6 + $0x3e0] ss:$48 sps:$4 sm:$0xff]  }
 0x24b   :  { %2997 = vmatpush1.bf16.msra.mxu1 %v4249_v56  ;;  %2896 = vmatprep.subr.bf16.mxu0 %v4254_v21  ;;  %v4327_v56 = vld [vmem:[#allocation6 + $0x3e8] ss:$48 sps:$4 sm:$0xff]   ;;  %v4332_v21 = vld [vmem:[#allocation6 + $0x444] ss:$48 sps:$4 sm:$0xff]  }
 0x24c   :  { %2998 = vmatprep.subr.bf16.mxu1 %v4257_v6  ;;  %v4335_v6 = vld [vmem:[#allocation6 + $0x44c] ss:$48 sps:$4 sm:$0xff]  }
 0x24e   :  { %2897 = vmatpush1.bf16.msra.mxu0 %v4252_v57  ;;  %v4330_v57 = vld [vmem:[#allocation6 + $0x440] ss:$48 sps:$4 sm:$0xff]  }
 0x24f   :  { %2999 = vmatpush1.bf16.msra.mxu1 %v4255_v5  ;;  %2898 = vmatprep.subr.bf16.mxu0 %v4260_v58  ;;  %v4333_v5 = vld [vmem:[#allocation6 + $0x448] ss:$48 sps:$4 sm:$0xff]   ;;  %v4338_v58 = vld [vmem:[#allocation6 + $0x4a4] ss:$48 sps:$4 sm:$0xff]  }
 0x250   :  { %3000 = vmatprep.subr.bf16.mxu1 %v4263_v59  ;;  %v4341_v59 = vld [vmem:[#allocation6 + $0x4ac] ss:$48 sps:$4 sm:$0xff]  }
 0x252   :  { %2899 = vmatpush1.bf16.msra.mxu0 %v4258_v28  ;;  %v4336_v28 = vld [vmem:[#allocation6 + $0x4a0] ss:$48 sps:$4 sm:$0xff]  }
 0x253   :  { %3001 = vmatpush1.bf16.msra.mxu1 %v4261_v60  ;;  %3021 = vmatprep.subr.bf16.mxu0 %v4266_v61  ;;  %v4339_v60 = vld [vmem:[#allocation6 + $0x4a8] ss:$48 sps:$4 sm:$0xff]   ;;  %v4344_v61 = vld [vmem:[#allocation6 + $0x504] ss:$48 sps:$4 sm:$0xff]  }
 0x254   :  { %3123 = vmatprep.subr.bf16.mxu1 %v4269_v63  ;;  %v4347_v63 = vld [vmem:[#allocation6 + $0x50c] ss:$48 sps:$4 sm:$0xff]  }
 0x255   :  { %2901 = vmatmul.mubr.bf16.vlgmr.msra.gmra.mrb[8].mxu0 %v4823_v17 }
 0x256   :  { %3003 = vmatmul.mubr.bf16.vlgmr.msra.gmra.mrb[8].mxu1 %v4823_v17  ;;  %2910 = vmatprep.mubr.bf16.mxu0 %v4854_v46 }
 0x257   :  { %3012 = vmatprep.mubr.bf16.mxu1 %v4854_v46  ;;  %3022 = vmatpush1.bf16.msra.mxu0 %v4264_v4  ;;  %v4342_v4 = vld [vmem:[#allocation6 + $0x500] ss:$48 sps:$4 sm:$0xff]  }
 0x258   :  { %3124 = vmatpush1.bf16.msra.mxu1 %v4267_v12  ;;  %3023 = vmatprep.subr.bf16.mxu0 %v4272_v23  ;;  %v4345_v12 = vld [vmem:[#allocation6 + $0x508] ss:$48 sps:$4 sm:$0xff]   ;;  %v4350_v23 = vld [vmem:[#allocation6 + $0x564] ss:$48 sps:$4 sm:$0xff]  }
 0x259   :  { %3125 = vmatprep.subr.bf16.mxu1 %v4275_v8  ;;  %v4353_v8 = vld [vmem:[#allocation6 + $0x56c] ss:$48 sps:$4 sm:$0xff]  }
 0x25b   :  { %3024 = vmatpush1.bf16.msra.mxu0 %v4270_v0  ;;  %v4348_v0 = vld [vmem:[#allocation6 + $0x560] ss:$48 sps:$4 sm:$0xff]  }
 0x25c   :  { %3126 = vmatpush1.bf16.msra.mxu1 %v4273_v2  ;;  %3025 = vmatprep.subr.bf16.mxu0 %v4278_v19  ;;  %v4351_v2 = vld [vmem:[#allocation6 + $0x568] ss:$48 sps:$4 sm:$0xff]   ;;  %v4356_v19 = vld [vmem:[#allocation6 + $0x5c4] ss:$48 sps:$4 sm:$0xff]  }
 0x25d   :  { %2911 = vmatmul.mubr.bf16.gmra.mrb[12].mxu0 %v4862_v48  ;;  %3127 = vmatprep.subr.bf16.mxu1 %v4281_v3  ;;  %v4359_v3 = vld [vmem:[#allocation6 + $0x5cc] ss:$48 sps:$4 sm:$0xff]  }
 0x25e   :  { %3013 = vmatmul.mubr.bf16.gmra.mrb[12].mxu1 %v4862_v48  ;;  %3053 = vmatprep.mubr.bf16.mxu0 %v4815_v62 }
 0x25f   :  { %3026 = vmatpush1.bf16.msra.mxu0 %v4276_v25  ;;  %3155 = vmatprep.mubr.bf16.mxu1 %v4815_v62  ;;  %v4297_v62 = vld [vmem:[#allocation6 + $0x208] ss:$48 sps:$4 sm:$0xff]   ;;  %v4354_v25 = vld [vmem:[#allocation6 + $0x5c0] ss:$48 sps:$4 sm:$0xff]  }
 0x260   :  { %3128 = vmatpush1.bf16.msra.mxu1 %v4279_v26  ;;  %3027 = vmatprep.subr.bf16.mxu0 %v4284_v27  ;;  %v4357_v26 = vld [vmem:[#allocation6 + $0x5c8] ss:$48 sps:$4 sm:$0xff]   ;;  %v4362_v27 = vld [vmem:[#allocation6 + $0x624] ss:$48 sps:$4 sm:$0xff]  }
 0x261   :  { %3129 = vmatprep.subr.bf16.mxu1 %v4287_v7  ;;  %v4365_v7 = vld [vmem:[#allocation6 + $0x62c] ss:$48 sps:$4 sm:$0xff]  }
 0x263   :  { %3028 = vmatpush1.bf16.msra.mxu0 %v4282_v29  ;;  %v4360_v29 = vld [vmem:[#allocation6 + $0x620] ss:$48 sps:$4 sm:$0xff]  }
 0x264   :  { %3130 = vmatpush1.bf16.msra.mxu1 %v4285_v30  ;;  %3029 = vmatprep.subr.bf16.mxu0 %v4290_v32  ;;  %v4363_v30 = vld [vmem:[#allocation6 + $0x628] ss:$48 sps:$4 sm:$0xff]   ;;  %v4368_v32 = vld [vmem:[#allocation6 + $0x684] ss:$48 sps:$4 sm:$0xff]  }
 0x265   :  { %3131 = vmatprep.subr.bf16.mxu1 %v4293_v35  ;;  %v4371_v35 = vld [vmem:[#allocation6 + $0x68c] ss:$48 sps:$4 sm:$0xff]  }
 0x267   :  { %3030 = vmatpush1.bf16.msra.mxu0 %v4288_v18  ;;  %v4366_v18 = vld [vmem:[#allocation6 + $0x680] ss:$48 sps:$4 sm:$0xff]  }
 0x268   :  { %3132 = vmatpush1.bf16.msra.mxu1 %v4291_v37  ;;  %3031 = vmatprep.subr.bf16.mxu0 %v4296_v38  ;;  %v4369_v37 = vld [vmem:[#allocation6 + $0x688] ss:$48 sps:$4 sm:$0xff]   ;;  %v4374_v38 = vld [vmem:[#allocation6 + $0x6e4] ss:$48 sps:$4 sm:$0xff]  }
 0x269   :  { %3133 = vmatprep.subr.bf16.mxu1 %v4299_v39  ;;  %v4377_v39 = vld [vmem:[#allocation6 + $0x6ec] ss:$48 sps:$4 sm:$0xff]  }
 0x26b   :  { %3032 = vmatpush1.bf16.msra.mxu0 %v4294_v40  ;;  %v4372_v40 = vld [vmem:[#allocation6 + $0x6e0] ss:$48 sps:$4 sm:$0xff]  }
 0x26c   :  { %3134 = vmatpush1.bf16.msra.mxu1 %v4297_v62  ;;  %3033 = vmatprep.subr.bf16.mxu0 %v4302_v41  ;;  %v4375_v62 = vld [vmem:[#allocation6 + $0x6e8] ss:$48 sps:$4 sm:$0xff]   ;;  %v4380_v41 = vld [vmem:[#allocation6 + $0x744] ss:$48 sps:$4 sm:$0xff]  }
 0x26d   :  { %3135 = vmatprep.subr.bf16.mxu1 %v4305_v42  ;;  %v4381_v42 = vld [vmem:[#allocation6 + $0x748] ss:$48 sps:$4 sm:$0xff]  }
 0x26f   :  { %3034 = vmatpush1.bf16.msra.mxu0 %v4300_v44  ;;  %v4386_v44 = vld [vmem:[#allocation6 + $0x7a4] ss:$48 sps:$4 sm:$0xff]  }
 0x270   :  { %3136 = vmatpush1.bf16.msra.mxu1 %v4303_v24  ;;  %3035 = vmatprep.subr.bf16.mxu0 %v4308_v43  ;;  %v4892_v24 = vld [vmem:[#allocation7] sm:$0xff]  ;;  %v4389_v43 = vld [vmem:[#allocation6 + $0x7ac] ss:$48 sps:$4 sm:$0xff]  }
 0x271   :  { %3137 = vmatprep.subr.bf16.mxu1 %v4311_v45  ;;  %v4384_v45 = vld [vmem:[#allocation6 + $0x7a0] ss:$48 sps:$4 sm:$0xff]  }
 0x273   :  { %3036 = vmatpush1.bf16.msra.mxu0 %v4306_v13  ;;  %v636_v13 = vrot.slane %v4892_v24, %v4789_v33 }
 0x274   :  { %3138 = vmatpush1.bf16.msra.mxu1 %v4309_v20  ;;  %3037 = vmatprep.subr.bf16.mxu0 %v4314_v14  ;;  %v640_v20 = vrot.slane %v4892_v24, %v4786_v16  ;;  %v648_v14 = vrot.slane %v4892_v24, %v4808_v54 }
 0x275   :  { %3139 = vmatprep.subr.bf16.mxu1 %v4317_v11  ;;  %v4392_v11 = vld [vmem:[#allocation6 + $0x804] ss:$48 sps:$4 sm:$0xff]  }
 0x277   :  { %3038 = vmatpush1.bf16.msra.mxu0 %v4312_v47  ;;  %v4395_v47 = vld [vmem:[#allocation6 + $0x80c] ss:$48 sps:$4 sm:$0xff]  }
 0x278   :  { %3140 = vmatpush1.bf16.msra.mxu1 %v4315_v10  ;;  %3039 = vmatprep.subr.bf16.mxu0 %v4320_v49 }
 0x279   :  { %3141 = vmatprep.subr.bf16.mxu1 %v4323_v50 }
 0x27b   :  { %3040 = vmatpush1.bf16.msra.mxu0 %v4318_v51 }
 0x27c   :  { %3142 = vmatpush1.bf16.msra.mxu1 %v4321_v52  ;;  %3041 = vmatprep.subr.bf16.mxu0 %v4326_v53 }
 0x27d   :  { %3143 = vmatprep.subr.bf16.mxu1 %v4329_v55  ;;  %v4390_v55 = vld [vmem:[#allocation6 + $0x800] ss:$48 sps:$4 sm:$0xff]  }
 0x27f   :  { %3042 = vmatpush1.bf16.msra.mxu0 %v4324_v22 }
 0x280   :  { %3144 = vmatpush1.bf16.msra.mxu1 %v4327_v56  ;;  %3043 = vmatprep.subr.bf16.mxu0 %v4332_v21  ;;  %v4393_v21 = vld [vmem:[#allocation6 + $0x808] ss:$48 sps:$4 sm:$0xff]  }
 0x281   :  { %3145 = vmatprep.subr.bf16.mxu1 %v4335_v6 }
 0x283   :  { %3044 = vmatpush1.bf16.msra.mxu0 %v4330_v57 }
 0x284   :  { %3146 = vmatpush1.bf16.msra.mxu1 %v4333_v5  ;;  %3045 = vmatprep.subr.bf16.mxu0 %v4338_v58  ;;  %v4398_v5 = vld [vmem:[#allocation6 + $0x864] ss:$48 sps:$4 sm:$0xff]  }
 0x285   :  { %3147 = vmatprep.subr.bf16.mxu1 %v4341_v59 }
 0x287   :  { %3046 = vmatpush1.bf16.msra.mxu0 %v4336_v28 }
 0x288   :  { %3148 = vmatpush1.bf16.msra.mxu1 %v4339_v60  ;;  %3047 = vmatprep.subr.bf16.mxu0 %v4344_v61  ;;  %v4401_v61 = vld [vmem:[#allocation6 + $0x86c] ss:$48 sps:$4 sm:$0xff]  }
 0x289   :  { %3149 = vmatprep.subr.bf16.mxu1 %v4347_v63 }
 0x28b   :  { %3048 = vmatpush1.bf16.msra.mxu0 %v4342_v4 }
 0x28c   :  { %3150 = vmatpush1.bf16.msra.mxu1 %v4345_v12  ;;  %3049 = vmatprep.subr.bf16.mxu0 %v4350_v23 }
 0x28d   :  { %3151 = vmatprep.subr.bf16.mxu1 %v4353_v8  ;;  %v4396_v8 = vld [vmem:[#allocation6 + $0x860] ss:$48 sps:$4 sm:$0xff]  }
 0x28f   :  { %3050 = vmatpush1.bf16.msra.mxu0 %v4348_v0 }
 0x290   :  { %3152 = vmatpush1.bf16.msra.mxu1 %v4351_v2  ;;  %3051 = vmatprep.subr.bf16.mxu0 %v4356_v19  ;;  %v4399_v19 = vld [vmem:[#allocation6 + $0x868] ss:$48 sps:$4 sm:$0xff]  }
 0x291   :  { %3153 = vmatprep.subr.bf16.mxu1 %v4359_v3  ;;  %v4404_v3 = vld [vmem:[#allocation6 + $0x8c4] ss:$48 sps:$4 sm:$0xff]  }
 0x293   :  { %3052 = vmatpush1.bf16.msra.mxu0 %v4354_v25  ;;  %v4407_v25 = vld [vmem:[#allocation6 + $0x8cc] ss:$48 sps:$4 sm:$0xff]  }
 0x294   :  { %3154 = vmatpush1.bf16.msra.mxu1 %v4357_v26  ;;  %3072 = vmatprep.subr.bf16.mxu0 %v4362_v27 }
 0x295   :  { %3174 = vmatprep.subr.bf16.mxu1 %v4365_v7 }
 0x296   :  { %3054 = vmatmul.mubr.bf16.vlgmr.msra.gmra.mrb[16].mxu0 %v4817_v9 }
 0x297   :  { %3156 = vmatmul.mubr.bf16.vlgmr.msra.gmra.mrb[16].mxu1 %v4817_v9  ;;  %3063 = vmatprep.mubr.bf16.mxu0 %v4831_v1  ;;  %v4383_v9 = vld [vmem:[#allocation6 + $0x74c] ss:$48 sps:$4 sm:$0xff]  }
 0x298   :  { %3073 = vmatpush1.bf16.msra.mxu0 %v4360_v29  ;;  %3165 = vmatprep.mubr.bf16.mxu1 %v4831_v1  ;;  %v4378_v1 = vld [vmem:[#allocation6 + $0x740] ss:$48 sps:$4 sm:$0xff]  }
 0x299   :  { %3175 = vmatpush1.bf16.msra.mxu1 %v4363_v30  ;;  %3074 = vmatprep.subr.bf16.mxu0 %v4368_v32 }
 0x29a   :  { %3176 = vmatprep.subr.bf16.mxu1 %v4371_v35  ;;  %v4402_v35 = vld [vmem:[#allocation6 + $0x8c0] ss:$48 sps:$4 sm:$0xff]  }
 0x29c   :  { %3075 = vmatpush1.bf16.msra.mxu0 %v4366_v18 }
 0x29d   :  { %3177 = vmatpush1.bf16.msra.mxu1 %v4369_v37  ;;  %3076 = vmatprep.subr.bf16.mxu0 %v4374_v38  ;;  %v4405_v38 = vld [vmem:[#allocation6 + $0x8c8] ss:$48 sps:$4 sm:$0xff]  }
 0x29e   :  { %3064 = vmatmul.mubr.bf16.gmra.mrb[20].mxu0 %v4841_v34  ;;  %3178 = vmatprep.subr.bf16.mxu1 %v4377_v39 }
 0x29f   :  { %3166 = vmatmul.mubr.bf16.gmra.mrb[20].mxu1 %v4841_v34  ;;  %3104 = vmatprep.mubr.bf16.mxu0 %v4846_v36  ;;  %v644_v34 = vrot.slane %v4892_v24, %v4783_v31 }
 0x2a0   :  { %3077 = vmatpush1.bf16.msra.mxu0 %v4372_v40  ;;  %3206 = vmatprep.mubr.bf16.mxu1 %v4846_v36  ;;  %v4387_v36 = vld [vmem:[#allocation6 + $0x7a8] ss:$48 sps:$4 sm:$0xff]  }
 0x2a1   :  { %3179 = vmatpush1.bf16.msra.mxu1 %v4375_v62  ;;  %3078 = vmatprep.subr.bf16.mxu0 %v4380_v41  ;;  %v4410_v62 = vld [vmem:[#allocation6 + $0x924] ss:$48 sps:$4 sm:$0xff]  }
 0x2a2   :  { %3180 = vmatprep.subr.bf16.mxu1 %v4383_v9 }
 0x2a4   :  { %3079 = vmatpush1.bf16.msra.mxu0 %v4378_v1  ;;  %v4413_v1 = vld [vmem:[#allocation6 + $0x92c] ss:$48 sps:$4 sm:$0xff]  }
 0x2a5   :  { %3181 = vmatpush1.bf16.msra.mxu1 %v4381_v42  ;;  %3080 = vmatprep.subr.bf16.mxu0 %v4386_v44 }
 0x2a6   :  { %3182 = vmatprep.subr.bf16.mxu1 %v4389_v43  ;;  %v4408_v43 = vld [vmem:[#allocation6 + $0x920] ss:$48 sps:$4 sm:$0xff]  }
 0x2a7   :  { %v2698_v10 = vpop.f32.mrb[0].mxu0  ;;  %v2800_v49 = vpop.f32.mrb[0].mxu1 }
 0x2a8   :  { %3081 = vmatpush1.bf16.msra.mxu0 %v4384_v45  ;;  %v3790_v50 = vadd.f32 %v2698_v10, %v636_v13  ;;  %v3796_v51 = vadd.f32 %v2800_v49, %v644_v34  ;;  %v2700_v52 = vpop.f32.mrb[1].mxu0  ;;  %v2802_v53 = vpop.f32.mrb[1].mxu1  ;;  %v4411_v45 = vld [vmem:[#allocation6 + $0x928] ss:$48 sps:$4 sm:$0xff]   ;;  %v4428_v49 = vld [vmem:[#allocation6 + $0xa44] ss:$48 sps:$4 sm:$0xff]  }
 0x2a9   :  { %3183 = vmatpush1.bf16.msra.mxu1 %v4387_v36  ;;  %v3791_v22 = vadd.f32 %v2700_v52, %v640_v20  ;;  %v3797_v56 = vadd.f32 %v2802_v53, %v648_v14  ;;  %3082 = vmatprep.subr.bf16.mxu0 %v4392_v11  ;;  %v2702_v6 = vpop.f32.mrb[2].mxu0  ;;  %v2804_v57 = vpop.f32.mrb[2].mxu1  ;;  %v4414_v36 = vld [vmem:[#allocation6 + $0x980] ss:$48 sps:$4 sm:$0xff]   ;;  %v4425_v11 = vld [vmem:[#allocation6 + $0x9ec] ss:$48 sps:$4 sm:$0xff]  }
 0x2aa   :  { %3184 = vmatprep.subr.bf16.mxu1 %v4395_v47  ;;  %v3792_v58 = vadd.f32 %v2702_v6, %v636_v13  ;;  %v3798_v59 = vadd.f32 %v2804_v57, %v644_v34  ;;  %v2704_v28 = vpop.f32.mrb[3].mxu0  ;;  %v2806_v60 = vpop.f32.mrb[3].mxu1  ;;  %v4420_v47 = vld [vmem:[#allocation6 + $0x9e0] ss:$48 sps:$4 sm:$0xff]   ;;  %v4423_v10 = vld [vmem:[#allocation6 + $0x9e8] ss:$48 sps:$4 sm:$0xff]  }
 0x2ab   :  { %v3772_v63 = vpack.c.bf16 %v3791_v22, %v3790_v50  ;;  %v3773_v4 = vpack.c.bf16 %v3797_v56, %v3796_v51  ;;  %v3793_v12 = vadd.f32 %v2704_v28, %v640_v20  ;;  %v3799_v23 = vadd.f32 %v2806_v60, %v648_v14  ;;  %v4431_v50 = vld [vmem:[#allocation6 + $0xa4c] ss:$48 sps:$4 sm:$0xff]   ;;  %v4426_v51 = vld [vmem:[#allocation6 + $0xa40] ss:$48 sps:$4 sm:$0xff]   ;;  %v4429_v52 = vld [vmem:[#allocation6 + $0xa48] ss:$48 sps:$4 sm:$0xff]  }
 0x2ac   :  { %3083 = vmatpush1.bf16.msra.mxu0 %v4390_v55  ;;  %v4434_v53 = vld [vmem:[#allocation6 + $0xaa4] ss:$48 sps:$4 sm:$0xff]   ;;  %v4437_v55 = vld [vmem:[#allocation6 + $0xaac] ss:$48 sps:$4 sm:$0xff]   ;;  %v4432_v22 = vld [vmem:[#allocation6 + $0xaa0] ss:$48 sps:$4 sm:$0xff]  }
 0x2ad   :  { %3345 = vst [vmem:[%s4979_s5] sm:$0xff] %v3772_v63  ;;  %3346 = vst [vmem:[%s4979_s5 + $0x8] sm:$0xff] %v3773_v4  ;;  %3185 = vmatpush1.bf16.msra.mxu1 %v4393_v21  ;;  %v3778_v0 = vpack.c.bf16 %v3793_v12, %v3792_v58  ;;  %v3779_v2 = vpack.c.bf16 %v3799_v23, %v3798_v59  ;;  %3084 = vmatprep.subr.bf16.mxu0 %v4398_v5  ;;  %v4435_v56 = vld [vmem:[#allocation6 + $0xaa8] ss:$48 sps:$4 sm:$0xff]   ;;  %v4440_v21 = vld [vmem:[#allocation6 + $0xb04] ss:$48 sps:$4 sm:$0xff]   ;;  %v651_v23 = vsub.s32 4, %v4780_v15 }
 0x2ae   :  { %3186 = vmatprep.subr.bf16.mxu1 %v4401_v61  ;;  %v4443_v6 = vld [vmem:[#allocation6 + $0xb0c] ss:$48 sps:$4 sm:$0xff]   ;;  %v4438_v57 = vld [vmem:[#allocation6 + $0xb00] ss:$48 sps:$4 sm:$0xff]   ;;  %v4441_v5 = vld [vmem:[#allocation6 + $0xb08] ss:$48 sps:$4 sm:$0xff]  }
 0x2af   :  { %3351 = vst [vmem:[%s4979_s5 + $0x30] sm:$0xff] %v3778_v0  ;;  %3352 = vst [vmem:[%s4979_s5 + $0x38] sm:$0xff] %v3779_v2  ;;  %v2708_v26 = vpop.f32.mrb[4].mxu0  ;;  %v2810_v27 = vpop.f32.mrb[4].mxu1  ;;  %v4446_v58 = vld [vmem:[#allocation6 + $0xb64] ss:$48 sps:$4 sm:$0xff]  }
 0x2b0   :  { %3085 = vmatpush1.bf16.msra.mxu0 %v4396_v8  ;;  %v3794_v7 = vadd.f32 %v2708_v26, %v636_v13  ;;  %v3800_v29 = vadd.f32 %v2810_v27, %v644_v34  ;;  %v2710_v30 = vpop.f32.mrb[5].mxu0  ;;  %v2812_v32 = vpop.f32.mrb[5].mxu1  ;;  %v4416_v13 = vld [vmem:[#allocation6 + $0x984] ss:$48 sps:$4 sm:$0xff]   ;;  %v4419_v34 = vld [vmem:[#allocation6 + $0x98c] ss:$48 sps:$4 sm:$0xff]  }
 0x2b1   :  { %3187 = vmatpush1.bf16.msra.mxu1 %v4399_v19  ;;  %v3795_v18 = vadd.f32 %v2710_v30, %v640_v20  ;;  %v3801_v37 = vadd.f32 %v2812_v32, %v648_v14  ;;  %3086 = vmatprep.subr.bf16.mxu0 %v4404_v3  ;;  %v2712_v39 = vpop.f32.mrb[6].mxu0  ;;  %v2814_v40 = vpop.f32.mrb[6].mxu1  ;;  %v4417_v20 = vld [vmem:[#allocation6 + $0x988] ss:$48 sps:$4 sm:$0xff]   ;;  %v4422_v14 = vld [vmem:[#allocation6 + $0x9e4] ss:$48 sps:$4 sm:$0xff]   ;;  %v652_v19 = vrot.slane %v4892_v24, %v651_v23 }
 0x2b2   :  { %3188 = vmatprep.subr.bf16.mxu1 %v4407_v25  ;;  %v2713_v41 = vpop.f32.mrb[7].mxu0  ;;  %v2815_v9 = vpop.f32.mrb[7].mxu1  ;;  %v4449_v59 = vld [vmem:[#allocation6 + $0xb6c] ss:$48 sps:$4 sm:$0xff]   ;;  %v4444_v28 = vld [vmem:[#allocation6 + $0xb60] ss:$48 sps:$4 sm:$0xff]  }
 0x2b3   :  { %v3784_v42 = vpack.c.bf16 %v3795_v18, %v3794_v7  ;;  %v3785_v44 = vpack.c.bf16 %v3801_v37, %v3800_v29  ;;  %v4447_v60 = vld [vmem:[#allocation6 + $0xb68] ss:$48 sps:$4 sm:$0xff]   ;;  %v4452_v61 = vld [vmem:[#allocation6 + $0xbc4] ss:$48 sps:$4 sm:$0xff]   ;;  %v4455_v63 = vld [vmem:[#allocation6 + $0xbcc] ss:$48 sps:$4 sm:$0xff]  }
 0x2b4   :  { %3087 = vmatpush1.bf16.msra.mxu0 %v4402_v35  ;;  %v4450_v4 = vld [vmem:[#allocation6 + $0xbc0] ss:$48 sps:$4 sm:$0xff]   ;;  %v4453_v12 = vld [vmem:[#allocation6 + $0xbc8] ss:$48 sps:$4 sm:$0xff]   ;;  %v659_v8 = vsub.s32 6, %v4780_v15  ;;  %v655_v0 = vsub.s32 5, %v4780_v15 }
 0x2b5   :  { %3357 = vst [vmem:[%s4979_s5 + $0x60] sm:$0x33] %v3784_v42  ;;  %3358 = vst [vmem:[%s4979_s5 + $0x68] sm:$0x33] %v3785_v44  ;;  %3189 = vmatpush1.bf16.msra.mxu1 %v4405_v38  ;;  %3088 = vmatprep.subr.bf16.mxu0 %v4410_v62  ;;  %v663_v2 = vsub.s32 7, %v4780_v15 }
 0x2b6   :  { %3190 = vmatprep.subr.bf16.mxu1 %v4413_v1  ;;  %v656_v3 = vrot.slane %v4892_v24, %v655_v0 }
 0x2b8   :  { %3089 = vmatpush1.bf16.msra.mxu0 %v4408_v43 }
 0x2b9   :  { %3191 = vmatpush1.bf16.msra.mxu1 %v4411_v45  ;;  %3090 = vmatprep.subr.bf16.mxu0 %v4416_v13 }
 0x2ba   :  { %3192 = vmatprep.subr.bf16.mxu1 %v4419_v34 }
 0x2bc   :  { %3091 = vmatpush1.bf16.msra.mxu0 %v4414_v36 }
 0x2bd   :  { %3193 = vmatpush1.bf16.msra.mxu1 %v4417_v20  ;;  %3092 = vmatprep.subr.bf16.mxu0 %v4422_v14 }
 0x2be   :  { %3194 = vmatprep.subr.bf16.mxu1 %v4425_v11 }
 0x2c0   :  { %3093 = vmatpush1.bf16.msra.mxu0 %v4420_v47 }
 0x2c1   :  { %3195 = vmatpush1.bf16.msra.mxu1 %v4423_v10  ;;  %3094 = vmatprep.subr.bf16.mxu0 %v4428_v49 }
 0x2c2   :  { %3196 = vmatprep.subr.bf16.mxu1 %v4431_v50 }
 0x2c4   :  { %3095 = vmatpush1.bf16.msra.mxu0 %v4426_v51  ;;  %v630_v51 = vld [vmem:[#allocation7 + $0x8] sm:$0xf] }
 0x2c5   :  { %3197 = vmatpush1.bf16.msra.mxu1 %v4429_v52  ;;  %3096 = vmatprep.subr.bf16.mxu0 %v4434_v53  ;;  %v668_v52 = vrot.slane %v630_v51, %v4789_v33  ;;  %v676_v53 = vrot.slane %v630_v51, %v4783_v31 }
 0x2c6   :  { %3198 = vmatprep.subr.bf16.mxu1 %v4437_v55  ;;  %v672_v55 = vrot.slane %v630_v51, %v4786_v16 }
 0x2c8   :  { %3097 = vmatpush1.bf16.msra.mxu0 %v4432_v22  ;;  %v680_v22 = vrot.slane %v630_v51, %v4808_v54 }
 0x2c9   :  { %3199 = vmatpush1.bf16.msra.mxu1 %v4435_v56  ;;  %3098 = vmatprep.subr.bf16.mxu0 %v4440_v21 }
 0x2ca   :  { %3200 = vmatprep.subr.bf16.mxu1 %v4443_v6 }
 0x2cc   :  { %3099 = vmatpush1.bf16.msra.mxu0 %v4438_v57 }
 0x2cd   :  { %3201 = vmatpush1.bf16.msra.mxu1 %v4441_v5  ;;  %3100 = vmatprep.subr.bf16.mxu0 %v4446_v58 }
 0x2ce   :  { %3202 = vmatprep.subr.bf16.mxu1 %v4449_v59 }
 0x2d0   :  { %3101 = vmatpush1.bf16.msra.mxu0 %v4444_v28 }
 0x2d1   :  { %3203 = vmatpush1.bf16.msra.mxu1 %v4447_v60  ;;  %3102 = vmatprep.subr.bf16.mxu0 %v4452_v61 }
 0x2d2   :  { %3204 = vmatprep.subr.bf16.mxu1 %v4455_v63 }
 0x2d4   :  { %3103 = vmatpush1.bf16.msra.mxu0 %v4450_v4 }
 0x2d5   :  { %3205 = vmatpush1.bf16.msra.mxu1 %v4453_v12 }
 0x2d7   :  { %3105 = vmatmul.mubr.bf16.vlgmr.msra.gmra.mrb[16].mxu0 %v4823_v17 }
 0x2d8   :  { %3207 = vmatmul.mubr.bf16.vlgmr.msra.gmra.mrb[16].mxu1 %v4823_v17  ;;  %3114 = vmatprep.mubr.bf16.mxu0 %v4854_v46  ;;  %v660_v17 = vrot.slane %v4892_v24, %v659_v8 }
 0x2d9   :  { %3216 = vmatprep.mubr.bf16.mxu1 %v4854_v46  ;;  %v664_v46 = vrot.slane %v4892_v24, %v663_v2 }
 0x2df   :  { %3115 = vmatmul.mubr.bf16.gmra.mrb[20].mxu0 %v4862_v48 }
 0x2e0   :  { %3217 = vmatmul.mubr.bf16.gmra.mrb[20].mxu1 %v4862_v48 }
 0x328   :  { %v2902_v25 = vpop.f32.mrb[8].mxu0 }
 0x329   :  { %v3802_v26 = vadd.f32 %v2902_v25, %v652_v19  ;;  %v3004_v27 = vpop.f32.mrb[8].mxu1  ;;  %v2904_v48 = vpop.f32.mrb[9].mxu0 }
 0x32a   :  { %v3808_v7 = vadd.f32 %v3004_v27, %v660_v17  ;;  %v3803_v29 = vadd.f32 %v2904_v48, %v656_v3  ;;  %v3006_v30 = vpop.f32.mrb[9].mxu1  ;;  %v2906_v32 = vpop.f32.mrb[10].mxu0 }
 0x32b   :  { %v3809_v35 = vadd.f32 %v3006_v30, %v664_v46  ;;  %v3804_v18 = vadd.f32 %v2906_v32, %v652_v19  ;;  %v3008_v37 = vpop.f32.mrb[10].mxu1  ;;  %v2908_v15 = vpop.f32.mrb[11].mxu0 }
 0x32c   :  { %v3774_v38 = vpack.c.bf16 %v3803_v29, %v3802_v26  ;;  %v3810_v39 = vadd.f32 %v3008_v37, %v660_v17  ;;  %v3805_v40 = vadd.f32 %v2908_v15, %v656_v3  ;;  %v3010_v62 = vpop.f32.mrb[11].mxu1 }
 0x32d   :  { %v3775_v41 = vpack.c.bf16 %v3809_v35, %v3808_v7  ;;  %v3811_v9 = vadd.f32 %v3010_v62, %v664_v46 }
 0x32e   :  { %3347 = vst [vmem:[%s4979_s5 + $0x10] sm:$0xff] %v3774_v38  ;;  %v3780_v24 = vpack.c.bf16 %v3805_v40, %v3804_v18 }
 0x32f   :  { %3348 = vst [vmem:[%s4979_s5 + $0x18] sm:$0xff] %v3775_v41  ;;  %v3781_v1 = vpack.c.bf16 %v3811_v9, %v3810_v39 }
 0x330   :  { %3353 = vst [vmem:[%s4979_s5 + $0x40] sm:$0xff] %v3780_v24  ;;  %v2912_v42 = vpop.f32.mrb[12].mxu0 }
 0x331   :  { %3354 = vst [vmem:[%s4979_s5 + $0x48] sm:$0xff] %v3781_v1  ;;  %v3806_v44 = vadd.f32 %v2912_v42, %v652_v19  ;;  %v3014_v43 = vpop.f32.mrb[12].mxu1  ;;  %v2914_v45 = vpop.f32.mrb[13].mxu0 }
 0x332   :  { %v3812_v13 = vadd.f32 %v3014_v43, %v660_v17  ;;  %v3807_v34 = vadd.f32 %v2914_v45, %v656_v3  ;;  %v3016_v36 = vpop.f32.mrb[13].mxu1  ;;  %v2916_v20 = vpop.f32.mrb[14].mxu0 }
 0x333   :  { %v3813_v14 = vadd.f32 %v3016_v36, %v664_v46  ;;  %v3018_v11 = vpop.f32.mrb[14].mxu1  ;;  %v2917_v47 = vpop.f32.mrb[15].mxu0 }
 0x334   :  { %v3786_v10 = vpack.c.bf16 %v3807_v34, %v3806_v44  ;;  %v3019_v49 = vpop.f32.mrb[15].mxu1 }
 0x335   :  { %v3787_v50 = vpack.c.bf16 %v3813_v14, %v3812_v13 }
 0x336   :  { %3359 = vst [vmem:[%s4979_s5 + $0x70] sm:$0x33] %v3786_v10 }
 0x337   :  { %3360 = vst [vmem:[%s4979_s5 + $0x78] sm:$0x33] %v3787_v50 }
 0x3aa   :  { %v3106_v56 = vpop.f32.mrb[16].mxu0 }
 0x3ab   :  { %v3814_v21 = vadd.f32 %v3106_v56, %v668_v52  ;;  %v3208_v6 = vpop.f32.mrb[16].mxu1  ;;  %v3108_v57 = vpop.f32.mrb[17].mxu0 }
 0x3ac   :  { %v3820_v5 = vadd.f32 %v3208_v6, %v676_v53  ;;  %v3815_v58 = vadd.f32 %v3108_v57, %v672_v55  ;;  %v3210_v59 = vpop.f32.mrb[17].mxu1  ;;  %v3110_v28 = vpop.f32.mrb[18].mxu0 }
 0x3ad   :  { %v3821_v60 = vadd.f32 %v3210_v59, %v680_v22  ;;  %v3816_v61 = vadd.f32 %v3110_v28, %v668_v52  ;;  %v3212_v63 = vpop.f32.mrb[18].mxu1  ;;  %v3112_v4 = vpop.f32.mrb[19].mxu0 }
 0x3ae   :  { %v3776_v12 = vpack.c.bf16 %v3815_v58, %v3814_v21  ;;  %v3822_v33 = vadd.f32 %v3212_v63, %v676_v53  ;;  %v3817_v23 = vadd.f32 %v3112_v4, %v672_v55  ;;  %v3214_v31 = vpop.f32.mrb[19].mxu1 }
 0x3af   :  { %v3777_v8 = vpack.c.bf16 %v3821_v60, %v3820_v5  ;;  %v3823_v16 = vadd.f32 %v3214_v31, %v680_v22 }
 0x3b0   :  { %3349 = vst [vmem:[%s4979_s5 + $0x20] sm:$0xff] %v3776_v12  ;;  %v3782_v54 = vpack.c.bf16 %v3817_v23, %v3816_v61 }
 0x3b1   :  { %3350 = vst [vmem:[%s4979_s5 + $0x28] sm:$0xff] %v3777_v8  ;;  %v3783_v0 = vpack.c.bf16 %v3823_v16, %v3822_v33 }
 0x3b2   :  { %3355 = vst [vmem:[%s4979_s5 + $0x50] sm:$0xff] %v3782_v54  ;;  %v3116_v2 = vpop.f32.mrb[20].mxu0 }
 0x3b3   :  { %3356 = vst [vmem:[%s4979_s5 + $0x58] sm:$0xff] %v3783_v0  ;;  %v3818_v19 = vadd.f32 %v3116_v2, %v668_v52  ;;  %v3218_v17 = vpop.f32.mrb[20].mxu1  ;;  %v3118_v3 = vpop.f32.mrb[21].mxu0 }
 0x3b4   :  { %v3824_v46 = vadd.f32 %v3218_v17, %v676_v53  ;;  %v3819_v25 = vadd.f32 %v3118_v3, %v672_v55  ;;  %v3220_v26 = vpop.f32.mrb[21].mxu1  ;;  %v3120_v27 = vpop.f32.mrb[22].mxu0 }
 0x3b5   :  { %v3825_v48 = vadd.f32 %v3220_v26, %v680_v22  ;;  %v3222_v7 = vpop.f32.mrb[22].mxu1  ;;  %v3121_v29 = vpop.f32.mrb[23].mxu0 }
 0x3b6   :  { %v3788_v30 = vpack.c.bf16 %v3819_v25, %v3818_v19  ;;  %v3223_v32 = vpop.f32.mrb[23].mxu1 }
 0x3b7   :  { %v3789_v35 = vpack.c.bf16 %v3825_v48, %v3824_v46 }
 0x3b8   :  { %3361 = vst [vmem:[%s4979_s5 + $0x80] sm:$0x33] %v3788_v30 }
 0x3b9   :  { %3362 = vst [vmem:[%s4979_s5 + $0x88] sm:$0x33] %v3789_v35 }
 0x3ba   :  { %3367 = vsyncpa [#allocation3], 1 }
 0x3bb   :  { %3368 = vsyncpa [#allocation5], 1 }
 0x3bc   :  { %3369 = vsyncpa [#allocation8], 1 }

// kernel: forward.19
= control target key start
LH: loop header
LB: loop body
LE: loop exit
PB: predicated region body
PF: predicated region fallthrough
CT: control target
= control target key end

     0   :  { %v30_v1 = vlaneseq  ;;  %v716_v2 = vmov 1983009808   ;;  %vm47_vm0 = vcmask 1041408   ;;  %s914_s0 = inlined_call_operand.vmem [shape: f32[2,512], index: 0, kind: input, shape index: {}]   ;;  %s915_s1 = inlined_call_operand.vmem [shape: f32[1,512], index: 1, kind: input, shape index: {}]   ;;  %s916_s2 = inlined_call_operand.vmem [shape: f32[1,512], index: 2, kind: input, shape index: {}]   ;;  %s917_s3 = inlined_call_operand.vmem [shape: bf16[512,128], index: 3, kind: input, shape index: {}]   ;;  %s918_s4 = inlined_call_operand.vmem [shape: f32[1,128], index: 4, kind: input, shape index: {}]   ;;  %s919_s5 = inlined_call_operand.vmem [shape: f32[2,512], index: 5, kind: output, shape index: {0}]   ;;  %s920_s6 = inlined_call_operand.hbm [shape: f32[2,128], index: 6, kind: output, shape index: {1}]  }
   0x1   :  { %v24_v0 = vld [vmem:[%s914_s0] sm:$0xff]  ;;  %v28_v3 = vunpack.c.l.s4 %v716_v2 }
   0x2   :  { %v757_v4 = vshrl.u32 %v30_v1, 7  ;;  %v26_v5 = vcombine.high %v24_v0, %v24_v0 }
   0x3   :  { %v29_v6 = vunpack.c.0.s8 %v28_v3 }
   0x5   :  { %v760_v7 = vsub.s32 %v29_v6, %v757_v4 }
   0x7   :  { %v33_v8 = vrot.slane %v24_v0, %v760_v7  ;;  %v40_v9 = vrot.slane %v26_v5, %v760_v7 }
   0x9   :  { %v41_v10 = vcombine.high %v33_v8, %v33_v8  ;;  %v42_v11 = vcombine.high %v40_v9, %v40_v9  ;;  %v48_v12 = vsel %vm47_vm0, %v33_v8, 0.0  ;;  %v51_v13 = vsel %vm47_vm0, %v40_v9, 0.0 }
   0xb   :  { %v49_v14 = vsel %vm47_vm0, %v41_v10, 0.0  ;;  %v53_v15 = vsel %vm47_vm0, %v42_v11, 0.0 }
   0xc   :  { %v50_v16 = vadd.f32 %v49_v14, %v48_v12 }
   0xe   :  { %v52_v17 = vadd.f32 %v51_v13, %v50_v16 }
  0x10   :  { %v54_v18 = vadd.f32 %v53_v15, %v52_v17 }
  0x12   :  { %55 = vadd.xlane.f32.xlu0 %v54_v18 }
  0x13   :  { %12 = vsyncpa [#allocation3], 0  ;;  %v658_v19 = vld [vmem:[%s917_s3 + $0x40] sm:$0xff]   ;;  %v717_v21 = vmov 269488144   ;;  %v662_v44 = vld [vmem:[%s917_s3 + $0x48] sm:$0xff]  }
  0x14   :  { %v659_v20 = vld [vmem:[%s917_s3] sm:$0xff]   ;;  %610 = vmatprep.subr.bf16.mxu0 %v658_v19  ;;  %v61_v22 = vunpack.c.l.s4 %v717_v21  ;;  %v663_v45 = vld [vmem:[%s917_s3 + $0x8] sm:$0xff]   ;;  %v666_v48 = vld [vmem:[%s917_s3 + $0x50] sm:$0xff]   ;;  %v118_v11 = vsub.s32 0, %v757_v4  ;;  %v122_v12 = vsub.s32 1, %v757_v4  ;;  %v126_v13 = vsub.s32 2, %v757_v4 }
  0x15   :  { %611 = vmatpush3.bf16.msra.mxu0 %v659_v20  ;;  %v660_v42 = vld [vmem:[%s917_s3 + $0xc0] sm:$0xff]   ;;  %v664_v46 = vld [vmem:[%s917_s3 + $0xc8] sm:$0xff]   ;;  %v667_v49 = vld [vmem:[%s917_s3 + $0x10] sm:$0xff]   ;;  %v130_v14 = vsub.s32 3, %v757_v4 }
  0x16   :  { %v62_v23 = vunpack.c.0.s8 %v61_v22  ;;  %v661_v43 = vld [vmem:[%s917_s3 + $0x80] sm:$0xff]   ;;  %632 = vmatprep.subr.bf16.mxu1 %v660_v42  ;;  %612 = vmatprep.subr.bf16.mxu0 %v662_v44  ;;  %v665_v47 = vld [vmem:[%s917_s3 + $0x88] sm:$0xff]   ;;  %v668_v50 = vld [vmem:[%s917_s3 + $0xd0] sm:$0xff]  }
  0x17   :  { %633 = vmatpush3.bf16.msra.mxu1 %v661_v43  ;;  %v669_v51 = vld [vmem:[%s917_s3 + $0x90] sm:$0xff]   ;;  %v670_v52 = vld [vmem:[%s917_s3 + $0x58] sm:$0xff]   ;;  %v674_v56 = vld [vmem:[%s917_s3 + $0x60] sm:$0xff]  }
  0x18   :  { %v775_v24 = vsub.s32 %v62_v23, %v757_v4  ;;  %634 = vmatprep.subr.bf16.mxu1 %v664_v46  ;;  %v671_v53 = vld [vmem:[%s917_s3 + $0x18] sm:$0xff]   ;;  %v675_v57 = vld [vmem:[%s917_s3 + $0x20] sm:$0xff]   ;;  %v678_v60 = vld [vmem:[%s917_s3 + $0x68] sm:$0xff]  }
  0x19   :  { %613 = vmatpush3.bf16.msra.mxu0 %v663_v45  ;;  %v672_v54 = vld [vmem:[%s917_s3 + $0xd8] sm:$0xff]   ;;  %v676_v58 = vld [vmem:[%s917_s3 + $0xe0] sm:$0xff]   ;;  %v679_v61 = vld [vmem:[%s917_s3 + $0x28] sm:$0xff]  }
  0x1a   :  { %614 = vmatprep.subr.bf16.mxu0 %v666_v48  ;;  %v673_v55 = vld [vmem:[%s917_s3 + $0x98] sm:$0xff]   ;;  %v677_v59 = vld [vmem:[%s917_s3 + $0xa0] sm:$0xff]   ;;  %v680_v62 = vld [vmem:[%s917_s3 + $0xe8] sm:$0xff]  }
  0x1b   :  { %635 = vmatpush3.bf16.msra.mxu1 %v665_v47  ;;  %v682_v63 = vld [vmem:[%s917_s3 + $0x70] sm:$0xff]   ;;  %v686_v3 = vld [vmem:[%s917_s3 + $0x78] sm:$0xff]   ;;  %v114_v16 = vld [vmem:[%s915_s1] sm:$0xf] }
  0x1c   :  { %636 = vmatprep.subr.bf16.mxu1 %v668_v50  ;;  %v684_v1 = vld [vmem:[%s917_s3 + $0xf0] sm:$0xff]   ;;  %v688_v6 = vld [vmem:[%s917_s3 + $0xf8] sm:$0xff]   ;;  %v151_v18 = vld [vmem:[%s916_s2] sm:$0xf]  ;;  %v119_v19 = vrot.slane %v114_v16, %v118_v11  ;;  %v123_v20 = vrot.slane %v114_v16, %v122_v12  ;;  %v127_v21 = vrot.slane %v114_v16, %v126_v13  ;;  %v131_v22 = vrot.slane %v114_v16, %v130_v14 }
  0x1d   :  { %615 = vmatpush3.bf16.msra.mxu0 %v667_v49  ;;  %v683_v2 = vld [vmem:[%s917_s3 + $0x30] sm:$0xff]   ;;  %v687_v8 = vld [vmem:[%s917_s3 + $0x38] sm:$0xff]   ;;  %v156_v23 = vrot.slane %v151_v18, %v118_v11 }
  0x1e   :  { %616 = vmatprep.subr.bf16.mxu0 %v670_v52  ;;  %v685_v5 = vld [vmem:[%s917_s3 + $0xb0] sm:$0xff]   ;;  %v689_v9 = vld [vmem:[%s917_s3 + $0xb8] sm:$0xff]   ;;  %v132_v4 = vcombine.low %v119_v19, %v123_v20 }
  0x1f   :  { %637 = vmatpush3.bf16.msra.mxu1 %v669_v51  ;;  %v577_v51 = vld [vmem:[%s918_s4] ss:$0 sm:$0xff] }
  0x20   :  { %638 = vmatprep.subr.bf16.mxu1 %v672_v54 }
  0x21   :  { %617 = vmatpush3.bf16.msra.mxu0 %v671_v53 }
  0x22   :  { %618 = vmatprep.subr.bf16.mxu0 %v674_v56 }
  0x23   :  { %639 = vmatpush3.bf16.msra.mxu1 %v673_v55 }
  0x24   :  { %640 = vmatprep.subr.bf16.mxu1 %v676_v58 }
  0x25   :  { %619 = vmatpush3.bf16.msra.mxu0 %v675_v57 }
  0x26   :  { %620 = vmatprep.subr.bf16.mxu0 %v678_v60 }
  0x27   :  { %641 = vmatpush3.bf16.msra.mxu1 %v677_v59 }
  0x28   :  { %642 = vmatprep.subr.bf16.mxu1 %v680_v62 }
  0x29   :  { %621 = vmatpush3.bf16.msra.mxu0 %v679_v61 }
  0x2a   :  { %622 = vmatprep.subr.bf16.mxu0 %v682_v63 }
  0x2d   :  { %623 = vmatpush3.bf16.msra.mxu0 %v683_v2 }
  0x2e   :  { %624 = vmatprep.subr.bf16.mxu0 %v686_v3 }
  0x31   :  { %625 = vmatpush3.bf16.msra.mxu0 %v687_v8 }
  0x9f   :  { %v56_v25 = vpop.xlane.xlu0 %55 }
  0xa0   :  { %v58_v26 = vmul.f32 0.001953125, %v56_v25  ;;  %v160_v25 = vrot.slane %v151_v18, %v122_v12 }
  0xa2   :  { %v66_v27 = vrot.slane %v58_v26, %v775_v24  ;;  %v164_v26 = vrot.slane %v151_v18, %v126_v13 }
  0xa4   :  { %v778_v28 = vsub.f32 %v24_v0, %v66_v27  ;;  %v681_v0 = vld [vmem:[%s917_s3 + $0xa8] sm:$0xff]   ;;  %v168_v27 = vrot.slane %v151_v18, %v130_v14 }
  0xa5   :  { %643 = vmatpush3.bf16.msra.mxu1 %v681_v0 }
  0xa6   :  { %v69_v29 = vmul.f32 %v778_v28, %v778_v28  ;;  %644 = vmatprep.subr.bf16.mxu1 %v684_v1 }
  0xa8   :  { %v71_v30 = vcombine.high %v69_v29, %v69_v29  ;;  %v78_v31 = vrot.slane %v69_v29, %v760_v7  ;;  %v133_v29 = vcombine.low %v127_v21, %v131_v22 }
  0xa9   :  { %645 = vmatpush3.bf16.msra.mxu1 %v685_v5 }
  0xaa   :  { %v85_v32 = vrot.slane %v71_v30, %v760_v7  ;;  %v86_v33 = vcombine.high %v78_v31, %v78_v31  ;;  %v92_v35 = vsel %vm47_vm0, %v78_v31, 0.0  ;;  %646 = vmatprep.subr.bf16.mxu1 %v688_v6  ;;  %v169_v30 = vcombine.low %v156_v23, %v160_v25 }
  0xab   :  { %v170_v31 = vcombine.low %v164_v26, %v168_v27 }
  0xac   :  { %v87_v34 = vcombine.high %v85_v32, %v85_v32  ;;  %v93_v36 = vsel %vm47_vm0, %v86_v33, 0.0  ;;  %v95_v38 = vsel %vm47_vm0, %v85_v32, 0.0  ;;  %v140_v32 = vrot.slane %v132_v4, %v760_v7 }
  0xad   :  { %v94_v37 = vadd.f32 %v93_v36, %v92_v35  ;;  %647 = vmatpush3.bf16.msra.mxu1 %v689_v9  ;;  %v147_v33 = vrot.slane %v133_v29, %v760_v7  ;;  %v184_v35 = vrot.slane %v170_v31, %v760_v7 }
  0xae   :  { %v97_v40 = vsel %vm47_vm0, %v87_v34, 0.0  ;;  %v177_v34 = vrot.slane %v169_v30, %v760_v7 }
  0xaf   :  { %v96_v39 = vadd.f32 %v95_v38, %v94_v37  ;;  %v148_v38 = vcombine.low %v140_v32, %v147_v33 }
  0xb1   :  { %v98_v41 = vadd.f32 %v97_v40, %v96_v39  ;;  %v185_v40 = vcombine.low %v177_v34, %v184_v35 }
  0xb3   :  { %99 = vadd.xlane.f32.xlu0 %v98_v41 }
 0x140   :  { %v100_v10 = vpop.xlane.xlu0 %99 }
 0x141   :  { %v101_v15 = vmul.f32 0.001953125, %v100_v10 }
 0x143   :  { %v102_v17 = vadd.f32 1e-05, %v101_v15 }
 0x145   :  { %690 = vrsqrt.f32 %v102_v17 }
 0x14f   :  { %v691_v36 = vpop.eup %690 }
 0x150   :  { %v111_v37 = vrot.slane %v691_v36, %v775_v24 }
 0x152   :  { %v113_v39 = vmul.f32 %v111_v37, %v778_v28 }
 0x154   :  { %v150_v41 = vmul.f32 %v148_v38, %v113_v39 }
 0x156   :  { %v187_v42 = vadd.f32 %v185_v40, %v150_v41 }
 0x158   :  { %188 = vst [vmem:[%s919_s5] sm:$0xff] %v187_v42  ;;  %v197_v43 = vrot.slane %v187_v42, %v760_v7  ;;  %v190_v44 = vcombine.high %v187_v42, %v187_v42  ;;  %s718_s5 = smov [#allocation2]  }
 0x159   :  { %s567_s17 = sshll.u32 %s718_s5, 4  ;;  %s568_s17 = int_to_ptr.vmem [resolvable:$true] %s567_s17 }
 0x15a   :  { %v205_v45 = vcombine.high %v197_v43, %v197_v43  ;;  %v204_v46 = vrot.slane %v190_v44, %v760_v7  ;;  %v211_v49 = vpack.c.bf16 %v197_v43, %v197_v43  ;;  %s692_s18 = scalar_lea.vmem %s568_s17, 32  ;;  %p697_p1 = scmp.lt.s32.totalorder %s568_s17, %s568_s17 }
 0x15b   :  { %p693_p0 = scmp.ne.s32.totalorder %s568_s17, %s692_s18  ;;  %p698_p2 = scmp.lt.s32.totalorder %s692_s18, %s692_s18 }
 0x15c   :  { %v212_v47 = vpack.c.bf16 %v205_v45, %v205_v45  ;;  %v206_v48 = vcombine.high %v204_v46, %v204_v46  ;;  %v213_v28 = vpack.c.bf16 %v204_v46, %v204_v46 }
 0x15d   :  { %p699_p3 = por %p698_p2, %p697_p1 }
 0x15e   :  { %510 = vmatprep.mubr.bf16.mxu0 %v212_v47  ;;  %v214_v24 = vpack.c.bf16 %v206_v48, %v206_v48 }
 0x15f   :  { %511 = vmatmul.mubr.bf16.vlgmr.msra.gmra.mrb[0].mxu0 %v211_v49  ;;  %p700_p4 = pnand %p699_p3, %p693_p0 }
 0x160   :  { %550 = vmatprep.mubr.bf16.mxu1 %v214_v24 }
 0x161   :  { %551 = vmatmul.mubr.bf16.vlgmr.msra.gmra.mrb[0].mxu1 %v213_v28 }
 0x232   :  { %v626_v50 = vpop.f32.mrb[0].mxu0 }
 0x233   :  { %v627_v52 = vpop.f32.mrb[1].mxu0 }
 0x234   :  { %v628_v53 = vadd.f32 %v627_v52, %v626_v50  ;;  %v629_v54 = vpop.f32.mrb[2].mxu0  ;;  %v648_v55 = vpop.f32.mrb[0].mxu1 }
 0x235   :  { %v630_v56 = vpop.f32.mrb[3].mxu0  ;;  %v649_v7 = vpop.f32.mrb[1].mxu1 }
 0x236   :  { %v513_v57 = vadd.f32 %v628_v53, %v577_v51  ;;  %v650_v58 = vadd.f32 %v649_v7, %v648_v55  ;;  %v651_v59 = vpop.f32.mrb[2].mxu1 }
 0x237   :  { %v652_v60 = vpop.f32.mrb[3].mxu1 }
 0x238   :  { %v553_v61 = vadd.f32 %v650_v58, %v513_v57 }
 0x23a   :  { %558 = vst [vmem:[#allocation2] sm:$0x3] %v553_v61 }
 0x23b   :  { %703 = shalt.err (!%p700_p4)
}
 0x23c   :  { %s704_s20 = scalar_lea.hbm %s920_s6, 32 }
 0x23d   :  { %p705_p5 = scmp.ne.s32.totalorder %s920_s6, %s704_s20  ;;  %p708_p6 = scmp.lt.u32.totalorder %s704_s20, %s920_s6 }
 0x23f   :  { %p710_p7 = pnand %p708_p6, %p705_p5 }
 0x241   :  { %713 = shalt.err (!%p710_p7)
}
 0x242   :  { %570 = dma.vmem_to_hbm [thread:$0]  %s568_s17, 32, %s920_s6, [#allocation3]  }
 0x243   :  { %714 = dma.done.wait [#allocation3], 32  }
 0x244   :  { %715 = vsyncadd [#allocation3], 4294967264 }
 0x245   :  { %576 = vsyncpa [#allocation3], 1 }

// kernel: forward.20
= control target key start
LH: loop header
LB: loop body
LE: loop exit
PB: predicated region body
PF: predicated region fallthrough
CT: control target
= control target key end

     0   :  { %vm1143_vm4 = vcmask 64512   ;;  %s1906_s1 = inlined_call_operand.vmem [shape: bf16[512,512], index: 1, kind: input, shape index: {}]   ;;  %s1907_s0 = inlined_call_operand.vmem [shape: f32[8,512], index: 0, kind: input, shape index: {}]   ;;  %s1908_s2 = inlined_call_operand.vmem [shape: f32[1,512], index: 2, kind: input, shape index: {}]   ;;  %s1909_s3 = inlined_call_operand.vmem [shape: f32[8,8], index: 3, kind: output, shape index: {}]  }
   0x1   :  { %v1290_v0 = vld [vmem:[%s1906_s1 + $0x4] ss:$16 sps:$4 sm:$0xff]   ;;  %v1292_v1 = vld [vmem:[%s1906_s1 + $0xc] ss:$16 sps:$4 sm:$0xff]   ;;  %v1294_v2 = vld [vmem:[%s1906_s1] ss:$16 sps:$4 sm:$0xff]  }
   0x2   :  { %812 = vmatprep.subr.bf16.mxu0 %v1290_v0  ;;  %v1295_v3 = vld [vmem:[%s1906_s1 + $0x8] ss:$16 sps:$4 sm:$0xff]   ;;  %894 = vmatprep.subr.bf16.mxu1 %v1292_v1  ;;  %v1296_v4 = vld [vmem:[%s1906_s1 + $0x24] ss:$16 sps:$4 sm:$0xff]   ;;  %v1298_v5 = vld [vmem:[%s1906_s1 + $0x2c] ss:$16 sps:$4 sm:$0xff]  }
   0x3   :  { %813 = vmatpush1.bf16.msra.mxu0 %v1294_v2  ;;  %895 = vmatpush1.bf16.msra.mxu1 %v1295_v3  ;;  %v1300_v6 = vld [vmem:[%s1906_s1 + $0x20] ss:$16 sps:$4 sm:$0xff]   ;;  %v1301_v7 = vld [vmem:[%s1906_s1 + $0x28] ss:$16 sps:$4 sm:$0xff]   ;;  %v1302_v8 = vld [vmem:[%s1906_s1 + $0x44] ss:$16 sps:$4 sm:$0xff]  }
   0x4   :  { %814 = vmatprep.subr.bf16.mxu0 %v1296_v4  ;;  %896 = vmatprep.subr.bf16.mxu1 %v1298_v5  ;;  %v1304_v9 = vld [vmem:[%s1906_s1 + $0x4c] ss:$16 sps:$4 sm:$0xff]   ;;  %v1306_v10 = vld [vmem:[%s1906_s1 + $0x40] ss:$16 sps:$4 sm:$0xff]   ;;  %v1307_v11 = vld [vmem:[%s1906_s1 + $0x48] ss:$16 sps:$4 sm:$0xff]  }
   0x5   :  { %v1308_v12 = vld [vmem:[%s1906_s1 + $0x64] ss:$16 sps:$4 sm:$0xff]   ;;  %v1310_v13 = vld [vmem:[%s1906_s1 + $0x6c] ss:$16 sps:$4 sm:$0xff]   ;;  %v1312_v14 = vld [vmem:[%s1906_s1 + $0x60] ss:$16 sps:$4 sm:$0xff]  }
   0x6   :  { %v1313_v15 = vld [vmem:[%s1906_s1 + $0x68] ss:$16 sps:$4 sm:$0xff]   ;;  %v1314_v16 = vld [vmem:[%s1906_s1 + $0x84] ss:$16 sps:$4 sm:$0xff]   ;;  %v1316_v17 = vld [vmem:[%s1906_s1 + $0x8c] ss:$16 sps:$4 sm:$0xff]  }
   0x7   :  { %815 = vmatpush1.bf16.msra.mxu0 %v1300_v6  ;;  %897 = vmatpush1.bf16.msra.mxu1 %v1301_v7  ;;  %v1318_v18 = vld [vmem:[%s1906_s1 + $0x80] ss:$16 sps:$4 sm:$0xff]   ;;  %v1319_v19 = vld [vmem:[%s1906_s1 + $0x88] ss:$16 sps:$4 sm:$0xff]   ;;  %v1320_v20 = vld [vmem:[%s1906_s1 + $0xa4] ss:$16 sps:$4 sm:$0xff]  }
   0x8   :  { %816 = vmatprep.subr.bf16.mxu0 %v1302_v8  ;;  %898 = vmatprep.subr.bf16.mxu1 %v1304_v9  ;;  %v1322_v21 = vld [vmem:[%s1906_s1 + $0xac] ss:$16 sps:$4 sm:$0xff]   ;;  %v1324_v22 = vld [vmem:[%s1906_s1 + $0xa0] ss:$16 sps:$4 sm:$0xff]   ;;  %v1325_v23 = vld [vmem:[%s1906_s1 + $0xa8] ss:$16 sps:$4 sm:$0xff]  }
   0x9   :  { %v1326_v24 = vld [vmem:[%s1906_s1 + $0xc4] ss:$16 sps:$4 sm:$0xff]   ;;  %v1328_v25 = vld [vmem:[%s1906_s1 + $0xcc] ss:$16 sps:$4 sm:$0xff]   ;;  %v1330_v26 = vld [vmem:[%s1906_s1 + $0xc0] ss:$16 sps:$4 sm:$0xff]  }
   0xa   :  { %v1331_v27 = vld [vmem:[%s1906_s1 + $0xc8] ss:$16 sps:$4 sm:$0xff]   ;;  %v1332_v28 = vld [vmem:[%s1906_s1 + $0xe4] ss:$16 sps:$4 sm:$0xff]   ;;  %v1334_v29 = vld [vmem:[%s1906_s1 + $0xec] ss:$16 sps:$4 sm:$0xff]  }
   0xb   :  { %817 = vmatpush1.bf16.msra.mxu0 %v1306_v10  ;;  %899 = vmatpush1.bf16.msra.mxu1 %v1307_v11  ;;  %v1336_v30 = vld [vmem:[%s1906_s1 + $0xe0] ss:$16 sps:$4 sm:$0xff]   ;;  %v1337_v31 = vld [vmem:[%s1906_s1 + $0xe8] ss:$16 sps:$4 sm:$0xff]   ;;  %v1338_v32 = vld [vmem:[%s1906_s1 + $0x104] ss:$16 sps:$4 sm:$0xff]  }
   0xc   :  { %818 = vmatprep.subr.bf16.mxu0 %v1308_v12  ;;  %900 = vmatprep.subr.bf16.mxu1 %v1310_v13  ;;  %v1340_v33 = vld [vmem:[%s1906_s1 + $0x10c] ss:$16 sps:$4 sm:$0xff]   ;;  %v1342_v34 = vld [vmem:[%s1906_s1 + $0x100] ss:$16 sps:$4 sm:$0xff]   ;;  %v1343_v35 = vld [vmem:[%s1906_s1 + $0x108] ss:$16 sps:$4 sm:$0xff]  }
   0xd   :  { %v1344_v36 = vld [vmem:[%s1906_s1 + $0x124] ss:$16 sps:$4 sm:$0xff]   ;;  %v1346_v37 = vld [vmem:[%s1906_s1 + $0x12c] ss:$16 sps:$4 sm:$0xff]   ;;  %v1348_v38 = vld [vmem:[%s1906_s1 + $0x120] ss:$16 sps:$4 sm:$0xff]  }
   0xe   :  { %v1349_v39 = vld [vmem:[%s1906_s1 + $0x128] ss:$16 sps:$4 sm:$0xff]   ;;  %v1350_v40 = vld [vmem:[%s1906_s1 + $0x144] ss:$16 sps:$4 sm:$0xff]   ;;  %v1352_v41 = vld [vmem:[%s1906_s1 + $0x14c] ss:$16 sps:$4 sm:$0xff]  }
   0xf   :  { %819 = vmatpush1.bf16.msra.mxu0 %v1312_v14  ;;  %901 = vmatpush1.bf16.msra.mxu1 %v1313_v15  ;;  %v1354_v42 = vld [vmem:[%s1906_s1 + $0x140] ss:$16 sps:$4 sm:$0xff]   ;;  %v1355_v43 = vld [vmem:[%s1906_s1 + $0x148] ss:$16 sps:$4 sm:$0xff]   ;;  %v1356_v44 = vld [vmem:[%s1906_s1 + $0x164] ss:$16 sps:$4 sm:$0xff]  }
  0x10   :  { %820 = vmatprep.subr.bf16.mxu0 %v1314_v16  ;;  %902 = vmatprep.subr.bf16.mxu1 %v1316_v17  ;;  %v1358_v45 = vld [vmem:[%s1906_s1 + $0x16c] ss:$16 sps:$4 sm:$0xff]   ;;  %v1360_v47 = vld [vmem:[%s1906_s1 + $0x160] ss:$16 sps:$4 sm:$0xff]   ;;  %v1361_v49 = vld [vmem:[%s1906_s1 + $0x168] ss:$16 sps:$4 sm:$0xff]  }
  0x11   :  { %v15_v46 = vld [vmem:[%s1907_s0 + $0x8] sm:$0xff]  ;;  %v1362_v50 = vld [vmem:[%s1906_s1 + $0x184] ss:$16 sps:$4 sm:$0xff]   ;;  %v1366_v52 = vld [vmem:[%s1906_s1 + $0x180] ss:$16 sps:$4 sm:$0xff]  }
  0x12   :  { %v19_v48 = vpack.c.bf16 %v15_v46, %v15_v46  ;;  %v1364_v51 = vld [vmem:[%s1906_s1 + $0x18c] ss:$16 sps:$4 sm:$0xff]   ;;  %v1367_v53 = vld [vmem:[%s1906_s1 + $0x188] ss:$16 sps:$4 sm:$0xff]   ;;  %v1368_v54 = vld [vmem:[%s1906_s1 + $0x1a4] ss:$16 sps:$4 sm:$0xff]  }
  0x13   :  { %821 = vmatpush1.bf16.msra.mxu0 %v1318_v18  ;;  %903 = vmatpush1.bf16.msra.mxu1 %v1319_v19  ;;  %v1370_v55 = vld [vmem:[%s1906_s1 + $0x1ac] ss:$16 sps:$4 sm:$0xff]   ;;  %v1372_v56 = vld [vmem:[%s1906_s1 + $0x1a0] ss:$16 sps:$4 sm:$0xff]   ;;  %v1373_v57 = vld [vmem:[%s1906_s1 + $0x1a8] ss:$16 sps:$4 sm:$0xff]  }
  0x14   :  { %822 = vmatprep.subr.bf16.mxu0 %v1320_v20  ;;  %904 = vmatprep.subr.bf16.mxu1 %v1322_v21  ;;  %v1374_v58 = vld [vmem:[%s1906_s1 + $0x1c4] ss:$16 sps:$4 sm:$0xff]   ;;  %v1376_v59 = vld [vmem:[%s1906_s1 + $0x1cc] ss:$16 sps:$4 sm:$0xff]   ;;  %v1378_v60 = vld [vmem:[%s1906_s1 + $0x1c0] ss:$16 sps:$4 sm:$0xff]  }
  0x15   :  { %844 = vmatprep.mubr.bf16.mxu0 %v19_v48  ;;  %926 = vmatprep.mubr.bf16.mxu1 %v19_v48  ;;  %v1379_v61 = vld [vmem:[%s1906_s1 + $0x1c8] ss:$16 sps:$4 sm:$0xff]   ;;  %v1380_v62 = vld [vmem:[%s1906_s1 + $0x1e4] ss:$16 sps:$4 sm:$0xff]   ;;  %v1382_v63 = vld [vmem:[%s1906_s1 + $0x1ec] ss:$16 sps:$4 sm:$0xff]  }
  0x16   :  { %v1384_v0 = vld [vmem:[%s1906_s1 + $0x1e0] ss:$16 sps:$4 sm:$0xff]   ;;  %v1385_v1 = vld [vmem:[%s1906_s1 + $0x1e8] ss:$16 sps:$4 sm:$0xff]   ;;  %v1388_v3 = vld [vmem:[%s1906_s1 + $0x204] ss:$16 sps:$4 sm:$0xff]  }
  0x17   :  { %823 = vmatpush1.bf16.msra.mxu0 %v1324_v22  ;;  %905 = vmatpush1.bf16.msra.mxu1 %v1325_v23  ;;  %v14_v2 = vld [vmem:[%s1907_s0] sm:$0xff]  ;;  %v1391_v4 = vld [vmem:[%s1906_s1 + $0x20c] ss:$16 sps:$4 sm:$0xff]   ;;  %v1389_v7 = vld [vmem:[%s1906_s1 + $0x208] ss:$16 sps:$4 sm:$0xff]  }
  0x18   :  { %824 = vmatprep.subr.bf16.mxu0 %v1326_v24  ;;  %906 = vmatprep.subr.bf16.mxu1 %v1328_v25  ;;  %v18_v5 = vpack.c.bf16 %v14_v2, %v14_v2  ;;  %v1386_v6 = vld [vmem:[%s1906_s1 + $0x200] ss:$16 sps:$4 sm:$0xff]   ;;  %v1394_v8 = vld [vmem:[%s1906_s1 + $0x224] ss:$16 sps:$4 sm:$0xff]   ;;  %v1397_v9 = vld [vmem:[%s1906_s1 + $0x22c] ss:$16 sps:$4 sm:$0xff]  }
  0x19   :  { %v1392_v10 = vld [vmem:[%s1906_s1 + $0x220] ss:$16 sps:$4 sm:$0xff]   ;;  %v1395_v11 = vld [vmem:[%s1906_s1 + $0x228] ss:$16 sps:$4 sm:$0xff]   ;;  %v1400_v12 = vld [vmem:[%s1906_s1 + $0x244] ss:$16 sps:$4 sm:$0xff]  }
  0x1a   :  { %v1403_v13 = vld [vmem:[%s1906_s1 + $0x24c] ss:$16 sps:$4 sm:$0xff]   ;;  %v1398_v14 = vld [vmem:[%s1906_s1 + $0x240] ss:$16 sps:$4 sm:$0xff]   ;;  %v1401_v15 = vld [vmem:[%s1906_s1 + $0x248] ss:$16 sps:$4 sm:$0xff]  }
  0x1b   :  { %825 = vmatpush1.bf16.msra.mxu0 %v1330_v26  ;;  %907 = vmatpush1.bf16.msra.mxu1 %v1331_v27  ;;  %v1406_v16 = vld [vmem:[%s1906_s1 + $0x264] ss:$16 sps:$4 sm:$0xff]   ;;  %v1409_v17 = vld [vmem:[%s1906_s1 + $0x26c] ss:$16 sps:$4 sm:$0xff]   ;;  %v1404_v18 = vld [vmem:[%s1906_s1 + $0x260] ss:$16 sps:$4 sm:$0xff]  }
  0x1c   :  { %826 = vmatprep.subr.bf16.mxu0 %v1332_v28  ;;  %908 = vmatprep.subr.bf16.mxu1 %v1334_v29  ;;  %v1407_v19 = vld [vmem:[%s1906_s1 + $0x268] ss:$16 sps:$4 sm:$0xff]   ;;  %v1412_v20 = vld [vmem:[%s1906_s1 + $0x284] ss:$16 sps:$4 sm:$0xff]   ;;  %v1415_v21 = vld [vmem:[%s1906_s1 + $0x28c] ss:$16 sps:$4 sm:$0xff]  }
  0x1d   :  { %v1410_v22 = vld [vmem:[%s1906_s1 + $0x280] ss:$16 sps:$4 sm:$0xff]   ;;  %v1413_v23 = vld [vmem:[%s1906_s1 + $0x288] ss:$16 sps:$4 sm:$0xff]   ;;  %v1418_v24 = vld [vmem:[%s1906_s1 + $0x2a4] ss:$16 sps:$4 sm:$0xff]  }
  0x1e   :  { %v1421_v25 = vld [vmem:[%s1906_s1 + $0x2ac] ss:$16 sps:$4 sm:$0xff]   ;;  %v1416_v26 = vld [vmem:[%s1906_s1 + $0x2a0] ss:$16 sps:$4 sm:$0xff]   ;;  %v1419_v27 = vld [vmem:[%s1906_s1 + $0x2a8] ss:$16 sps:$4 sm:$0xff]  }
  0x1f   :  { %827 = vmatpush1.bf16.msra.mxu0 %v1336_v30  ;;  %909 = vmatpush1.bf16.msra.mxu1 %v1337_v31  ;;  %v1424_v28 = vld [vmem:[%s1906_s1 + $0x2c4] ss:$16 sps:$4 sm:$0xff]   ;;  %v1427_v29 = vld [vmem:[%s1906_s1 + $0x2cc] ss:$16 sps:$4 sm:$0xff]   ;;  %v1446_v48 = vld [vmem:[%s1906_s1 + $0x340] ss:$16 sps:$4 sm:$0xff]  }
  0x20   :  { %828 = vmatprep.subr.bf16.mxu0 %v1338_v32  ;;  %910 = vmatprep.subr.bf16.mxu1 %v1340_v33  ;;  %v17_v30 = vld [vmem:[%s1907_s0 + $0x18] sm:$0xff]  ;;  %v1422_v32 = vld [vmem:[%s1906_s1 + $0x2c0] ss:$16 sps:$4 sm:$0xff]   ;;  %v1448_v46 = vld [vmem:[%s1906_s1 + $0x344] ss:$16 sps:$4 sm:$0xff]  }
  0x21   :  { %v21_v31 = vpack.c.bf16 %v17_v30, %v17_v30  ;;  %v1425_v33 = vld [vmem:[%s1906_s1 + $0x2c8] ss:$16 sps:$4 sm:$0xff]   ;;  %v1478_v2 = vld [vmem:[%s1906_s1 + $0x3e4] ss:$16 sps:$4 sm:$0xff]  }
  0x23   :  { %829 = vmatpush1.bf16.msra.mxu0 %v1342_v34  ;;  %911 = vmatpush1.bf16.msra.mxu1 %v1343_v35  ;;  %v1430_v34 = vld [vmem:[%s1906_s1 + $0x2e4] ss:$16 sps:$4 sm:$0xff]   ;;  %v1433_v35 = vld [vmem:[%s1906_s1 + $0x2ec] ss:$16 sps:$4 sm:$0xff]  }
  0x24   :  { %830 = vmatprep.subr.bf16.mxu0 %v1344_v36  ;;  %912 = vmatprep.subr.bf16.mxu1 %v1346_v37  ;;  %v1428_v36 = vld [vmem:[%s1906_s1 + $0x2e0] ss:$16 sps:$4 sm:$0xff]   ;;  %v1431_v37 = vld [vmem:[%s1906_s1 + $0x2e8] ss:$16 sps:$4 sm:$0xff]  }
  0x27   :  { %831 = vmatpush1.bf16.msra.mxu0 %v1348_v38  ;;  %913 = vmatpush1.bf16.msra.mxu1 %v1349_v39  ;;  %v1436_v38 = vld [vmem:[%s1906_s1 + $0x304] ss:$16 sps:$4 sm:$0xff]   ;;  %v1439_v39 = vld [vmem:[%s1906_s1 + $0x30c] ss:$16 sps:$4 sm:$0xff]  }
  0x28   :  { %832 = vmatprep.subr.bf16.mxu0 %v1350_v40  ;;  %914 = vmatprep.subr.bf16.mxu1 %v1352_v41  ;;  %v1434_v40 = vld [vmem:[%s1906_s1 + $0x300] ss:$16 sps:$4 sm:$0xff]   ;;  %v1437_v41 = vld [vmem:[%s1906_s1 + $0x308] ss:$16 sps:$4 sm:$0xff]  }
  0x2b   :  { %833 = vmatpush1.bf16.msra.mxu0 %v1354_v42  ;;  %915 = vmatpush1.bf16.msra.mxu1 %v1355_v43  ;;  %v1442_v42 = vld [vmem:[%s1906_s1 + $0x324] ss:$16 sps:$4 sm:$0xff]   ;;  %v1445_v43 = vld [vmem:[%s1906_s1 + $0x32c] ss:$16 sps:$4 sm:$0xff]  }
  0x2c   :  { %834 = vmatprep.subr.bf16.mxu0 %v1356_v44  ;;  %916 = vmatprep.subr.bf16.mxu1 %v1358_v45  ;;  %v1440_v44 = vld [vmem:[%s1906_s1 + $0x320] ss:$16 sps:$4 sm:$0xff]   ;;  %v1443_v45 = vld [vmem:[%s1906_s1 + $0x328] ss:$16 sps:$4 sm:$0xff]  }
  0x2f   :  { %835 = vmatpush1.bf16.msra.mxu0 %v1360_v47  ;;  %917 = vmatpush1.bf16.msra.mxu1 %v1361_v49  ;;  %v1451_v47 = vld [vmem:[%s1906_s1 + $0x34c] ss:$16 sps:$4 sm:$0xff]   ;;  %v1449_v49 = vld [vmem:[%s1906_s1 + $0x348] ss:$16 sps:$4 sm:$0xff]  }
  0x30   :  { %836 = vmatprep.subr.bf16.mxu0 %v1362_v50  ;;  %918 = vmatprep.subr.bf16.mxu1 %v1364_v51  ;;  %v1454_v50 = vld [vmem:[%s1906_s1 + $0x364] ss:$16 sps:$4 sm:$0xff]   ;;  %v1457_v51 = vld [vmem:[%s1906_s1 + $0x36c] ss:$16 sps:$4 sm:$0xff]  }
  0x33   :  { %837 = vmatpush1.bf16.msra.mxu0 %v1366_v52  ;;  %919 = vmatpush1.bf16.msra.mxu1 %v1367_v53  ;;  %v1452_v52 = vld [vmem:[%s1906_s1 + $0x360] ss:$16 sps:$4 sm:$0xff]   ;;  %v1455_v53 = vld [vmem:[%s1906_s1 + $0x368] ss:$16 sps:$4 sm:$0xff]  }
  0x34   :  { %838 = vmatprep.subr.bf16.mxu0 %v1368_v54  ;;  %920 = vmatprep.subr.bf16.mxu1 %v1370_v55  ;;  %v1460_v54 = vld [vmem:[%s1906_s1 + $0x384] ss:$16 sps:$4 sm:$0xff]   ;;  %v1463_v55 = vld [vmem:[%s1906_s1 + $0x38c] ss:$16 sps:$4 sm:$0xff]  }
  0x37   :  { %839 = vmatpush1.bf16.msra.mxu0 %v1372_v56  ;;  %921 = vmatpush1.bf16.msra.mxu1 %v1373_v57  ;;  %v1458_v56 = vld [vmem:[%s1906_s1 + $0x380] ss:$16 sps:$4 sm:$0xff]   ;;  %v1461_v57 = vld [vmem:[%s1906_s1 + $0x388] ss:$16 sps:$4 sm:$0xff]  }
  0x38   :  { %840 = vmatprep.subr.bf16.mxu0 %v1374_v58  ;;  %922 = vmatprep.subr.bf16.mxu1 %v1376_v59  ;;  %v1466_v58 = vld [vmem:[%s1906_s1 + $0x3a4] ss:$16 sps:$4 sm:$0xff]   ;;  %v1469_v59 = vld [vmem:[%s1906_s1 + $0x3ac] ss:$16 sps:$4 sm:$0xff]  }
  0x3b   :  { %841 = vmatpush1.bf16.msra.mxu0 %v1378_v60  ;;  %923 = vmatpush1.bf16.msra.mxu1 %v1379_v61  ;;  %v1464_v60 = vld [vmem:[%s1906_s1 + $0x3a0] ss:$16 sps:$4 sm:$0xff]   ;;  %v1467_v61 = vld [vmem:[%s1906_s1 + $0x3a8] ss:$16 sps:$4 sm:$0xff]  }
  0x3c   :  { %842 = vmatprep.subr.bf16.mxu0 %v1380_v62  ;;  %924 = vmatprep.subr.bf16.mxu1 %v1382_v63  ;;  %v1472_v62 = vld [vmem:[%s1906_s1 + $0x3c4] ss:$16 sps:$4 sm:$0xff]   ;;  %v1475_v63 = vld [vmem:[%s1906_s1 + $0x3cc] ss:$16 sps:$4 sm:$0xff]  }
  0x3f   :  { %843 = vmatpush1.bf16.msra.mxu0 %v1384_v0  ;;  %925 = vmatpush1.bf16.msra.mxu1 %v1385_v1  ;;  %v1470_v0 = vld [vmem:[%s1906_s1 + $0x3c0] ss:$16 sps:$4 sm:$0xff]   ;;  %v1473_v1 = vld [vmem:[%s1906_s1 + $0x3c8] ss:$16 sps:$4 sm:$0xff]  }
  0x40   :  { %853 = vmatprep.subr.bf16.mxu0 %v1388_v3  ;;  %935 = vmatprep.subr.bf16.mxu1 %v1391_v4  ;;  %v1481_v3 = vld [vmem:[%s1906_s1 + $0x3ec] ss:$16 sps:$4 sm:$0xff]   ;;  %v1476_v4 = vld [vmem:[%s1906_s1 + $0x3e0] ss:$16 sps:$4 sm:$0xff]  }
  0x42   :  { %845 = vmatmul.mubr.bf16.vlgmr.msra.gmra.mrb[0].mxu0 %v18_v5  ;;  %927 = vmatmul.mubr.bf16.vlgmr.msra.gmra.mrb[0].mxu1 %v18_v5  ;;  %v1479_v5 = vld [vmem:[%s1906_s1 + $0x3e8] ss:$16 sps:$4 sm:$0xff]  }
  0x43   :  { %854 = vmatpush1.bf16.msra.mxu0 %v1386_v6  ;;  %936 = vmatpush1.bf16.msra.mxu1 %v1389_v7  ;;  %v16_v6 = vld [vmem:[%s1907_s0 + $0x10] sm:$0xff] }
  0x44   :  { %855 = vmatprep.subr.bf16.mxu0 %v1394_v8  ;;  %937 = vmatprep.subr.bf16.mxu1 %v1397_v9  ;;  %v20_v7 = vpack.c.bf16 %v16_v6, %v16_v6  ;;  %v152_v8 = vlaneseq }
  0x45   :  { %885 = vmatprep.mubr.bf16.mxu0 %v21_v31  ;;  %967 = vmatprep.mubr.bf16.mxu1 %v21_v31 }
  0x46   :  { %v153_v9 = vshrl.u32 %v152_v8, 7 }
  0x47   :  { %856 = vmatpush1.bf16.msra.mxu0 %v1392_v10  ;;  %938 = vmatpush1.bf16.msra.mxu1 %v1395_v11 }
  0x48   :  { %857 = vmatprep.subr.bf16.mxu0 %v1400_v12  ;;  %939 = vmatprep.subr.bf16.mxu1 %v1403_v13  ;;  %v154_v10 = vsub.s32 0, %v153_v9  ;;  %v162_v11 = vsub.s32 2, %v153_v9  ;;  %v150_v12 = vld [vmem:[%s1908_s2] sm:$0xf]  ;;  %v158_v13 = vsub.s32 1, %v153_v9 }
  0x4b   :  { %858 = vmatpush1.bf16.msra.mxu0 %v1398_v14  ;;  %940 = vmatpush1.bf16.msra.mxu1 %v1401_v15  ;;  %v166_v14 = vsub.s32 3, %v153_v9  ;;  %v155_v15 = vrot.slane %v150_v12, %v154_v10 }
  0x4c   :  { %859 = vmatprep.subr.bf16.mxu0 %v1406_v16  ;;  %941 = vmatprep.subr.bf16.mxu1 %v1409_v17  ;;  %v163_v16 = vrot.slane %v150_v12, %v162_v11  ;;  %v159_v17 = vrot.slane %v150_v12, %v158_v13 }
  0x4f   :  { %860 = vmatpush1.bf16.msra.mxu0 %v1404_v18  ;;  %942 = vmatpush1.bf16.msra.mxu1 %v1407_v19  ;;  %v167_v18 = vrot.slane %v150_v12, %v166_v14 }
  0x50   :  { %861 = vmatprep.subr.bf16.mxu0 %v1412_v20  ;;  %943 = vmatprep.subr.bf16.mxu1 %v1415_v21 }
  0x53   :  { %862 = vmatpush1.bf16.msra.mxu0 %v1410_v22  ;;  %944 = vmatpush1.bf16.msra.mxu1 %v1413_v23 }
  0x54   :  { %863 = vmatprep.subr.bf16.mxu0 %v1418_v24  ;;  %945 = vmatprep.subr.bf16.mxu1 %v1421_v25 }
  0x57   :  { %864 = vmatpush1.bf16.msra.mxu0 %v1416_v26  ;;  %946 = vmatpush1.bf16.msra.mxu1 %v1419_v27 }
  0x58   :  { %865 = vmatprep.subr.bf16.mxu0 %v1424_v28  ;;  %947 = vmatprep.subr.bf16.mxu1 %v1427_v29 }
  0x5b   :  { %866 = vmatpush1.bf16.msra.mxu0 %v1422_v32  ;;  %948 = vmatpush1.bf16.msra.mxu1 %v1425_v33 }
  0x5c   :  { %867 = vmatprep.subr.bf16.mxu0 %v1430_v34  ;;  %949 = vmatprep.subr.bf16.mxu1 %v1433_v35 }
  0x5f   :  { %868 = vmatpush1.bf16.msra.mxu0 %v1428_v36  ;;  %950 = vmatpush1.bf16.msra.mxu1 %v1431_v37 }
  0x60   :  { %869 = vmatprep.subr.bf16.mxu0 %v1436_v38  ;;  %951 = vmatprep.subr.bf16.mxu1 %v1439_v39 }
  0x63   :  { %870 = vmatpush1.bf16.msra.mxu0 %v1434_v40  ;;  %952 = vmatpush1.bf16.msra.mxu1 %v1437_v41 }
  0x64   :  { %871 = vmatprep.subr.bf16.mxu0 %v1442_v42  ;;  %953 = vmatprep.subr.bf16.mxu1 %v1445_v43 }
  0x67   :  { %872 = vmatpush1.bf16.msra.mxu0 %v1440_v44  ;;  %954 = vmatpush1.bf16.msra.mxu1 %v1443_v45 }
  0x68   :  { %873 = vmatprep.subr.bf16.mxu0 %v1448_v46  ;;  %955 = vmatprep.subr.bf16.mxu1 %v1451_v47 }
  0x6b   :  { %874 = vmatpush1.bf16.msra.mxu0 %v1446_v48  ;;  %956 = vmatpush1.bf16.msra.mxu1 %v1449_v49 }
  0x6c   :  { %875 = vmatprep.subr.bf16.mxu0 %v1454_v50  ;;  %957 = vmatprep.subr.bf16.mxu1 %v1457_v51 }
  0x6f   :  { %876 = vmatpush1.bf16.msra.mxu0 %v1452_v52  ;;  %958 = vmatpush1.bf16.msra.mxu1 %v1455_v53 }
  0x70   :  { %877 = vmatprep.subr.bf16.mxu0 %v1460_v54  ;;  %959 = vmatprep.subr.bf16.mxu1 %v1463_v55 }
  0x73   :  { %878 = vmatpush1.bf16.msra.mxu0 %v1458_v56  ;;  %960 = vmatpush1.bf16.msra.mxu1 %v1461_v57 }
  0x74   :  { %879 = vmatprep.subr.bf16.mxu0 %v1466_v58  ;;  %961 = vmatprep.subr.bf16.mxu1 %v1469_v59 }
  0x77   :  { %880 = vmatpush1.bf16.msra.mxu0 %v1464_v60  ;;  %962 = vmatpush1.bf16.msra.mxu1 %v1467_v61 }
  0x78   :  { %881 = vmatprep.subr.bf16.mxu0 %v1472_v62  ;;  %963 = vmatprep.subr.bf16.mxu1 %v1475_v63 }
  0x7b   :  { %882 = vmatpush1.bf16.msra.mxu0 %v1470_v0  ;;  %964 = vmatpush1.bf16.msra.mxu1 %v1473_v1 }
  0x7c   :  { %883 = vmatprep.subr.bf16.mxu0 %v1478_v2  ;;  %965 = vmatprep.subr.bf16.mxu1 %v1481_v3 }
  0x7f   :  { %884 = vmatpush1.bf16.msra.mxu0 %v1476_v4  ;;  %966 = vmatpush1.bf16.msra.mxu1 %v1479_v5 }
  0x82   :  { %886 = vmatmul.mubr.bf16.vlgmr.msra.gmra.mrb[0].mxu0 %v20_v7  ;;  %968 = vmatmul.mubr.bf16.vlgmr.msra.gmra.mrb[0].mxu1 %v20_v7 }
 0x155   :  { %v887_v19 = vpop.f32.mrb[0].mxu0  ;;  %v969_v20 = vpop.f32.mrb[0].mxu1 }
 0x156   :  { %v1277_v21 = vadd.f32 %v887_v19, %v155_v15  ;;  %v1279_v22 = vadd.f32 %v969_v20, %v163_v16  ;;  %v889_v23 = vpop.f32.mrb[1].mxu0  ;;  %v971_v24 = vpop.f32.mrb[1].mxu1 }
 0x157   :  { %v1278_v25 = vadd.f32 %v889_v23, %v159_v17  ;;  %v1280_v26 = vadd.f32 %v971_v24, %v167_v18  ;;  %v891_v27 = vpop.f32.mrb[2].mxu0  ;;  %v973_v28 = vpop.f32.mrb[2].mxu1 }
 0x158   :  { %vm976_vm0 = vcmp.gt.f32.partialorder %v1277_v21, 0.0  ;;  %v980_v29 = vmul.f32 0.01, %v1277_v21  ;;  %vm978_vm1 = vcmp.gt.f32.partialorder %v1279_v22, 0.0  ;;  %v982_v30 = vmul.f32 0.01, %v1279_v22 }
 0x159   :  { %vm977_vm2 = vcmp.gt.f32.partialorder %v1278_v25, 0.0  ;;  %v981_v31 = vmul.f32 0.01, %v1278_v25  ;;  %v983_v32 = vmul.f32 0.01, %v1280_v26  ;;  %vm979_vm3 = vcmp.gt.f32.partialorder %v1280_v26, 0.0 }
 0x15a   :  { %v984_v33 = vsel %vm976_vm0, %v1277_v21, %v980_v29  ;;  %v892_v34 = vpop.f32.mrb[3].mxu0  ;;  %v974_v35 = vpop.f32.mrb[3].mxu1  ;;  %v986_v37 = vsel %vm978_vm1, %v1279_v22, %v982_v30 }
 0x15b   :  { %v985_v36 = vsel %vm977_vm2, %v1278_v25, %v981_v31  ;;  %v988_v38 = vmul.f32 %v984_v33, %v984_v33  ;;  %v987_v40 = vsel %vm979_vm3, %v1280_v26, %v983_v32  ;;  %v990_v41 = vmul.f32 %v986_v37, %v986_v37 }
 0x15c   :  { %v989_v39 = vmul.f32 %v985_v36, %v985_v36  ;;  %v991_v43 = vmul.f32 %v987_v40, %v987_v40 }
 0x15e   :  { %v992_v42 = vadd.f32 %v989_v39, %v988_v38 }
 0x160   :  { %v993_v44 = vadd.f32 %v992_v42, %v990_v41 }
 0x162   :  { %v994_v45 = vadd.f32 %v993_v44, %v991_v43 }
 0x164   :  { %995 = vadd.xlane.f32.xlu0 %v994_v45 }
 0x1f1   :  { %v996_v46 = vpop.xlane.xlu0 %995 }
 0x1f2   :  { %v997_v47 = vadd.f32 1e-12, %v996_v46 }
 0x1f4   :  { %1482 = vrsqrt.f32 %v997_v47 }
 0x1fe   :  { %v1483_v48 = vpop.eup %1482 }
 0x1ff   :  { %v1000_v49 = vmul.f32 %v1483_v48, %v985_v36  ;;  %v1002_v50 = vmul.f32 %v1483_v48, %v987_v40  ;;  %v999_v51 = vmul.f32 %v1483_v48, %v984_v33  ;;  %v1001_v52 = vmul.f32 %v1483_v48, %v986_v37 }
 0x201   :  { %1003 = vmatprep.subr.mxu1 %v1000_v49  ;;  %1067 = vmatprep.mubr.f32.mxu1 %v1000_v49 }
 0x202   :  { %1073 = vmatprep.subr.mxu0 %v1002_v50  ;;  %1137 = vmatprep.mubr.f32.mxu0 %v1002_v50 }
 0x203   :  { %1004 = vmatpush1.xpose.msra.mxu1 %v999_v51  ;;  %1074 = vmatpush1.xpose.msra.mxu0 %v1001_v52 }
 0x206   :  { %1068 = vmatmul.mubr.f32.vlgmr.msra.gmra.mrb[4].mxu1 %v999_v51  ;;  %1138 = vmatmul.mubr.f32.vlgmr.msra.gmra.mrb[4].mxu0 %v1001_v52 }
 0x2d9   :  { %v1069_v53 = vpop.f32.mrb[4].mxu1  ;;  %v1139_v54 = vpop.f32.mrb[4].mxu0 }
 0x2da   :  { %v1140_v55 = vadd.f32 %v1139_v54, %v1069_v53  ;;  %v1071_v56 = vpop.f32.mrb[5].mxu1  ;;  %v1141_v57 = vpop.f32.mrb[5].mxu0 }
 0x2dc   :  { %1144 = vst.msk [vmem:[%s1909_s3] sm:$0xff] %vm1143_vm4, %v1140_v55 }

// kernel: forward.16
= control target key start
LH: loop header
LB: loop body
LE: loop exit
PB: predicated region body
PF: predicated region fallthrough
CT: control target
= control target key end

     0   :  { %vm42_vm0 = vcmask 1043456   ;;  %s5932_s0 = inlined_call_operand.vmem [shape: f32[20,512], index: 0, kind: input, shape index: {}]   ;;  %s5933_s3 = inlined_call_operand.vmem [shape: bf16[512,1536], index: 3, kind: input, shape index: {}]   ;;  %s5934_s1 = inlined_call_operand.vmem [shape: f32[1,512], index: 1, kind: input, shape index: {}]   ;;  %s5935_s2 = inlined_call_operand.vmem [shape: f32[1,512], index: 2, kind: input, shape index: {}]   ;;  %s5936_s4 = inlined_call_operand.vmem [shape: f32[1,1536], index: 4, kind: input, shape index: {}]   ;;  %s5937_s5 = inlined_call_operand.vmem [shape: bf16[20,1536], index: 5, kind: output, shape index: {}]  }
   0x1   :  { %v4437_v0 = vld [vmem:[%s5932_s0] sm:$0xff]  ;;  %v4442_v1 = vld [vmem:[%s5932_s0 + $0x8] sm:$0xff]  ;;  %v4447_v2 = vld [vmem:[%s5932_s0 + $0x10] sm:$0xff] }
   0x2   :  { %v4452_v3 = vld [vmem:[%s5932_s0 + $0x18] sm:$0xff]  ;;  %v32_v4 = vadd.f32 %v4442_v1, %v4437_v0  ;;  %v4459_v5 = vld [vmem:[%s5932_s0 + $0x40] sm:$0xf]  ;;  %v4464_v6 = vld [vmem:[%s5932_s0 + $0x48] sm:$0xf] }
   0x3   :  { %v4469_v7 = vld [vmem:[%s5932_s0 + $0x50] sm:$0xf]  ;;  %v4474_v8 = vld [vmem:[%s5932_s0 + $0x58] sm:$0xf]  ;;  %v43_v9 = vsel %vm42_vm0, %v4459_v5, 0.0  ;;  %v44_v10 = vsel %vm42_vm0, %v4464_v6, 0.0 }
   0x4   :  { %v33_v11 = vadd.f32 %v32_v4, %v4447_v2  ;;  %v45_v12 = vadd.f32 %v44_v10, %v43_v9  ;;  %v46_v13 = vsel %vm42_vm0, %v4469_v7, 0.0  ;;  %v4486_v14 = vld [vmem:[%s5932_s0 + $0x20] sm:$0xff]  ;;  %v4491_v15 = vld [vmem:[%s5932_s0 + $0x28] sm:$0xff]  ;;  %v4496_v16 = vld [vmem:[%s5932_s0 + $0x30] sm:$0xff]  ;;  %v48_v17 = vsel %vm42_vm0, %v4474_v8, 0.0 }
   0x5   :  { %v37_v18 = vadd.f32 %v4491_v15, %v4486_v14  ;;  %v4506_v21 = vld [vmem:[%s5932_s0 + $0x38] sm:$0xff]  ;;  %v3822_v25 = vld [vmem:[%s5933_s3 + $0x4] ss:$48 sps:$4 sm:$0xff]   ;;  %v3826_v27 = vld [vmem:[%s5933_s3] ss:$48 sps:$4 sm:$0xff]  }
   0x6   :  { %v34_v19 = vadd.f32 %v33_v11, %v4452_v3  ;;  %v47_v20 = vadd.f32 %v46_v13, %v45_v12  ;;  %v3824_v26 = vld [vmem:[%s5933_s3 + $0xc] ss:$48 sps:$4 sm:$0xff]   ;;  %2564 = vmatprep.subr.bf16.mxu0 %v3822_v25  ;;  %v3827_v28 = vld [vmem:[%s5933_s3 + $0x8] ss:$48 sps:$4 sm:$0xff]   ;;  %v3828_v29 = vld [vmem:[%s5933_s3 + $0x64] ss:$48 sps:$4 sm:$0xff]  }
   0x7   :  { %v38_v22 = vadd.f32 %v37_v18, %v4496_v16  ;;  %2666 = vmatprep.subr.bf16.mxu1 %v3824_v26  ;;  %2565 = vmatpush1.bf16.msra.mxu0 %v3826_v27  ;;  %v3830_v30 = vld [vmem:[%s5933_s3 + $0x6c] ss:$48 sps:$4 sm:$0xff]   ;;  %v3832_v31 = vld [vmem:[%s5933_s3 + $0x60] ss:$48 sps:$4 sm:$0xff]   ;;  %v3833_v32 = vld [vmem:[%s5933_s3 + $0x68] ss:$48 sps:$4 sm:$0xff]  }
   0x8   :  { %35 = vadd.xlane.f32.xlu0 %v34_v19  ;;  %v49_v23 = vadd.f32 %v48_v17, %v47_v20  ;;  %2667 = vmatpush1.bf16.msra.mxu1 %v3827_v28  ;;  %v3834_v33 = vld [vmem:[%s5933_s3 + $0xc4] ss:$48 sps:$4 sm:$0xff]   ;;  %v3836_v34 = vld [vmem:[%s5933_s3 + $0xcc] ss:$48 sps:$4 sm:$0xff]   ;;  %v3838_v35 = vld [vmem:[%s5933_s3 + $0xc0] ss:$48 sps:$4 sm:$0xff]  }
   0x9   :  { %v39_v24 = vadd.f32 %v38_v22, %v4506_v21  ;;  %2566 = vmatprep.subr.bf16.mxu0 %v3828_v29  ;;  %2668 = vmatprep.subr.bf16.mxu1 %v3830_v30  ;;  %v3839_v36 = vld [vmem:[%s5933_s3 + $0xc8] ss:$48 sps:$4 sm:$0xff]   ;;  %v3840_v37 = vld [vmem:[%s5933_s3 + $0x124] ss:$48 sps:$4 sm:$0xff]   ;;  %v3842_v38 = vld [vmem:[%s5933_s3 + $0x12c] ss:$48 sps:$4 sm:$0xff]  }
   0xa   :  { %50 = vadd.xlane.f32.xlu1 %v49_v23  ;;  %v3844_v39 = vld [vmem:[%s5933_s3 + $0x120] ss:$48 sps:$4 sm:$0xff]   ;;  %v3845_v40 = vld [vmem:[%s5933_s3 + $0x128] ss:$48 sps:$4 sm:$0xff]   ;;  %v3846_v41 = vld [vmem:[%s5933_s3 + $0x184] ss:$48 sps:$4 sm:$0xff]  }
   0xb   :  { %2567 = vmatpush1.bf16.msra.mxu0 %v3832_v31  ;;  %v3848_v42 = vld [vmem:[%s5933_s3 + $0x18c] ss:$48 sps:$4 sm:$0xff]   ;;  %v3850_v43 = vld [vmem:[%s5933_s3 + $0x180] ss:$48 sps:$4 sm:$0xff]   ;;  %v3851_v44 = vld [vmem:[%s5933_s3 + $0x188] ss:$48 sps:$4 sm:$0xff]  }
   0xc   :  { %40 = vadd.xlane.f32.xlu0 %v39_v24  ;;  %2669 = vmatpush1.bf16.msra.mxu1 %v3833_v32  ;;  %v3852_v45 = vld [vmem:[%s5933_s3 + $0x1e4] ss:$48 sps:$4 sm:$0xff]   ;;  %v3854_v46 = vld [vmem:[%s5933_s3 + $0x1ec] ss:$48 sps:$4 sm:$0xff]   ;;  %v3856_v47 = vld [vmem:[%s5933_s3 + $0x1e0] ss:$48 sps:$4 sm:$0xff]  }
   0xd   :  { %2568 = vmatprep.subr.bf16.mxu0 %v3834_v33  ;;  %2670 = vmatprep.subr.bf16.mxu1 %v3836_v34  ;;  %v3857_v48 = vld [vmem:[%s5933_s3 + $0x1e8] ss:$48 sps:$4 sm:$0xff]   ;;  %v3858_v49 = vld [vmem:[%s5933_s3 + $0x244] ss:$48 sps:$4 sm:$0xff]   ;;  %v3860_v50 = vld [vmem:[%s5933_s3 + $0x24c] ss:$48 sps:$4 sm:$0xff]  }
   0xe   :  { %v3862_v51 = vld [vmem:[%s5933_s3 + $0x240] ss:$48 sps:$4 sm:$0xff]   ;;  %v3863_v52 = vld [vmem:[%s5933_s3 + $0x248] ss:$48 sps:$4 sm:$0xff]   ;;  %v3864_v53 = vld [vmem:[%s5933_s3 + $0x2a4] ss:$48 sps:$4 sm:$0xff]  }
   0xf   :  { %2569 = vmatpush1.bf16.msra.mxu0 %v3838_v35  ;;  %v3866_v54 = vld [vmem:[%s5933_s3 + $0x2ac] ss:$48 sps:$4 sm:$0xff]   ;;  %v3868_v55 = vld [vmem:[%s5933_s3 + $0x2a0] ss:$48 sps:$4 sm:$0xff]   ;;  %v3869_v56 = vld [vmem:[%s5933_s3 + $0x2a8] ss:$48 sps:$4 sm:$0xff]  }
  0x10   :  { %2671 = vmatpush1.bf16.msra.mxu1 %v3839_v36  ;;  %2570 = vmatprep.subr.bf16.mxu0 %v3840_v37  ;;  %v3870_v57 = vld [vmem:[%s5933_s3 + $0x304] ss:$48 sps:$4 sm:$0xff]   ;;  %v3872_v58 = vld [vmem:[%s5933_s3 + $0x30c] ss:$48 sps:$4 sm:$0xff]   ;;  %v3874_v59 = vld [vmem:[%s5933_s3 + $0x300] ss:$48 sps:$4 sm:$0xff]  }
  0x11   :  { %2672 = vmatprep.subr.bf16.mxu1 %v3842_v38  ;;  %v3875_v60 = vld [vmem:[%s5933_s3 + $0x308] ss:$48 sps:$4 sm:$0xff]   ;;  %v3876_v61 = vld [vmem:[%s5933_s3 + $0x364] ss:$48 sps:$4 sm:$0xff]   ;;  %v3878_v62 = vld [vmem:[%s5933_s3 + $0x36c] ss:$48 sps:$4 sm:$0xff]  }
  0x13   :  { %2571 = vmatpush1.bf16.msra.mxu0 %v3844_v39 }
  0x14   :  { %2673 = vmatpush1.bf16.msra.mxu1 %v3845_v40  ;;  %2572 = vmatprep.subr.bf16.mxu0 %v3846_v41 }
  0x15   :  { %2674 = vmatprep.subr.bf16.mxu1 %v3848_v42  ;;  %v3880_v42 = vld [vmem:[%s5933_s3 + $0x360] ss:$48 sps:$4 sm:$0xff]  }
  0x17   :  { %2573 = vmatpush1.bf16.msra.mxu0 %v3850_v43  ;;  %v3881_v43 = vld [vmem:[%s5933_s3 + $0x368] ss:$48 sps:$4 sm:$0xff]  }
  0x18   :  { %2675 = vmatpush1.bf16.msra.mxu1 %v3851_v44  ;;  %2574 = vmatprep.subr.bf16.mxu0 %v3852_v45  ;;  %v3882_v44 = vld [vmem:[%s5933_s3 + $0x3c4] ss:$48 sps:$4 sm:$0xff]   ;;  %v3884_v45 = vld [vmem:[%s5933_s3 + $0x3cc] ss:$48 sps:$4 sm:$0xff]  }
  0x19   :  { %2676 = vmatprep.subr.bf16.mxu1 %v3854_v46  ;;  %v3886_v46 = vld [vmem:[%s5933_s3 + $0x3c0] ss:$48 sps:$4 sm:$0xff]  }
  0x1b   :  { %2575 = vmatpush1.bf16.msra.mxu0 %v3856_v47  ;;  %v3887_v47 = vld [vmem:[%s5933_s3 + $0x3c8] ss:$48 sps:$4 sm:$0xff]  }
  0x1c   :  { %2677 = vmatpush1.bf16.msra.mxu1 %v3857_v48  ;;  %2576 = vmatprep.subr.bf16.mxu0 %v3858_v49  ;;  %v3888_v48 = vld [vmem:[%s5933_s3 + $0x424] ss:$48 sps:$4 sm:$0xff]   ;;  %v3890_v49 = vld [vmem:[%s5933_s3 + $0x42c] ss:$48 sps:$4 sm:$0xff]  }
  0x1d   :  { %2678 = vmatprep.subr.bf16.mxu1 %v3860_v50  ;;  %v3892_v50 = vld [vmem:[%s5933_s3 + $0x420] ss:$48 sps:$4 sm:$0xff]  }
  0x1f   :  { %2577 = vmatpush1.bf16.msra.mxu0 %v3862_v51  ;;  %v3893_v51 = vld [vmem:[%s5933_s3 + $0x428] ss:$48 sps:$4 sm:$0xff]  }
  0x20   :  { %2679 = vmatpush1.bf16.msra.mxu1 %v3863_v52  ;;  %2578 = vmatprep.subr.bf16.mxu0 %v3864_v53  ;;  %v3894_v52 = vld [vmem:[%s5933_s3 + $0x484] ss:$48 sps:$4 sm:$0xff]   ;;  %v3896_v53 = vld [vmem:[%s5933_s3 + $0x48c] ss:$48 sps:$4 sm:$0xff]  }
  0x21   :  { %2680 = vmatprep.subr.bf16.mxu1 %v3866_v54  ;;  %v3898_v54 = vld [vmem:[%s5933_s3 + $0x480] ss:$48 sps:$4 sm:$0xff]  }
  0x23   :  { %2579 = vmatpush1.bf16.msra.mxu0 %v3868_v55  ;;  %v3899_v55 = vld [vmem:[%s5933_s3 + $0x488] ss:$48 sps:$4 sm:$0xff]  }
  0x24   :  { %2681 = vmatpush1.bf16.msra.mxu1 %v3869_v56  ;;  %2580 = vmatprep.subr.bf16.mxu0 %v3870_v57  ;;  %v3900_v56 = vld [vmem:[%s5933_s3 + $0x4e4] ss:$48 sps:$4 sm:$0xff]   ;;  %v3902_v57 = vld [vmem:[%s5933_s3 + $0x4ec] ss:$48 sps:$4 sm:$0xff]  }
  0x25   :  { %2682 = vmatprep.subr.bf16.mxu1 %v3872_v58  ;;  %v3904_v58 = vld [vmem:[%s5933_s3 + $0x4e0] ss:$48 sps:$4 sm:$0xff]  }
  0x27   :  { %2581 = vmatpush1.bf16.msra.mxu0 %v3874_v59  ;;  %v3905_v59 = vld [vmem:[%s5933_s3 + $0x4e8] ss:$48 sps:$4 sm:$0xff]  }
  0x28   :  { %2683 = vmatpush1.bf16.msra.mxu1 %v3875_v60  ;;  %2582 = vmatprep.subr.bf16.mxu0 %v3876_v61  ;;  %v3906_v60 = vld [vmem:[%s5933_s3 + $0x544] ss:$48 sps:$4 sm:$0xff]   ;;  %v3908_v61 = vld [vmem:[%s5933_s3 + $0x54c] ss:$48 sps:$4 sm:$0xff]  }
  0x29   :  { %2684 = vmatprep.subr.bf16.mxu1 %v3878_v62  ;;  %v3910_v62 = vld [vmem:[%s5933_s3 + $0x540] ss:$48 sps:$4 sm:$0xff]  }
  0x2b   :  { %2583 = vmatpush1.bf16.msra.mxu0 %v3880_v42 }
  0x2c   :  { %2685 = vmatpush1.bf16.msra.mxu1 %v3881_v43  ;;  %2584 = vmatprep.subr.bf16.mxu0 %v3882_v44 }
  0x2d   :  { %2686 = vmatprep.subr.bf16.mxu1 %v3884_v45 }
  0x2f   :  { %2585 = vmatpush1.bf16.msra.mxu0 %v3886_v46 }
  0x30   :  { %2687 = vmatpush1.bf16.msra.mxu1 %v3887_v47  ;;  %2586 = vmatprep.subr.bf16.mxu0 %v3888_v48 }
  0x31   :  { %2688 = vmatprep.subr.bf16.mxu1 %v3890_v49 }
  0x33   :  { %2587 = vmatpush1.bf16.msra.mxu0 %v3892_v50 }
  0x34   :  { %2689 = vmatpush1.bf16.msra.mxu1 %v3893_v51  ;;  %2588 = vmatprep.subr.bf16.mxu0 %v3894_v52 }
  0x35   :  { %2690 = vmatprep.subr.bf16.mxu1 %v3896_v53 }
  0x37   :  { %2589 = vmatpush1.bf16.msra.mxu0 %v3898_v54 }
  0x38   :  { %2691 = vmatpush1.bf16.msra.mxu1 %v3899_v55  ;;  %2590 = vmatprep.subr.bf16.mxu0 %v3900_v56 }
  0x39   :  { %2692 = vmatprep.subr.bf16.mxu1 %v3902_v57 }
  0x3b   :  { %2591 = vmatpush1.bf16.msra.mxu0 %v3904_v58 }
  0x3c   :  { %2693 = vmatpush1.bf16.msra.mxu1 %v3905_v59  ;;  %2592 = vmatprep.subr.bf16.mxu0 %v3906_v60 }
  0x3d   :  { %2694 = vmatprep.subr.bf16.mxu1 %v3908_v61 }
  0x3f   :  { %2593 = vmatpush1.bf16.msra.mxu0 %v3910_v62 }
  0x95   :  { %v36_v63 = vpop.xlane.xlu0 %35 }
  0x96   :  { %v53_v4 = vmul.f32 0.001953125, %v36_v63  ;;  %v3911_v63 = vld [vmem:[%s5933_s3 + $0x548] ss:$48 sps:$4 sm:$0xff]  }
  0x97   :  { %v51_v9 = vpop.xlane.xlu1 %50  ;;  %2695 = vmatpush1.bf16.msra.mxu1 %v3911_v63  ;;  %v3918_v63 = vld [vmem:[%s5933_s3 + $0x600] ss:$48 sps:$4 sm:$0xff]  }
  0x98   :  { %v4625_v10 = vsub.f32 %v4437_v0, %v53_v4  ;;  %v4628_v11 = vsub.f32 %v4442_v1, %v53_v4  ;;  %v55_v12 = vmul.f32 0.001953125, %v51_v9  ;;  %v4631_v13 = vsub.f32 %v4447_v2, %v53_v4  ;;  %v3914_v9 = vld [vmem:[%s5933_s3 + $0x5ac] ss:$48 sps:$4 sm:$0xff]  }
  0x99   :  { %v41_v17 = vpop.xlane.xlu0 %40  ;;  %v4634_v18 = vsub.f32 %v4452_v3, %v53_v4  ;;  %v3912_v4 = vld [vmem:[%s5933_s3 + $0x5a4] ss:$48 sps:$4 sm:$0xff]   ;;  %2696 = vmatprep.subr.bf16.mxu1 %v3914_v9 }
  0x9a   :  { %v4637_v19 = vsub.f32 %v4459_v5, %v55_v12  ;;  %v4640_v20 = vsub.f32 %v4464_v6, %v55_v12  ;;  %v54_v22 = vmul.f32 0.001953125, %v41_v17  ;;  %v68_v0 = vmul.f32 %v4625_v10, %v4625_v10  ;;  %v3917_v17 = vld [vmem:[%s5933_s3 + $0x5a8] ss:$48 sps:$4 sm:$0xff]   ;;  %2594 = vmatprep.subr.bf16.mxu0 %v3912_v4 }
  0x9b   :  { %v69_v1 = vmul.f32 %v4628_v11, %v4628_v11  ;;  %v70_v2 = vmul.f32 %v4631_v13, %v4631_v13  ;;  %v71_v3 = vmul.f32 %v4634_v18, %v4634_v18  ;;  %v4651_v23 = vsub.f32 %v4469_v7, %v55_v12  ;;  %2697 = vmatpush1.bf16.msra.mxu1 %v3917_v17 }
  0x9c   :  { %v4654_v5 = vsub.f32 %v4486_v14, %v54_v22  ;;  %v4657_v6 = vsub.f32 %v4491_v15, %v54_v22  ;;  %v4660_v24 = vsub.f32 %v4474_v8, %v55_v12  ;;  %v76_v25 = vmul.f32 %v4637_v19, %v4637_v19  ;;  %v3916_v12 = vld [vmem:[%s5933_s3 + $0x5a0] ss:$48 sps:$4 sm:$0xff]  }
  0x9d   :  { %v80_v26 = vadd.f32 %v69_v1, %v68_v0  ;;  %v77_v27 = vmul.f32 %v4640_v20, %v4640_v20  ;;  %v78_v7 = vmul.f32 %v4651_v23, %v4651_v23  ;;  %v4669_v28 = vsub.f32 %v4496_v16, %v54_v22  ;;  %2595 = vmatpush1.bf16.msra.mxu0 %v3916_v12  ;;  %v3923_v0 = vld [vmem:[%s5933_s3 + $0x60c] ss:$48 sps:$4 sm:$0xff]  }
  0x9e   :  { %v79_v14 = vmul.f32 %v4660_v24, %v4660_v24  ;;  %v90_v15 = vsel %vm42_vm0, %v76_v25, 0.0  ;;  %v4675_v8 = vsub.f32 %v4506_v21, %v54_v22  ;;  %v72_v29 = vmul.f32 %v4654_v5, %v4654_v5  ;;  %v3920_v22 = vld [vmem:[%s5933_s3 + $0x604] ss:$48 sps:$4 sm:$0xff]   ;;  %2717 = vmatprep.subr.bf16.mxu1 %v3923_v0  ;;  %v3929_v0 = vld [vmem:[%s5933_s3 + $0x66c] ss:$48 sps:$4 sm:$0xff]  }
  0x9f   :  { %v81_v30 = vadd.f32 %v80_v26, %v70_v2  ;;  %v91_v31 = vsel %vm42_vm0, %v77_v27, 0.0  ;;  %v93_v32 = vsel %vm42_vm0, %v78_v7, 0.0  ;;  %v73_v16 = vmul.f32 %v4657_v6, %v4657_v6  ;;  %2615 = vmatprep.subr.bf16.mxu0 %v3920_v22  ;;  %v3926_v22 = vld [vmem:[%s5933_s3 + $0x664] ss:$48 sps:$4 sm:$0xff]  }
  0xa0   :  { %v92_v33 = vadd.f32 %v91_v31, %v90_v15  ;;  %v95_v35 = vsel %vm42_vm0, %v79_v14, 0.0  ;;  %v74_v36 = vmul.f32 %v4669_v28, %v4669_v28  ;;  %v75_v38 = vmul.f32 %v4675_v8, %v4675_v8 }
  0xa1   :  { %v82_v34 = vadd.f32 %v81_v30, %v71_v3  ;;  %v85_v21 = vadd.f32 %v73_v16, %v72_v29  ;;  %v122_v3 = vlaneseq }
  0xa2   :  { %v94_v37 = vadd.f32 %v93_v32, %v92_v33  ;;  %v120_v32 = vld [vmem:[%s5934_s1] sm:$0xf] }
  0xa3   :  { %83 = vadd.xlane.f32.xlu1 %v82_v34  ;;  %v86_v39 = vadd.f32 %v85_v21, %v74_v36  ;;  %v4772_v15 = vshrl.u32 %v122_v3, 7  ;;  %v154_v36 = vld [vmem:[%s5935_s2] sm:$0xf]  ;;  %v3927_v3 = vld [vmem:[%s5933_s3 + $0x668] ss:$48 sps:$4 sm:$0xff]  }
  0xa4   :  { %v96_v40 = vadd.f32 %v95_v35, %v94_v37 }
  0xa5   :  { %v87_v41 = vadd.f32 %v86_v39, %v75_v38  ;;  %v4775_v31 = vsub.s32 2, %v4772_v15  ;;  %v4781_v16 = vsub.s32 1, %v4772_v15  ;;  %v4784_v33 = vsub.s32 0, %v4772_v15 }
  0xa6   :  { %v4806_v54 = vsub.s32 3, %v4772_v15 }
  0xa7   :  { %97 = vadd.xlane.f32.xlu1 %v96_v40  ;;  %88 = vadd.xlane.f32.xlu0 %v87_v41  ;;  %v133_v34 = vrot.slane %v120_v32, %v4775_v31  ;;  %v129_v38 = vrot.slane %v120_v32, %v4781_v16  ;;  %v125_v40 = vrot.slane %v120_v32, %v4784_v33 }
  0xa8   :  { %v167_v42 = vrot.slane %v154_v36, %v4775_v31  ;;  %v163_v45 = vrot.slane %v154_v36, %v4781_v16  ;;  %v159_v46 = vrot.slane %v154_v36, %v4784_v33  ;;  %v4824_v4 = vrot.slane %v120_v32, %v4806_v54  ;;  %v3933_v32 = vld [vmem:[%s5933_s3 + $0x6c8] ss:$48 sps:$4 sm:$0xff]  }
 0x130   :  { %v84_v1 = vpop.xlane.xlu1 %83 }
 0x131   :  { %v99_v2 = vmul.f32 0.001953125, %v84_v1 }
 0x133   :  { %v102_v25 = vadd.f32 1e-05, %v99_v2  ;;  %v3924_v2 = vld [vmem:[%s5933_s3 + $0x660] ss:$48 sps:$4 sm:$0xff]  }
 0x134   :  { %v98_v26 = vpop.xlane.xlu1 %97  ;;  %v89_v27 = vpop.xlane.xlu0 %88 }
 0x135   :  { %4398 = vrsqrt.f32 %v102_v25  ;;  %v101_v7 = vmul.f32 0.001953125, %v98_v26  ;;  %v100_v14 = vmul.f32 0.001953125, %v89_v27  ;;  %v3932_v25 = vld [vmem:[%s5933_s3 + $0x6c4] ss:$48 sps:$4 sm:$0xff]   ;;  %v3935_v26 = vld [vmem:[%s5933_s3 + $0x6cc] ss:$48 sps:$4 sm:$0xff]  }
 0x137   :  { %v104_v29 = vadd.f32 1e-05, %v101_v7  ;;  %v103_v30 = vadd.f32 1e-05, %v100_v14  ;;  %v4860_v14 = vrot.slane %v154_v36, %v4806_v54  ;;  %v3938_v36 = vld [vmem:[%s5933_s3 + $0x724] ss:$48 sps:$4 sm:$0xff]  }
 0x139   :  { %4400 = vrsqrt.f32 %v104_v29 }
 0x13a   :  { %4402 = vrsqrt.f32 %v103_v30  ;;  %v3930_v30 = vld [vmem:[%s5933_s3 + $0x6c0] ss:$48 sps:$4 sm:$0xff]  }
 0x13f   :  { %v4399_v35 = vpop.eup %4398 }
 0x140   :  { %v110_v21 = vmul.f32 %v4399_v35, %v4631_v13  ;;  %v109_v37 = vmul.f32 %v4399_v35, %v4628_v11  ;;  %v108_v39 = vmul.f32 %v4399_v35, %v4625_v10 }
 0x142   :  { %v144_v41 = vmul.f32 %v133_v34, %v110_v21  ;;  %v143_v47 = vmul.f32 %v129_v38, %v109_v37  ;;  %v142_v48 = vmul.f32 %v125_v40, %v108_v39  ;;  %v3941_v21 = vld [vmem:[%s5933_s3 + $0x72c] ss:$48 sps:$4 sm:$0xff]   ;;  %v3939_v39 = vld [vmem:[%s5933_s3 + $0x728] ss:$48 sps:$4 sm:$0xff]  }
 0x143   :  { %v4796_v43 = vpop.eup %4400 }
 0x144   :  { %v4403_v44 = vpop.eup %4402  ;;  %v117_v13 = vmul.f32 %v4796_v43, %v4640_v20  ;;  %v178_v51 = vadd.f32 %v167_v42, %v144_v41  ;;  %v116_v55 = vmul.f32 %v4796_v43, %v4637_v19  ;;  %v118_v20 = vmul.f32 %v4796_v43, %v4651_v23  ;;  %v3921_v19 = vld [vmem:[%s5933_s3 + $0x608] ss:$48 sps:$4 sm:$0xff]   ;;  %v3947_v41 = vld [vmem:[%s5933_s3 + $0x78c] ss:$48 sps:$4 sm:$0xff]  }
 0x145   :  { %v113_v11 = vmul.f32 %v4403_v44, %v4657_v6  ;;  %v112_v10 = vmul.f32 %v4403_v44, %v4654_v5  ;;  %v114_v50 = vmul.f32 %v4403_v44, %v4669_v28  ;;  %v177_v6 = vadd.f32 %v163_v45, %v143_v47  ;;  %v3956_v47 = vld [vmem:[%s5933_s3 + $0x844] ss:$48 sps:$4 sm:$0xff]  }
 0x146   :  { %v151_v49 = vmul.f32 %v129_v38, %v117_v13  ;;  %v176_v5 = vadd.f32 %v159_v46, %v142_v48  ;;  %v115_v28 = vmul.f32 %v4403_v44, %v4675_v8  ;;  %v152_v61 = vmul.f32 %v133_v34, %v118_v20  ;;  %v3945_v44 = vld [vmem:[%s5933_s3 + $0x788] ss:$48 sps:$4 sm:$0xff]   ;;  %v3948_v13 = vld [vmem:[%s5933_s3 + $0x7e0] ss:$48 sps:$4 sm:$0xff]  }
 0x147   :  { %v147_v52 = vmul.f32 %v129_v38, %v113_v11  ;;  %v146_v53 = vmul.f32 %v125_v40, %v112_v10  ;;  %v148_v56 = vmul.f32 %v133_v34, %v114_v50  ;;  %v150_v9 = vmul.f32 %v125_v40, %v116_v55  ;;  %v3936_v38 = vld [vmem:[%s5933_s3 + $0x720] ss:$48 sps:$4 sm:$0xff]   ;;  %v3944_v40 = vld [vmem:[%s5933_s3 + $0x784] ss:$48 sps:$4 sm:$0xff]   ;;  %v3951_v11 = vld [vmem:[%s5933_s3 + $0x7e8] ss:$48 sps:$4 sm:$0xff]  }
 0x148   :  { %v185_v59 = vadd.f32 %v163_v45, %v151_v49  ;;  %v111_v8 = vmul.f32 %v4399_v35, %v4634_v18  ;;  %v4829_v17 = vadd.f32 %v167_v42, %v152_v61  ;;  %v149_v1 = vmul.f32 %v4824_v4, %v115_v28  ;;  %v3959_v10 = vld [vmem:[%s5933_s3 + $0x84c] ss:$48 sps:$4 sm:$0xff]   ;;  %v3954_v48 = vld [vmem:[%s5933_s3 + $0x840] ss:$48 sps:$4 sm:$0xff]   ;;  %v3957_v49 = vld [vmem:[%s5933_s3 + $0x848] ss:$48 sps:$4 sm:$0xff]  }
 0x149   :  { %v181_v57 = vadd.f32 %v163_v45, %v147_v52  ;;  %v180_v58 = vadd.f32 %v159_v46, %v146_v53  ;;  %v182_v60 = vadd.f32 %v167_v42, %v148_v56  ;;  %v184_v27 = vadd.f32 %v159_v46, %v150_v9  ;;  %v3942_v42 = vld [vmem:[%s5933_s3 + $0x780] ss:$48 sps:$4 sm:$0xff]   ;;  %v3950_v45 = vld [vmem:[%s5933_s3 + $0x7e4] ss:$48 sps:$4 sm:$0xff]   ;;  %v3953_v46 = vld [vmem:[%s5933_s3 + $0x7ec] ss:$48 sps:$4 sm:$0xff]  }
 0x14a   :  { %v4841_v18 = vpack.c.bf16 %v185_v59, %v185_v59  ;;  %v145_v7 = vmul.f32 %v4824_v4, %v111_v8  ;;  %v183_v29 = vadd.f32 %v4860_v14, %v149_v1  ;;  %v3962_v50 = vld [vmem:[%s5933_s3 + $0x8a4] ss:$48 sps:$4 sm:$0xff]   ;;  %v3960_v52 = vld [vmem:[%s5933_s3 + $0x8a0] ss:$48 sps:$4 sm:$0xff]   ;;  %v3963_v53 = vld [vmem:[%s5933_s3 + $0x8a8] ss:$48 sps:$4 sm:$0xff]  }
 0x14b   :  { %v4813_v62 = vpack.c.bf16 %v181_v57, %v177_v6  ;;  %v4821_v23 = vpack.c.bf16 %v180_v58, %v176_v5  ;;  %v4827_v12 = vpack.c.bf16 %v182_v60, %v178_v51  ;;  %v4869_v34 = vpack.c.bf16 %v184_v27, %v184_v27  ;;  %v3965_v51 = vld [vmem:[%s5933_s3 + $0x8ac] ss:$48 sps:$4 sm:$0xff]   ;;  %v3968_v55 = vld [vmem:[%s5933_s3 + $0x904] ss:$48 sps:$4 sm:$0xff]   ;;  %v3966_v20 = vld [vmem:[%s5933_s3 + $0x900] ss:$48 sps:$4 sm:$0xff]  }
 0x14c   :  { %v179_v35 = vadd.f32 %v4860_v14, %v145_v7  ;;  %v3971_v56 = vld [vmem:[%s5933_s3 + $0x90c] ss:$48 sps:$4 sm:$0xff]   ;;  %v3969_v6 = vld [vmem:[%s5933_s3 + $0x908] ss:$48 sps:$4 sm:$0xff]   ;;  %v3974_v57 = vld [vmem:[%s5933_s3 + $0x964] ss:$48 sps:$4 sm:$0xff]  }
 0x14d   :  { %2596 = vmatprep.mubr.bf16.mxu0 %v4813_v62  ;;  %2698 = vmatprep.mubr.bf16.mxu1 %v4813_v62  ;;  %v3977_v5 = vld [vmem:[%s5933_s3 + $0x96c] ss:$48 sps:$4 sm:$0xff]   ;;  %v3972_v58 = vld [vmem:[%s5933_s3 + $0x960] ss:$48 sps:$4 sm:$0xff]   ;;  %v3975_v59 = vld [vmem:[%s5933_s3 + $0x968] ss:$48 sps:$4 sm:$0xff]  }
 0x14e   :  { %2597 = vmatmul.mubr.bf16.vlgmr.msra.gmra.mrb[0].mxu0 %v4821_v23  ;;  %2699 = vmatmul.mubr.bf16.vlgmr.msra.gmra.mrb[0].mxu1 %v4821_v23  ;;  %v4880_v37 = vpack.c.bf16 %v183_v29, %v179_v35  ;;  %v3980_v28 = vld [vmem:[%s5933_s3 + $0x9c4] ss:$48 sps:$4 sm:$0xff]   ;;  %v3983_v60 = vld [vmem:[%s5933_s3 + $0x9cc] ss:$48 sps:$4 sm:$0xff]   ;;  %v3978_v61 = vld [vmem:[%s5933_s3 + $0x9c0] ss:$48 sps:$4 sm:$0xff]  }
 0x14f   :  { %2616 = vmatpush1.bf16.msra.mxu0 %v3918_v63  ;;  %2718 = vmatpush1.bf16.msra.mxu1 %v3921_v19  ;;  %v3981_v63 = vld [vmem:[%s5933_s3 + $0x9c8] ss:$48 sps:$4 sm:$0xff]   ;;  %v3986_v19 = vld [vmem:[%s5933_s3 + $0xa24] ss:$48 sps:$4 sm:$0xff]   ;;  %v3989_v9 = vld [vmem:[%s5933_s3 + $0xa2c] ss:$48 sps:$4 sm:$0xff]  }
 0x150   :  { %2606 = vmatprep.mubr.bf16.mxu0 %v4841_v18  ;;  %2708 = vmatprep.mubr.bf16.mxu1 %v4841_v18  ;;  %v3984_v8 = vld [vmem:[%s5933_s3 + $0xa20] ss:$48 sps:$4 sm:$0xff]   ;;  %v3995_v1 = vld [vmem:[%s5933_s3 + $0xa8c] ss:$48 sps:$4 sm:$0xff]   ;;  %v3999_v7 = vld [vmem:[%s5933_s3 + $0xae8] ss:$48 sps:$4 sm:$0xff]  }
 0x151   :  { %2617 = vmatprep.subr.bf16.mxu0 %v3926_v22  ;;  %2719 = vmatprep.subr.bf16.mxu1 %v3929_v0  ;;  %v3987_v22 = vld [vmem:[%s5933_s3 + $0xa28] ss:$48 sps:$4 sm:$0xff]   ;;  %v3992_v0 = vld [vmem:[%s5933_s3 + $0xa84] ss:$48 sps:$4 sm:$0xff]   ;;  %v3996_v27 = vld [vmem:[%s5933_s3 + $0xae0] ss:$48 sps:$4 sm:$0xff]  }
 0x152   :  { %v4004_v29 = vld [vmem:[%s5933_s3 + $0xb44] ss:$48 sps:$4 sm:$0xff]   ;;  %v4002_v35 = vld [vmem:[%s5933_s3 + $0xb40] ss:$48 sps:$4 sm:$0xff]  }
 0x153   :  { %2618 = vmatpush1.bf16.msra.mxu0 %v3924_v2  ;;  %2720 = vmatpush1.bf16.msra.mxu1 %v3927_v3  ;;  %v3990_v2 = vld [vmem:[%s5933_s3 + $0xa80] ss:$48 sps:$4 sm:$0xff]   ;;  %v3993_v3 = vld [vmem:[%s5933_s3 + $0xa88] ss:$48 sps:$4 sm:$0xff]  }
 0x154   :  { %2619 = vmatprep.subr.bf16.mxu0 %v3932_v25  ;;  %2721 = vmatprep.subr.bf16.mxu1 %v3935_v26  ;;  %v3998_v25 = vld [vmem:[%s5933_s3 + $0xae4] ss:$48 sps:$4 sm:$0xff]   ;;  %v4001_v26 = vld [vmem:[%s5933_s3 + $0xaec] ss:$48 sps:$4 sm:$0xff]  }
 0x156   :  { %2607 = vmatmul.mubr.bf16.gmra.mrb[4].mxu0 %v4869_v34  ;;  %2709 = vmatmul.mubr.bf16.gmra.mrb[4].mxu1 %v4869_v34 }
 0x157   :  { %2620 = vmatpush1.bf16.msra.mxu0 %v3930_v30  ;;  %2722 = vmatpush1.bf16.msra.mxu1 %v3933_v32  ;;  %v4007_v30 = vld [vmem:[%s5933_s3 + $0xb4c] ss:$48 sps:$4 sm:$0xff]   ;;  %v119_v32 = vmul.f32 %v4796_v43, %v4660_v24 }
 0x158   :  { %2647 = vmatprep.mubr.bf16.mxu0 %v4880_v37  ;;  %2749 = vmatprep.mubr.bf16.mxu1 %v4880_v37  ;;  %v4013_v24 = vld [vmem:[%s5933_s3 + $0xbac] ss:$48 sps:$4 sm:$0xff]  }
 0x159   :  { %2621 = vmatprep.subr.bf16.mxu0 %v3938_v36  ;;  %2723 = vmatprep.subr.bf16.mxu1 %v3941_v21  ;;  %v4005_v36 = vld [vmem:[%s5933_s3 + $0xb48] ss:$48 sps:$4 sm:$0xff]   ;;  %v4010_v21 = vld [vmem:[%s5933_s3 + $0xba4] ss:$48 sps:$4 sm:$0xff]   ;;  %v153_v43 = vmul.f32 %v4824_v4, %v119_v32  ;;  %v4019_v4 = vld [vmem:[%s5933_s3 + $0x1c] ss:$48 sps:$4 sm:$0xff]  }
 0x15a   :  { %v4074_v32 = vld [vmem:[%s5933_s3 + $0x3d0] ss:$48 sps:$4 sm:$0xff]  }
 0x15b   :  { %2622 = vmatpush1.bf16.msra.mxu0 %v3936_v38  ;;  %2724 = vmatpush1.bf16.msra.mxu1 %v3939_v39  ;;  %v4008_v38 = vld [vmem:[%s5933_s3 + $0xba0] ss:$48 sps:$4 sm:$0xff]   ;;  %v4011_v39 = vld [vmem:[%s5933_s3 + $0xba8] ss:$48 sps:$4 sm:$0xff]  }
 0x15c   :  { %2623 = vmatprep.subr.bf16.mxu0 %v3944_v40  ;;  %2725 = vmatprep.subr.bf16.mxu1 %v3947_v41  ;;  %v4016_v40 = vld [vmem:[%s5933_s3 + $0x14] ss:$48 sps:$4 sm:$0xff]   ;;  %v187_v41 = vadd.f32 %v4860_v14, %v153_v43  ;;  %v4025_v14 = vld [vmem:[%s5933_s3 + $0x7c] ss:$48 sps:$4 sm:$0xff]   ;;  %v4083_v43 = vld [vmem:[%s5933_s3 + $0x438] ss:$48 sps:$4 sm:$0xff]  }
 0x15f   :  { %2624 = vmatpush1.bf16.msra.mxu0 %v3942_v42  ;;  %2726 = vmatpush1.bf16.msra.mxu1 %v3945_v44  ;;  %v4014_v42 = vld [vmem:[%s5933_s3 + $0x10] ss:$48 sps:$4 sm:$0xff]   ;;  %v4017_v44 = vld [vmem:[%s5933_s3 + $0x18] ss:$48 sps:$4 sm:$0xff]  }
 0x160   :  { %2625 = vmatprep.subr.bf16.mxu0 %v3950_v45  ;;  %2727 = vmatprep.subr.bf16.mxu1 %v3953_v46  ;;  %v5050_v45 = vpack.c.bf16 %v187_v41, %v187_v41  ;;  %v4022_v46 = vld [vmem:[%s5933_s3 + $0x74] ss:$48 sps:$4 sm:$0xff]  }
 0x161   :  { %v4094_v41 = vld [vmem:[%s5933_s3 + $0x4f4] ss:$48 sps:$4 sm:$0xff]  }
 0x163   :  { %2626 = vmatpush1.bf16.msra.mxu0 %v3948_v13  ;;  %2728 = vmatpush1.bf16.msra.mxu1 %v3951_v11  ;;  %v4020_v13 = vld [vmem:[%s5933_s3 + $0x70] ss:$48 sps:$4 sm:$0xff]   ;;  %v4023_v11 = vld [vmem:[%s5933_s3 + $0x78] ss:$48 sps:$4 sm:$0xff]  }
 0x164   :  { %2627 = vmatprep.subr.bf16.mxu0 %v3956_v47  ;;  %2729 = vmatprep.subr.bf16.mxu1 %v3959_v10  ;;  %v4028_v47 = vld [vmem:[%s5933_s3 + $0xd4] ss:$48 sps:$4 sm:$0xff]   ;;  %v4031_v10 = vld [vmem:[%s5933_s3 + $0xdc] ss:$48 sps:$4 sm:$0xff]  }
 0x167   :  { %2628 = vmatpush1.bf16.msra.mxu0 %v3954_v48  ;;  %2730 = vmatpush1.bf16.msra.mxu1 %v3957_v49  ;;  %v5076_v48 = vpack.c.bf16 %v4829_v17, %v4829_v17  ;;  %v4026_v49 = vld [vmem:[%s5933_s3 + $0xd0] ss:$48 sps:$4 sm:$0xff]  }
 0x168   :  { %2629 = vmatprep.subr.bf16.mxu0 %v3962_v50  ;;  %2731 = vmatprep.subr.bf16.mxu1 %v3965_v51  ;;  %v4029_v50 = vld [vmem:[%s5933_s3 + $0xd8] ss:$48 sps:$4 sm:$0xff]   ;;  %v4034_v51 = vld [vmem:[%s5933_s3 + $0x134] ss:$48 sps:$4 sm:$0xff]   ;;  %v4032_v17 = vld [vmem:[%s5933_s3 + $0x130] ss:$48 sps:$4 sm:$0xff]  }
 0x16b   :  { %2630 = vmatpush1.bf16.msra.mxu0 %v3960_v52  ;;  %2732 = vmatpush1.bf16.msra.mxu1 %v3963_v53  ;;  %v4037_v52 = vld [vmem:[%s5933_s3 + $0x13c] ss:$48 sps:$4 sm:$0xff]   ;;  %v4035_v53 = vld [vmem:[%s5933_s3 + $0x138] ss:$48 sps:$4 sm:$0xff]  }
 0x16c   :  { %2631 = vmatprep.subr.bf16.mxu0 %v3968_v55  ;;  %2733 = vmatprep.subr.bf16.mxu1 %v3971_v56  ;;  %v4040_v55 = vld [vmem:[%s5933_s3 + $0x194] ss:$48 sps:$4 sm:$0xff]   ;;  %v4043_v56 = vld [vmem:[%s5933_s3 + $0x19c] ss:$48 sps:$4 sm:$0xff]  }
 0x16f   :  { %2632 = vmatpush1.bf16.msra.mxu0 %v3966_v20  ;;  %2734 = vmatpush1.bf16.msra.mxu1 %v3969_v6  ;;  %v4038_v20 = vld [vmem:[%s5933_s3 + $0x190] ss:$48 sps:$4 sm:$0xff]   ;;  %v4041_v6 = vld [vmem:[%s5933_s3 + $0x198] ss:$48 sps:$4 sm:$0xff]  }
 0x170   :  { %2633 = vmatprep.subr.bf16.mxu0 %v3974_v57  ;;  %2735 = vmatprep.subr.bf16.mxu1 %v3977_v5  ;;  %v4046_v57 = vld [vmem:[%s5933_s3 + $0x1f4] ss:$48 sps:$4 sm:$0xff]   ;;  %v4049_v5 = vld [vmem:[%s5933_s3 + $0x1fc] ss:$48 sps:$4 sm:$0xff]  }
 0x173   :  { %2634 = vmatpush1.bf16.msra.mxu0 %v3972_v58  ;;  %2736 = vmatpush1.bf16.msra.mxu1 %v3975_v59  ;;  %v4044_v58 = vld [vmem:[%s5933_s3 + $0x1f0] ss:$48 sps:$4 sm:$0xff]   ;;  %v4047_v59 = vld [vmem:[%s5933_s3 + $0x1f8] ss:$48 sps:$4 sm:$0xff]  }
 0x174   :  { %2635 = vmatprep.subr.bf16.mxu0 %v3980_v28  ;;  %2737 = vmatprep.subr.bf16.mxu1 %v3983_v60  ;;  %v4052_v28 = vld [vmem:[%s5933_s3 + $0x254] ss:$48 sps:$4 sm:$0xff]   ;;  %v4055_v60 = vld [vmem:[%s5933_s3 + $0x25c] ss:$48 sps:$4 sm:$0xff]  }
 0x177   :  { %2636 = vmatpush1.bf16.msra.mxu0 %v3978_v61  ;;  %2738 = vmatpush1.bf16.msra.mxu1 %v3981_v63  ;;  %v4050_v61 = vld [vmem:[%s5933_s3 + $0x250] ss:$48 sps:$4 sm:$0xff]   ;;  %v4053_v63 = vld [vmem:[%s5933_s3 + $0x258] ss:$48 sps:$4 sm:$0xff]  }
 0x178   :  { %2637 = vmatprep.subr.bf16.mxu0 %v3986_v19  ;;  %2739 = vmatprep.subr.bf16.mxu1 %v3989_v9  ;;  %v4058_v19 = vld [vmem:[%s5933_s3 + $0x2b4] ss:$48 sps:$4 sm:$0xff]   ;;  %v4061_v9 = vld [vmem:[%s5933_s3 + $0x2bc] ss:$48 sps:$4 sm:$0xff]  }
 0x17b   :  { %2638 = vmatpush1.bf16.msra.mxu0 %v3984_v8  ;;  %2740 = vmatpush1.bf16.msra.mxu1 %v3987_v22  ;;  %v4056_v8 = vld [vmem:[%s5933_s3 + $0x2b0] ss:$48 sps:$4 sm:$0xff]   ;;  %v4059_v22 = vld [vmem:[%s5933_s3 + $0x2b8] ss:$48 sps:$4 sm:$0xff]  }
 0x17c   :  { %2639 = vmatprep.subr.bf16.mxu0 %v3992_v0  ;;  %2741 = vmatprep.subr.bf16.mxu1 %v3995_v1  ;;  %v4064_v0 = vld [vmem:[%s5933_s3 + $0x314] ss:$48 sps:$4 sm:$0xff]   ;;  %v4067_v1 = vld [vmem:[%s5933_s3 + $0x31c] ss:$48 sps:$4 sm:$0xff]  }
 0x17f   :  { %2640 = vmatpush1.bf16.msra.mxu0 %v3990_v2  ;;  %2742 = vmatpush1.bf16.msra.mxu1 %v3993_v3  ;;  %v4062_v2 = vld [vmem:[%s5933_s3 + $0x310] ss:$48 sps:$4 sm:$0xff]   ;;  %v4065_v3 = vld [vmem:[%s5933_s3 + $0x318] ss:$48 sps:$4 sm:$0xff]  }
 0x180   :  { %2641 = vmatprep.subr.bf16.mxu0 %v3998_v25  ;;  %2743 = vmatprep.subr.bf16.mxu1 %v4001_v26  ;;  %v4070_v25 = vld [vmem:[%s5933_s3 + $0x374] ss:$48 sps:$4 sm:$0xff]   ;;  %v4073_v26 = vld [vmem:[%s5933_s3 + $0x37c] ss:$48 sps:$4 sm:$0xff]  }
 0x183   :  { %2642 = vmatpush1.bf16.msra.mxu0 %v3996_v27  ;;  %2744 = vmatpush1.bf16.msra.mxu1 %v3999_v7  ;;  %v4068_v27 = vld [vmem:[%s5933_s3 + $0x370] ss:$48 sps:$4 sm:$0xff]   ;;  %v4071_v7 = vld [vmem:[%s5933_s3 + $0x378] ss:$48 sps:$4 sm:$0xff]  }
 0x184   :  { %2643 = vmatprep.subr.bf16.mxu0 %v4004_v29  ;;  %2745 = vmatprep.subr.bf16.mxu1 %v4007_v30  ;;  %v4076_v29 = vld [vmem:[%s5933_s3 + $0x3d4] ss:$48 sps:$4 sm:$0xff]   ;;  %v4079_v30 = vld [vmem:[%s5933_s3 + $0x3dc] ss:$48 sps:$4 sm:$0xff]  }
 0x187   :  { %2644 = vmatpush1.bf16.msra.mxu0 %v4002_v35  ;;  %2746 = vmatpush1.bf16.msra.mxu1 %v4005_v36  ;;  %v4077_v35 = vld [vmem:[%s5933_s3 + $0x3d8] ss:$48 sps:$4 sm:$0xff]   ;;  %v4082_v36 = vld [vmem:[%s5933_s3 + $0x434] ss:$48 sps:$4 sm:$0xff]  }
 0x188   :  { %2645 = vmatprep.subr.bf16.mxu0 %v4010_v21  ;;  %2747 = vmatprep.subr.bf16.mxu1 %v4013_v24  ;;  %v4085_v21 = vld [vmem:[%s5933_s3 + $0x43c] ss:$48 sps:$4 sm:$0xff]   ;;  %v4080_v24 = vld [vmem:[%s5933_s3 + $0x430] ss:$48 sps:$4 sm:$0xff]  }
 0x18b   :  { %2646 = vmatpush1.bf16.msra.mxu0 %v4008_v38  ;;  %2748 = vmatpush1.bf16.msra.mxu1 %v4011_v39  ;;  %v4088_v38 = vld [vmem:[%s5933_s3 + $0x494] ss:$48 sps:$4 sm:$0xff]   ;;  %v4091_v39 = vld [vmem:[%s5933_s3 + $0x49c] ss:$48 sps:$4 sm:$0xff]  }
 0x18c   :  { %2768 = vmatprep.subr.bf16.mxu0 %v4016_v40  ;;  %2870 = vmatprep.subr.bf16.mxu1 %v4019_v4  ;;  %v4086_v40 = vld [vmem:[%s5933_s3 + $0x490] ss:$48 sps:$4 sm:$0xff]   ;;  %v4089_v4 = vld [vmem:[%s5933_s3 + $0x498] ss:$48 sps:$4 sm:$0xff]  }
 0x18e   :  { %2648 = vmatmul.mubr.bf16.vlgmr.msra.gmra.mrb[0].mxu0 %v4827_v12  ;;  %2750 = vmatmul.mubr.bf16.vlgmr.msra.gmra.mrb[0].mxu1 %v4827_v12 }
 0x18f   :  { %2657 = vmatprep.mubr.bf16.mxu0 %v5050_v45  ;;  %2759 = vmatprep.mubr.bf16.mxu1 %v5050_v45 }
 0x190   :  { %2769 = vmatpush1.bf16.msra.mxu0 %v4014_v42  ;;  %2871 = vmatpush1.bf16.msra.mxu1 %v4017_v44  ;;  %v4097_v42 = vld [vmem:[%s5933_s3 + $0x4fc] ss:$48 sps:$4 sm:$0xff]   ;;  %v4092_v44 = vld [vmem:[%s5933_s3 + $0x4f0] ss:$48 sps:$4 sm:$0xff]  }
 0x191   :  { %2770 = vmatprep.subr.bf16.mxu0 %v4022_v46  ;;  %2872 = vmatprep.subr.bf16.mxu1 %v4025_v14  ;;  %v4095_v46 = vld [vmem:[%s5933_s3 + $0x4f8] ss:$48 sps:$4 sm:$0xff]   ;;  %v4100_v14 = vld [vmem:[%s5933_s3 + $0x554] ss:$48 sps:$4 sm:$0xff]  }
 0x194   :  { %2771 = vmatpush1.bf16.msra.mxu0 %v4020_v13  ;;  %2873 = vmatpush1.bf16.msra.mxu1 %v4023_v11  ;;  %v4103_v13 = vld [vmem:[%s5933_s3 + $0x55c] ss:$48 sps:$4 sm:$0xff]   ;;  %v4098_v11 = vld [vmem:[%s5933_s3 + $0x550] ss:$48 sps:$4 sm:$0xff]  }
 0x195   :  { %2772 = vmatprep.subr.bf16.mxu0 %v4028_v47  ;;  %2874 = vmatprep.subr.bf16.mxu1 %v4031_v10  ;;  %v4101_v47 = vld [vmem:[%s5933_s3 + $0x558] ss:$48 sps:$4 sm:$0xff]   ;;  %v4106_v10 = vld [vmem:[%s5933_s3 + $0x5b4] ss:$48 sps:$4 sm:$0xff]  }
 0x196   :  { %2658 = vmatmul.mubr.bf16.gmra.mrb[4].mxu0 %v5076_v48  ;;  %2760 = vmatmul.mubr.bf16.gmra.mrb[4].mxu1 %v5076_v48 }
 0x197   :  { %2800 = vmatprep.mubr.bf16.mxu0 %v4813_v62  ;;  %2902 = vmatprep.mubr.bf16.mxu1 %v4813_v62 }
 0x198   :  { %2773 = vmatpush1.bf16.msra.mxu0 %v4026_v49  ;;  %2875 = vmatpush1.bf16.msra.mxu1 %v4029_v50  ;;  %v4109_v49 = vld [vmem:[%s5933_s3 + $0x5bc] ss:$48 sps:$4 sm:$0xff]   ;;  %v4104_v50 = vld [vmem:[%s5933_s3 + $0x5b0] ss:$48 sps:$4 sm:$0xff]  }
 0x199   :  { %2774 = vmatprep.subr.bf16.mxu0 %v4034_v51  ;;  %2876 = vmatprep.subr.bf16.mxu1 %v4037_v52  ;;  %v4107_v51 = vld [vmem:[%s5933_s3 + $0x5b8] ss:$48 sps:$4 sm:$0xff]   ;;  %v4112_v52 = vld [vmem:[%s5933_s3 + $0x614] ss:$48 sps:$4 sm:$0xff]  }
 0x19c   :  { %2775 = vmatpush1.bf16.msra.mxu0 %v4032_v17  ;;  %2877 = vmatpush1.bf16.msra.mxu1 %v4035_v53  ;;  %v4115_v17 = vld [vmem:[%s5933_s3 + $0x61c] ss:$48 sps:$4 sm:$0xff]   ;;  %v4110_v53 = vld [vmem:[%s5933_s3 + $0x610] ss:$48 sps:$4 sm:$0xff]  }
 0x19d   :  { %2776 = vmatprep.subr.bf16.mxu0 %v4040_v55  ;;  %2878 = vmatprep.subr.bf16.mxu1 %v4043_v56  ;;  %v4113_v55 = vld [vmem:[%s5933_s3 + $0x618] ss:$48 sps:$4 sm:$0xff]   ;;  %v4118_v56 = vld [vmem:[%s5933_s3 + $0x674] ss:$48 sps:$4 sm:$0xff]  }
 0x1a0   :  { %2777 = vmatpush1.bf16.msra.mxu0 %v4038_v20  ;;  %2879 = vmatpush1.bf16.msra.mxu1 %v4041_v6  ;;  %v4121_v20 = vld [vmem:[%s5933_s3 + $0x67c] ss:$48 sps:$4 sm:$0xff]   ;;  %v4116_v6 = vld [vmem:[%s5933_s3 + $0x670] ss:$48 sps:$4 sm:$0xff]  }
 0x1a1   :  { %2778 = vmatprep.subr.bf16.mxu0 %v4046_v57  ;;  %2880 = vmatprep.subr.bf16.mxu1 %v4049_v5  ;;  %v4119_v57 = vld [vmem:[%s5933_s3 + $0x678] ss:$48 sps:$4 sm:$0xff]   ;;  %v4124_v5 = vld [vmem:[%s5933_s3 + $0x6d4] ss:$48 sps:$4 sm:$0xff]  }
 0x1a4   :  { %2779 = vmatpush1.bf16.msra.mxu0 %v4044_v58  ;;  %2881 = vmatpush1.bf16.msra.mxu1 %v4047_v59  ;;  %v4127_v58 = vld [vmem:[%s5933_s3 + $0x6dc] ss:$48 sps:$4 sm:$0xff]   ;;  %v4122_v59 = vld [vmem:[%s5933_s3 + $0x6d0] ss:$48 sps:$4 sm:$0xff]  }
 0x1a5   :  { %2780 = vmatprep.subr.bf16.mxu0 %v4052_v28  ;;  %2882 = vmatprep.subr.bf16.mxu1 %v4055_v60  ;;  %v4125_v28 = vld [vmem:[%s5933_s3 + $0x6d8] ss:$48 sps:$4 sm:$0xff]   ;;  %v4130_v60 = vld [vmem:[%s5933_s3 + $0x734] ss:$48 sps:$4 sm:$0xff]  }
 0x1a8   :  { %2781 = vmatpush1.bf16.msra.mxu0 %v4050_v61  ;;  %2883 = vmatpush1.bf16.msra.mxu1 %v4053_v63  ;;  %v4133_v61 = vld [vmem:[%s5933_s3 + $0x73c] ss:$48 sps:$4 sm:$0xff]   ;;  %v4128_v63 = vld [vmem:[%s5933_s3 + $0x730] ss:$48 sps:$4 sm:$0xff]  }
 0x1a9   :  { %2782 = vmatprep.subr.bf16.mxu0 %v4058_v19  ;;  %2884 = vmatprep.subr.bf16.mxu1 %v4061_v9  ;;  %v4131_v19 = vld [vmem:[%s5933_s3 + $0x738] ss:$48 sps:$4 sm:$0xff]   ;;  %v4136_v9 = vld [vmem:[%s5933_s3 + $0x794] ss:$48 sps:$4 sm:$0xff]  }
 0x1ac   :  { %2783 = vmatpush1.bf16.msra.mxu0 %v4056_v8  ;;  %2885 = vmatpush1.bf16.msra.mxu1 %v4059_v22  ;;  %v4139_v8 = vld [vmem:[%s5933_s3 + $0x79c] ss:$48 sps:$4 sm:$0xff]   ;;  %v4134_v22 = vld [vmem:[%s5933_s3 + $0x790] ss:$48 sps:$4 sm:$0xff]  }
 0x1ad   :  { %2784 = vmatprep.subr.bf16.mxu0 %v4064_v0  ;;  %2886 = vmatprep.subr.bf16.mxu1 %v4067_v1  ;;  %v4137_v0 = vld [vmem:[%s5933_s3 + $0x798] ss:$48 sps:$4 sm:$0xff]   ;;  %v4142_v1 = vld [vmem:[%s5933_s3 + $0x7f4] ss:$48 sps:$4 sm:$0xff]  }
 0x1b0   :  { %2785 = vmatpush1.bf16.msra.mxu0 %v4062_v2  ;;  %2887 = vmatpush1.bf16.msra.mxu1 %v4065_v3  ;;  %v4145_v2 = vld [vmem:[%s5933_s3 + $0x7fc] ss:$48 sps:$4 sm:$0xff]   ;;  %v4140_v3 = vld [vmem:[%s5933_s3 + $0x7f0] ss:$48 sps:$4 sm:$0xff]  }
 0x1b1   :  { %2786 = vmatprep.subr.bf16.mxu0 %v4070_v25  ;;  %2888 = vmatprep.subr.bf16.mxu1 %v4073_v26  ;;  %v4143_v25 = vld [vmem:[%s5933_s3 + $0x7f8] ss:$48 sps:$4 sm:$0xff]   ;;  %v4148_v26 = vld [vmem:[%s5933_s3 + $0x854] ss:$48 sps:$4 sm:$0xff]  }
 0x1b4   :  { %2787 = vmatpush1.bf16.msra.mxu0 %v4068_v27  ;;  %2889 = vmatpush1.bf16.msra.mxu1 %v4071_v7  ;;  %v4151_v27 = vld [vmem:[%s5933_s3 + $0x85c] ss:$48 sps:$4 sm:$0xff]   ;;  %v4146_v7 = vld [vmem:[%s5933_s3 + $0x850] ss:$48 sps:$4 sm:$0xff]  }
 0x1b5   :  { %2788 = vmatprep.subr.bf16.mxu0 %v4076_v29  ;;  %2890 = vmatprep.subr.bf16.mxu1 %v4079_v30  ;;  %v4149_v29 = vld [vmem:[%s5933_s3 + $0x858] ss:$48 sps:$4 sm:$0xff]   ;;  %v4154_v30 = vld [vmem:[%s5933_s3 + $0x8b4] ss:$48 sps:$4 sm:$0xff]  }
 0x1b8   :  { %2789 = vmatpush1.bf16.msra.mxu0 %v4074_v32  ;;  %2891 = vmatpush1.bf16.msra.mxu1 %v4077_v35  ;;  %v4157_v32 = vld [vmem:[%s5933_s3 + $0x8bc] ss:$48 sps:$4 sm:$0xff]   ;;  %v4152_v35 = vld [vmem:[%s5933_s3 + $0x8b0] ss:$48 sps:$4 sm:$0xff]  }
 0x1b9   :  { %2790 = vmatprep.subr.bf16.mxu0 %v4082_v36  ;;  %2892 = vmatprep.subr.bf16.mxu1 %v4085_v21  ;;  %v4155_v36 = vld [vmem:[%s5933_s3 + $0x8b8] ss:$48 sps:$4 sm:$0xff]   ;;  %v4160_v21 = vld [vmem:[%s5933_s3 + $0x914] ss:$48 sps:$4 sm:$0xff]  }
 0x1bc   :  { %2791 = vmatpush1.bf16.msra.mxu0 %v4080_v24  ;;  %2893 = vmatpush1.bf16.msra.mxu1 %v4083_v43  ;;  %v4163_v24 = vld [vmem:[%s5933_s3 + $0x91c] ss:$48 sps:$4 sm:$0xff]   ;;  %v4158_v43 = vld [vmem:[%s5933_s3 + $0x910] ss:$48 sps:$4 sm:$0xff]  }
 0x1bd   :  { %2792 = vmatprep.subr.bf16.mxu0 %v4088_v38  ;;  %2894 = vmatprep.subr.bf16.mxu1 %v4091_v39  ;;  %v4161_v38 = vld [vmem:[%s5933_s3 + $0x918] ss:$48 sps:$4 sm:$0xff]   ;;  %v4166_v39 = vld [vmem:[%s5933_s3 + $0x974] ss:$48 sps:$4 sm:$0xff]  }
 0x1c0   :  { %2793 = vmatpush1.bf16.msra.mxu0 %v4086_v40  ;;  %2895 = vmatpush1.bf16.msra.mxu1 %v4089_v4  ;;  %v4169_v40 = vld [vmem:[%s5933_s3 + $0x97c] ss:$48 sps:$4 sm:$0xff]   ;;  %v4164_v4 = vld [vmem:[%s5933_s3 + $0x970] ss:$48 sps:$4 sm:$0xff]  }
 0x1c1   :  { %2794 = vmatprep.subr.bf16.mxu0 %v4094_v41  ;;  %2896 = vmatprep.subr.bf16.mxu1 %v4097_v42  ;;  %v4167_v41 = vld [vmem:[%s5933_s3 + $0x978] ss:$48 sps:$4 sm:$0xff]   ;;  %v4172_v42 = vld [vmem:[%s5933_s3 + $0x9d4] ss:$48 sps:$4 sm:$0xff]  }
 0x1c4   :  { %2795 = vmatpush1.bf16.msra.mxu0 %v4092_v44  ;;  %2897 = vmatpush1.bf16.msra.mxu1 %v4095_v46  ;;  %v4175_v44 = vld [vmem:[%s5933_s3 + $0x9dc] ss:$48 sps:$4 sm:$0xff]   ;;  %v4170_v46 = vld [vmem:[%s5933_s3 + $0x9d0] ss:$48 sps:$4 sm:$0xff]  }
 0x1c5   :  { %2796 = vmatprep.subr.bf16.mxu0 %v4100_v14  ;;  %2898 = vmatprep.subr.bf16.mxu1 %v4103_v13  ;;  %v4173_v14 = vld [vmem:[%s5933_s3 + $0x9d8] ss:$48 sps:$4 sm:$0xff]   ;;  %v4178_v13 = vld [vmem:[%s5933_s3 + $0xa34] ss:$48 sps:$4 sm:$0xff]  }
 0x1c8   :  { %2797 = vmatpush1.bf16.msra.mxu0 %v4098_v11  ;;  %2899 = vmatpush1.bf16.msra.mxu1 %v4101_v47  ;;  %v4181_v11 = vld [vmem:[%s5933_s3 + $0xa3c] ss:$48 sps:$4 sm:$0xff]   ;;  %v4176_v47 = vld [vmem:[%s5933_s3 + $0xa30] ss:$48 sps:$4 sm:$0xff]  }
 0x1c9   :  { %2798 = vmatprep.subr.bf16.mxu0 %v4106_v10  ;;  %2900 = vmatprep.subr.bf16.mxu1 %v4109_v49  ;;  %v4179_v10 = vld [vmem:[%s5933_s3 + $0xa38] ss:$48 sps:$4 sm:$0xff]   ;;  %v4184_v49 = vld [vmem:[%s5933_s3 + $0xa94] ss:$48 sps:$4 sm:$0xff]  }
 0x1cc   :  { %2799 = vmatpush1.bf16.msra.mxu0 %v4104_v50  ;;  %2901 = vmatpush1.bf16.msra.mxu1 %v4107_v51  ;;  %v4187_v50 = vld [vmem:[%s5933_s3 + $0xa9c] ss:$48 sps:$4 sm:$0xff]   ;;  %v4182_v51 = vld [vmem:[%s5933_s3 + $0xa90] ss:$48 sps:$4 sm:$0xff]  }
 0x1cd   :  { %2819 = vmatprep.subr.bf16.mxu0 %v4112_v52  ;;  %2921 = vmatprep.subr.bf16.mxu1 %v4115_v17  ;;  %v4185_v52 = vld [vmem:[%s5933_s3 + $0xa98] ss:$48 sps:$4 sm:$0xff]   ;;  %v4190_v17 = vld [vmem:[%s5933_s3 + $0xaf4] ss:$48 sps:$4 sm:$0xff]  }
 0x1cf   :  { %2801 = vmatmul.mubr.bf16.vlgmr.msra.gmra.mrb[8].mxu0 %v4821_v23  ;;  %2903 = vmatmul.mubr.bf16.vlgmr.msra.gmra.mrb[8].mxu1 %v4821_v23 }
 0x1d0   :  { %2810 = vmatprep.mubr.bf16.mxu0 %v4841_v18  ;;  %2820 = vmatpush1.bf16.msra.mxu0 %v4110_v53  ;;  %v4193_v53 = vld [vmem:[%s5933_s3 + $0xafc] ss:$48 sps:$4 sm:$0xff]  }
 0x1d1   :  { %2912 = vmatprep.mubr.bf16.mxu1 %v4841_v18  ;;  %2922 = vmatpush1.bf16.msra.mxu1 %v4113_v55  ;;  %v4188_v55 = vld [vmem:[%s5933_s3 + $0xaf0] ss:$48 sps:$4 sm:$0xff]  }
 0x1d2   :  { %2821 = vmatprep.subr.bf16.mxu0 %v4118_v56  ;;  %2923 = vmatprep.subr.bf16.mxu1 %v4121_v20  ;;  %v4191_v56 = vld [vmem:[%s5933_s3 + $0xaf8] ss:$48 sps:$4 sm:$0xff]   ;;  %v4196_v20 = vld [vmem:[%s5933_s3 + $0xb54] ss:$48 sps:$4 sm:$0xff]  }
 0x1d4   :  { %2822 = vmatpush1.bf16.msra.mxu0 %v4116_v6  ;;  %v4199_v6 = vld [vmem:[%s5933_s3 + $0xb5c] ss:$48 sps:$4 sm:$0xff]  }
 0x1d5   :  { %2924 = vmatpush1.bf16.msra.mxu1 %v4119_v57  ;;  %2823 = vmatprep.subr.bf16.mxu0 %v4124_v5  ;;  %v4194_v57 = vld [vmem:[%s5933_s3 + $0xb50] ss:$48 sps:$4 sm:$0xff]   ;;  %v4197_v5 = vld [vmem:[%s5933_s3 + $0xb58] ss:$48 sps:$4 sm:$0xff]  }
 0x1d6   :  { %2925 = vmatprep.subr.bf16.mxu1 %v4127_v58  ;;  %v4202_v58 = vld [vmem:[%s5933_s3 + $0xbb4] ss:$48 sps:$4 sm:$0xff]  }
 0x1d7   :  { %2811 = vmatmul.mubr.bf16.gmra.mrb[12].mxu0 %v4869_v34  ;;  %2913 = vmatmul.mubr.bf16.gmra.mrb[12].mxu1 %v4869_v34 }
 0x1d8   :  { %2824 = vmatpush1.bf16.msra.mxu0 %v4122_v59  ;;  %2851 = vmatprep.mubr.bf16.mxu0 %v4880_v37  ;;  %v4205_v59 = vld [vmem:[%s5933_s3 + $0xbbc] ss:$48 sps:$4 sm:$0xff]  }
 0x1d9   :  { %2926 = vmatpush1.bf16.msra.mxu1 %v4125_v28  ;;  %2953 = vmatprep.mubr.bf16.mxu1 %v4880_v37  ;;  %v4200_v28 = vld [vmem:[%s5933_s3 + $0xbb0] ss:$48 sps:$4 sm:$0xff]  }
 0x1da   :  { %2825 = vmatprep.subr.bf16.mxu0 %v4130_v60  ;;  %2927 = vmatprep.subr.bf16.mxu1 %v4133_v61  ;;  %v4203_v60 = vld [vmem:[%s5933_s3 + $0xbb8] ss:$48 sps:$4 sm:$0xff]   ;;  %v4208_v61 = vld [vmem:[%s5933_s3 + $0x24] ss:$48 sps:$4 sm:$0xff]  }
 0x1dc   :  { %2826 = vmatpush1.bf16.msra.mxu0 %v4128_v63  ;;  %v4211_v63 = vld [vmem:[%s5933_s3 + $0x2c] ss:$48 sps:$4 sm:$0xff]  }
 0x1dd   :  { %2928 = vmatpush1.bf16.msra.mxu1 %v4131_v19  ;;  %2827 = vmatprep.subr.bf16.mxu0 %v4136_v9  ;;  %v4206_v19 = vld [vmem:[%s5933_s3 + $0x20] ss:$48 sps:$4 sm:$0xff]   ;;  %v4209_v9 = vld [vmem:[%s5933_s3 + $0x28] ss:$48 sps:$4 sm:$0xff]  }
 0x1de   :  { %2929 = vmatprep.subr.bf16.mxu1 %v4139_v8  ;;  %v4214_v8 = vld [vmem:[%s5933_s3 + $0x84] ss:$48 sps:$4 sm:$0xff]  }
 0x1e0   :  { %2828 = vmatpush1.bf16.msra.mxu0 %v4134_v22  ;;  %v4217_v22 = vld [vmem:[%s5933_s3 + $0x8c] ss:$48 sps:$4 sm:$0xff]  }
 0x1e1   :  { %2930 = vmatpush1.bf16.msra.mxu1 %v4137_v0  ;;  %2829 = vmatprep.subr.bf16.mxu0 %v4142_v1  ;;  %v4212_v0 = vld [vmem:[%s5933_s3 + $0x80] ss:$48 sps:$4 sm:$0xff]   ;;  %v4215_v1 = vld [vmem:[%s5933_s3 + $0x88] ss:$48 sps:$4 sm:$0xff]  }
 0x1e2   :  { %2931 = vmatprep.subr.bf16.mxu1 %v4145_v2  ;;  %v4220_v2 = vld [vmem:[%s5933_s3 + $0xe4] ss:$48 sps:$4 sm:$0xff]  }
 0x1e4   :  { %2830 = vmatpush1.bf16.msra.mxu0 %v4140_v3  ;;  %v4223_v3 = vld [vmem:[%s5933_s3 + $0xec] ss:$48 sps:$4 sm:$0xff]  }
 0x1e5   :  { %2932 = vmatpush1.bf16.msra.mxu1 %v4143_v25  ;;  %2831 = vmatprep.subr.bf16.mxu0 %v4148_v26  ;;  %v4218_v25 = vld [vmem:[%s5933_s3 + $0xe0] ss:$48 sps:$4 sm:$0xff]   ;;  %v4221_v26 = vld [vmem:[%s5933_s3 + $0xe8] ss:$48 sps:$4 sm:$0xff]  }
 0x1e6   :  { %2933 = vmatprep.subr.bf16.mxu1 %v4151_v27  ;;  %v4226_v27 = vld [vmem:[%s5933_s3 + $0x144] ss:$48 sps:$4 sm:$0xff]  }
 0x1e8   :  { %2832 = vmatpush1.bf16.msra.mxu0 %v4146_v7  ;;  %v4229_v7 = vld [vmem:[%s5933_s3 + $0x14c] ss:$48 sps:$4 sm:$0xff]  }
 0x1e9   :  { %2934 = vmatpush1.bf16.msra.mxu1 %v4149_v29  ;;  %2833 = vmatprep.subr.bf16.mxu0 %v4154_v30  ;;  %v4224_v29 = vld [vmem:[%s5933_s3 + $0x140] ss:$48 sps:$4 sm:$0xff]   ;;  %v4227_v30 = vld [vmem:[%s5933_s3 + $0x148] ss:$48 sps:$4 sm:$0xff]  }
 0x1ea   :  { %2935 = vmatprep.subr.bf16.mxu1 %v4157_v32  ;;  %v4232_v32 = vld [vmem:[%s5933_s3 + $0x1a4] ss:$48 sps:$4 sm:$0xff]  }
 0x1ec   :  { %2834 = vmatpush1.bf16.msra.mxu0 %v4152_v35  ;;  %v4235_v35 = vld [vmem:[%s5933_s3 + $0x1ac] ss:$48 sps:$4 sm:$0xff]  }
 0x1ed   :  { %2936 = vmatpush1.bf16.msra.mxu1 %v4155_v36  ;;  %2835 = vmatprep.subr.bf16.mxu0 %v4160_v21  ;;  %v4233_v36 = vld [vmem:[%s5933_s3 + $0x1a8] ss:$48 sps:$4 sm:$0xff]   ;;  %v4238_v21 = vld [vmem:[%s5933_s3 + $0x204] ss:$48 sps:$4 sm:$0xff]  }
 0x1ee   :  { %2937 = vmatprep.subr.bf16.mxu1 %v4163_v24  ;;  %v4241_v24 = vld [vmem:[%s5933_s3 + $0x20c] ss:$48 sps:$4 sm:$0xff]  }
 0x1f0   :  { %2836 = vmatpush1.bf16.msra.mxu0 %v4158_v43  ;;  %v4236_v43 = vld [vmem:[%s5933_s3 + $0x200] ss:$48 sps:$4 sm:$0xff]  }
 0x1f1   :  { %2938 = vmatpush1.bf16.msra.mxu1 %v4161_v38  ;;  %2837 = vmatprep.subr.bf16.mxu0 %v4166_v39  ;;  %v4239_v38 = vld [vmem:[%s5933_s3 + $0x208] ss:$48 sps:$4 sm:$0xff]   ;;  %v4244_v39 = vld [vmem:[%s5933_s3 + $0x264] ss:$48 sps:$4 sm:$0xff]  }
 0x1f2   :  { %2939 = vmatprep.subr.bf16.mxu1 %v4169_v40  ;;  %v4247_v40 = vld [vmem:[%s5933_s3 + $0x26c] ss:$48 sps:$4 sm:$0xff]  }
 0x1f4   :  { %2838 = vmatpush1.bf16.msra.mxu0 %v4164_v4  ;;  %v4242_v4 = vld [vmem:[%s5933_s3 + $0x260] ss:$48 sps:$4 sm:$0xff]  }
 0x1f5   :  { %2940 = vmatpush1.bf16.msra.mxu1 %v4167_v41  ;;  %2839 = vmatprep.subr.bf16.mxu0 %v4172_v42  ;;  %v4245_v41 = vld [vmem:[%s5933_s3 + $0x268] ss:$48 sps:$4 sm:$0xff]   ;;  %v4250_v42 = vld [vmem:[%s5933_s3 + $0x2c4] ss:$48 sps:$4 sm:$0xff]  }
 0x1f6   :  { %2941 = vmatprep.subr.bf16.mxu1 %v4175_v44  ;;  %v4253_v44 = vld [vmem:[%s5933_s3 + $0x2cc] ss:$48 sps:$4 sm:$0xff]  }
 0x1f8   :  { %2840 = vmatpush1.bf16.msra.mxu0 %v4170_v46  ;;  %v4248_v46 = vld [vmem:[%s5933_s3 + $0x2c0] ss:$48 sps:$4 sm:$0xff]  }
 0x1f9   :  { %2942 = vmatpush1.bf16.msra.mxu1 %v4173_v14  ;;  %2841 = vmatprep.subr.bf16.mxu0 %v4178_v13  ;;  %v4251_v14 = vld [vmem:[%s5933_s3 + $0x2c8] ss:$48 sps:$4 sm:$0xff]   ;;  %v4256_v13 = vld [vmem:[%s5933_s3 + $0x324] ss:$48 sps:$4 sm:$0xff]  }
 0x1fa   :  { %2943 = vmatprep.subr.bf16.mxu1 %v4181_v11  ;;  %v4259_v11 = vld [vmem:[%s5933_s3 + $0x32c] ss:$48 sps:$4 sm:$0xff]  }
 0x1fc   :  { %2842 = vmatpush1.bf16.msra.mxu0 %v4176_v47  ;;  %v4254_v47 = vld [vmem:[%s5933_s3 + $0x320] ss:$48 sps:$4 sm:$0xff]  }
 0x1fd   :  { %2944 = vmatpush1.bf16.msra.mxu1 %v4179_v10  ;;  %2843 = vmatprep.subr.bf16.mxu0 %v4184_v49  ;;  %v4257_v10 = vld [vmem:[%s5933_s3 + $0x328] ss:$48 sps:$4 sm:$0xff]   ;;  %v4262_v49 = vld [vmem:[%s5933_s3 + $0x384] ss:$48 sps:$4 sm:$0xff]  }
 0x1fe   :  { %2945 = vmatprep.subr.bf16.mxu1 %v4187_v50  ;;  %v4265_v50 = vld [vmem:[%s5933_s3 + $0x38c] ss:$48 sps:$4 sm:$0xff]  }
 0x200   :  { %2844 = vmatpush1.bf16.msra.mxu0 %v4182_v51  ;;  %v4260_v51 = vld [vmem:[%s5933_s3 + $0x380] ss:$48 sps:$4 sm:$0xff]  }
 0x201   :  { %2946 = vmatpush1.bf16.msra.mxu1 %v4185_v52  ;;  %2845 = vmatprep.subr.bf16.mxu0 %v4190_v17  ;;  %v4263_v52 = vld [vmem:[%s5933_s3 + $0x388] ss:$48 sps:$4 sm:$0xff]   ;;  %v4268_v17 = vld [vmem:[%s5933_s3 + $0x3e4] ss:$48 sps:$4 sm:$0xff]  }
 0x202   :  { %2947 = vmatprep.subr.bf16.mxu1 %v4193_v53  ;;  %v4271_v53 = vld [vmem:[%s5933_s3 + $0x3ec] ss:$48 sps:$4 sm:$0xff]  }
 0x204   :  { %2846 = vmatpush1.bf16.msra.mxu0 %v4188_v55  ;;  %v4266_v55 = vld [vmem:[%s5933_s3 + $0x3e0] ss:$48 sps:$4 sm:$0xff]  }
 0x205   :  { %2948 = vmatpush1.bf16.msra.mxu1 %v4191_v56  ;;  %2847 = vmatprep.subr.bf16.mxu0 %v4196_v20  ;;  %v4269_v56 = vld [vmem:[%s5933_s3 + $0x3e8] ss:$48 sps:$4 sm:$0xff]   ;;  %v4274_v20 = vld [vmem:[%s5933_s3 + $0x444] ss:$48 sps:$4 sm:$0xff]  }
 0x206   :  { %2949 = vmatprep.subr.bf16.mxu1 %v4199_v6  ;;  %v4277_v6 = vld [vmem:[%s5933_s3 + $0x44c] ss:$48 sps:$4 sm:$0xff]  }
 0x208   :  { %2848 = vmatpush1.bf16.msra.mxu0 %v4194_v57  ;;  %v4272_v57 = vld [vmem:[%s5933_s3 + $0x440] ss:$48 sps:$4 sm:$0xff]  }
 0x209   :  { %2950 = vmatpush1.bf16.msra.mxu1 %v4197_v5  ;;  %2849 = vmatprep.subr.bf16.mxu0 %v4202_v58  ;;  %v4275_v5 = vld [vmem:[%s5933_s3 + $0x448] ss:$48 sps:$4 sm:$0xff]   ;;  %v4280_v58 = vld [vmem:[%s5933_s3 + $0x4a4] ss:$48 sps:$4 sm:$0xff]  }
 0x20a   :  { %2951 = vmatprep.subr.bf16.mxu1 %v4205_v59  ;;  %v4283_v59 = vld [vmem:[%s5933_s3 + $0x4ac] ss:$48 sps:$4 sm:$0xff]  }
 0x20c   :  { %2850 = vmatpush1.bf16.msra.mxu0 %v4200_v28  ;;  %v4278_v28 = vld [vmem:[%s5933_s3 + $0x4a0] ss:$48 sps:$4 sm:$0xff]  }
 0x20d   :  { %2952 = vmatpush1.bf16.msra.mxu1 %v4203_v60  ;;  %2972 = vmatprep.subr.bf16.mxu0 %v4208_v61  ;;  %v4281_v60 = vld [vmem:[%s5933_s3 + $0x4a8] ss:$48 sps:$4 sm:$0xff]   ;;  %v4286_v61 = vld [vmem:[%s5933_s3 + $0x504] ss:$48 sps:$4 sm:$0xff]  }
 0x20e   :  { %3074 = vmatprep.subr.bf16.mxu1 %v4211_v63  ;;  %v4289_v63 = vld [vmem:[%s5933_s3 + $0x50c] ss:$48 sps:$4 sm:$0xff]  }
 0x20f   :  { %2852 = vmatmul.mubr.bf16.vlgmr.msra.gmra.mrb[8].mxu0 %v4827_v12 }
 0x210   :  { %2954 = vmatmul.mubr.bf16.vlgmr.msra.gmra.mrb[8].mxu1 %v4827_v12  ;;  %2861 = vmatprep.mubr.bf16.mxu0 %v5050_v45 }
 0x211   :  { %2963 = vmatprep.mubr.bf16.mxu1 %v5050_v45  ;;  %2973 = vmatpush1.bf16.msra.mxu0 %v4206_v19  ;;  %v4284_v19 = vld [vmem:[%s5933_s3 + $0x500] ss:$48 sps:$4 sm:$0xff]  }
 0x212   :  { %3075 = vmatpush1.bf16.msra.mxu1 %v4209_v9  ;;  %2974 = vmatprep.subr.bf16.mxu0 %v4214_v8  ;;  %v4287_v9 = vld [vmem:[%s5933_s3 + $0x508] ss:$48 sps:$4 sm:$0xff]   ;;  %v4292_v8 = vld [vmem:[%s5933_s3 + $0x564] ss:$48 sps:$4 sm:$0xff]  }
 0x213   :  { %3076 = vmatprep.subr.bf16.mxu1 %v4217_v22  ;;  %v4295_v22 = vld [vmem:[%s5933_s3 + $0x56c] ss:$48 sps:$4 sm:$0xff]  }
 0x215   :  { %2975 = vmatpush1.bf16.msra.mxu0 %v4212_v0  ;;  %v4290_v0 = vld [vmem:[%s5933_s3 + $0x560] ss:$48 sps:$4 sm:$0xff]  }
 0x216   :  { %3077 = vmatpush1.bf16.msra.mxu1 %v4215_v1  ;;  %2976 = vmatprep.subr.bf16.mxu0 %v4220_v2  ;;  %v4293_v1 = vld [vmem:[%s5933_s3 + $0x568] ss:$48 sps:$4 sm:$0xff]   ;;  %v4298_v2 = vld [vmem:[%s5933_s3 + $0x5c4] ss:$48 sps:$4 sm:$0xff]  }
 0x217   :  { %2862 = vmatmul.mubr.bf16.gmra.mrb[12].mxu0 %v5076_v48  ;;  %3078 = vmatprep.subr.bf16.mxu1 %v4223_v3  ;;  %v4301_v3 = vld [vmem:[%s5933_s3 + $0x5cc] ss:$48 sps:$4 sm:$0xff]  }
 0x218   :  { %2964 = vmatmul.mubr.bf16.gmra.mrb[12].mxu1 %v5076_v48  ;;  %3004 = vmatprep.mubr.bf16.mxu0 %v4813_v62 }
 0x219   :  { %2977 = vmatpush1.bf16.msra.mxu0 %v4218_v25  ;;  %3106 = vmatprep.mubr.bf16.mxu1 %v4813_v62  ;;  %v4230_v62 = vld [vmem:[%s5933_s3 + $0x1a0] ss:$48 sps:$4 sm:$0xff]  }
 0x21a   :  { %3079 = vmatpush1.bf16.msra.mxu1 %v4221_v26  ;;  %2978 = vmatprep.subr.bf16.mxu0 %v4226_v27  ;;  %v4296_v25 = vld [vmem:[%s5933_s3 + $0x5c0] ss:$48 sps:$4 sm:$0xff]   ;;  %v4299_v26 = vld [vmem:[%s5933_s3 + $0x5c8] ss:$48 sps:$4 sm:$0xff]   ;;  %v4304_v27 = vld [vmem:[%s5933_s3 + $0x624] ss:$48 sps:$4 sm:$0xff]  }
 0x21b   :  { %3080 = vmatprep.subr.bf16.mxu1 %v4229_v7  ;;  %v4307_v7 = vld [vmem:[%s5933_s3 + $0x62c] ss:$48 sps:$4 sm:$0xff]  }
 0x21d   :  { %2979 = vmatpush1.bf16.msra.mxu0 %v4224_v29  ;;  %v4302_v29 = vld [vmem:[%s5933_s3 + $0x620] ss:$48 sps:$4 sm:$0xff]  }
 0x21e   :  { %3081 = vmatpush1.bf16.msra.mxu1 %v4227_v30  ;;  %2980 = vmatprep.subr.bf16.mxu0 %v4232_v32  ;;  %v4305_v30 = vld [vmem:[%s5933_s3 + $0x628] ss:$48 sps:$4 sm:$0xff]   ;;  %v4310_v32 = vld [vmem:[%s5933_s3 + $0x684] ss:$48 sps:$4 sm:$0xff]  }
 0x21f   :  { %3082 = vmatprep.subr.bf16.mxu1 %v4235_v35  ;;  %v4313_v35 = vld [vmem:[%s5933_s3 + $0x68c] ss:$48 sps:$4 sm:$0xff]  }
 0x221   :  { %2981 = vmatpush1.bf16.msra.mxu0 %v4230_v62  ;;  %v4308_v62 = vld [vmem:[%s5933_s3 + $0x680] ss:$48 sps:$4 sm:$0xff]  }
 0x222   :  { %3083 = vmatpush1.bf16.msra.mxu1 %v4233_v36  ;;  %2982 = vmatprep.subr.bf16.mxu0 %v4238_v21  ;;  %v4311_v36 = vld [vmem:[%s5933_s3 + $0x688] ss:$48 sps:$4 sm:$0xff]   ;;  %v4316_v21 = vld [vmem:[%s5933_s3 + $0x6e4] ss:$48 sps:$4 sm:$0xff]  }
 0x223   :  { %3084 = vmatprep.subr.bf16.mxu1 %v4241_v24  ;;  %v4317_v24 = vld [vmem:[%s5933_s3 + $0x6e8] ss:$48 sps:$4 sm:$0xff]  }
 0x225   :  { %2983 = vmatpush1.bf16.msra.mxu0 %v4236_v43  ;;  %v4322_v43 = vld [vmem:[%s5933_s3 + $0x744] ss:$48 sps:$4 sm:$0xff]  }
 0x226   :  { %3085 = vmatpush1.bf16.msra.mxu1 %v4239_v38  ;;  %2984 = vmatprep.subr.bf16.mxu0 %v4244_v39  ;;  %v4325_v38 = vld [vmem:[%s5933_s3 + $0x74c] ss:$48 sps:$4 sm:$0xff]   ;;  %v4320_v39 = vld [vmem:[%s5933_s3 + $0x740] ss:$48 sps:$4 sm:$0xff]  }
 0x227   :  { %3086 = vmatprep.subr.bf16.mxu1 %v4247_v40  ;;  %v4323_v40 = vld [vmem:[%s5933_s3 + $0x748] ss:$48 sps:$4 sm:$0xff]  }
 0x229   :  { %2985 = vmatpush1.bf16.msra.mxu0 %v4242_v4  ;;  %v4328_v4 = vld [vmem:[%s5933_s3 + $0x7a4] ss:$48 sps:$4 sm:$0xff]  }
 0x22a   :  { %3087 = vmatpush1.bf16.msra.mxu1 %v4245_v41  ;;  %2986 = vmatprep.subr.bf16.mxu0 %v4250_v42  ;;  %v4326_v41 = vld [vmem:[%s5933_s3 + $0x7a0] ss:$48 sps:$4 sm:$0xff]  }
 0x22b   :  { %3088 = vmatprep.subr.bf16.mxu1 %v4253_v44 }
 0x22d   :  { %2987 = vmatpush1.bf16.msra.mxu0 %v4248_v46  ;;  %v4329_v46 = vld [vmem:[%s5933_s3 + $0x7a8] ss:$48 sps:$4 sm:$0xff]  }
 0x22e   :  { %3089 = vmatpush1.bf16.msra.mxu1 %v4251_v14  ;;  %2988 = vmatprep.subr.bf16.mxu0 %v4256_v13 }
 0x22f   :  { %3090 = vmatprep.subr.bf16.mxu1 %v4259_v11  ;;  %v4334_v11 = vld [vmem:[%s5933_s3 + $0x804] ss:$48 sps:$4 sm:$0xff]  }
 0x231   :  { %2989 = vmatpush1.bf16.msra.mxu0 %v4254_v47  ;;  %v4337_v47 = vld [vmem:[%s5933_s3 + $0x80c] ss:$48 sps:$4 sm:$0xff]  }
 0x232   :  { %3091 = vmatpush1.bf16.msra.mxu1 %v4257_v10  ;;  %2990 = vmatprep.subr.bf16.mxu0 %v4262_v49 }
 0x233   :  { %3092 = vmatprep.subr.bf16.mxu1 %v4265_v50 }
 0x235   :  { %2991 = vmatpush1.bf16.msra.mxu0 %v4260_v51 }
 0x236   :  { %3093 = vmatpush1.bf16.msra.mxu1 %v4263_v52  ;;  %2992 = vmatprep.subr.bf16.mxu0 %v4268_v17 }
 0x237   :  { %3094 = vmatprep.subr.bf16.mxu1 %v4271_v53  ;;  %v4332_v53 = vld [vmem:[%s5933_s3 + $0x800] ss:$48 sps:$4 sm:$0xff]  }
 0x239   :  { %2993 = vmatpush1.bf16.msra.mxu0 %v4266_v55 }
 0x23a   :  { %3095 = vmatpush1.bf16.msra.mxu1 %v4269_v56  ;;  %2994 = vmatprep.subr.bf16.mxu0 %v4274_v20  ;;  %v4335_v20 = vld [vmem:[%s5933_s3 + $0x808] ss:$48 sps:$4 sm:$0xff]  }
 0x23b   :  { %3096 = vmatprep.subr.bf16.mxu1 %v4277_v6 }
 0x23d   :  { %2995 = vmatpush1.bf16.msra.mxu0 %v4272_v57 }
 0x23e   :  { %3097 = vmatpush1.bf16.msra.mxu1 %v4275_v5  ;;  %2996 = vmatprep.subr.bf16.mxu0 %v4280_v58  ;;  %v4340_v5 = vld [vmem:[%s5933_s3 + $0x864] ss:$48 sps:$4 sm:$0xff]  }
 0x23f   :  { %3098 = vmatprep.subr.bf16.mxu1 %v4283_v59 }
 0x241   :  { %2997 = vmatpush1.bf16.msra.mxu0 %v4278_v28 }
 0x242   :  { %3099 = vmatpush1.bf16.msra.mxu1 %v4281_v60  ;;  %2998 = vmatprep.subr.bf16.mxu0 %v4286_v61  ;;  %v4343_v61 = vld [vmem:[%s5933_s3 + $0x86c] ss:$48 sps:$4 sm:$0xff]  }
 0x243   :  { %3100 = vmatprep.subr.bf16.mxu1 %v4289_v63 }
 0x245   :  { %2999 = vmatpush1.bf16.msra.mxu0 %v4284_v19 }
 0x246   :  { %3101 = vmatpush1.bf16.msra.mxu1 %v4287_v9  ;;  %3000 = vmatprep.subr.bf16.mxu0 %v4292_v8 }
 0x247   :  { %3102 = vmatprep.subr.bf16.mxu1 %v4295_v22  ;;  %v4338_v22 = vld [vmem:[%s5933_s3 + $0x860] ss:$48 sps:$4 sm:$0xff]  }
 0x249   :  { %3001 = vmatpush1.bf16.msra.mxu0 %v4290_v0 }
 0x24a   :  { %3103 = vmatpush1.bf16.msra.mxu1 %v4293_v1  ;;  %3002 = vmatprep.subr.bf16.mxu0 %v4298_v2  ;;  %v4341_v2 = vld [vmem:[%s5933_s3 + $0x868] ss:$48 sps:$4 sm:$0xff]  }
 0x24b   :  { %3104 = vmatprep.subr.bf16.mxu1 %v4301_v3  ;;  %v4346_v3 = vld [vmem:[%s5933_s3 + $0x8c4] ss:$48 sps:$4 sm:$0xff]  }
 0x24d   :  { %3003 = vmatpush1.bf16.msra.mxu0 %v4296_v25  ;;  %v4349_v25 = vld [vmem:[%s5933_s3 + $0x8cc] ss:$48 sps:$4 sm:$0xff]  }
 0x24e   :  { %3105 = vmatpush1.bf16.msra.mxu1 %v4299_v26  ;;  %3023 = vmatprep.subr.bf16.mxu0 %v4304_v27 }
 0x24f   :  { %3125 = vmatprep.subr.bf16.mxu1 %v4307_v7 }
 0x250   :  { %3005 = vmatmul.mubr.bf16.vlgmr.msra.gmra.mrb[16].mxu0 %v4821_v23 }
 0x251   :  { %3107 = vmatmul.mubr.bf16.vlgmr.msra.gmra.mrb[16].mxu1 %v4821_v23  ;;  %3014 = vmatprep.mubr.bf16.mxu0 %v4841_v18  ;;  %v4319_v23 = vld [vmem:[%s5933_s3 + $0x6ec] ss:$48 sps:$4 sm:$0xff]  }
 0x252   :  { %3024 = vmatpush1.bf16.msra.mxu0 %v4302_v29  ;;  %3116 = vmatprep.mubr.bf16.mxu1 %v4841_v18  ;;  %v4314_v18 = vld [vmem:[%s5933_s3 + $0x6e0] ss:$48 sps:$4 sm:$0xff]  }
 0x253   :  { %3126 = vmatpush1.bf16.msra.mxu1 %v4305_v30  ;;  %3025 = vmatprep.subr.bf16.mxu0 %v4310_v32 }
 0x254   :  { %3127 = vmatprep.subr.bf16.mxu1 %v4313_v35  ;;  %v4344_v35 = vld [vmem:[%s5933_s3 + $0x8c0] ss:$48 sps:$4 sm:$0xff]  }
 0x256   :  { %3026 = vmatpush1.bf16.msra.mxu0 %v4308_v62 }
 0x257   :  { %3128 = vmatpush1.bf16.msra.mxu1 %v4311_v36  ;;  %3027 = vmatprep.subr.bf16.mxu0 %v4316_v21  ;;  %v4347_v21 = vld [vmem:[%s5933_s3 + $0x8c8] ss:$48 sps:$4 sm:$0xff]  }
 0x258   :  { %3015 = vmatmul.mubr.bf16.gmra.mrb[20].mxu0 %v4869_v34  ;;  %3129 = vmatprep.subr.bf16.mxu1 %v4319_v23 }
 0x259   :  { %3117 = vmatmul.mubr.bf16.gmra.mrb[20].mxu1 %v4869_v34  ;;  %3055 = vmatprep.mubr.bf16.mxu0 %v4880_v37  ;;  %v5706_v34 = vld [vmem:[%s5936_s4] sm:$0xff] }
 0x25a   :  { %3028 = vmatpush1.bf16.msra.mxu0 %v4314_v18  ;;  %3157 = vmatprep.mubr.bf16.mxu1 %v4880_v37  ;;  %v4331_v37 = vld [vmem:[%s5933_s3 + $0x7ac] ss:$48 sps:$4 sm:$0xff]   ;;  %v587_v42 = vrot.slane %v5706_v34, %v4784_v33  ;;  %v595_v44 = vrot.slane %v5706_v34, %v4775_v31  ;;  %v591_v14 = vrot.slane %v5706_v34, %v4781_v16 }
 0x25b   :  { %3130 = vmatpush1.bf16.msra.mxu1 %v4317_v24  ;;  %3029 = vmatprep.subr.bf16.mxu0 %v4322_v43  ;;  %v599_v13 = vrot.slane %v5706_v34, %v4806_v54  ;;  %v4352_v24 = vld [vmem:[%s5933_s3 + $0x924] ss:$48 sps:$4 sm:$0xff]  }
 0x25c   :  { %3131 = vmatprep.subr.bf16.mxu1 %v4325_v38 }
 0x25e   :  { %3030 = vmatpush1.bf16.msra.mxu0 %v4320_v39  ;;  %v4355_v39 = vld [vmem:[%s5933_s3 + $0x92c] ss:$48 sps:$4 sm:$0xff]  }
 0x25f   :  { %3132 = vmatpush1.bf16.msra.mxu1 %v4323_v40  ;;  %3031 = vmatprep.subr.bf16.mxu0 %v4328_v4 }
 0x260   :  { %3133 = vmatprep.subr.bf16.mxu1 %v4331_v37  ;;  %v4350_v37 = vld [vmem:[%s5933_s3 + $0x920] ss:$48 sps:$4 sm:$0xff]  }
 0x261   :  { %v2649_v10 = vpop.f32.mrb[0].mxu0  ;;  %v2751_v49 = vpop.f32.mrb[0].mxu1 }
 0x262   :  { %3032 = vmatpush1.bf16.msra.mxu0 %v4326_v41  ;;  %v3738_v50 = vadd.f32 %v2649_v10, %v587_v42  ;;  %v3744_v51 = vadd.f32 %v2751_v49, %v595_v44  ;;  %v2651_v52 = vpop.f32.mrb[1].mxu0  ;;  %v2753_v17 = vpop.f32.mrb[1].mxu1  ;;  %v4353_v41 = vld [vmem:[%s5933_s3 + $0x928] ss:$48 sps:$4 sm:$0xff]   ;;  %v4370_v49 = vld [vmem:[%s5933_s3 + $0xa44] ss:$48 sps:$4 sm:$0xff]  }
 0x263   :  { %3134 = vmatpush1.bf16.msra.mxu1 %v4329_v46  ;;  %v3739_v55 = vadd.f32 %v2651_v52, %v591_v14  ;;  %v3745_v56 = vadd.f32 %v2753_v17, %v599_v13  ;;  %3033 = vmatprep.subr.bf16.mxu0 %v4334_v11  ;;  %v2653_v6 = vpop.f32.mrb[2].mxu0  ;;  %v2755_v57 = vpop.f32.mrb[2].mxu1  ;;  %v4356_v46 = vld [vmem:[%s5933_s3 + $0x980] ss:$48 sps:$4 sm:$0xff]   ;;  %v4367_v11 = vld [vmem:[%s5933_s3 + $0x9ec] ss:$48 sps:$4 sm:$0xff]  }
 0x264   :  { %3135 = vmatprep.subr.bf16.mxu1 %v4337_v47  ;;  %v3740_v58 = vadd.f32 %v2653_v6, %v587_v42  ;;  %v3746_v59 = vadd.f32 %v2755_v57, %v595_v44  ;;  %v2655_v28 = vpop.f32.mrb[3].mxu0  ;;  %v2757_v60 = vpop.f32.mrb[3].mxu1  ;;  %v4362_v47 = vld [vmem:[%s5933_s3 + $0x9e0] ss:$48 sps:$4 sm:$0xff]   ;;  %v4365_v10 = vld [vmem:[%s5933_s3 + $0x9e8] ss:$48 sps:$4 sm:$0xff]  }
 0x265   :  { %v3720_v63 = vpack.c.bf16 %v3739_v55, %v3738_v50  ;;  %v3721_v19 = vpack.c.bf16 %v3745_v56, %v3744_v51  ;;  %v3741_v9 = vadd.f32 %v2655_v28, %v591_v14  ;;  %v3747_v8 = vadd.f32 %v2757_v60, %v599_v13  ;;  %v4373_v50 = vld [vmem:[%s5933_s3 + $0xa4c] ss:$48 sps:$4 sm:$0xff]   ;;  %v4368_v51 = vld [vmem:[%s5933_s3 + $0xa40] ss:$48 sps:$4 sm:$0xff]   ;;  %v4371_v52 = vld [vmem:[%s5933_s3 + $0xa48] ss:$48 sps:$4 sm:$0xff]  }
 0x266   :  { %3034 = vmatpush1.bf16.msra.mxu0 %v4332_v53  ;;  %v4376_v17 = vld [vmem:[%s5933_s3 + $0xaa4] ss:$48 sps:$4 sm:$0xff]   ;;  %v4379_v53 = vld [vmem:[%s5933_s3 + $0xaac] ss:$48 sps:$4 sm:$0xff]   ;;  %v4374_v55 = vld [vmem:[%s5933_s3 + $0xaa0] ss:$48 sps:$4 sm:$0xff]  }
 0x267   :  { %3296 = vst [vmem:[%s5937_s5] sm:$0xff] %v3720_v63  ;;  %3297 = vst [vmem:[%s5937_s5 + $0x8] sm:$0xff] %v3721_v19  ;;  %3136 = vmatpush1.bf16.msra.mxu1 %v4335_v20  ;;  %v3726_v0 = vpack.c.bf16 %v3741_v9, %v3740_v58  ;;  %v3727_v1 = vpack.c.bf16 %v3747_v8, %v3746_v59  ;;  %3035 = vmatprep.subr.bf16.mxu0 %v4340_v5  ;;  %v4377_v56 = vld [vmem:[%s5933_s3 + $0xaa8] ss:$48 sps:$4 sm:$0xff]   ;;  %v4382_v20 = vld [vmem:[%s5933_s3 + $0xb04] ss:$48 sps:$4 sm:$0xff]   ;;  %v602_v8 = vsub.s32 4, %v4772_v15 }
 0x268   :  { %3137 = vmatprep.subr.bf16.mxu1 %v4343_v61  ;;  %v4385_v6 = vld [vmem:[%s5933_s3 + $0xb0c] ss:$48 sps:$4 sm:$0xff]   ;;  %v4380_v57 = vld [vmem:[%s5933_s3 + $0xb00] ss:$48 sps:$4 sm:$0xff]   ;;  %v4383_v5 = vld [vmem:[%s5933_s3 + $0xb08] ss:$48 sps:$4 sm:$0xff]  }
 0x269   :  { %3302 = vst [vmem:[%s5937_s5 + $0x30] sm:$0xff] %v3726_v0  ;;  %3303 = vst [vmem:[%s5937_s5 + $0x38] sm:$0xff] %v3727_v1  ;;  %v2659_v26 = vpop.f32.mrb[4].mxu0  ;;  %v2761_v27 = vpop.f32.mrb[4].mxu1  ;;  %v4388_v58 = vld [vmem:[%s5933_s3 + $0xb64] ss:$48 sps:$4 sm:$0xff]  }
 0x26a   :  { %3036 = vmatpush1.bf16.msra.mxu0 %v4338_v22  ;;  %v3742_v7 = vadd.f32 %v2659_v26, %v587_v42  ;;  %v3748_v29 = vadd.f32 %v2761_v27, %v595_v44  ;;  %v2661_v30 = vpop.f32.mrb[5].mxu0  ;;  %v2763_v32 = vpop.f32.mrb[5].mxu1  ;;  %v4358_v42 = vld [vmem:[%s5933_s3 + $0x984] ss:$48 sps:$4 sm:$0xff]   ;;  %v4361_v44 = vld [vmem:[%s5933_s3 + $0x98c] ss:$48 sps:$4 sm:$0xff]  }
 0x26b   :  { %3138 = vmatpush1.bf16.msra.mxu1 %v4341_v2  ;;  %v3743_v62 = vadd.f32 %v2661_v30, %v591_v14  ;;  %v3749_v36 = vadd.f32 %v2763_v32, %v599_v13  ;;  %3037 = vmatprep.subr.bf16.mxu0 %v4346_v3  ;;  %v2663_v23 = vpop.f32.mrb[6].mxu0  ;;  %v2765_v18 = vpop.f32.mrb[6].mxu1  ;;  %v4359_v14 = vld [vmem:[%s5933_s3 + $0x988] ss:$48 sps:$4 sm:$0xff]   ;;  %v4364_v13 = vld [vmem:[%s5933_s3 + $0x9e4] ss:$48 sps:$4 sm:$0xff]   ;;  %v603_v2 = vrot.slane %v5706_v34, %v602_v8 }
 0x26c   :  { %3139 = vmatprep.subr.bf16.mxu1 %v4349_v25  ;;  %v2664_v43 = vpop.f32.mrb[7].mxu0  ;;  %v2766_v38 = vpop.f32.mrb[7].mxu1  ;;  %v4391_v59 = vld [vmem:[%s5933_s3 + $0xb6c] ss:$48 sps:$4 sm:$0xff]   ;;  %v4386_v28 = vld [vmem:[%s5933_s3 + $0xb60] ss:$48 sps:$4 sm:$0xff]  }
 0x26d   :  { %v3732_v40 = vpack.c.bf16 %v3743_v62, %v3742_v7  ;;  %v3733_v4 = vpack.c.bf16 %v3749_v36, %v3748_v29  ;;  %v4389_v60 = vld [vmem:[%s5933_s3 + $0xb68] ss:$48 sps:$4 sm:$0xff]   ;;  %v4394_v61 = vld [vmem:[%s5933_s3 + $0xbc4] ss:$48 sps:$4 sm:$0xff]   ;;  %v4397_v63 = vld [vmem:[%s5933_s3 + $0xbcc] ss:$48 sps:$4 sm:$0xff]  }
 0x26e   :  { %3038 = vmatpush1.bf16.msra.mxu0 %v4344_v35  ;;  %v4392_v19 = vld [vmem:[%s5933_s3 + $0xbc0] ss:$48 sps:$4 sm:$0xff]   ;;  %v4395_v9 = vld [vmem:[%s5933_s3 + $0xbc8] ss:$48 sps:$4 sm:$0xff]   ;;  %v610_v22 = vsub.s32 6, %v4772_v15  ;;  %v606_v0 = vsub.s32 5, %v4772_v15 }
 0x26f   :  { %3308 = vst [vmem:[%s5937_s5 + $0x60] sm:$0x33] %v3732_v40  ;;  %3309 = vst [vmem:[%s5937_s5 + $0x68] sm:$0x33] %v3733_v4  ;;  %3140 = vmatpush1.bf16.msra.mxu1 %v4347_v21  ;;  %3039 = vmatprep.subr.bf16.mxu0 %v4352_v24  ;;  %v614_v1 = vsub.s32 7, %v4772_v15 }
 0x270   :  { %3141 = vmatprep.subr.bf16.mxu1 %v4355_v39  ;;  %v607_v3 = vrot.slane %v5706_v34, %v606_v0 }
 0x272   :  { %3040 = vmatpush1.bf16.msra.mxu0 %v4350_v37 }
 0x273   :  { %3142 = vmatpush1.bf16.msra.mxu1 %v4353_v41  ;;  %3041 = vmatprep.subr.bf16.mxu0 %v4358_v42 }
 0x274   :  { %3143 = vmatprep.subr.bf16.mxu1 %v4361_v44 }
 0x276   :  { %3042 = vmatpush1.bf16.msra.mxu0 %v4356_v46 }
 0x277   :  { %3144 = vmatpush1.bf16.msra.mxu1 %v4359_v14  ;;  %3043 = vmatprep.subr.bf16.mxu0 %v4364_v13 }
 0x278   :  { %3145 = vmatprep.subr.bf16.mxu1 %v4367_v11 }
 0x27a   :  { %3044 = vmatpush1.bf16.msra.mxu0 %v4362_v47 }
 0x27b   :  { %3146 = vmatpush1.bf16.msra.mxu1 %v4365_v10  ;;  %3045 = vmatprep.subr.bf16.mxu0 %v4370_v49 }
 0x27c   :  { %3147 = vmatprep.subr.bf16.mxu1 %v4373_v50 }
 0x27e   :  { %3046 = vmatpush1.bf16.msra.mxu0 %v4368_v51  ;;  %v581_v51 = vld [vmem:[%s5936_s4 + $0x8] sm:$0xf] }
 0x27f   :  { %3148 = vmatpush1.bf16.msra.mxu1 %v4371_v52  ;;  %3047 = vmatprep.subr.bf16.mxu0 %v4376_v17  ;;  %v619_v52 = vrot.slane %v581_v51, %v4784_v33  ;;  %v627_v17 = vrot.slane %v581_v51, %v4775_v31 }
 0x280   :  { %3149 = vmatprep.subr.bf16.mxu1 %v4379_v53  ;;  %v623_v53 = vrot.slane %v581_v51, %v4781_v16 }
 0x282   :  { %3048 = vmatpush1.bf16.msra.mxu0 %v4374_v55  ;;  %v631_v55 = vrot.slane %v581_v51, %v4806_v54 }
 0x283   :  { %3150 = vmatpush1.bf16.msra.mxu1 %v4377_v56  ;;  %3049 = vmatprep.subr.bf16.mxu0 %v4382_v20 }
 0x284   :  { %3151 = vmatprep.subr.bf16.mxu1 %v4385_v6 }
 0x286   :  { %3050 = vmatpush1.bf16.msra.mxu0 %v4380_v57 }
 0x287   :  { %3152 = vmatpush1.bf16.msra.mxu1 %v4383_v5  ;;  %3051 = vmatprep.subr.bf16.mxu0 %v4388_v58 }
 0x288   :  { %3153 = vmatprep.subr.bf16.mxu1 %v4391_v59 }
 0x28a   :  { %3052 = vmatpush1.bf16.msra.mxu0 %v4386_v28 }
 0x28b   :  { %3154 = vmatpush1.bf16.msra.mxu1 %v4389_v60  ;;  %3053 = vmatprep.subr.bf16.mxu0 %v4394_v61 }
 0x28c   :  { %3155 = vmatprep.subr.bf16.mxu1 %v4397_v63 }
 0x28e   :  { %3054 = vmatpush1.bf16.msra.mxu0 %v4392_v19 }
 0x28f   :  { %3156 = vmatpush1.bf16.msra.mxu1 %v4395_v9 }
 0x291   :  { %3056 = vmatmul.mubr.bf16.vlgmr.msra.gmra.mrb[16].mxu0 %v4827_v12 }
 0x292   :  { %3158 = vmatmul.mubr.bf16.vlgmr.msra.gmra.mrb[16].mxu1 %v4827_v12  ;;  %3065 = vmatprep.mubr.bf16.mxu0 %v5050_v45  ;;  %v611_v12 = vrot.slane %v5706_v34, %v610_v22 }
 0x293   :  { %3167 = vmatprep.mubr.bf16.mxu1 %v5050_v45  ;;  %v615_v45 = vrot.slane %v5706_v34, %v614_v1 }
 0x299   :  { %3066 = vmatmul.mubr.bf16.gmra.mrb[20].mxu0 %v5076_v48 }
 0x29a   :  { %3168 = vmatmul.mubr.bf16.gmra.mrb[20].mxu1 %v5076_v48 }
 0x2e2   :  { %v2853_v25 = vpop.f32.mrb[8].mxu0 }
 0x2e3   :  { %v3750_v26 = vadd.f32 %v2853_v25, %v603_v2  ;;  %v2955_v27 = vpop.f32.mrb[8].mxu1  ;;  %v2855_v48 = vpop.f32.mrb[9].mxu0 }
 0x2e4   :  { %v3756_v7 = vadd.f32 %v2955_v27, %v611_v12  ;;  %v3751_v29 = vadd.f32 %v2855_v48, %v607_v3  ;;  %v2957_v30 = vpop.f32.mrb[9].mxu1  ;;  %v2857_v32 = vpop.f32.mrb[10].mxu0 }
 0x2e5   :  { %v3757_v35 = vadd.f32 %v2957_v30, %v615_v45  ;;  %v3752_v62 = vadd.f32 %v2857_v32, %v603_v2  ;;  %v2959_v36 = vpop.f32.mrb[10].mxu1  ;;  %v2859_v15 = vpop.f32.mrb[11].mxu0 }
 0x2e6   :  { %v3722_v21 = vpack.c.bf16 %v3751_v29, %v3750_v26  ;;  %v3758_v23 = vadd.f32 %v2959_v36, %v611_v12  ;;  %v3753_v18 = vadd.f32 %v2859_v15, %v607_v3  ;;  %v2961_v24 = vpop.f32.mrb[11].mxu1 }
 0x2e7   :  { %v3723_v43 = vpack.c.bf16 %v3757_v35, %v3756_v7  ;;  %v3759_v38 = vadd.f32 %v2961_v24, %v615_v45 }
 0x2e8   :  { %3298 = vst [vmem:[%s5937_s5 + $0x10] sm:$0xff] %v3722_v21  ;;  %v3728_v34 = vpack.c.bf16 %v3753_v18, %v3752_v62 }
 0x2e9   :  { %3299 = vst [vmem:[%s5937_s5 + $0x18] sm:$0xff] %v3723_v43  ;;  %v3729_v39 = vpack.c.bf16 %v3759_v38, %v3758_v23 }
 0x2ea   :  { %3304 = vst [vmem:[%s5937_s5 + $0x40] sm:$0xff] %v3728_v34  ;;  %v2863_v40 = vpop.f32.mrb[12].mxu0 }
 0x2eb   :  { %3305 = vst [vmem:[%s5937_s5 + $0x48] sm:$0xff] %v3729_v39  ;;  %v3754_v4 = vadd.f32 %v2863_v40, %v603_v2  ;;  %v2965_v37 = vpop.f32.mrb[12].mxu1  ;;  %v2865_v41 = vpop.f32.mrb[13].mxu0 }
 0x2ec   :  { %v3760_v42 = vadd.f32 %v2965_v37, %v611_v12  ;;  %v3755_v44 = vadd.f32 %v2865_v41, %v607_v3  ;;  %v2967_v46 = vpop.f32.mrb[13].mxu1  ;;  %v2867_v14 = vpop.f32.mrb[14].mxu0 }
 0x2ed   :  { %v3761_v13 = vadd.f32 %v2967_v46, %v615_v45  ;;  %v2969_v11 = vpop.f32.mrb[14].mxu1  ;;  %v2868_v47 = vpop.f32.mrb[15].mxu0 }
 0x2ee   :  { %v3734_v10 = vpack.c.bf16 %v3755_v44, %v3754_v4  ;;  %v2970_v49 = vpop.f32.mrb[15].mxu1 }
 0x2ef   :  { %v3735_v50 = vpack.c.bf16 %v3761_v13, %v3760_v42 }
 0x2f0   :  { %3310 = vst [vmem:[%s5937_s5 + $0x70] sm:$0x33] %v3734_v10 }
 0x2f1   :  { %3311 = vst [vmem:[%s5937_s5 + $0x78] sm:$0x33] %v3735_v50 }
 0x364   :  { %v3057_v56 = vpop.f32.mrb[16].mxu0 }
 0x365   :  { %v3762_v20 = vadd.f32 %v3057_v56, %v619_v52  ;;  %v3159_v6 = vpop.f32.mrb[16].mxu1  ;;  %v3059_v57 = vpop.f32.mrb[17].mxu0 }
 0x366   :  { %v3768_v5 = vadd.f32 %v3159_v6, %v627_v17  ;;  %v3763_v58 = vadd.f32 %v3059_v57, %v623_v53  ;;  %v3161_v59 = vpop.f32.mrb[17].mxu1  ;;  %v3061_v28 = vpop.f32.mrb[18].mxu0 }
 0x367   :  { %v3769_v60 = vadd.f32 %v3161_v59, %v631_v55  ;;  %v3764_v61 = vadd.f32 %v3061_v28, %v619_v52  ;;  %v3163_v63 = vpop.f32.mrb[18].mxu1  ;;  %v3063_v19 = vpop.f32.mrb[19].mxu0 }
 0x368   :  { %v3724_v9 = vpack.c.bf16 %v3763_v58, %v3762_v20  ;;  %v3770_v33 = vadd.f32 %v3163_v63, %v627_v17  ;;  %v3765_v8 = vadd.f32 %v3063_v19, %v623_v53  ;;  %v3165_v31 = vpop.f32.mrb[19].mxu1 }
 0x369   :  { %v3725_v22 = vpack.c.bf16 %v3769_v60, %v3768_v5  ;;  %v3771_v16 = vadd.f32 %v3165_v31, %v631_v55 }
 0x36a   :  { %3300 = vst [vmem:[%s5937_s5 + $0x20] sm:$0xff] %v3724_v9  ;;  %v3730_v54 = vpack.c.bf16 %v3765_v8, %v3764_v61 }
 0x36b   :  { %3301 = vst [vmem:[%s5937_s5 + $0x28] sm:$0xff] %v3725_v22  ;;  %v3731_v0 = vpack.c.bf16 %v3771_v16, %v3770_v33 }
 0x36c   :  { %3306 = vst [vmem:[%s5937_s5 + $0x50] sm:$0xff] %v3730_v54  ;;  %v3067_v1 = vpop.f32.mrb[20].mxu0 }
 0x36d   :  { %3307 = vst [vmem:[%s5937_s5 + $0x58] sm:$0xff] %v3731_v0  ;;  %v3766_v2 = vadd.f32 %v3067_v1, %v619_v52  ;;  %v3169_v12 = vpop.f32.mrb[20].mxu1  ;;  %v3069_v3 = vpop.f32.mrb[21].mxu0 }
 0x36e   :  { %v3772_v45 = vadd.f32 %v3169_v12, %v627_v17  ;;  %v3767_v25 = vadd.f32 %v3069_v3, %v623_v53  ;;  %v3171_v26 = vpop.f32.mrb[21].mxu1  ;;  %v3071_v27 = vpop.f32.mrb[22].mxu0 }
 0x36f   :  { %v3773_v48 = vadd.f32 %v3171_v26, %v631_v55  ;;  %v3173_v7 = vpop.f32.mrb[22].mxu1  ;;  %v3072_v29 = vpop.f32.mrb[23].mxu0 }
 0x370   :  { %v3736_v30 = vpack.c.bf16 %v3767_v25, %v3766_v2  ;;  %v3174_v32 = vpop.f32.mrb[23].mxu1 }
 0x371   :  { %v3737_v35 = vpack.c.bf16 %v3773_v48, %v3772_v45 }
 0x372   :  { %3312 = vst [vmem:[%s5937_s5 + $0x80] sm:$0x33] %v3736_v30 }
 0x373   :  { %3313 = vst [vmem:[%s5937_s5 + $0x88] sm:$0x33] %v3737_v35 }

// kernel: forward.21
= control target key start
LH: loop header
LB: loop body
LE: loop exit
PB: predicated region body
PF: predicated region fallthrough
CT: control target
= control target key end

     0   :  { %vm511_vm0 = vcmask 64512   ;;  %vm1069_vm1 = vmmov 0   ;;  %s1374_s2 = inlined_call_operand.vmem [shape: bf16[512,256], index: 2, kind: input, shape index: {}]   ;;  %s1375_s1 = inlined_call_operand.vmem [shape: f32[8,512], index: 1, kind: input, shape index: {}]   ;;  %s1376_s4 = inlined_call_operand.vmem [shape: bf16[256,128], index: 4, kind: input, shape index: {}]   ;;  %s1377_s0 = inlined_call_operand.vmem [shape: f32[8,8], index: 0, kind: input, shape index: {}]   ;;  %s1378_s3 = inlined_call_operand.vmem [shape: f32[1,256], index: 3, kind: input, shape index: {}]   ;;  %s1379_s5 = inlined_call_operand.vmem [shape: f32[1,128], index: 5, kind: input, shape index: {}]   ;;  %s1380_s6 = inlined_call_operand.vmem [shape: f32[8,128], index: 6, kind: output, shape index: {}]  }
   0x1   :  { %v956_v0 = vld [vmem:[%s1374_s2 + $0x4] ss:$8 sps:$4 sm:$0xff]   ;;  %v960_v2 = vld [vmem:[%s1374_s2] ss:$8 sps:$4 sm:$0xff]   ;;  %v962_v4 = vld [vmem:[%s1374_s2 + $0x14] ss:$8 sps:$4 sm:$0xff]  }
   0x2   :  { %v958_v1 = vld [vmem:[%s1374_s2 + $0x104] ss:$8 sps:$4 sm:$0xff]   ;;  %417 = vmatprep.subr.bf16.mxu1 %v956_v0  ;;  %v961_v3 = vld [vmem:[%s1374_s2 + $0x100] ss:$8 sps:$4 sm:$0xff]   ;;  %v964_v5 = vld [vmem:[%s1374_s2 + $0x114] ss:$8 sps:$4 sm:$0xff]  }
   0x3   :  { %458 = vmatprep.subr.bf16.mxu0 %v958_v1  ;;  %418 = vmatpush1.bf16.msra.mxu1 %v960_v2  ;;  %v966_v6 = vld [vmem:[%s1374_s2 + $0x10] ss:$8 sps:$4 sm:$0xff]   ;;  %v968_v8 = vld [vmem:[%s1374_s2 + $0x24] ss:$8 sps:$4 sm:$0xff]   ;;  %v972_v10 = vld [vmem:[%s1374_s2 + $0x20] ss:$8 sps:$4 sm:$0xff]  }
   0x4   :  { %459 = vmatpush1.bf16.msra.mxu0 %v961_v3  ;;  %419 = vmatprep.subr.bf16.mxu1 %v962_v4  ;;  %v967_v7 = vld [vmem:[%s1374_s2 + $0x110] ss:$8 sps:$4 sm:$0xff]   ;;  %v970_v9 = vld [vmem:[%s1374_s2 + $0x124] ss:$8 sps:$4 sm:$0xff]   ;;  %v973_v11 = vld [vmem:[%s1374_s2 + $0x120] ss:$8 sps:$4 sm:$0xff]  }
   0x5   :  { %460 = vmatprep.subr.bf16.mxu0 %v964_v5  ;;  %v974_v12 = vld [vmem:[%s1374_s2 + $0x34] ss:$8 sps:$4 sm:$0xff]   ;;  %v978_v14 = vld [vmem:[%s1374_s2 + $0x30] ss:$8 sps:$4 sm:$0xff]   ;;  %v980_v16 = vld [vmem:[%s1374_s2 + $0x44] ss:$8 sps:$4 sm:$0xff]  }
   0x6   :  { %v976_v13 = vld [vmem:[%s1374_s2 + $0x134] ss:$8 sps:$4 sm:$0xff]   ;;  %v979_v15 = vld [vmem:[%s1374_s2 + $0x130] ss:$8 sps:$4 sm:$0xff]   ;;  %v982_v17 = vld [vmem:[%s1374_s2 + $0x144] ss:$8 sps:$4 sm:$0xff]  }
   0x7   :  { %420 = vmatpush1.bf16.msra.mxu1 %v966_v6  ;;  %v984_v18 = vld [vmem:[%s1374_s2 + $0x40] ss:$8 sps:$4 sm:$0xff]   ;;  %v986_v20 = vld [vmem:[%s1374_s2 + $0x54] ss:$8 sps:$4 sm:$0xff]   ;;  %v990_v22 = vld [vmem:[%s1374_s2 + $0x50] ss:$8 sps:$4 sm:$0xff]  }
   0x8   :  { %461 = vmatpush1.bf16.msra.mxu0 %v967_v7  ;;  %421 = vmatprep.subr.bf16.mxu1 %v968_v8  ;;  %v985_v19 = vld [vmem:[%s1374_s2 + $0x140] ss:$8 sps:$4 sm:$0xff]   ;;  %v988_v21 = vld [vmem:[%s1374_s2 + $0x154] ss:$8 sps:$4 sm:$0xff]   ;;  %v991_v23 = vld [vmem:[%s1374_s2 + $0x150] ss:$8 sps:$4 sm:$0xff]  }
   0x9   :  { %462 = vmatprep.subr.bf16.mxu0 %v970_v9  ;;  %v992_v24 = vld [vmem:[%s1374_s2 + $0x64] ss:$8 sps:$4 sm:$0xff]   ;;  %v996_v26 = vld [vmem:[%s1374_s2 + $0x60] ss:$8 sps:$4 sm:$0xff]   ;;  %v998_v28 = vld [vmem:[%s1374_s2 + $0x74] ss:$8 sps:$4 sm:$0xff]  }
   0xa   :  { %v994_v25 = vld [vmem:[%s1374_s2 + $0x164] ss:$8 sps:$4 sm:$0xff]   ;;  %v997_v27 = vld [vmem:[%s1374_s2 + $0x160] ss:$8 sps:$4 sm:$0xff]   ;;  %v1000_v29 = vld [vmem:[%s1374_s2 + $0x174] ss:$8 sps:$4 sm:$0xff]  }
   0xb   :  { %422 = vmatpush1.bf16.msra.mxu1 %v972_v10  ;;  %v1002_v30 = vld [vmem:[%s1374_s2 + $0x70] ss:$8 sps:$4 sm:$0xff]   ;;  %v1004_v32 = vld [vmem:[%s1374_s2 + $0x84] ss:$8 sps:$4 sm:$0xff]   ;;  %v1008_v34 = vld [vmem:[%s1374_s2 + $0x80] ss:$8 sps:$4 sm:$0xff]  }
   0xc   :  { %463 = vmatpush1.bf16.msra.mxu0 %v973_v11  ;;  %423 = vmatprep.subr.bf16.mxu1 %v974_v12  ;;  %v1003_v31 = vld [vmem:[%s1374_s2 + $0x170] ss:$8 sps:$4 sm:$0xff]   ;;  %v1006_v33 = vld [vmem:[%s1374_s2 + $0x184] ss:$8 sps:$4 sm:$0xff]   ;;  %v1009_v35 = vld [vmem:[%s1374_s2 + $0x180] ss:$8 sps:$4 sm:$0xff]  }
   0xd   :  { %464 = vmatprep.subr.bf16.mxu0 %v976_v13  ;;  %v1010_v36 = vld [vmem:[%s1374_s2 + $0x94] ss:$8 sps:$4 sm:$0xff]   ;;  %v1014_v38 = vld [vmem:[%s1374_s2 + $0x90] ss:$8 sps:$4 sm:$0xff]   ;;  %v1016_v40 = vld [vmem:[%s1374_s2 + $0xa4] ss:$8 sps:$4 sm:$0xff]  }
   0xe   :  { %v1012_v37 = vld [vmem:[%s1374_s2 + $0x194] ss:$8 sps:$4 sm:$0xff]   ;;  %v1015_v39 = vld [vmem:[%s1374_s2 + $0x190] ss:$8 sps:$4 sm:$0xff]   ;;  %v1018_v41 = vld [vmem:[%s1374_s2 + $0x1a4] ss:$8 sps:$4 sm:$0xff]  }
   0xf   :  { %424 = vmatpush1.bf16.msra.mxu1 %v978_v14  ;;  %v1020_v42 = vld [vmem:[%s1374_s2 + $0xa0] ss:$8 sps:$4 sm:$0xff]   ;;  %v1022_v44 = vld [vmem:[%s1374_s2 + $0xb4] ss:$8 sps:$4 sm:$0xff]   ;;  %v1026_v49 = vld [vmem:[%s1374_s2 + $0xb0] ss:$8 sps:$4 sm:$0xff]  }
  0x10   :  { %465 = vmatpush1.bf16.msra.mxu0 %v979_v15  ;;  %425 = vmatprep.subr.bf16.mxu1 %v980_v16  ;;  %v1021_v43 = vld [vmem:[%s1374_s2 + $0x1a0] ss:$8 sps:$4 sm:$0xff]   ;;  %v1024_v45 = vld [vmem:[%s1374_s2 + $0x1b4] ss:$8 sps:$4 sm:$0xff]   ;;  %v1027_v50 = vld [vmem:[%s1374_s2 + $0x1b0] ss:$8 sps:$4 sm:$0xff]  }
  0x11   :  { %466 = vmatprep.subr.bf16.mxu0 %v982_v17  ;;  %v26_v46 = vld [vmem:[%s1375_s1 + $0x8] sm:$0xff]  ;;  %v28_v48 = vld [vmem:[%s1375_s1 + $0x18] sm:$0xff]  ;;  %v25_v4 = vld [vmem:[%s1375_s1] sm:$0xff]  ;;  %v1068_v8 = vmov 0.0  }
  0x12   :  { %v30_v47 = vpack.c.bf16 %v26_v46, %v26_v46  ;;  %v32_v51 = vpack.c.bf16 %v28_v48, %v28_v48  ;;  %v1028_v52 = vld [vmem:[%s1374_s2 + $0xc4] ss:$8 sps:$4 sm:$0xff]   ;;  %v1032_v54 = vld [vmem:[%s1374_s2 + $0xc0] ss:$8 sps:$4 sm:$0xff]   ;;  %v1034_v56 = vld [vmem:[%s1374_s2 + $0xd4] ss:$8 sps:$4 sm:$0xff]   ;;  %v29_v6 = vpack.c.bf16 %v25_v4, %v25_v4 }
  0x13   :  { %426 = vmatpush1.bf16.msra.mxu1 %v984_v18  ;;  %v1030_v53 = vld [vmem:[%s1374_s2 + $0x1c4] ss:$8 sps:$4 sm:$0xff]   ;;  %v1033_v55 = vld [vmem:[%s1374_s2 + $0x1c0] ss:$8 sps:$4 sm:$0xff]   ;;  %v1036_v57 = vld [vmem:[%s1374_s2 + $0x1d4] ss:$8 sps:$4 sm:$0xff]  }
  0x14   :  { %467 = vmatpush1.bf16.msra.mxu0 %v985_v19  ;;  %427 = vmatprep.subr.bf16.mxu1 %v986_v20  ;;  %v1038_v58 = vld [vmem:[%s1374_s2 + $0xd0] ss:$8 sps:$4 sm:$0xff]   ;;  %v1040_v60 = vld [vmem:[%s1374_s2 + $0xe4] ss:$8 sps:$4 sm:$0xff]   ;;  %v1044_v62 = vld [vmem:[%s1374_s2 + $0xe0] ss:$8 sps:$4 sm:$0xff]  }
  0x15   :  { %468 = vmatprep.subr.bf16.mxu0 %v988_v21  ;;  %449 = vmatprep.mubr.bf16.mxu1 %v30_v47  ;;  %v1039_v59 = vld [vmem:[%s1374_s2 + $0x1d0] ss:$8 sps:$4 sm:$0xff]   ;;  %v1042_v61 = vld [vmem:[%s1374_s2 + $0x1e4] ss:$8 sps:$4 sm:$0xff]   ;;  %v1045_v63 = vld [vmem:[%s1374_s2 + $0x1e0] ss:$8 sps:$4 sm:$0xff]  }
  0x16   :  { %490 = vmatprep.mubr.bf16.mxu0 %v32_v51  ;;  %v1046_v0 = vld [vmem:[%s1374_s2 + $0xf4] ss:$8 sps:$4 sm:$0xff]   ;;  %v1050_v2 = vld [vmem:[%s1374_s2 + $0xf0] ss:$8 sps:$4 sm:$0xff]   ;;  %v1052_v9 = vld [vmem:[%s1376_s4 + $0x40] sm:$0xff]  }
  0x17   :  { %428 = vmatpush1.bf16.msra.mxu1 %v990_v22  ;;  %v1048_v1 = vld [vmem:[%s1374_s2 + $0x1f4] ss:$8 sps:$4 sm:$0xff]   ;;  %v1051_v3 = vld [vmem:[%s1374_s2 + $0x1f0] ss:$8 sps:$4 sm:$0xff]   ;;  %v1053_v10 = vld [vmem:[%s1376_s4] sm:$0xff]  }
  0x18   :  { %469 = vmatpush1.bf16.msra.mxu0 %v991_v23  ;;  %429 = vmatprep.subr.bf16.mxu1 %v992_v24  ;;  %v27_v5 = vld [vmem:[%s1375_s1 + $0x10] sm:$0xff]  ;;  %v1054_v11 = vld [vmem:[%s1376_s4 + $0x48] sm:$0xff]   ;;  %v1058_v15 = vld [vmem:[%s1376_s4 + $0x58] sm:$0xff]  }
  0x19   :  { %470 = vmatprep.subr.bf16.mxu0 %v994_v25  ;;  %v31_v7 = vpack.c.bf16 %v27_v5, %v27_v5  ;;  %v1055_v12 = vld [vmem:[%s1376_s4 + $0x8] sm:$0xff]   ;;  %v1056_v13 = vld [vmem:[%s1376_s4 + $0x50] sm:$0xff]   ;;  %v1059_v16 = vld [vmem:[%s1376_s4 + $0x18] sm:$0xff]  }
  0x1a   :  { %v1057_v14 = vld [vmem:[%s1376_s4 + $0x10] sm:$0xff]   ;;  %v1060_v17 = vld [vmem:[%s1376_s4 + $0x60] sm:$0xff]   ;;  %v1062_v19 = vld [vmem:[%s1376_s4 + $0x68] sm:$0xff]  }
  0x1b   :  { %430 = vmatpush1.bf16.msra.mxu1 %v996_v26  ;;  %v1061_v18 = vld [vmem:[%s1376_s4 + $0x20] sm:$0xff]   ;;  %v1063_v20 = vld [vmem:[%s1376_s4 + $0x28] sm:$0xff]  }
  0x1c   :  { %471 = vmatpush1.bf16.msra.mxu0 %v997_v27  ;;  %431 = vmatprep.subr.bf16.mxu1 %v998_v28 }
  0x1d   :  { %472 = vmatprep.subr.bf16.mxu0 %v1000_v29 }
  0x1f   :  { %432 = vmatpush1.bf16.msra.mxu1 %v1002_v30 }
  0x20   :  { %473 = vmatpush1.bf16.msra.mxu0 %v1003_v31  ;;  %433 = vmatprep.subr.bf16.mxu1 %v1004_v32  ;;  %v24_v31 = vld [vmem:[%s1377_s0] sm:$0xff]  ;;  %v1064_v32 = vld [vmem:[%s1376_s4 + $0x70] sm:$0xff]  }
  0x21   :  { %474 = vmatprep.subr.bf16.mxu0 %v1006_v33  ;;  %v1065_v33 = vld [vmem:[%s1376_s4 + $0x30] sm:$0xff]  }
  0x23   :  { %434 = vmatpush1.bf16.msra.mxu1 %v1008_v34  ;;  %v1066_v34 = vld [vmem:[%s1376_s4 + $0x78] sm:$0xff]  }
  0x24   :  { %475 = vmatpush1.bf16.msra.mxu0 %v1009_v35  ;;  %435 = vmatprep.subr.bf16.mxu1 %v1010_v36  ;;  %v1067_v35 = vld [vmem:[%s1376_s4 + $0x38] sm:$0xff]   ;;  %v501_v36 = vlaneseq }
  0x25   :  { %476 = vmatprep.subr.bf16.mxu0 %v1012_v37 }
  0x26   :  { %v502_v37 = vshrl.u32 %v501_v36, 7 }
  0x27   :  { %436 = vmatpush1.bf16.msra.mxu1 %v1014_v38 }
  0x28   :  { %477 = vmatpush1.bf16.msra.mxu0 %v1015_v39  ;;  %437 = vmatprep.subr.bf16.mxu1 %v1016_v40  ;;  %v503_v38 = vsub.s32 0, %v502_v37  ;;  %v499_v39 = vld [vmem:[%s1378_s3] sm:$0x3]  ;;  %v507_v40 = vsub.s32 1, %v502_v37 }
  0x29   :  { %478 = vmatprep.subr.bf16.mxu0 %v1018_v41 }
  0x2a   :  { %v504_v41 = vrot.slane %v499_v39, %v503_v38 }
  0x2b   :  { %438 = vmatpush1.bf16.msra.mxu1 %v1020_v42  ;;  %v508_v42 = vrot.slane %v499_v39, %v507_v40 }
  0x2c   :  { %479 = vmatpush1.bf16.msra.mxu0 %v1021_v43  ;;  %439 = vmatprep.subr.bf16.mxu1 %v1022_v44 }
  0x2d   :  { %480 = vmatprep.subr.bf16.mxu0 %v1024_v45 }
  0x2f   :  { %440 = vmatpush1.bf16.msra.mxu1 %v1026_v49 }
  0x30   :  { %481 = vmatpush1.bf16.msra.mxu0 %v1027_v50  ;;  %441 = vmatprep.subr.bf16.mxu1 %v1028_v52 }
  0x31   :  { %482 = vmatprep.subr.bf16.mxu0 %v1030_v53 }
  0x33   :  { %442 = vmatpush1.bf16.msra.mxu1 %v1032_v54 }
  0x34   :  { %483 = vmatpush1.bf16.msra.mxu0 %v1033_v55  ;;  %443 = vmatprep.subr.bf16.mxu1 %v1034_v56  ;;  %v921_v56 = vld [vmem:[%s1379_s5] ss:$0 sm:$0xff] }
  0x35   :  { %484 = vmatprep.subr.bf16.mxu0 %v1036_v57 }
  0x37   :  { %444 = vmatpush1.bf16.msra.mxu1 %v1038_v58 }
  0x38   :  { %485 = vmatpush1.bf16.msra.mxu0 %v1039_v59  ;;  %445 = vmatprep.subr.bf16.mxu1 %v1040_v60 }
  0x39   :  { %486 = vmatprep.subr.bf16.mxu0 %v1042_v61 }
  0x3b   :  { %446 = vmatpush1.bf16.msra.mxu1 %v1044_v62 }
  0x3c   :  { %487 = vmatpush1.bf16.msra.mxu0 %v1045_v63  ;;  %447 = vmatprep.subr.bf16.mxu1 %v1046_v0 }
  0x3d   :  { %488 = vmatprep.subr.bf16.mxu0 %v1048_v1 }
  0x3f   :  { %448 = vmatpush1.bf16.msra.mxu1 %v1050_v2 }
  0x40   :  { %489 = vmatpush1.bf16.msra.mxu0 %v1051_v3 }
  0x41   :  { %923 = vmatprep.subr.bf16.mxu0 %v1052_v9 }
  0x42   :  { %450 = vmatmul.mubr.bf16.vlgmr.msra.gmra.mrb[0].mxu1 %v29_v6 }
  0x43   :  { %491 = vmatmul.mubr.bf16.vlgmr.msra.gmra.mrb[0].mxu0 %v31_v7  ;;  %579 = vmatprep.mubr.f32.mxu1 %v1068_v8 }
  0x44   :  { %924 = vmatpush3.bf16.msra.mxu0 %v1053_v10 }
  0x45   :  { %925 = vmatprep.subr.bf16.mxu0 %v1054_v11 }
  0x48   :  { %926 = vmatpush3.bf16.msra.mxu0 %v1055_v12 }
  0x49   :  { %927 = vmatprep.subr.bf16.mxu0 %v1056_v13 }
  0x4c   :  { %928 = vmatpush3.bf16.msra.mxu0 %v1057_v14 }
  0x4d   :  { %929 = vmatprep.subr.bf16.mxu0 %v1058_v15 }
  0x50   :  { %930 = vmatpush3.bf16.msra.mxu0 %v1059_v16 }
  0x51   :  { %931 = vmatprep.subr.bf16.mxu0 %v1060_v17 }
  0x54   :  { %932 = vmatpush3.bf16.msra.mxu0 %v1061_v18 }
  0x55   :  { %933 = vmatprep.subr.bf16.mxu0 %v1062_v19 }
  0x58   :  { %934 = vmatpush3.bf16.msra.mxu0 %v1063_v20 }
  0x59   :  { %935 = vmatprep.subr.bf16.mxu0 %v1064_v32 }
  0x5c   :  { %936 = vmatpush3.bf16.msra.mxu0 %v1065_v33 }
  0x5d   :  { %937 = vmatprep.subr.bf16.mxu0 %v1066_v34 }
  0x60   :  { %938 = vmatpush3.bf16.msra.mxu0 %v1067_v35 }
 0x115   :  { %v451_v21 = vpop.f32.mrb[0].mxu1 }
 0x116   :  { %v492_v22 = vpop.f32.mrb[0].mxu0  ;;  %v453_v24 = vpop.f32.mrb[1].mxu1 }
 0x117   :  { %v493_v23 = vadd.f32 %v492_v22, %v451_v21  ;;  %v494_v25 = vpop.f32.mrb[1].mxu0  ;;  %v455_v27 = vpop.f32.mrb[2].mxu1 }
 0x118   :  { %v495_v26 = vadd.f32 %v494_v25, %v453_v24  ;;  %v496_v28 = vpop.f32.mrb[2].mxu0  ;;  %v456_v29 = vpop.f32.mrb[3].mxu1 }
 0x119   :  { %v497_v30 = vpop.f32.mrb[3].mxu0 }
 0x11a   :  { %515 = vmatprep.subr.mxu1 %v495_v26 }
 0x11b   :  { %516 = vmatpush1.msra.mxu1 %v493_v23 }
 0x11c   :  { %904 = vmatmul.mubr.msk.f32.vlgmr.msra.gmra.mrb[4].mxu1 %vm511_vm0, %v24_v31  ;;  %947 = vmatprep.subr.mxu1 %v1068_v8 }
 0x11d   :  { %949 = vmatprep.mubr.msk.f32.mxu1 %vm1069_vm1, %v1068_v8 }
 0x1ef   :  { %v581_v43 = vpop.f32.mrb[4].mxu1 }
 0x1f0   :  { %v582_v44 = vadd.f32 %v581_v43, %v504_v41  ;;  %v583_v45 = vpop.f32.mrb[5].mxu1 }
 0x1f1   :  { %v584_v46 = vadd.f32 %v583_v45, %v508_v42 }
 0x1f2   :  { %v586_v47 = vmax.f32 %v582_v44, 0.0 }
 0x1f3   :  { %v587_v48 = vmax.f32 %v584_v46, 0.0 }
 0x1f4   :  { %v588_v50 = vpack.c.bf16 %v586_v47, %v586_v47 }
 0x1f5   :  { %v589_v49 = vpack.c.bf16 %v587_v48, %v587_v48 }
 0x1f7   :  { %750 = vmatprep.mubr.bf16.mxu0 %v589_v49 }
 0x1f8   :  { %751 = vmatmul.mubr.bf16.vlgmr.msra.gmra.mrb[4].mxu0 %v588_v50 }
 0x2cb   :  { %v939_v51 = vpop.f32.mrb[4].mxu0 }
 0x2cc   :  { %v940_v52 = vpop.f32.mrb[5].mxu0 }
 0x2cd   :  { %v941_v53 = vadd.f32 %v940_v52, %v939_v51  ;;  %v942_v54 = vpop.f32.mrb[6].mxu0 }
 0x2ce   :  { %v943_v55 = vpop.f32.mrb[7].mxu0 }
 0x2cf   :  { %948 = vmatpush3.msra.mxu1 %v941_v53 }
 0x2d0   :  { %950 = vmatmul.mubr.msk.f32.vlgmr.msra.gmra.mrb[6].mxu1 %vm511_vm0, %v24_v31 }
 0x3a3   :  { %v831_v57 = vpop.f32.mrb[6].mxu1 }
 0x3a4   :  { %v832_v58 = vadd.f32 %v921_v56, %v831_v57  ;;  %v951_v59 = vpop.f32.mrb[7].mxu1 }
 0x3a6   :  { %835 = vst [vmem:[%s1380_s6] sm:$0xff] %v832_v58 }

</bundles_post_ra>
